<compile_context>
chip_gen: v7x
topology: tpu7x:2x2x1
jax: 0.10.0
libtpu: 0.0.40
codegen_flags: <defaults>
</compile_context>

<pallas_src>
import functools

import jax
import jax.numpy as jnp
from jax.experimental import pallas as pl
from jax.experimental.pallas import tpu as pltpu


# -----------------------------------------------------------------------------
# elementwise helper (matches torch.nn.Softplus(beta=1, threshold=20))
# -----------------------------------------------------------------------------
def _softplus(x):
    return jnp.where(x > 20.0, x, jnp.log1p(jnp.exp(jnp.minimum(x, 20.0))))


# -----------------------------------------------------------------------------
# Fused LeNet kernel: conv1 -> pool1 -> conv2 -> pool2 -> flatten -> MLP
# One grid step == one image.
# -----------------------------------------------------------------------------
def _lenet_kernel(O1, Q1, O2, Q2, C1, C2,
                  p1_ref, w1_ref, b1_ref, w2_ref, b2_ref,
                  fw1_ref, fb1_ref, fw2_ref, fb2_ref, fw3_ref, fb3_ref,
                  o_ref,
                  a1_s, pool1_s, patch2_s, t1_s, t2_s, flat_s):
    f32 = jnp.float32
    bf16 = jnp.bfloat16

    # ---- conv1 (pre-activation): one MXU matmul over all O1*O1 positions ----
    patches1 = p1_ref[0]                                     # (O1*O1, 25*Cin) bf16
    a1_s[...] = jnp.dot(patches1, w1_ref[...],
                        preferred_element_type=f32)          # (O1*O1, C1)

    b1 = b1_ref[...]                                         # (1, C1)

    # ---- pool1 (2x2/2) fused with bias + softplus (softplus commutes w/ max) --
    for y in range(Q1):
        row_a = a1_s[(2 * y) * O1:(2 * y) * O1 + O1, :]      # oh = 2y   -> (O1, C1)
        row_b = a1_s[(2 * y + 1) * O1:(2 * y + 1) * O1 + O1, :]
        t1_s[...] = jnp.maximum(row_a, row_b)                # (O1, C1), rows = ow
        even = t1_s[pl.ds(0, Q1, 2), :]                      # ow = 0,2,4,...
        odd = t1_s[pl.ds(1, Q1, 2), :]                       # ow = 1,3,5,...
        pool1_s[y, :, :] = _softplus(jnp.maximum(even, odd) + b1)   # (Q1, C1)

    # ---- conv2 im2col from the VMEM-resident pooled activations --------------
    for kh in range(5):
        for kw in range(5):
            c0 = (kh * 5 + kw) * C1
            patch2_s[:, :, c0:c0 + C1] = pool1_s[kh:kh + O2, kw:kw + O2, :]

    w2 = w2_ref[...]                                         # (150, C2) bf16
    b2 = b2_ref[...]                                         # (1, C2)

    # ---- conv2 + bias + softplus + pool2 + flatten ---------------------------
    for y in range(Q2):
        row_a = jnp.dot(patch2_s[2 * y].astype(bf16), w2,
                        preferred_element_type=f32)          # y2 = 2y   -> (O2, C2)
        row_b = jnp.dot(patch2_s[2 * y + 1].astype(bf16), w2,
                        preferred_element_type=f32)          # y2 = 2y+1
        t2_s[...] = jnp.maximum(row_a, row_b)                # (O2, C2), rows = x2
        even = t2_s[pl.ds(0, Q2, 2), :]
        odd = t2_s[pl.ds(1, Q2, 2), :]
        pooled = _softplus(jnp.maximum(even, odd) + b2)      # (Q2, C2)
        # flatten in (h, w, c) order; fc1 weights were pre-permuted to match.
        for x in range(Q2):
            base = (y * Q2 + x) * C2
            flat_s[0:1, base:base + C2] = pooled[x:x + 1, :]

    # ---- fused MLP: fc1 -> softplus -> fc2 -> softplus -> fc3 ----------------
    h = flat_s[...].astype(bf16)                             # (1, flat)
    h = _softplus(jnp.dot(h, fw1_ref[...],
                          preferred_element_type=f32) + fb1_ref[...])
    h = _softplus(jnp.dot(h.astype(bf16), fw2_ref[...],
                          preferred_element_type=f32) + fb2_ref[...])
    out = jnp.dot(h.astype(bf16), fw3_ref[...],
                  preferred_element_type=f32) + fb3_ref[...]
    o_ref[0] = out                                           # (1, outputs)


# -----------------------------------------------------------------------------
# Forward wrapper (de=False, get_emb=False path of BBBLeNet.forward)
# -----------------------------------------------------------------------------
def _bbb_lenet_forward(params, x_nchw):
    # layout glue: PyTorch NCHW -> NHWC
    x = jnp.transpose(x_nchw, (0, 2, 3, 1)).astype(jnp.float32)
    N, H, W, Cin = x.shape
    KH = KW = 5
    O1 = H - KH + 1                  # conv1 output size (28)
    Q1 = O1 // 2                     # pool1 output size (14)
    O2 = Q1 - KH + 1                 # conv2 output size (10)
    Q2 = O2 // 2                     # pool2 output size (5)
    C1 = params["conv1_w"].shape[0]  # 6
    C2 = params["conv2_w"].shape[0]  # 16
    K1 = KH * KW * Cin
    K2 = KH * KW * C1
    n_fc1 = params["fc1_w"].shape[0]
    p_hid = params["fc2_w"].shape[0]
    n_out = params["fc3_w"].shape[0]
    flat = Q2 * Q2 * C2

    # conv1 im2col (pure layout, done once in XLA; ~0.24 MB in bf16)
    cols = [x[:, kh:kh + O1, kw:kw + O1, :]
            for kh in range(KH) for kw in range(KW)]
    patches1 = jnp.stack(cols, axis=3).reshape(N, O1 * O1, K1).astype(jnp.bfloat16)

    # weight/bias preparation (index order (kh, kw, cin) matches the im2col)
    w1 = jnp.transpose(params["conv1_w"], (2, 3, 1, 0)).reshape(K1, C1).astype(jnp.bfloat16)
    b1 = params["conv1_b"].reshape(1, C1).astype(jnp.float32)
    w2 = jnp.transpose(params["conv2_w"], (2, 3, 1, 0)).reshape(K2, C2).astype(jnp.bfloat16)
    b2 = params["conv2_b"].reshape(1, C2).astype(jnp.float32)

    # fc1: reorder columns from PyTorch (c, h, w) flatten order to (h, w, c)
    fw1 = params["fc1_w"].reshape(n_fc1, C2, Q2, Q2)
    fw1 = jnp.transpose(fw1, (0, 2, 3, 1)).reshape(n_fc1, flat)
    fw1 = fw1.T.astype(jnp.bfloat16)                         # (flat, 120)
    fb1 = params["fc1_b"].reshape(1, n_fc1).astype(jnp.float32)
    fw2 = params["fc2_w"].T.astype(jnp.bfloat16)             # (120, p)
    fb2 = params["fc2_b"].reshape(1, p_hid).astype(jnp.float32)
    fw3 = params["fc3_w"].T.astype(jnp.bfloat16)             # (p, outputs)
    fb3 = params["fc3_b"].reshape(1, n_out).astype(jnp.float32)

    kernel = functools.partial(_lenet_kernel, O1, Q1, O2, Q2, C1, C2)

    out = pl.pallas_call(
        kernel,
        out_shape=jax.ShapeDtypeStruct((N, 1, n_out), jnp.float32),
        grid=(N,),
        in_specs=[
            pl.BlockSpec((1, O1 * O1, K1), lambda n: (n, 0, 0)),   # conv1 patches
            pl.BlockSpec((K1, C1), lambda n: (0, 0)),              # w1
            pl.BlockSpec((1, C1), lambda n: (0, 0)),               # b1
            pl.BlockSpec((K2, C2), lambda n: (0, 0)),              # w2
            pl.BlockSpec((1, C2), lambda n: (0, 0)),               # b2
            pl.BlockSpec((flat, n_fc1), lambda n: (0, 0)),         # fc1 W^T
            pl.BlockSpec((1, n_fc1), lambda n: (0, 0)),            # fc1 b
            pl.BlockSpec((n_fc1, p_hid), lambda n: (0, 0)),        # fc2 W^T
            pl.BlockSpec((1, p_hid), lambda n: (0, 0)),            # fc2 b
            pl.BlockSpec((p_hid, n_out), lambda n: (0, 0)),        # fc3 W^T
            pl.BlockSpec((1, n_out), lambda n: (0, 0)),            # fc3 b
        ],
        out_specs=pl.BlockSpec((1, 1, n_out), lambda n: (n, 0, 0)),
        scratch_shapes=[
            pltpu.VMEM((O1 * O1, C1), jnp.float32),   # conv1 pre-activation
            pltpu.VMEM((Q1, Q1, C1), jnp.float32),    # pooled1
            pltpu.VMEM((O2, O2, K2), jnp.float32),    # conv2 patches
            pltpu.VMEM((O1, C1), jnp.float32),        # pool1 row staging
            pltpu.VMEM((O2, C2), jnp.float32),        # pool2 row staging
            pltpu.VMEM((1, flat), jnp.float32),       # flattened features
        ],
        compiler_params=pltpu.CompilerParams(dimension_semantics=("parallel",)),
    )(patches1, w1, b1, w2, b2, fw1, fb1, fw2, fb2, fw3, fb3)

    return out.reshape(N, n_out)


bbb_lenet_forward = jax.jit(_bbb_lenet_forward)


# -----------------------------------------------------------------------------
# Parameter setup (deterministic reparameterised samples of the BBB layers)
# -----------------------------------------------------------------------------
def _sample_bbb(key, shape):
    k_mu, k_rho, k_eps = jax.random.split(key, 3)
    mu = 0.1 * jax.random.normal(k_mu, shape, jnp.float32)
    rho = -3.0 + 0.1 * jax.random.normal(k_rho, shape, jnp.float32)
    sigma = jnp.log1p(jnp.exp(rho))
    eps = jax.random.normal(k_eps, shape, jnp.float32)
    return mu + sigma * eps


def init_params(key, inputs=3, outputs=10, image_size=32, p=84):
    out_size = (image_size - 5 + 1) // 2
    out_size = (out_size - 5 + 1) // 2
    flat = out_size * out_size * 16
    ks = jax.random.split(key, 10)
    return {
        "conv1_w": _sample_bbb(ks[0], (6, inputs, 5, 5)),
        "conv1_b": _sample_bbb(ks[1], (6,)),
        "conv2_w": _sample_bbb(ks[2], (16, 6, 5, 5)),
        "conv2_b": _sample_bbb(ks[3], (16,)),
        "fc1_w":   _sample_bbb(ks[4], (120, flat)),
        "fc1_b":   _sample_bbb(ks[5], (120,)),
        "fc2_w":   _sample_bbb(ks[6], (p, 120)),
        "fc2_b":   _sample_bbb(ks[7], (p,)),
        "fc3_w":   _sample_bbb(ks[8], (outputs, p)),
        "fc3_b":   _sample_bbb(ks[9], (outputs,)),
    }


if __name__ == "__main__":
    key = jax.random.PRNGKey(0)
    k_param, k_x = jax.random.split(key)

    INPUTS, OUTPUTS, IMAGE_SIZE, P, BATCH = 3, 10, 32, 84, 2
    params = init_params(k_param, inputs=INPUTS, outputs=OUTPUTS,
                         image_size=IMAGE_SIZE, p=P)
    x = jax.random.normal(k_x, (BATCH, INPUTS, IMAGE_SIZE, IMAGE_SIZE),
                          jnp.float32)

    out = bbb_lenet_forward(params, x)
    jax.block_until_ready(out)
    assert out.shape == (BATCH, OUTPUTS)
    assert bool(jnp.all(jnp.isfinite(out)))
    print("KERNEL_OK")
</pallas_src>

<mosaic_0001>
module attributes {stable_mosaic.version = 11 : i64} {
  func.func @_lenet_kernel(%arg0: i32, %arg1: memref<1x784x75xbf16, #tpu.memory_space<vmem>>, %arg2: memref<75x6xbf16, #tpu.memory_space<vmem>>, %arg3: memref<1x6xf32, #tpu.memory_space<vmem>>, %arg4: memref<150x16xbf16, #tpu.memory_space<vmem>>, %arg5: memref<1x16xf32, #tpu.memory_space<vmem>>, %arg6: memref<400x120xbf16, #tpu.memory_space<vmem>>, %arg7: memref<1x120xf32, #tpu.memory_space<vmem>>, %arg8: memref<120x84xbf16, #tpu.memory_space<vmem>>, %arg9: memref<1x84xf32, #tpu.memory_space<vmem>>, %arg10: memref<84x10xbf16, #tpu.memory_space<vmem>>, %arg11: memref<1x10xf32, #tpu.memory_space<vmem>>, %arg12: memref<1x1x10xf32, #tpu.memory_space<vmem>>, %arg13: memref<784x6xf32, #tpu.memory_space<vmem>>, %arg14: memref<14x14x6xf32, #tpu.memory_space<vmem>>, %arg15: memref<10x10x150xf32, #tpu.memory_space<vmem>>, %arg16: memref<28x6xf32, #tpu.memory_space<vmem>>, %arg17: memref<10x16xf32, #tpu.memory_space<vmem>>, %arg18: memref<1x400xf32, #tpu.memory_space<vmem>>) attributes {dimension_semantics = [#tpu.dimension_semantics<parallel>], iteration_bounds = array<i64: 2>, scalar_prefetch = 0 : i64, scratch_operands = 6 : i64, tpu.core_type = #tpu.core_type<tc>, window_params = [{transform_indices = @transform_0, window_bounds = array<i64: 1, 784, 75>}, {pipeline_mode = #tpu.pipeline_mode<synchronous>, transform_indices = @transform_1, window_bounds = array<i64: 75, 6>}, {pipeline_mode = #tpu.pipeline_mode<synchronous>, transform_indices = @transform_2, window_bounds = array<i64: 1, 6>}, {pipeline_mode = #tpu.pipeline_mode<synchronous>, transform_indices = @transform_3, window_bounds = array<i64: 150, 16>}, {pipeline_mode = #tpu.pipeline_mode<synchronous>, transform_indices = @transform_4, window_bounds = array<i64: 1, 16>}, {pipeline_mode = #tpu.pipeline_mode<synchronous>, transform_indices = @transform_5, window_bounds = array<i64: 400, 120>}, {pipeline_mode = #tpu.pipeline_mode<synchronous>, transform_indices = @transform_6, window_bounds = array<i64: 1, 120>}, {pipeline_mode = #tpu.pipeline_mode<synchronous>, transform_indices = @transform_7, window_bounds = array<i64: 120, 84>}, {pipeline_mode = #tpu.pipeline_mode<synchronous>, transform_indices = @transform_8, window_bounds = array<i64: 1, 84>}, {pipeline_mode = #tpu.pipeline_mode<synchronous>, transform_indices = @transform_9, window_bounds = array<i64: 84, 10>}, {pipeline_mode = #tpu.pipeline_mode<synchronous>, transform_indices = @transform_10, window_bounds = array<i64: 1, 10>}, {transform_indices = @transform_11, window_bounds = array<i64: 1, 1, 10>}]} {
    %c0 = arith.constant 0 : index
    %c0_0 = arith.constant 0 : index
    %c0_1 = arith.constant 0 : index
    %0 = vector.load %arg1[%c0, %c0_0, %c0_1] : memref<1x784x75xbf16, #tpu.memory_space<vmem>>, vector<1x784x75xbf16>
    %1 = vector.shape_cast %0 : vector<1x784x75xbf16> to vector<784x75xbf16>
    %c0_2 = arith.constant 0 : index
    %c0_3 = arith.constant 0 : index
    %2 = vector.load %arg2[%c0_2, %c0_3] : memref<75x6xbf16, #tpu.memory_space<vmem>>, vector<75x6xbf16>
    %cst = arith.constant dense<0.000000e+00> : vector<784x6xf32>
    %3 = tpu.matmul %1, %2, %cst {dimension_numbers = #tpu.dot_dimension_numbers<[1], [0], [0], [1], [0, 0, 1, 1], [], []>} : vector<784x75xbf16>, vector<75x6xbf16>, vector<784x6xf32> -> vector<784x6xf32>
    %c0_4 = arith.constant 0 : index
    %c0_5 = arith.constant 0 : index
    %4 = vector.load %arg13[%c0_4, %c0_5] : memref<784x6xf32, #tpu.memory_space<vmem>>, vector<784x6xf32>
    tpu.vector_store %arg13[%c0_4, %c0_5], %3 {strides = array<i32>} : memref<784x6xf32, #tpu.memory_space<vmem>>, vector<784x6xf32>,
    %c0_6 = arith.constant 0 : index
    %c0_7 = arith.constant 0 : index
    %5 = vector.load %arg3[%c0_6, %c0_7] : memref<1x6xf32, #tpu.memory_space<vmem>>, vector<1x6xf32>
    %c0_8 = arith.constant 0 : index
    %c0_9 = arith.constant 0 : index
    %6 = vector.load %arg13[%c0_8, %c0_9] : memref<784x6xf32, #tpu.memory_space<vmem>>, vector<28x6xf32>
    %c28 = arith.constant 28 : index
    %c0_10 = arith.constant 0 : index
    %7 = vector.load %arg13[%c28, %c0_10] : memref<784x6xf32, #tpu.memory_space<vmem>>, vector<28x6xf32>
    %8 = arith.maximumf %6, %7 : vector<28x6xf32>
    %c0_11 = arith.constant 0 : index
    %c0_12 = arith.constant 0 : index
    %9 = vector.load %arg16[%c0_11, %c0_12] : memref<28x6xf32, #tpu.memory_space<vmem>>, vector<28x6xf32>
    tpu.vector_store %arg16[%c0_11, %c0_12], %8 {strides = array<i32>} : memref<28x6xf32, #tpu.memory_space<vmem>>, vector<28x6xf32>,
    %c0_13 = arith.constant 0 : index
    %c0_14 = arith.constant 0 : index
    %10 = tpu.strided_load %arg16[%c0_13, %c0_14] {strides = array<i32: 2, 1>} : memref<28x6xf32, #tpu.memory_space<vmem>>, vector<14x6xf32>
    %c1 = arith.constant 1 : index
    %c0_15 = arith.constant 0 : index
    %11 = tpu.strided_load %arg16[%c1, %c0_15] {strides = array<i32: 2, 1>} : memref<28x6xf32, #tpu.memory_space<vmem>>, vector<14x6xf32>
    %12 = arith.maximumf %10, %11 : vector<14x6xf32>
    %13 = vector.broadcast %5 : vector<1x6xf32> to vector<14x6xf32>
    %14 = arith.addf %12, %13 : vector<14x6xf32>
    %cst_16 = arith.constant 2.000000e+01 : f32
    %15 = vector.broadcast %cst_16 : f32 to vector<14x6xf32>
    %16 = arith.cmpf ogt, %14, %15 : vector<14x6xf32>
    %cst_17 = arith.constant 2.000000e+01 : f32
    %17 = vector.broadcast %cst_17 : f32 to vector<14x6xf32>
    %18 = arith.minimumf %14, %17 : vector<14x6xf32>
    %19 = math.exp %18 : vector<14x6xf32>
    %20 = math.log1p %19 : vector<14x6xf32>
    %21 = arith.select %16, %14, %20 : vector<14x6xi1>, vector<14x6xf32>
    %c0_18 = arith.constant 0 : index
    %c0_19 = arith.constant 0 : index
    %c0_20 = arith.constant 0 : index
    %22 = vector.load %arg14[%c0_18, %c0_19, %c0_20] : memref<14x14x6xf32, #tpu.memory_space<vmem>>, vector<1x14x6xf32>
    %23 = vector.shape_cast %22 : vector<1x14x6xf32> to vector<14x6xf32>
    %24 = vector.shape_cast %21 : vector<14x6xf32> to vector<1x14x6xf32>
    tpu.vector_store %arg14[%c0_18, %c0_19, %c0_20], %24 {strides = array<i32>} : memref<14x14x6xf32, #tpu.memory_space<vmem>>, vector<1x14x6xf32>,
    %c56 = arith.constant 56 : index
    %c0_21 = arith.constant 0 : index
    %25 = vector.load %arg13[%c56, %c0_21] : memref<784x6xf32, #tpu.memory_space<vmem>>, vector<28x6xf32>
    %c84 = arith.constant 84 : index
    %c0_22 = arith.constant 0 : index
    %26 = vector.load %arg13[%c84, %c0_22] : memref<784x6xf32, #tpu.memory_space<vmem>>, vector<28x6xf32>
    %27 = arith.maximumf %25, %26 : vector<28x6xf32>
    %c0_23 = arith.constant 0 : index
    %c0_24 = arith.constant 0 : index
    %28 = vector.load %arg16[%c0_23, %c0_24] : memref<28x6xf32, #tpu.memory_space<vmem>>, vector<28x6xf32>
    tpu.vector_store %arg16[%c0_23, %c0_24], %27 {strides = array<i32>} : memref<28x6xf32, #tpu.memory_space<vmem>>, vector<28x6xf32>,
    %c0_25 = arith.constant 0 : index
    %c0_26 = arith.constant 0 : index
    %29 = tpu.strided_load %arg16[%c0_25, %c0_26] {strides = array<i32: 2, 1>} : memref<28x6xf32, #tpu.memory_space<vmem>>, vector<14x6xf32>
    %c1_27 = arith.constant 1 : index
    %c0_28 = arith.constant 0 : index
    %30 = tpu.strided_load %arg16[%c1_27, %c0_28] {strides = array<i32: 2, 1>} : memref<28x6xf32, #tpu.memory_space<vmem>>, vector<14x6xf32>
    %31 = arith.maximumf %29, %30 : vector<14x6xf32>
    %32 = vector.broadcast %5 : vector<1x6xf32> to vector<14x6xf32>
    %33 = arith.addf %31, %32 : vector<14x6xf32>
    %cst_29 = arith.constant 2.000000e+01 : f32
    %34 = vector.broadcast %cst_29 : f32 to vector<14x6xf32>
    %35 = arith.cmpf ogt, %33, %34 : vector<14x6xf32>
    %cst_30 = arith.constant 2.000000e+01 : f32
    %36 = vector.broadcast %cst_30 : f32 to vector<14x6xf32>
    %37 = arith.minimumf %33, %36 : vector<14x6xf32>
    %38 = math.exp %37 : vector<14x6xf32>
    %39 = math.log1p %38 : vector<14x6xf32>
    %40 = arith.select %35, %33, %39 : vector<14x6xi1>, vector<14x6xf32>
    %c1_31 = arith.constant 1 : index
    %c0_32 = arith.constant 0 : index
    %c0_33 = arith.constant 0 : index
    %41 = vector.load %arg14[%c1_31, %c0_32, %c0_33] : memref<14x14x6xf32, #tpu.memory_space<vmem>>, vector<1x14x6xf32>
    %42 = vector.shape_cast %41 : vector<1x14x6xf32> to vector<14x6xf32>
    %43 = vector.shape_cast %40 : vector<14x6xf32> to vector<1x14x6xf32>
    tpu.vector_store %arg14[%c1_31, %c0_32, %c0_33], %43 {strides = array<i32>} : memref<14x14x6xf32, #tpu.memory_space<vmem>>, vector<1x14x6xf32>,
    %c112 = arith.constant 112 : index
    %c0_34 = arith.constant 0 : index
    %44 = vector.load %arg13[%c112, %c0_34] : memref<784x6xf32, #tpu.memory_space<vmem>>, vector<28x6xf32>
    %c140 = arith.constant 140 : index
    %c0_35 = arith.constant 0 : index
    %45 = vector.load %arg13[%c140, %c0_35] : memref<784x6xf32, #tpu.memory_space<vmem>>, vector<28x6xf32>
    %46 = arith.maximumf %44, %45 : vector<28x6xf32>
    %c0_36 = arith.constant 0 : index
    %c0_37 = arith.constant 0 : index
    %47 = vector.load %arg16[%c0_36, %c0_37] : memref<28x6xf32, #tpu.memory_space<vmem>>, vector<28x6xf32>
    tpu.vector_store %arg16[%c0_36, %c0_37], %46 {strides = array<i32>} : memref<28x6xf32, #tpu.memory_space<vmem>>, vector<28x6xf32>,
    %c0_38 = arith.constant 0 : index
    %c0_39 = arith.constant 0 : index
    %48 = tpu.strided_load %arg16[%c0_38, %c0_39] {strides = array<i32: 2, 1>} : memref<28x6xf32, #tpu.memory_space<vmem>>, vector<14x6xf32>
    %c1_40 = arith.constant 1 : index
    %c0_41 = arith.constant 0 : index
    %49 = tpu.strided_load %arg16[%c1_40, %c0_41] {strides = array<i32: 2, 1>} : memref<28x6xf32, #tpu.memory_space<vmem>>, vector<14x6xf32>
    %50 = arith.maximumf %48, %49 : vector<14x6xf32>
    %51 = vector.broadcast %5 : vector<1x6xf32> to vector<14x6xf32>
    %52 = arith.addf %50, %51 : vector<14x6xf32>
    %cst_42 = arith.constant 2.000000e+01 : f32
    %53 = vector.broadcast %cst_42 : f32 to vector<14x6xf32>
    %54 = arith.cmpf ogt, %52, %53 : vector<14x6xf32>
    %cst_43 = arith.constant 2.000000e+01 : f32
    %55 = vector.broadcast %cst_43 : f32 to vector<14x6xf32>
    %56 = arith.minimumf %52, %55 : vector<14x6xf32>
    %57 = math.exp %56 : vector<14x6xf32>
    %58 = math.log1p %57 : vector<14x6xf32>
    %59 = arith.select %54, %52, %58 : vector<14x6xi1>, vector<14x6xf32>
    %c2 = arith.constant 2 : index
    %c0_44 = arith.constant 0 : index
    %c0_45 = arith.constant 0 : index
    %60 = vector.load %arg14[%c2, %c0_44, %c0_45] : memref<14x14x6xf32, #tpu.memory_space<vmem>>, vector<1x14x6xf32>
    %61 = vector.shape_cast %60 : vector<1x14x6xf32> to vector<14x6xf32>
    %62 = vector.shape_cast %59 : vector<14x6xf32> to vector<1x14x6xf32>
    tpu.vector_store %arg14[%c2, %c0_44, %c0_45], %62 {strides = array<i32>} : memref<14x14x6xf32, #tpu.memory_space<vmem>>, vector<1x14x6xf32>,
    %c168 = arith.constant 168 : index
    %c0_46 = arith.constant 0 : index
    %63 = vector.load %arg13[%c168, %c0_46] : memref<784x6xf32, #tpu.memory_space<vmem>>, vector<28x6xf32>
    %c196 = arith.constant 196 : index
    %c0_47 = arith.constant 0 : index
    %64 = vector.load %arg13[%c196, %c0_47] : memref<784x6xf32, #tpu.memory_space<vmem>>, vector<28x6xf32>
    %65 = arith.maximumf %63, %64 : vector<28x6xf32>
    %c0_48 = arith.constant 0 : index
    %c0_49 = arith.constant 0 : index
    %66 = vector.load %arg16[%c0_48, %c0_49] : memref<28x6xf32, #tpu.memory_space<vmem>>, vector<28x6xf32>
    tpu.vector_store %arg16[%c0_48, %c0_49], %65 {strides = array<i32>} : memref<28x6xf32, #tpu.memory_space<vmem>>, vector<28x6xf32>,
    %c0_50 = arith.constant 0 : index
    %c0_51 = arith.constant 0 : index
    %67 = tpu.strided_load %arg16[%c0_50, %c0_51] {strides = array<i32: 2, 1>} : memref<28x6xf32, #tpu.memory_space<vmem>>, vector<14x6xf32>
    %c1_52 = arith.constant 1 : index
    %c0_53 = arith.constant 0 : index
    %68 = tpu.strided_load %arg16[%c1_52, %c0_53] {strides = array<i32: 2, 1>} : memref<28x6xf32, #tpu.memory_space<vmem>>, vector<14x6xf32>
    %69 = arith.maximumf %67, %68 : vector<14x6xf32>
    %70 = vector.broadcast %5 : vector<1x6xf32> to vector<14x6xf32>
    %71 = arith.addf %69, %70 : vector<14x6xf32>
    %cst_54 = arith.constant 2.000000e+01 : f32
    %72 = vector.broadcast %cst_54 : f32 to vector<14x6xf32>
    %73 = arith.cmpf ogt, %71, %72 : vector<14x6xf32>
    %cst_55 = arith.constant 2.000000e+01 : f32
    %74 = vector.broadcast %cst_55 : f32 to vector<14x6xf32>
    %75 = arith.minimumf %71, %74 : vector<14x6xf32>
    %76 = math.exp %75 : vector<14x6xf32>
    %77 = math.log1p %76 : vector<14x6xf32>
    %78 = arith.select %73, %71, %77 : vector<14x6xi1>, vector<14x6xf32>
    %c3 = arith.constant 3 : index
    %c0_56 = arith.constant 0 : index
    %c0_57 = arith.constant 0 : index
    %79 = vector.load %arg14[%c3, %c0_56, %c0_57] : memref<14x14x6xf32, #tpu.memory_space<vmem>>, vector<1x14x6xf32>
    %80 = vector.shape_cast %79 : vector<1x14x6xf32> to vector<14x6xf32>
    %81 = vector.shape_cast %78 : vector<14x6xf32> to vector<1x14x6xf32>
    tpu.vector_store %arg14[%c3, %c0_56, %c0_57], %81 {strides = array<i32>} : memref<14x14x6xf32, #tpu.memory_space<vmem>>, vector<1x14x6xf32>,
    %c224 = arith.constant 224 : index
    %c0_58 = arith.constant 0 : index
    %82 = vector.load %arg13[%c224, %c0_58] : memref<784x6xf32, #tpu.memory_space<vmem>>, vector<28x6xf32>
    %c252 = arith.constant 252 : index
    %c0_59 = arith.constant 0 : index
    %83 = vector.load %arg13[%c252, %c0_59] : memref<784x6xf32, #tpu.memory_space<vmem>>, vector<28x6xf32>
    %84 = arith.maximumf %82, %83 : vector<28x6xf32>
    %c0_60 = arith.constant 0 : index
    %c0_61 = arith.constant 0 : index
    %85 = vector.load %arg16[%c0_60, %c0_61] : memref<28x6xf32, #tpu.memory_space<vmem>>, vector<28x6xf32>
    tpu.vector_store %arg16[%c0_60, %c0_61], %84 {strides = array<i32>} : memref<28x6xf32, #tpu.memory_space<vmem>>, vector<28x6xf32>,
    %c0_62 = arith.constant 0 : index
    %c0_63 = arith.constant 0 : index
    %86 = tpu.strided_load %arg16[%c0_62, %c0_63] {strides = array<i32: 2, 1>} : memref<28x6xf32, #tpu.memory_space<vmem>>, vector<14x6xf32>
    %c1_64 = arith.constant 1 : index
    %c0_65 = arith.constant 0 : index
    %87 = tpu.strided_load %arg16[%c1_64, %c0_65] {strides = array<i32: 2, 1>} : memref<28x6xf32, #tpu.memory_space<vmem>>, vector<14x6xf32>
    %88 = arith.maximumf %86, %87 : vector<14x6xf32>
    %89 = vector.broadcast %5 : vector<1x6xf32> to vector<14x6xf32>
    %90 = arith.addf %88, %89 : vector<14x6xf32>
    %cst_66 = arith.constant 2.000000e+01 : f32
    %91 = vector.broadcast %cst_66 : f32 to vector<14x6xf32>
    %92 = arith.cmpf ogt, %90, %91 : vector<14x6xf32>
    %cst_67 = arith.constant 2.000000e+01 : f32
    %93 = vector.broadcast %cst_67 : f32 to vector<14x6xf32>
    %94 = arith.minimumf %90, %93 : vector<14x6xf32>
    %95 = math.exp %94 : vector<14x6xf32>
    %96 = math.log1p %95 : vector<14x6xf32>
    %97 = arith.select %92, %90, %96 : vector<14x6xi1>, vector<14x6xf32>
    %c4 = arith.constant 4 : index
    %c0_68 = arith.constant 0 : index
    %c0_69 = arith.constant 0 : index
    %98 = vector.load %arg14[%c4, %c0_68, %c0_69] : memref<14x14x6xf32, #tpu.memory_space<vmem>>, vector<1x14x6xf32>
    %99 = vector.shape_cast %98 : vector<1x14x6xf32> to vector<14x6xf32>
    %100 = vector.shape_cast %97 : vector<14x6xf32> to vector<1x14x6xf32>
    tpu.vector_store %arg14[%c4, %c0_68, %c0_69], %100 {strides = array<i32>} : memref<14x14x6xf32, #tpu.memory_space<vmem>>, vector<1x14x6xf32>,
    %c280 = arith.constant 280 : index
    %c0_70 = arith.constant 0 : index
    %101 = vector.load %arg13[%c280, %c0_70] : memref<784x6xf32, #tpu.memory_space<vmem>>, vector<28x6xf32>
    %c308 = arith.constant 308 : index
    %c0_71 = arith.constant 0 : index
    %102 = vector.load %arg13[%c308, %c0_71] : memref<784x6xf32, #tpu.memory_space<vmem>>, vector<28x6xf32>
    %103 = arith.maximumf %101, %102 : vector<28x6xf32>
    %c0_72 = arith.constant 0 : index
    %c0_73 = arith.constant 0 : index
    %104 = vector.load %arg16[%c0_72, %c0_73] : memref<28x6xf32, #tpu.memory_space<vmem>>, vector<28x6xf32>
    tpu.vector_store %arg16[%c0_72, %c0_73], %103 {strides = array<i32>} : memref<28x6xf32, #tpu.memory_space<vmem>>, vector<28x6xf32>,
    %c0_74 = arith.constant 0 : index
    %c0_75 = arith.constant 0 : index
    %105 = tpu.strided_load %arg16[%c0_74, %c0_75] {strides = array<i32: 2, 1>} : memref<28x6xf32, #tpu.memory_space<vmem>>, vector<14x6xf32>
    %c1_76 = arith.constant 1 : index
    %c0_77 = arith.constant 0 : index
    %106 = tpu.strided_load %arg16[%c1_76, %c0_77] {strides = array<i32: 2, 1>} : memref<28x6xf32, #tpu.memory_space<vmem>>, vector<14x6xf32>
    %107 = arith.maximumf %105, %106 : vector<14x6xf32>
    %108 = vector.broadcast %5 : vector<1x6xf32> to vector<14x6xf32>
    %109 = arith.addf %107, %108 : vector<14x6xf32>
    %cst_78 = arith.constant 2.000000e+01 : f32
    %110 = vector.broadcast %cst_78 : f32 to vector<14x6xf32>
    %111 = arith.cmpf ogt, %109, %110 : vector<14x6xf32>
    %cst_79 = arith.constant 2.000000e+01 : f32
    %112 = vector.broadcast %cst_79 : f32 to vector<14x6xf32>
    %113 = arith.minimumf %109, %112 : vector<14x6xf32>
    %114 = math.exp %113 : vector<14x6xf32>
    %115 = math.log1p %114 : vector<14x6xf32>
    %116 = arith.select %111, %109, %115 : vector<14x6xi1>, vector<14x6xf32>
    %c5 = arith.constant 5 : index
    %c0_80 = arith.constant 0 : index
    %c0_81 = arith.constant 0 : index
    %117 = vector.load %arg14[%c5, %c0_80, %c0_81] : memref<14x14x6xf32, #tpu.memory_space<vmem>>, vector<1x14x6xf32>
    %118 = vector.shape_cast %117 : vector<1x14x6xf32> to vector<14x6xf32>
    %119 = vector.shape_cast %116 : vector<14x6xf32> to vector<1x14x6xf32>
    tpu.vector_store %arg14[%c5, %c0_80, %c0_81], %119 {strides = array<i32>} : memref<14x14x6xf32, #tpu.memory_space<vmem>>, vector<1x14x6xf32>,
    %c336 = arith.constant 336 : index
    %c0_82 = arith.constant 0 : index
    %120 = vector.load %arg13[%c336, %c0_82] : memref<784x6xf32, #tpu.memory_space<vmem>>, vector<28x6xf32>
    %c364 = arith.constant 364 : index
    %c0_83 = arith.constant 0 : index
    %121 = vector.load %arg13[%c364, %c0_83] : memref<784x6xf32, #tpu.memory_space<vmem>>, vector<28x6xf32>
    %122 = arith.maximumf %120, %121 : vector<28x6xf32>
    %c0_84 = arith.constant 0 : index
    %c0_85 = arith.constant 0 : index
    %123 = vector.load %arg16[%c0_84, %c0_85] : memref<28x6xf32, #tpu.memory_space<vmem>>, vector<28x6xf32>
    tpu.vector_store %arg16[%c0_84, %c0_85], %122 {strides = array<i32>} : memref<28x6xf32, #tpu.memory_space<vmem>>, vector<28x6xf32>,
    %c0_86 = arith.constant 0 : index
    %c0_87 = arith.constant 0 : index
    %124 = tpu.strided_load %arg16[%c0_86, %c0_87] {strides = array<i32: 2, 1>} : memref<28x6xf32, #tpu.memory_space<vmem>>, vector<14x6xf32>
    %c1_88 = arith.constant 1 : index
    %c0_89 = arith.constant 0 : index
    %125 = tpu.strided_load %arg16[%c1_88, %c0_89] {strides = array<i32: 2, 1>} : memref<28x6xf32, #tpu.memory_space<vmem>>, vector<14x6xf32>
    %126 = arith.maximumf %124, %125 : vector<14x6xf32>
    %127 = vector.broadcast %5 : vector<1x6xf32> to vector<14x6xf32>
    %128 = arith.addf %126, %127 : vector<14x6xf32>
    %cst_90 = arith.constant 2.000000e+01 : f32
    %129 = vector.broadcast %cst_90 : f32 to vector<14x6xf32>
    %130 = arith.cmpf ogt, %128, %129 : vector<14x6xf32>
    %cst_91 = arith.constant 2.000000e+01 : f32
    %131 = vector.broadcast %cst_91 : f32 to vector<14x6xf32>
    %132 = arith.minimumf %128, %131 : vector<14x6xf32>
    %133 = math.exp %132 : vector<14x6xf32>
    %134 = math.log1p %133 : vector<14x6xf32>
    %135 = arith.select %130, %128, %134 : vector<14x6xi1>, vector<14x6xf32>
    %c6 = arith.constant 6 : index
    %c0_92 = arith.constant 0 : index
    %c0_93 = arith.constant 0 : index
    %136 = vector.load %arg14[%c6, %c0_92, %c0_93] : memref<14x14x6xf32, #tpu.memory_space<vmem>>, vector<1x14x6xf32>
    %137 = vector.shape_cast %136 : vector<1x14x6xf32> to vector<14x6xf32>
    %138 = vector.shape_cast %135 : vector<14x6xf32> to vector<1x14x6xf32>
    tpu.vector_store %arg14[%c6, %c0_92, %c0_93], %138 {strides = array<i32>} : memref<14x14x6xf32, #tpu.memory_space<vmem>>, vector<1x14x6xf32>,
    %c392 = arith.constant 392 : index
    %c0_94 = arith.constant 0 : index
    %139 = vector.load %arg13[%c392, %c0_94] : memref<784x6xf32, #tpu.memory_space<vmem>>, vector<28x6xf32>
    %c420 = arith.constant 420 : index
    %c0_95 = arith.constant 0 : index
    %140 = vector.load %arg13[%c420, %c0_95] : memref<784x6xf32, #tpu.memory_space<vmem>>, vector<28x6xf32>
    %141 = arith.maximumf %139, %140 : vector<28x6xf32>
    %c0_96 = arith.constant 0 : index
    %c0_97 = arith.constant 0 : index
    %142 = vector.load %arg16[%c0_96, %c0_97] : memref<28x6xf32, #tpu.memory_space<vmem>>, vector<28x6xf32>
    tpu.vector_store %arg16[%c0_96, %c0_97], %141 {strides = array<i32>} : memref<28x6xf32, #tpu.memory_space<vmem>>, vector<28x6xf32>,
    %c0_98 = arith.constant 0 : index
    %c0_99 = arith.constant 0 : index
    %143 = tpu.strided_load %arg16[%c0_98, %c0_99] {strides = array<i32: 2, 1>} : memref<28x6xf32, #tpu.memory_space<vmem>>, vector<14x6xf32>
    %c1_100 = arith.constant 1 : index
    %c0_101 = arith.constant 0 : index
    %144 = tpu.strided_load %arg16[%c1_100, %c0_101] {strides = array<i32: 2, 1>} : memref<28x6xf32, #tpu.memory_space<vmem>>, vector<14x6xf32>
    %145 = arith.maximumf %143, %144 : vector<14x6xf32>
    %146 = vector.broadcast %5 : vector<1x6xf32> to vector<14x6xf32>
    %147 = arith.addf %145, %146 : vector<14x6xf32>
    %cst_102 = arith.constant 2.000000e+01 : f32
    %148 = vector.broadcast %cst_102 : f32 to vector<14x6xf32>
    %149 = arith.cmpf ogt, %147, %148 : vector<14x6xf32>
    %cst_103 = arith.constant 2.000000e+01 : f32
    %150 = vector.broadcast %cst_103 : f32 to vector<14x6xf32>
    %151 = arith.minimumf %147, %150 : vector<14x6xf32>
    %152 = math.exp %151 : vector<14x6xf32>
    %153 = math.log1p %152 : vector<14x6xf32>
    %154 = arith.select %149, %147, %153 : vector<14x6xi1>, vector<14x6xf32>
    %c7 = arith.constant 7 : index
    %c0_104 = arith.constant 0 : index
    %c0_105 = arith.constant 0 : index
    %155 = vector.load %arg14[%c7, %c0_104, %c0_105] : memref<14x14x6xf32, #tpu.memory_space<vmem>>, vector<1x14x6xf32>
    %156 = vector.shape_cast %155 : vector<1x14x6xf32> to vector<14x6xf32>
    %157 = vector.shape_cast %154 : vector<14x6xf32> to vector<1x14x6xf32>
    tpu.vector_store %arg14[%c7, %c0_104, %c0_105], %157 {strides = array<i32>} : memref<14x14x6xf32, #tpu.memory_space<vmem>>, vector<1x14x6xf32>,
    %c448 = arith.constant 448 : index
    %c0_106 = arith.constant 0 : index
    %158 = vector.load %arg13[%c448, %c0_106] : memref<784x6xf32, #tpu.memory_space<vmem>>, vector<28x6xf32>
    %c476 = arith.constant 476 : index
    %c0_107 = arith.constant 0 : index
    %159 = vector.load %arg13[%c476, %c0_107] : memref<784x6xf32, #tpu.memory_space<vmem>>, vector<28x6xf32>
    %160 = arith.maximumf %158, %159 : vector<28x6xf32>
    %c0_108 = arith.constant 0 : index
    %c0_109 = arith.constant 0 : index
    %161 = vector.load %arg16[%c0_108, %c0_109] : memref<28x6xf32, #tpu.memory_space<vmem>>, vector<28x6xf32>
    tpu.vector_store %arg16[%c0_108, %c0_109], %160 {strides = array<i32>} : memref<28x6xf32, #tpu.memory_space<vmem>>, vector<28x6xf32>,
    %c0_110 = arith.constant 0 : index
    %c0_111 = arith.constant 0 : index
    %162 = tpu.strided_load %arg16[%c0_110, %c0_111] {strides = array<i32: 2, 1>} : memref<28x6xf32, #tpu.memory_space<vmem>>, vector<14x6xf32>
    %c1_112 = arith.constant 1 : index
    %c0_113 = arith.constant 0 : index
    %163 = tpu.strided_load %arg16[%c1_112, %c0_113] {strides = array<i32: 2, 1>} : memref<28x6xf32, #tpu.memory_space<vmem>>, vector<14x6xf32>
    %164 = arith.maximumf %162, %163 : vector<14x6xf32>
    %165 = vector.broadcast %5 : vector<1x6xf32> to vector<14x6xf32>
    %166 = arith.addf %164, %165 : vector<14x6xf32>
    %cst_114 = arith.constant 2.000000e+01 : f32
    %167 = vector.broadcast %cst_114 : f32 to vector<14x6xf32>
    %168 = arith.cmpf ogt, %166, %167 : vector<14x6xf32>
    %cst_115 = arith.constant 2.000000e+01 : f32
    %169 = vector.broadcast %cst_115 : f32 to vector<14x6xf32>
    %170 = arith.minimumf %166, %169 : vector<14x6xf32>
    %171 = math.exp %170 : vector<14x6xf32>
    %172 = math.log1p %171 : vector<14x6xf32>
    %173 = arith.select %168, %166, %172 : vector<14x6xi1>, vector<14x6xf32>
    %c8 = arith.constant 8 : index
    %c0_116 = arith.constant 0 : index
    %c0_117 = arith.constant 0 : index
    %174 = vector.load %arg14[%c8, %c0_116, %c0_117] : memref<14x14x6xf32, #tpu.memory_space<vmem>>, vector<1x14x6xf32>
    %175 = vector.shape_cast %174 : vector<1x14x6xf32> to vector<14x6xf32>
    %176 = vector.shape_cast %173 : vector<14x6xf32> to vector<1x14x6xf32>
    tpu.vector_store %arg14[%c8, %c0_116, %c0_117], %176 {strides = array<i32>} : memref<14x14x6xf32, #tpu.memory_space<vmem>>, vector<1x14x6xf32>,
    %c504 = arith.constant 504 : index
    %c0_118 = arith.constant 0 : index
    %177 = vector.load %arg13[%c504, %c0_118] : memref<784x6xf32, #tpu.memory_space<vmem>>, vector<28x6xf32>
    %c532 = arith.constant 532 : index
    %c0_119 = arith.constant 0 : index
    %178 = vector.load %arg13[%c532, %c0_119] : memref<784x6xf32, #tpu.memory_space<vmem>>, vector<28x6xf32>
    %179 = arith.maximumf %177, %178 : vector<28x6xf32>
    %c0_120 = arith.constant 0 : index
    %c0_121 = arith.constant 0 : index
    %180 = vector.load %arg16[%c0_120, %c0_121] : memref<28x6xf32, #tpu.memory_space<vmem>>, vector<28x6xf32>
    tpu.vector_store %arg16[%c0_120, %c0_121], %179 {strides = array<i32>} : memref<28x6xf32, #tpu.memory_space<vmem>>, vector<28x6xf32>,
    %c0_122 = arith.constant 0 : index
    %c0_123 = arith.constant 0 : index
    %181 = tpu.strided_load %arg16[%c0_122, %c0_123] {strides = array<i32: 2, 1>} : memref<28x6xf32, #tpu.memory_space<vmem>>, vector<14x6xf32>
    %c1_124 = arith.constant 1 : index
    %c0_125 = arith.constant 0 : index
    %182 = tpu.strided_load %arg16[%c1_124, %c0_125] {strides = array<i32: 2, 1>} : memref<28x6xf32, #tpu.memory_space<vmem>>, vector<14x6xf32>
    %183 = arith.maximumf %181, %182 : vector<14x6xf32>
    %184 = vector.broadcast %5 : vector<1x6xf32> to vector<14x6xf32>
    %185 = arith.addf %183, %184 : vector<14x6xf32>
    %cst_126 = arith.constant 2.000000e+01 : f32
    %186 = vector.broadcast %cst_126 : f32 to vector<14x6xf32>
    %187 = arith.cmpf ogt, %185, %186 : vector<14x6xf32>
    %cst_127 = arith.constant 2.000000e+01 : f32
    %188 = vector.broadcast %cst_127 : f32 to vector<14x6xf32>
    %189 = arith.minimumf %185, %188 : vector<14x6xf32>
    %190 = math.exp %189 : vector<14x6xf32>
    %191 = math.log1p %190 : vector<14x6xf32>
    %192 = arith.select %187, %185, %191 : vector<14x6xi1>, vector<14x6xf32>
    %c9 = arith.constant 9 : index
    %c0_128 = arith.constant 0 : index
    %c0_129 = arith.constant 0 : index
    %193 = vector.load %arg14[%c9, %c0_128, %c0_129] : memref<14x14x6xf32, #tpu.memory_space<vmem>>, vector<1x14x6xf32>
    %194 = vector.shape_cast %193 : vector<1x14x6xf32> to vector<14x6xf32>
    %195 = vector.shape_cast %192 : vector<14x6xf32> to vector<1x14x6xf32>
    tpu.vector_store %arg14[%c9, %c0_128, %c0_129], %195 {strides = array<i32>} : memref<14x14x6xf32, #tpu.memory_space<vmem>>, vector<1x14x6xf32>,
    %c560 = arith.constant 560 : index
    %c0_130 = arith.constant 0 : index
    %196 = vector.load %arg13[%c560, %c0_130] : memref<784x6xf32, #tpu.memory_space<vmem>>, vector<28x6xf32>
    %c588 = arith.constant 588 : index
    %c0_131 = arith.constant 0 : index
    %197 = vector.load %arg13[%c588, %c0_131] : memref<784x6xf32, #tpu.memory_space<vmem>>, vector<28x6xf32>
    %198 = arith.maximumf %196, %197 : vector<28x6xf32>
    %c0_132 = arith.constant 0 : index
    %c0_133 = arith.constant 0 : index
    %199 = vector.load %arg16[%c0_132, %c0_133] : memref<28x6xf32, #tpu.memory_space<vmem>>, vector<28x6xf32>
    tpu.vector_store %arg16[%c0_132, %c0_133], %198 {strides = array<i32>} : memref<28x6xf32, #tpu.memory_space<vmem>>, vector<28x6xf32>,
    %c0_134 = arith.constant 0 : index
    %c0_135 = arith.constant 0 : index
    %200 = tpu.strided_load %arg16[%c0_134, %c0_135] {strides = array<i32: 2, 1>} : memref<28x6xf32, #tpu.memory_space<vmem>>, vector<14x6xf32>
    %c1_136 = arith.constant 1 : index
    %c0_137 = arith.constant 0 : index
    %201 = tpu.strided_load %arg16[%c1_136, %c0_137] {strides = array<i32: 2, 1>} : memref<28x6xf32, #tpu.memory_space<vmem>>, vector<14x6xf32>
    %202 = arith.maximumf %200, %201 : vector<14x6xf32>
    %203 = vector.broadcast %5 : vector<1x6xf32> to vector<14x6xf32>
    %204 = arith.addf %202, %203 : vector<14x6xf32>
    %cst_138 = arith.constant 2.000000e+01 : f32
    %205 = vector.broadcast %cst_138 : f32 to vector<14x6xf32>
    %206 = arith.cmpf ogt, %204, %205 : vector<14x6xf32>
    %cst_139 = arith.constant 2.000000e+01 : f32
    %207 = vector.broadcast %cst_139 : f32 to vector<14x6xf32>
    %208 = arith.minimumf %204, %207 : vector<14x6xf32>
    %209 = math.exp %208 : vector<14x6xf32>
    %210 = math.log1p %209 : vector<14x6xf32>
    %211 = arith.select %206, %204, %210 : vector<14x6xi1>, vector<14x6xf32>
    %c10 = arith.constant 10 : index
    %c0_140 = arith.constant 0 : index
    %c0_141 = arith.constant 0 : index
    %212 = vector.load %arg14[%c10, %c0_140, %c0_141] : memref<14x14x6xf32, #tpu.memory_space<vmem>>, vector<1x14x6xf32>
    %213 = vector.shape_cast %212 : vector<1x14x6xf32> to vector<14x6xf32>
    %214 = vector.shape_cast %211 : vector<14x6xf32> to vector<1x14x6xf32>
    tpu.vector_store %arg14[%c10, %c0_140, %c0_141], %214 {strides = array<i32>} : memref<14x14x6xf32, #tpu.memory_space<vmem>>, vector<1x14x6xf32>,
    %c616 = arith.constant 616 : index
    %c0_142 = arith.constant 0 : index
    %215 = vector.load %arg13[%c616, %c0_142] : memref<784x6xf32, #tpu.memory_space<vmem>>, vector<28x6xf32>
    %c644 = arith.constant 644 : index
    %c0_143 = arith.constant 0 : index
    %216 = vector.load %arg13[%c644, %c0_143] : memref<784x6xf32, #tpu.memory_space<vmem>>, vector<28x6xf32>
    %217 = arith.maximumf %215, %216 : vector<28x6xf32>
    %c0_144 = arith.constant 0 : index
    %c0_145 = arith.constant 0 : index
    %218 = vector.load %arg16[%c0_144, %c0_145] : memref<28x6xf32, #tpu.memory_space<vmem>>, vector<28x6xf32>
    tpu.vector_store %arg16[%c0_144, %c0_145], %217 {strides = array<i32>} : memref<28x6xf32, #tpu.memory_space<vmem>>, vector<28x6xf32>,
    %c0_146 = arith.constant 0 : index
    %c0_147 = arith.constant 0 : index
    %219 = tpu.strided_load %arg16[%c0_146, %c0_147] {strides = array<i32: 2, 1>} : memref<28x6xf32, #tpu.memory_space<vmem>>, vector<14x6xf32>
    %c1_148 = arith.constant 1 : index
    %c0_149 = arith.constant 0 : index
    %220 = tpu.strided_load %arg16[%c1_148, %c0_149] {strides = array<i32: 2, 1>} : memref<28x6xf32, #tpu.memory_space<vmem>>, vector<14x6xf32>
    %221 = arith.maximumf %219, %220 : vector<14x6xf32>
    %222 = vector.broadcast %5 : vector<1x6xf32> to vector<14x6xf32>
    %223 = arith.addf %221, %222 : vector<14x6xf32>
    %cst_150 = arith.constant 2.000000e+01 : f32
    %224 = vector.broadcast %cst_150 : f32 to vector<14x6xf32>
    %225 = arith.cmpf ogt, %223, %224 : vector<14x6xf32>
    %cst_151 = arith.constant 2.000000e+01 : f32
    %226 = vector.broadcast %cst_151 : f32 to vector<14x6xf32>
    %227 = arith.minimumf %223, %226 : vector<14x6xf32>
    %228 = math.exp %227 : vector<14x6xf32>
    %229 = math.log1p %228 : vector<14x6xf32>
    %230 = arith.select %225, %223, %229 : vector<14x6xi1>, vector<14x6xf32>
    %c11 = arith.constant 11 : index
    %c0_152 = arith.constant 0 : index
    %c0_153 = arith.constant 0 : index
    %231 = vector.load %arg14[%c11, %c0_152, %c0_153] : memref<14x14x6xf32, #tpu.memory_space<vmem>>, vector<1x14x6xf32>
    %232 = vector.shape_cast %231 : vector<1x14x6xf32> to vector<14x6xf32>
    %233 = vector.shape_cast %230 : vector<14x6xf32> to vector<1x14x6xf32>
    tpu.vector_store %arg14[%c11, %c0_152, %c0_153], %233 {strides = array<i32>} : memref<14x14x6xf32, #tpu.memory_space<vmem>>, vector<1x14x6xf32>,
    %c672 = arith.constant 672 : index
    %c0_154 = arith.constant 0 : index
    %234 = vector.load %arg13[%c672, %c0_154] : memref<784x6xf32, #tpu.memory_space<vmem>>, vector<28x6xf32>
    %c700 = arith.constant 700 : index
    %c0_155 = arith.constant 0 : index
    %235 = vector.load %arg13[%c700, %c0_155] : memref<784x6xf32, #tpu.memory_space<vmem>>, vector<28x6xf32>
    %236 = arith.maximumf %234, %235 : vector<28x6xf32>
    %c0_156 = arith.constant 0 : index
    %c0_157 = arith.constant 0 : index
    %237 = vector.load %arg16[%c0_156, %c0_157] : memref<28x6xf32, #tpu.memory_space<vmem>>, vector<28x6xf32>
    tpu.vector_store %arg16[%c0_156, %c0_157], %236 {strides = array<i32>} : memref<28x6xf32, #tpu.memory_space<vmem>>, vector<28x6xf32>,
    %c0_158 = arith.constant 0 : index
    %c0_159 = arith.constant 0 : index
    %238 = tpu.strided_load %arg16[%c0_158, %c0_159] {strides = array<i32: 2, 1>} : memref<28x6xf32, #tpu.memory_space<vmem>>, vector<14x6xf32>
    %c1_160 = arith.constant 1 : index
    %c0_161 = arith.constant 0 : index
    %239 = tpu.strided_load %arg16[%c1_160, %c0_161] {strides = array<i32: 2, 1>} : memref<28x6xf32, #tpu.memory_space<vmem>>, vector<14x6xf32>
    %240 = arith.maximumf %238, %239 : vector<14x6xf32>
    %241 = vector.broadcast %5 : vector<1x6xf32> to vector<14x6xf32>
    %242 = arith.addf %240, %241 : vector<14x6xf32>
    %cst_162 = arith.constant 2.000000e+01 : f32
    %243 = vector.broadcast %cst_162 : f32 to vector<14x6xf32>
    %244 = arith.cmpf ogt, %242, %243 : vector<14x6xf32>
    %cst_163 = arith.constant 2.000000e+01 : f32
    %245 = vector.broadcast %cst_163 : f32 to vector<14x6xf32>
    %246 = arith.minimumf %242, %245 : vector<14x6xf32>
    %247 = math.exp %246 : vector<14x6xf32>
    %248 = math.log1p %247 : vector<14x6xf32>
    %249 = arith.select %244, %242, %248 : vector<14x6xi1>, vector<14x6xf32>
    %c12 = arith.constant 12 : index
    %c0_164 = arith.constant 0 : index
    %c0_165 = arith.constant 0 : index
    %250 = vector.load %arg14[%c12, %c0_164, %c0_165] : memref<14x14x6xf32, #tpu.memory_space<vmem>>, vector<1x14x6xf32>
    %251 = vector.shape_cast %250 : vector<1x14x6xf32> to vector<14x6xf32>
    %252 = vector.shape_cast %249 : vector<14x6xf32> to vector<1x14x6xf32>
    tpu.vector_store %arg14[%c12, %c0_164, %c0_165], %252 {strides = array<i32>} : memref<14x14x6xf32, #tpu.memory_space<vmem>>, vector<1x14x6xf32>,
    %c728 = arith.constant 728 : index
    %c0_166 = arith.constant 0 : index
    %253 = vector.load %arg13[%c728, %c0_166] : memref<784x6xf32, #tpu.memory_space<vmem>>, vector<28x6xf32>
    %c756 = arith.constant 756 : index
    %c0_167 = arith.constant 0 : index
    %254 = vector.load %arg13[%c756, %c0_167] : memref<784x6xf32, #tpu.memory_space<vmem>>, vector<28x6xf32>
    %255 = arith.maximumf %253, %254 : vector<28x6xf32>
    %c0_168 = arith.constant 0 : index
    %c0_169 = arith.constant 0 : index
    %256 = vector.load %arg16[%c0_168, %c0_169] : memref<28x6xf32, #tpu.memory_space<vmem>>, vector<28x6xf32>
    tpu.vector_store %arg16[%c0_168, %c0_169], %255 {strides = array<i32>} : memref<28x6xf32, #tpu.memory_space<vmem>>, vector<28x6xf32>,
    %c0_170 = arith.constant 0 : index
    %c0_171 = arith.constant 0 : index
    %257 = tpu.strided_load %arg16[%c0_170, %c0_171] {strides = array<i32: 2, 1>} : memref<28x6xf32, #tpu.memory_space<vmem>>, vector<14x6xf32>
    %c1_172 = arith.constant 1 : index
    %c0_173 = arith.constant 0 : index
    %258 = tpu.strided_load %arg16[%c1_172, %c0_173] {strides = array<i32: 2, 1>} : memref<28x6xf32, #tpu.memory_space<vmem>>, vector<14x6xf32>
    %259 = arith.maximumf %257, %258 : vector<14x6xf32>
    %260 = vector.broadcast %5 : vector<1x6xf32> to vector<14x6xf32>
    %261 = arith.addf %259, %260 : vector<14x6xf32>
    %cst_174 = arith.constant 2.000000e+01 : f32
    %262 = vector.broadcast %cst_174 : f32 to vector<14x6xf32>
    %263 = arith.cmpf ogt, %261, %262 : vector<14x6xf32>
    %cst_175 = arith.constant 2.000000e+01 : f32
    %264 = vector.broadcast %cst_175 : f32 to vector<14x6xf32>
    %265 = arith.minimumf %261, %264 : vector<14x6xf32>
    %266 = math.exp %265 : vector<14x6xf32>
    %267 = math.log1p %266 : vector<14x6xf32>
    %268 = arith.select %263, %261, %267 : vector<14x6xi1>, vector<14x6xf32>
    %c13 = arith.constant 13 : index
    %c0_176 = arith.constant 0 : index
    %c0_177 = arith.constant 0 : index
    %269 = vector.load %arg14[%c13, %c0_176, %c0_177] : memref<14x14x6xf32, #tpu.memory_space<vmem>>, vector<1x14x6xf32>
    %270 = vector.shape_cast %269 : vector<1x14x6xf32> to vector<14x6xf32>
    %271 = vector.shape_cast %268 : vector<14x6xf32> to vector<1x14x6xf32>
    tpu.vector_store %arg14[%c13, %c0_176, %c0_177], %271 {strides = array<i32>} : memref<14x14x6xf32, #tpu.memory_space<vmem>>, vector<1x14x6xf32>,
    %c0_178 = arith.constant 0 : index
    %c0_179 = arith.constant 0 : index
    %c0_180 = arith.constant 0 : index
    %272 = vector.load %arg14[%c0_178, %c0_179, %c0_180] : memref<14x14x6xf32, #tpu.memory_space<vmem>>, vector<10x10x6xf32>
    %c0_181 = arith.constant 0 : index
    %c0_182 = arith.constant 0 : index
    %c0_183 = arith.constant 0 : index
    %273 = vector.load %arg15[%c0_181, %c0_182, %c0_183] : memref<10x10x150xf32, #tpu.memory_space<vmem>>, vector<10x10x6xf32>
    tpu.vector_store %arg15[%c0_181, %c0_182, %c0_183], %272 {strides = array<i32>} : memref<10x10x150xf32, #tpu.memory_space<vmem>>, vector<10x10x6xf32>,
    %c0_184 = arith.constant 0 : index
    %c1_185 = arith.constant 1 : index
    %c0_186 = arith.constant 0 : index
    %274 = vector.load %arg14[%c0_184, %c1_185, %c0_186] : memref<14x14x6xf32, #tpu.memory_space<vmem>>, vector<10x10x6xf32>
    %c0_187 = arith.constant 0 : index
    %c0_188 = arith.constant 0 : index
    %c6_189 = arith.constant 6 : index
    %275 = vector.load %arg15[%c0_187, %c0_188, %c6_189] : memref<10x10x150xf32, #tpu.memory_space<vmem>>, vector<10x10x6xf32>
    tpu.vector_store %arg15[%c0_187, %c0_188, %c6_189], %274 {strides = array<i32>} : memref<10x10x150xf32, #tpu.memory_space<vmem>>, vector<10x10x6xf32>,
    %c0_190 = arith.constant 0 : index
    %c2_191 = arith.constant 2 : index
    %c0_192 = arith.constant 0 : index
    %276 = vector.load %arg14[%c0_190, %c2_191, %c0_192] : memref<14x14x6xf32, #tpu.memory_space<vmem>>, vector<10x10x6xf32>
    %c0_193 = arith.constant 0 : index
    %c0_194 = arith.constant 0 : index
    %c12_195 = arith.constant 12 : index
    %277 = vector.load %arg15[%c0_193, %c0_194, %c12_195] : memref<10x10x150xf32, #tpu.memory_space<vmem>>, vector<10x10x6xf32>
    tpu.vector_store %arg15[%c0_193, %c0_194, %c12_195], %276 {strides = array<i32>} : memref<10x10x150xf32, #tpu.memory_space<vmem>>, vector<10x10x6xf32>,
    %c0_196 = arith.constant 0 : index
    %c3_197 = arith.constant 3 : index
    %c0_198 = arith.constant 0 : index
    %278 = vector.load %arg14[%c0_196, %c3_197, %c0_198] : memref<14x14x6xf32, #tpu.memory_space<vmem>>, vector<10x10x6xf32>
    %c0_199 = arith.constant 0 : index
    %c0_200 = arith.constant 0 : index
    %c18 = arith.constant 18 : index
    %279 = vector.load %arg15[%c0_199, %c0_200, %c18] : memref<10x10x150xf32, #tpu.memory_space<vmem>>, vector<10x10x6xf32>
    tpu.vector_store %arg15[%c0_199, %c0_200, %c18], %278 {strides = array<i32>} : memref<10x10x150xf32, #tpu.memory_space<vmem>>, vector<10x10x6xf32>,
    %c0_201 = arith.constant 0 : index
    %c4_202 = arith.constant 4 : index
    %c0_203 = arith.constant 0 : index
    %280 = vector.load %arg14[%c0_201, %c4_202, %c0_203] : memref<14x14x6xf32, #tpu.memory_space<vmem>>, vector<10x10x6xf32>
    %c0_204 = arith.constant 0 : index
    %c0_205 = arith.constant 0 : index
    %c24 = arith.constant 24 : index
    %281 = vector.load %arg15[%c0_204, %c0_205, %c24] : memref<10x10x150xf32, #tpu.memory_space<vmem>>, vector<10x10x6xf32>
    tpu.vector_store %arg15[%c0_204, %c0_205, %c24], %280 {strides = array<i32>} : memref<10x10x150xf32, #tpu.memory_space<vmem>>, vector<10x10x6xf32>,
    %c1_206 = arith.constant 1 : index
    %c0_207 = arith.constant 0 : index
    %c0_208 = arith.constant 0 : index
    %282 = vector.load %arg14[%c1_206, %c0_207, %c0_208] : memref<14x14x6xf32, #tpu.memory_space<vmem>>, vector<10x10x6xf32>
    %c0_209 = arith.constant 0 : index
    %c0_210 = arith.constant 0 : index
    %c30 = arith.constant 30 : index
    %283 = vector.load %arg15[%c0_209, %c0_210, %c30] : memref<10x10x150xf32, #tpu.memory_space<vmem>>, vector<10x10x6xf32>
    tpu.vector_store %arg15[%c0_209, %c0_210, %c30], %282 {strides = array<i32>} : memref<10x10x150xf32, #tpu.memory_space<vmem>>, vector<10x10x6xf32>,
    %c1_211 = arith.constant 1 : index
    %c1_212 = arith.constant 1 : index
    %c0_213 = arith.constant 0 : index
    %284 = vector.load %arg14[%c1_211, %c1_212, %c0_213] : memref<14x14x6xf32, #tpu.memory_space<vmem>>, vector<10x10x6xf32>
    %c0_214 = arith.constant 0 : index
    %c0_215 = arith.constant 0 : index
    %c36 = arith.constant 36 : index
    %285 = vector.load %arg15[%c0_214, %c0_215, %c36] : memref<10x10x150xf32, #tpu.memory_space<vmem>>, vector<10x10x6xf32>
    tpu.vector_store %arg15[%c0_214, %c0_215, %c36], %284 {strides = array<i32>} : memref<10x10x150xf32, #tpu.memory_space<vmem>>, vector<10x10x6xf32>,
    %c1_216 = arith.constant 1 : index
    %c2_217 = arith.constant 2 : index
    %c0_218 = arith.constant 0 : index
    %286 = vector.load %arg14[%c1_216, %c2_217, %c0_218] : memref<14x14x6xf32, #tpu.memory_space<vmem>>, vector<10x10x6xf32>
    %c0_219 = arith.constant 0 : index
    %c0_220 = arith.constant 0 : index
    %c42 = arith.constant 42 : index
    %287 = vector.load %arg15[%c0_219, %c0_220, %c42] : memref<10x10x150xf32, #tpu.memory_space<vmem>>, vector<10x10x6xf32>
    tpu.vector_store %arg15[%c0_219, %c0_220, %c42], %286 {strides = array<i32>} : memref<10x10x150xf32, #tpu.memory_space<vmem>>, vector<10x10x6xf32>,
    %c1_221 = arith.constant 1 : index
    %c3_222 = arith.constant 3 : index
    %c0_223 = arith.constant 0 : index
    %288 = vector.load %arg14[%c1_221, %c3_222, %c0_223] : memref<14x14x6xf32, #tpu.memory_space<vmem>>, vector<10x10x6xf32>
    %c0_224 = arith.constant 0 : index
    %c0_225 = arith.constant 0 : index
    %c48 = arith.constant 48 : index
    %289 = vector.load %arg15[%c0_224, %c0_225, %c48] : memref<10x10x150xf32, #tpu.memory_space<vmem>>, vector<10x10x6xf32>
    tpu.vector_store %arg15[%c0_224, %c0_225, %c48], %288 {strides = array<i32>} : memref<10x10x150xf32, #tpu.memory_space<vmem>>, vector<10x10x6xf32>,
    %c1_226 = arith.constant 1 : index
    %c4_227 = arith.constant 4 : index
    %c0_228 = arith.constant 0 : index
    %290 = vector.load %arg14[%c1_226, %c4_227, %c0_228] : memref<14x14x6xf32, #tpu.memory_space<vmem>>, vector<10x10x6xf32>
    %c0_229 = arith.constant 0 : index
    %c0_230 = arith.constant 0 : index
    %c54 = arith.constant 54 : index
    %291 = vector.load %arg15[%c0_229, %c0_230, %c54] : memref<10x10x150xf32, #tpu.memory_space<vmem>>, vector<10x10x6xf32>
    tpu.vector_store %arg15[%c0_229, %c0_230, %c54], %290 {strides = array<i32>} : memref<10x10x150xf32, #tpu.memory_space<vmem>>, vector<10x10x6xf32>,
    %c2_231 = arith.constant 2 : index
    %c0_232 = arith.constant 0 : index
    %c0_233 = arith.constant 0 : index
    %292 = vector.load %arg14[%c2_231, %c0_232, %c0_233] : memref<14x14x6xf32, #tpu.memory_space<vmem>>, vector<10x10x6xf32>
    %c0_234 = arith.constant 0 : index
    %c0_235 = arith.constant 0 : index
    %c60 = arith.constant 60 : index
    %293 = vector.load %arg15[%c0_234, %c0_235, %c60] : memref<10x10x150xf32, #tpu.memory_space<vmem>>, vector<10x10x6xf32>
    tpu.vector_store %arg15[%c0_234, %c0_235, %c60], %292 {strides = array<i32>} : memref<10x10x150xf32, #tpu.memory_space<vmem>>, vector<10x10x6xf32>,
    %c2_236 = arith.constant 2 : index
    %c1_237 = arith.constant 1 : index
    %c0_238 = arith.constant 0 : index
    %294 = vector.load %arg14[%c2_236, %c1_237, %c0_238] : memref<14x14x6xf32, #tpu.memory_space<vmem>>, vector<10x10x6xf32>
    %c0_239 = arith.constant 0 : index
    %c0_240 = arith.constant 0 : index
    %c66 = arith.constant 66 : index
    %295 = vector.load %arg15[%c0_239, %c0_240, %c66] : memref<10x10x150xf32, #tpu.memory_space<vmem>>, vector<10x10x6xf32>
    tpu.vector_store %arg15[%c0_239, %c0_240, %c66], %294 {strides = array<i32>} : memref<10x10x150xf32, #tpu.memory_space<vmem>>, vector<10x10x6xf32>,
    %c2_241 = arith.constant 2 : index
    %c2_242 = arith.constant 2 : index
    %c0_243 = arith.constant 0 : index
    %296 = vector.load %arg14[%c2_241, %c2_242, %c0_243] : memref<14x14x6xf32, #tpu.memory_space<vmem>>, vector<10x10x6xf32>
    %c0_244 = arith.constant 0 : index
    %c0_245 = arith.constant 0 : index
    %c72 = arith.constant 72 : index
    %297 = vector.load %arg15[%c0_244, %c0_245, %c72] : memref<10x10x150xf32, #tpu.memory_space<vmem>>, vector<10x10x6xf32>
    tpu.vector_store %arg15[%c0_244, %c0_245, %c72], %296 {strides = array<i32>} : memref<10x10x150xf32, #tpu.memory_space<vmem>>, vector<10x10x6xf32>,
    %c2_246 = arith.constant 2 : index
    %c3_247 = arith.constant 3 : index
    %c0_248 = arith.constant 0 : index
    %298 = vector.load %arg14[%c2_246, %c3_247, %c0_248] : memref<14x14x6xf32, #tpu.memory_space<vmem>>, vector<10x10x6xf32>
    %c0_249 = arith.constant 0 : index
    %c0_250 = arith.constant 0 : index
    %c78 = arith.constant 78 : index
    %299 = vector.load %arg15[%c0_249, %c0_250, %c78] : memref<10x10x150xf32, #tpu.memory_space<vmem>>, vector<10x10x6xf32>
    tpu.vector_store %arg15[%c0_249, %c0_250, %c78], %298 {strides = array<i32>} : memref<10x10x150xf32, #tpu.memory_space<vmem>>, vector<10x10x6xf32>,
    %c2_251 = arith.constant 2 : index
    %c4_252 = arith.constant 4 : index
    %c0_253 = arith.constant 0 : index
    %300 = vector.load %arg14[%c2_251, %c4_252, %c0_253] : memref<14x14x6xf32, #tpu.memory_space<vmem>>, vector<10x10x6xf32>
    %c0_254 = arith.constant 0 : index
    %c0_255 = arith.constant 0 : index
    %c84_256 = arith.constant 84 : index
    %301 = vector.load %arg15[%c0_254, %c0_255, %c84_256] : memref<10x10x150xf32, #tpu.memory_space<vmem>>, vector<10x10x6xf32>
    tpu.vector_store %arg15[%c0_254, %c0_255, %c84_256], %300 {strides = array<i32>} : memref<10x10x150xf32, #tpu.memory_space<vmem>>, vector<10x10x6xf32>,
    %c3_257 = arith.constant 3 : index
    %c0_258 = arith.constant 0 : index
    %c0_259 = arith.constant 0 : index
    %302 = vector.load %arg14[%c3_257, %c0_258, %c0_259] : memref<14x14x6xf32, #tpu.memory_space<vmem>>, vector<10x10x6xf32>
    %c0_260 = arith.constant 0 : index
    %c0_261 = arith.constant 0 : index
    %c90 = arith.constant 90 : index
    %303 = vector.load %arg15[%c0_260, %c0_261, %c90] : memref<10x10x150xf32, #tpu.memory_space<vmem>>, vector<10x10x6xf32>
    tpu.vector_store %arg15[%c0_260, %c0_261, %c90], %302 {strides = array<i32>} : memref<10x10x150xf32, #tpu.memory_space<vmem>>, vector<10x10x6xf32>,
    %c3_262 = arith.constant 3 : index
    %c1_263 = arith.constant 1 : index
    %c0_264 = arith.constant 0 : index
    %304 = vector.load %arg14[%c3_262, %c1_263, %c0_264] : memref<14x14x6xf32, #tpu.memory_space<vmem>>, vector<10x10x6xf32>
    %c0_265 = arith.constant 0 : index
    %c0_266 = arith.constant 0 : index
    %c96 = arith.constant 96 : index
    %305 = vector.load %arg15[%c0_265, %c0_266, %c96] : memref<10x10x150xf32, #tpu.memory_space<vmem>>, vector<10x10x6xf32>
    tpu.vector_store %arg15[%c0_265, %c0_266, %c96], %304 {strides = array<i32>} : memref<10x10x150xf32, #tpu.memory_space<vmem>>, vector<10x10x6xf32>,
    %c3_267 = arith.constant 3 : index
    %c2_268 = arith.constant 2 : index
    %c0_269 = arith.constant 0 : index
    %306 = vector.load %arg14[%c3_267, %c2_268, %c0_269] : memref<14x14x6xf32, #tpu.memory_space<vmem>>, vector<10x10x6xf32>
    %c0_270 = arith.constant 0 : index
    %c0_271 = arith.constant 0 : index
    %c102 = arith.constant 102 : index
    %307 = vector.load %arg15[%c0_270, %c0_271, %c102] : memref<10x10x150xf32, #tpu.memory_space<vmem>>, vector<10x10x6xf32>
    tpu.vector_store %arg15[%c0_270, %c0_271, %c102], %306 {strides = array<i32>} : memref<10x10x150xf32, #tpu.memory_space<vmem>>, vector<10x10x6xf32>,
    %c3_272 = arith.constant 3 : index
    %c3_273 = arith.constant 3 : index
    %c0_274 = arith.constant 0 : index
    %308 = vector.load %arg14[%c3_272, %c3_273, %c0_274] : memref<14x14x6xf32, #tpu.memory_space<vmem>>, vector<10x10x6xf32>
    %c0_275 = arith.constant 0 : index
    %c0_276 = arith.constant 0 : index
    %c108 = arith.constant 108 : index
    %309 = vector.load %arg15[%c0_275, %c0_276, %c108] : memref<10x10x150xf32, #tpu.memory_space<vmem>>, vector<10x10x6xf32>
    tpu.vector_store %arg15[%c0_275, %c0_276, %c108], %308 {strides = array<i32>} : memref<10x10x150xf32, #tpu.memory_space<vmem>>, vector<10x10x6xf32>,
    %c3_277 = arith.constant 3 : index
    %c4_278 = arith.constant 4 : index
    %c0_279 = arith.constant 0 : index
    %310 = vector.load %arg14[%c3_277, %c4_278, %c0_279] : memref<14x14x6xf32, #tpu.memory_space<vmem>>, vector<10x10x6xf32>
    %c0_280 = arith.constant 0 : index
    %c0_281 = arith.constant 0 : index
    %c114 = arith.constant 114 : index
    %311 = vector.load %arg15[%c0_280, %c0_281, %c114] : memref<10x10x150xf32, #tpu.memory_space<vmem>>, vector<10x10x6xf32>
    tpu.vector_store %arg15[%c0_280, %c0_281, %c114], %310 {strides = array<i32>} : memref<10x10x150xf32, #tpu.memory_space<vmem>>, vector<10x10x6xf32>,
    %c4_282 = arith.constant 4 : index
    %c0_283 = arith.constant 0 : index
    %c0_284 = arith.constant 0 : index
    %312 = vector.load %arg14[%c4_282, %c0_283, %c0_284] : memref<14x14x6xf32, #tpu.memory_space<vmem>>, vector<10x10x6xf32>
    %c0_285 = arith.constant 0 : index
    %c0_286 = arith.constant 0 : index
    %c120 = arith.constant 120 : index
    %313 = vector.load %arg15[%c0_285, %c0_286, %c120] : memref<10x10x150xf32, #tpu.memory_space<vmem>>, vector<10x10x6xf32>
    tpu.vector_store %arg15[%c0_285, %c0_286, %c120], %312 {strides = array<i32>} : memref<10x10x150xf32, #tpu.memory_space<vmem>>, vector<10x10x6xf32>,
    %c4_287 = arith.constant 4 : index
    %c1_288 = arith.constant 1 : index
    %c0_289 = arith.constant 0 : index
    %314 = vector.load %arg14[%c4_287, %c1_288, %c0_289] : memref<14x14x6xf32, #tpu.memory_space<vmem>>, vector<10x10x6xf32>
    %c0_290 = arith.constant 0 : index
    %c0_291 = arith.constant 0 : index
    %c126 = arith.constant 126 : index
    %315 = vector.load %arg15[%c0_290, %c0_291, %c126] : memref<10x10x150xf32, #tpu.memory_space<vmem>>, vector<10x10x6xf32>
    tpu.vector_store %arg15[%c0_290, %c0_291, %c126], %314 {strides = array<i32>} : memref<10x10x150xf32, #tpu.memory_space<vmem>>, vector<10x10x6xf32>,
    %c4_292 = arith.constant 4 : index
    %c2_293 = arith.constant 2 : index
    %c0_294 = arith.constant 0 : index
    %316 = vector.load %arg14[%c4_292, %c2_293, %c0_294] : memref<14x14x6xf32, #tpu.memory_space<vmem>>, vector<10x10x6xf32>
    %c0_295 = arith.constant 0 : index
    %c0_296 = arith.constant 0 : index
    %c132 = arith.constant 132 : index
    %317 = vector.load %arg15[%c0_295, %c0_296, %c132] : memref<10x10x150xf32, #tpu.memory_space<vmem>>, vector<10x10x6xf32>
    tpu.vector_store %arg15[%c0_295, %c0_296, %c132], %316 {strides = array<i32>} : memref<10x10x150xf32, #tpu.memory_space<vmem>>, vector<10x10x6xf32>,
    %c4_297 = arith.constant 4 : index
    %c3_298 = arith.constant 3 : index
    %c0_299 = arith.constant 0 : index
    %318 = vector.load %arg14[%c4_297, %c3_298, %c0_299] : memref<14x14x6xf32, #tpu.memory_space<vmem>>, vector<10x10x6xf32>
    %c0_300 = arith.constant 0 : index
    %c0_301 = arith.constant 0 : index
    %c138 = arith.constant 138 : index
    %319 = vector.load %arg15[%c0_300, %c0_301, %c138] : memref<10x10x150xf32, #tpu.memory_space<vmem>>, vector<10x10x6xf32>
    tpu.vector_store %arg15[%c0_300, %c0_301, %c138], %318 {strides = array<i32>} : memref<10x10x150xf32, #tpu.memory_space<vmem>>, vector<10x10x6xf32>,
    %c4_302 = arith.constant 4 : index
    %c4_303 = arith.constant 4 : index
    %c0_304 = arith.constant 0 : index
    %320 = vector.load %arg14[%c4_302, %c4_303, %c0_304] : memref<14x14x6xf32, #tpu.memory_space<vmem>>, vector<10x10x6xf32>
    %c0_305 = arith.constant 0 : index
    %c0_306 = arith.constant 0 : index
    %c144 = arith.constant 144 : index
    %321 = vector.load %arg15[%c0_305, %c0_306, %c144] : memref<10x10x150xf32, #tpu.memory_space<vmem>>, vector<10x10x6xf32>
    tpu.vector_store %arg15[%c0_305, %c0_306, %c144], %320 {strides = array<i32>} : memref<10x10x150xf32, #tpu.memory_space<vmem>>, vector<10x10x6xf32>,
    %c0_307 = arith.constant 0 : index
    %c0_308 = arith.constant 0 : index
    %322 = vector.load %arg4[%c0_307, %c0_308] : memref<150x16xbf16, #tpu.memory_space<vmem>>, vector<150x16xbf16>
    %c0_309 = arith.constant 0 : index
    %c0_310 = arith.constant 0 : index
    %323 = vector.load %arg5[%c0_309, %c0_310] : memref<1x16xf32, #tpu.memory_space<vmem>>, vector<1x16xf32>
    %c0_311 = arith.constant 0 : index
    %c0_312 = arith.constant 0 : index
    %c0_313 = arith.constant 0 : index
    %324 = vector.load %arg15[%c0_311, %c0_312, %c0_313] : memref<10x10x150xf32, #tpu.memory_space<vmem>>, vector<1x10x150xf32>
    %325 = vector.shape_cast %324 : vector<1x10x150xf32> to vector<10x150xf32>
    %326 = arith.truncf %325 : vector<10x150xf32> to vector<10x150xbf16>
    %cst_314 = arith.constant dense<0.000000e+00> : vector<10x16xf32>
    %327 = tpu.matmul %326, %322, %cst_314 {dimension_numbers = #tpu.dot_dimension_numbers<[1], [0], [0], [1], [0, 0, 1, 1], [], []>} : vector<10x150xbf16>, vector<150x16xbf16>, vector<10x16xf32> -> vector<10x16xf32>
    %c1_315 = arith.constant 1 : index
    %c0_316 = arith.constant 0 : index
    %c0_317 = arith.constant 0 : index
    %328 = vector.load %arg15[%c1_315, %c0_316, %c0_317] : memref<10x10x150xf32, #tpu.memory_space<vmem>>, vector<1x10x150xf32>
    %329 = vector.shape_cast %328 : vector<1x10x150xf32> to vector<10x150xf32>
    %330 = arith.truncf %329 : vector<10x150xf32> to vector<10x150xbf16>
    %cst_318 = arith.constant dense<0.000000e+00> : vector<10x16xf32>
    %331 = tpu.matmul %330, %322, %cst_318 {dimension_numbers = #tpu.dot_dimension_numbers<[1], [0], [0], [1], [0, 0, 1, 1], [], []>} : vector<10x150xbf16>, vector<150x16xbf16>, vector<10x16xf32> -> vector<10x16xf32>
    %332 = arith.maximumf %327, %331 : vector<10x16xf32>
    %c0_319 = arith.constant 0 : index
    %c0_320 = arith.constant 0 : index
    %333 = vector.load %arg17[%c0_319, %c0_320] : memref<10x16xf32, #tpu.memory_space<vmem>>, vector<10x16xf32>
    tpu.vector_store %arg17[%c0_319, %c0_320], %332 {strides = array<i32>} : memref<10x16xf32, #tpu.memory_space<vmem>>, vector<10x16xf32>,
    %c0_321 = arith.constant 0 : index
    %c0_322 = arith.constant 0 : index
    %334 = tpu.strided_load %arg17[%c0_321, %c0_322] {strides = array<i32: 2, 1>} : memref<10x16xf32, #tpu.memory_space<vmem>>, vector<5x16xf32>
    %c1_323 = arith.constant 1 : index
    %c0_324 = arith.constant 0 : index
    %335 = tpu.strided_load %arg17[%c1_323, %c0_324] {strides = array<i32: 2, 1>} : memref<10x16xf32, #tpu.memory_space<vmem>>, vector<5x16xf32>
    %336 = arith.maximumf %334, %335 : vector<5x16xf32>
    %337 = vector.broadcast %323 : vector<1x16xf32> to vector<5x16xf32>
    %338 = arith.addf %336, %337 : vector<5x16xf32>
    %cst_325 = arith.constant 2.000000e+01 : f32
    %339 = vector.broadcast %cst_325 : f32 to vector<5x16xf32>
    %340 = arith.cmpf ogt, %338, %339 : vector<5x16xf32>
    %cst_326 = arith.constant 2.000000e+01 : f32
    %341 = vector.broadcast %cst_326 : f32 to vector<5x16xf32>
    %342 = arith.minimumf %338, %341 : vector<5x16xf32>
    %343 = math.exp %342 : vector<5x16xf32>
    %344 = math.log1p %343 : vector<5x16xf32>
    %345 = arith.select %340, %338, %344 : vector<5x16xi1>, vector<5x16xf32>
    %346 = vector.extract_strided_slice %345 {offsets = [0, 0], sizes = [1, 16], strides = [1, 1]} : vector<5x16xf32> to vector<1x16xf32>
    %c0_327 = arith.constant 0 : index
    %c0_328 = arith.constant 0 : index
    %347 = vector.load %arg18[%c0_327, %c0_328] : memref<1x400xf32, #tpu.memory_space<vmem>>, vector<1x16xf32>
    tpu.vector_store %arg18[%c0_327, %c0_328], %346 {strides = array<i32>} : memref<1x400xf32, #tpu.memory_space<vmem>>, vector<1x16xf32>,
    %348 = vector.extract_strided_slice %345 {offsets = [1, 0], sizes = [1, 16], strides = [1, 1]} : vector<5x16xf32> to vector<1x16xf32>
    %c0_329 = arith.constant 0 : index
    %c16 = arith.constant 16 : index
    %349 = vector.load %arg18[%c0_329, %c16] : memref<1x400xf32, #tpu.memory_space<vmem>>, vector<1x16xf32>
    tpu.vector_store %arg18[%c0_329, %c16], %348 {strides = array<i32>} : memref<1x400xf32, #tpu.memory_space<vmem>>, vector<1x16xf32>,
    %350 = vector.extract_strided_slice %345 {offsets = [2, 0], sizes = [1, 16], strides = [1, 1]} : vector<5x16xf32> to vector<1x16xf32>
    %c0_330 = arith.constant 0 : index
    %c32 = arith.constant 32 : index
    %351 = vector.load %arg18[%c0_330, %c32] : memref<1x400xf32, #tpu.memory_space<vmem>>, vector<1x16xf32>
    tpu.vector_store %arg18[%c0_330, %c32], %350 {strides = array<i32>} : memref<1x400xf32, #tpu.memory_space<vmem>>, vector<1x16xf32>,
    %352 = vector.extract_strided_slice %345 {offsets = [3, 0], sizes = [1, 16], strides = [1, 1]} : vector<5x16xf32> to vector<1x16xf32>
    %c0_331 = arith.constant 0 : index
    %c48_332 = arith.constant 48 : index
    %353 = vector.load %arg18[%c0_331, %c48_332] : memref<1x400xf32, #tpu.memory_space<vmem>>, vector<1x16xf32>
    tpu.vector_store %arg18[%c0_331, %c48_332], %352 {strides = array<i32>} : memref<1x400xf32, #tpu.memory_space<vmem>>, vector<1x16xf32>,
    %354 = vector.extract_strided_slice %345 {offsets = [4, 0], sizes = [1, 16], strides = [1, 1]} : vector<5x16xf32> to vector<1x16xf32>
    %c0_333 = arith.constant 0 : index
    %c64 = arith.constant 64 : index
    %355 = vector.load %arg18[%c0_333, %c64] : memref<1x400xf32, #tpu.memory_space<vmem>>, vector<1x16xf32>
    tpu.vector_store %arg18[%c0_333, %c64], %354 {strides = array<i32>} : memref<1x400xf32, #tpu.memory_space<vmem>>, vector<1x16xf32>,
    %c2_334 = arith.constant 2 : index
    %c0_335 = arith.constant 0 : index
    %c0_336 = arith.constant 0 : index
    %356 = vector.load %arg15[%c2_334, %c0_335, %c0_336] : memref<10x10x150xf32, #tpu.memory_space<vmem>>, vector<1x10x150xf32>
    %357 = vector.shape_cast %356 : vector<1x10x150xf32> to vector<10x150xf32>
    %358 = arith.truncf %357 : vector<10x150xf32> to vector<10x150xbf16>
    %cst_337 = arith.constant dense<0.000000e+00> : vector<10x16xf32>
    %359 = tpu.matmul %358, %322, %cst_337 {dimension_numbers = #tpu.dot_dimension_numbers<[1], [0], [0], [1], [0, 0, 1, 1], [], []>} : vector<10x150xbf16>, vector<150x16xbf16>, vector<10x16xf32> -> vector<10x16xf32>
    %c3_338 = arith.constant 3 : index
    %c0_339 = arith.constant 0 : index
    %c0_340 = arith.constant 0 : index
    %360 = vector.load %arg15[%c3_338, %c0_339, %c0_340] : memref<10x10x150xf32, #tpu.memory_space<vmem>>, vector<1x10x150xf32>
    %361 = vector.shape_cast %360 : vector<1x10x150xf32> to vector<10x150xf32>
    %362 = arith.truncf %361 : vector<10x150xf32> to vector<10x150xbf16>
    %cst_341 = arith.constant dense<0.000000e+00> : vector<10x16xf32>
    %363 = tpu.matmul %362, %322, %cst_341 {dimension_numbers = #tpu.dot_dimension_numbers<[1], [0], [0], [1], [0, 0, 1, 1], [], []>} : vector<10x150xbf16>, vector<150x16xbf16>, vector<10x16xf32> -> vector<10x16xf32>
    %364 = arith.maximumf %359, %363 : vector<10x16xf32>
    %c0_342 = arith.constant 0 : index
    %c0_343 = arith.constant 0 : index
    %365 = vector.load %arg17[%c0_342, %c0_343] : memref<10x16xf32, #tpu.memory_space<vmem>>, vector<10x16xf32>
    tpu.vector_store %arg17[%c0_342, %c0_343], %364 {strides = array<i32>} : memref<10x16xf32, #tpu.memory_space<vmem>>, vector<10x16xf32>,
    %c0_344 = arith.constant 0 : index
    %c0_345 = arith.constant 0 : index
    %366 = tpu.strided_load %arg17[%c0_344, %c0_345] {strides = array<i32: 2, 1>} : memref<10x16xf32, #tpu.memory_space<vmem>>, vector<5x16xf32>
    %c1_346 = arith.constant 1 : index
    %c0_347 = arith.constant 0 : index
    %367 = tpu.strided_load %arg17[%c1_346, %c0_347] {strides = array<i32: 2, 1>} : memref<10x16xf32, #tpu.memory_space<vmem>>, vector<5x16xf32>
    %368 = arith.maximumf %366, %367 : vector<5x16xf32>
    %369 = vector.broadcast %323 : vector<1x16xf32> to vector<5x16xf32>
    %370 = arith.addf %368, %369 : vector<5x16xf32>
    %cst_348 = arith.constant 2.000000e+01 : f32
    %371 = vector.broadcast %cst_348 : f32 to vector<5x16xf32>
    %372 = arith.cmpf ogt, %370, %371 : vector<5x16xf32>
    %cst_349 = arith.constant 2.000000e+01 : f32
    %373 = vector.broadcast %cst_349 : f32 to vector<5x16xf32>
    %374 = arith.minimumf %370, %373 : vector<5x16xf32>
    %375 = math.exp %374 : vector<5x16xf32>
    %376 = math.log1p %375 : vector<5x16xf32>
    %377 = arith.select %372, %370, %376 : vector<5x16xi1>, vector<5x16xf32>
    %378 = vector.extract_strided_slice %377 {offsets = [0, 0], sizes = [1, 16], strides = [1, 1]} : vector<5x16xf32> to vector<1x16xf32>
    %c0_350 = arith.constant 0 : index
    %c80 = arith.constant 80 : index
    %379 = vector.load %arg18[%c0_350, %c80] : memref<1x400xf32, #tpu.memory_space<vmem>>, vector<1x16xf32>
    tpu.vector_store %arg18[%c0_350, %c80], %378 {strides = array<i32>} : memref<1x400xf32, #tpu.memory_space<vmem>>, vector<1x16xf32>,
    %380 = vector.extract_strided_slice %377 {offsets = [1, 0], sizes = [1, 16], strides = [1, 1]} : vector<5x16xf32> to vector<1x16xf32>
    %c0_351 = arith.constant 0 : index
    %c96_352 = arith.constant 96 : index
    %381 = vector.load %arg18[%c0_351, %c96_352] : memref<1x400xf32, #tpu.memory_space<vmem>>, vector<1x16xf32>
    tpu.vector_store %arg18[%c0_351, %c96_352], %380 {strides = array<i32>} : memref<1x400xf32, #tpu.memory_space<vmem>>, vector<1x16xf32>,
    %382 = vector.extract_strided_slice %377 {offsets = [2, 0], sizes = [1, 16], strides = [1, 1]} : vector<5x16xf32> to vector<1x16xf32>
    %c0_353 = arith.constant 0 : index
    %c112_354 = arith.constant 112 : index
    %383 = vector.load %arg18[%c0_353, %c112_354] : memref<1x400xf32, #tpu.memory_space<vmem>>, vector<1x16xf32>
    tpu.vector_store %arg18[%c0_353, %c112_354], %382 {strides = array<i32>} : memref<1x400xf32, #tpu.memory_space<vmem>>, vector<1x16xf32>,
    %384 = vector.extract_strided_slice %377 {offsets = [3, 0], sizes = [1, 16], strides = [1, 1]} : vector<5x16xf32> to vector<1x16xf32>
    %c0_355 = arith.constant 0 : index
    %c128 = arith.constant 128 : index
    %385 = vector.load %arg18[%c0_355, %c128] : memref<1x400xf32, #tpu.memory_space<vmem>>, vector<1x16xf32>
    tpu.vector_store %arg18[%c0_355, %c128], %384 {strides = array<i32>} : memref<1x400xf32, #tpu.memory_space<vmem>>, vector<1x16xf32>,
    %386 = vector.extract_strided_slice %377 {offsets = [4, 0], sizes = [1, 16], strides = [1, 1]} : vector<5x16xf32> to vector<1x16xf32>
    %c0_356 = arith.constant 0 : index
    %c144_357 = arith.constant 144 : index
    %387 = vector.load %arg18[%c0_356, %c144_357] : memref<1x400xf32, #tpu.memory_space<vmem>>, vector<1x16xf32>
    tpu.vector_store %arg18[%c0_356, %c144_357], %386 {strides = array<i32>} : memref<1x400xf32, #tpu.memory_space<vmem>>, vector<1x16xf32>,
    %c4_358 = arith.constant 4 : index
    %c0_359 = arith.constant 0 : index
    %c0_360 = arith.constant 0 : index
    %388 = vector.load %arg15[%c4_358, %c0_359, %c0_360] : memref<10x10x150xf32, #tpu.memory_space<vmem>>, vector<1x10x150xf32>
    %389 = vector.shape_cast %388 : vector<1x10x150xf32> to vector<10x150xf32>
    %390 = arith.truncf %389 : vector<10x150xf32> to vector<10x150xbf16>
    %cst_361 = arith.constant dense<0.000000e+00> : vector<10x16xf32>
    %391 = tpu.matmul %390, %322, %cst_361 {dimension_numbers = #tpu.dot_dimension_numbers<[1], [0], [0], [1], [0, 0, 1, 1], [], []>} : vector<10x150xbf16>, vector<150x16xbf16>, vector<10x16xf32> -> vector<10x16xf32>
    %c5_362 = arith.constant 5 : index
    %c0_363 = arith.constant 0 : index
    %c0_364 = arith.constant 0 : index
    %392 = vector.load %arg15[%c5_362, %c0_363, %c0_364] : memref<10x10x150xf32, #tpu.memory_space<vmem>>, vector<1x10x150xf32>
    %393 = vector.shape_cast %392 : vector<1x10x150xf32> to vector<10x150xf32>
    %394 = arith.truncf %393 : vector<10x150xf32> to vector<10x150xbf16>
    %cst_365 = arith.constant dense<0.000000e+00> : vector<10x16xf32>
    %395 = tpu.matmul %394, %322, %cst_365 {dimension_numbers = #tpu.dot_dimension_numbers<[1], [0], [0], [1], [0, 0, 1, 1], [], []>} : vector<10x150xbf16>, vector<150x16xbf16>, vector<10x16xf32> -> vector<10x16xf32>
    %396 = arith.maximumf %391, %395 : vector<10x16xf32>
    %c0_366 = arith.constant 0 : index
    %c0_367 = arith.constant 0 : index
    %397 = vector.load %arg17[%c0_366, %c0_367] : memref<10x16xf32, #tpu.memory_space<vmem>>, vector<10x16xf32>
    tpu.vector_store %arg17[%c0_366, %c0_367], %396 {strides = array<i32>} : memref<10x16xf32, #tpu.memory_space<vmem>>, vector<10x16xf32>,
    %c0_368 = arith.constant 0 : index
    %c0_369 = arith.constant 0 : index
    %398 = tpu.strided_load %arg17[%c0_368, %c0_369] {strides = array<i32: 2, 1>} : memref<10x16xf32, #tpu.memory_space<vmem>>, vector<5x16xf32>
    %c1_370 = arith.constant 1 : index
    %c0_371 = arith.constant 0 : index
    %399 = tpu.strided_load %arg17[%c1_370, %c0_371] {strides = array<i32: 2, 1>} : memref<10x16xf32, #tpu.memory_space<vmem>>, vector<5x16xf32>
    %400 = arith.maximumf %398, %399 : vector<5x16xf32>
    %401 = vector.broadcast %323 : vector<1x16xf32> to vector<5x16xf32>
    %402 = arith.addf %400, %401 : vector<5x16xf32>
    %cst_372 = arith.constant 2.000000e+01 : f32
    %403 = vector.broadcast %cst_372 : f32 to vector<5x16xf32>
    %404 = arith.cmpf ogt, %402, %403 : vector<5x16xf32>
    %cst_373 = arith.constant 2.000000e+01 : f32
    %405 = vector.broadcast %cst_373 : f32 to vector<5x16xf32>
    %406 = arith.minimumf %402, %405 : vector<5x16xf32>
    %407 = math.exp %406 : vector<5x16xf32>
    %408 = math.log1p %407 : vector<5x16xf32>
    %409 = arith.select %404, %402, %408 : vector<5x16xi1>, vector<5x16xf32>
    %410 = vector.extract_strided_slice %409 {offsets = [0, 0], sizes = [1, 16], strides = [1, 1]} : vector<5x16xf32> to vector<1x16xf32>
    %c0_374 = arith.constant 0 : index
    %c160 = arith.constant 160 : index
    %411 = vector.load %arg18[%c0_374, %c160] : memref<1x400xf32, #tpu.memory_space<vmem>>, vector<1x16xf32>
    tpu.vector_store %arg18[%c0_374, %c160], %410 {strides = array<i32>} : memref<1x400xf32, #tpu.memory_space<vmem>>, vector<1x16xf32>,
    %412 = vector.extract_strided_slice %409 {offsets = [1, 0], sizes = [1, 16], strides = [1, 1]} : vector<5x16xf32> to vector<1x16xf32>
    %c0_375 = arith.constant 0 : index
    %c176 = arith.constant 176 : index
    %413 = vector.load %arg18[%c0_375, %c176] : memref<1x400xf32, #tpu.memory_space<vmem>>, vector<1x16xf32>
    tpu.vector_store %arg18[%c0_375, %c176], %412 {strides = array<i32>} : memref<1x400xf32, #tpu.memory_space<vmem>>, vector<1x16xf32>,
    %414 = vector.extract_strided_slice %409 {offsets = [2, 0], sizes = [1, 16], strides = [1, 1]} : vector<5x16xf32> to vector<1x16xf32>
    %c0_376 = arith.constant 0 : index
    %c192 = arith.constant 192 : index
    %415 = vector.load %arg18[%c0_376, %c192] : memref<1x400xf32, #tpu.memory_space<vmem>>, vector<1x16xf32>
    tpu.vector_store %arg18[%c0_376, %c192], %414 {strides = array<i32>} : memref<1x400xf32, #tpu.memory_space<vmem>>, vector<1x16xf32>,
    %416 = vector.extract_strided_slice %409 {offsets = [3, 0], sizes = [1, 16], strides = [1, 1]} : vector<5x16xf32> to vector<1x16xf32>
    %c0_377 = arith.constant 0 : index
    %c208 = arith.constant 208 : index
    %417 = vector.load %arg18[%c0_377, %c208] : memref<1x400xf32, #tpu.memory_space<vmem>>, vector<1x16xf32>
    tpu.vector_store %arg18[%c0_377, %c208], %416 {strides = array<i32>} : memref<1x400xf32, #tpu.memory_space<vmem>>, vector<1x16xf32>,
    %418 = vector.extract_strided_slice %409 {offsets = [4, 0], sizes = [1, 16], strides = [1, 1]} : vector<5x16xf32> to vector<1x16xf32>
    %c0_378 = arith.constant 0 : index
    %c224_379 = arith.constant 224 : index
    %419 = vector.load %arg18[%c0_378, %c224_379] : memref<1x400xf32, #tpu.memory_space<vmem>>, vector<1x16xf32>
    tpu.vector_store %arg18[%c0_378, %c224_379], %418 {strides = array<i32>} : memref<1x400xf32, #tpu.memory_space<vmem>>, vector<1x16xf32>,
    %c6_380 = arith.constant 6 : index
    %c0_381 = arith.constant 0 : index
    %c0_382 = arith.constant 0 : index
    %420 = vector.load %arg15[%c6_380, %c0_381, %c0_382] : memref<10x10x150xf32, #tpu.memory_space<vmem>>, vector<1x10x150xf32>
    %421 = vector.shape_cast %420 : vector<1x10x150xf32> to vector<10x150xf32>
    %422 = arith.truncf %421 : vector<10x150xf32> to vector<10x150xbf16>
    %cst_383 = arith.constant dense<0.000000e+00> : vector<10x16xf32>
    %423 = tpu.matmul %422, %322, %cst_383 {dimension_numbers = #tpu.dot_dimension_numbers<[1], [0], [0], [1], [0, 0, 1, 1], [], []>} : vector<10x150xbf16>, vector<150x16xbf16>, vector<10x16xf32> -> vector<10x16xf32>
    %c7_384 = arith.constant 7 : index
    %c0_385 = arith.constant 0 : index
    %c0_386 = arith.constant 0 : index
    %424 = vector.load %arg15[%c7_384, %c0_385, %c0_386] : memref<10x10x150xf32, #tpu.memory_space<vmem>>, vector<1x10x150xf32>
    %425 = vector.shape_cast %424 : vector<1x10x150xf32> to vector<10x150xf32>
    %426 = arith.truncf %425 : vector<10x150xf32> to vector<10x150xbf16>
    %cst_387 = arith.constant dense<0.000000e+00> : vector<10x16xf32>
    %427 = tpu.matmul %426, %322, %cst_387 {dimension_numbers = #tpu.dot_dimension_numbers<[1], [0], [0], [1], [0, 0, 1, 1], [], []>} : vector<10x150xbf16>, vector<150x16xbf16>, vector<10x16xf32> -> vector<10x16xf32>
    %428 = arith.maximumf %423, %427 : vector<10x16xf32>
    %c0_388 = arith.constant 0 : index
    %c0_389 = arith.constant 0 : index
    %429 = vector.load %arg17[%c0_388, %c0_389] : memref<10x16xf32, #tpu.memory_space<vmem>>, vector<10x16xf32>
    tpu.vector_store %arg17[%c0_388, %c0_389], %428 {strides = array<i32>} : memref<10x16xf32, #tpu.memory_space<vmem>>, vector<10x16xf32>,
    %c0_390 = arith.constant 0 : index
    %c0_391 = arith.constant 0 : index
    %430 = tpu.strided_load %arg17[%c0_390, %c0_391] {strides = array<i32: 2, 1>} : memref<10x16xf32, #tpu.memory_space<vmem>>, vector<5x16xf32>
    %c1_392 = arith.constant 1 : index
    %c0_393 = arith.constant 0 : index
    %431 = tpu.strided_load %arg17[%c1_392, %c0_393] {strides = array<i32: 2, 1>} : memref<10x16xf32, #tpu.memory_space<vmem>>, vector<5x16xf32>
    %432 = arith.maximumf %430, %431 : vector<5x16xf32>
    %433 = vector.broadcast %323 : vector<1x16xf32> to vector<5x16xf32>
    %434 = arith.addf %432, %433 : vector<5x16xf32>
    %cst_394 = arith.constant 2.000000e+01 : f32
    %435 = vector.broadcast %cst_394 : f32 to vector<5x16xf32>
    %436 = arith.cmpf ogt, %434, %435 : vector<5x16xf32>
    %cst_395 = arith.constant 2.000000e+01 : f32
    %437 = vector.broadcast %cst_395 : f32 to vector<5x16xf32>
    %438 = arith.minimumf %434, %437 : vector<5x16xf32>
    %439 = math.exp %438 : vector<5x16xf32>
    %440 = math.log1p %439 : vector<5x16xf32>
    %441 = arith.select %436, %434, %440 : vector<5x16xi1>, vector<5x16xf32>
    %442 = vector.extract_strided_slice %441 {offsets = [0, 0], sizes = [1, 16], strides = [1, 1]} : vector<5x16xf32> to vector<1x16xf32>
    %c0_396 = arith.constant 0 : index
    %c240 = arith.constant 240 : index
    %443 = vector.load %arg18[%c0_396, %c240] : memref<1x400xf32, #tpu.memory_space<vmem>>, vector<1x16xf32>
    tpu.vector_store %arg18[%c0_396, %c240], %442 {strides = array<i32>} : memref<1x400xf32, #tpu.memory_space<vmem>>, vector<1x16xf32>,
    %444 = vector.extract_strided_slice %441 {offsets = [1, 0], sizes = [1, 16], strides = [1, 1]} : vector<5x16xf32> to vector<1x16xf32>
    %c0_397 = arith.constant 0 : index
    %c256 = arith.constant 256 : index
    %445 = vector.load %arg18[%c0_397, %c256] : memref<1x400xf32, #tpu.memory_space<vmem>>, vector<1x16xf32>
    tpu.vector_store %arg18[%c0_397, %c256], %444 {strides = array<i32>} : memref<1x400xf32, #tpu.memory_space<vmem>>, vector<1x16xf32>,
    %446 = vector.extract_strided_slice %441 {offsets = [2, 0], sizes = [1, 16], strides = [1, 1]} : vector<5x16xf32> to vector<1x16xf32>
    %c0_398 = arith.constant 0 : index
    %c272 = arith.constant 272 : index
    %447 = vector.load %arg18[%c0_398, %c272] : memref<1x400xf32, #tpu.memory_space<vmem>>, vector<1x16xf32>
    tpu.vector_store %arg18[%c0_398, %c272], %446 {strides = array<i32>} : memref<1x400xf32, #tpu.memory_space<vmem>>, vector<1x16xf32>,
    %448 = vector.extract_strided_slice %441 {offsets = [3, 0], sizes = [1, 16], strides = [1, 1]} : vector<5x16xf32> to vector<1x16xf32>
    %c0_399 = arith.constant 0 : index
    %c288 = arith.constant 288 : index
    %449 = vector.load %arg18[%c0_399, %c288] : memref<1x400xf32, #tpu.memory_space<vmem>>, vector<1x16xf32>
    tpu.vector_store %arg18[%c0_399, %c288], %448 {strides = array<i32>} : memref<1x400xf32, #tpu.memory_space<vmem>>, vector<1x16xf32>,
    %450 = vector.extract_strided_slice %441 {offsets = [4, 0], sizes = [1, 16], strides = [1, 1]} : vector<5x16xf32> to vector<1x16xf32>
    %c0_400 = arith.constant 0 : index
    %c304 = arith.constant 304 : index
    %451 = vector.load %arg18[%c0_400, %c304] : memref<1x400xf32, #tpu.memory_space<vmem>>, vector<1x16xf32>
    tpu.vector_store %arg18[%c0_400, %c304], %450 {strides = array<i32>} : memref<1x400xf32, #tpu.memory_space<vmem>>, vector<1x16xf32>,
    %c8_401 = arith.constant 8 : index
    %c0_402 = arith.constant 0 : index
    %c0_403 = arith.constant 0 : index
    %452 = vector.load %arg15[%c8_401, %c0_402, %c0_403] : memref<10x10x150xf32, #tpu.memory_space<vmem>>, vector<1x10x150xf32>
    %453 = vector.shape_cast %452 : vector<1x10x150xf32> to vector<10x150xf32>
    %454 = arith.truncf %453 : vector<10x150xf32> to vector<10x150xbf16>
    %cst_404 = arith.constant dense<0.000000e+00> : vector<10x16xf32>
    %455 = tpu.matmul %454, %322, %cst_404 {dimension_numbers = #tpu.dot_dimension_numbers<[1], [0], [0], [1], [0, 0, 1, 1], [], []>} : vector<10x150xbf16>, vector<150x16xbf16>, vector<10x16xf32> -> vector<10x16xf32>
    %c9_405 = arith.constant 9 : index
    %c0_406 = arith.constant 0 : index
    %c0_407 = arith.constant 0 : index
    %456 = vector.load %arg15[%c9_405, %c0_406, %c0_407] : memref<10x10x150xf32, #tpu.memory_space<vmem>>, vector<1x10x150xf32>
    %457 = vector.shape_cast %456 : vector<1x10x150xf32> to vector<10x150xf32>
    %458 = arith.truncf %457 : vector<10x150xf32> to vector<10x150xbf16>
    %cst_408 = arith.constant dense<0.000000e+00> : vector<10x16xf32>
    %459 = tpu.matmul %458, %322, %cst_408 {dimension_numbers = #tpu.dot_dimension_numbers<[1], [0], [0], [1], [0, 0, 1, 1], [], []>} : vector<10x150xbf16>, vector<150x16xbf16>, vector<10x16xf32> -> vector<10x16xf32>
    %460 = arith.maximumf %455, %459 : vector<10x16xf32>
    %c0_409 = arith.constant 0 : index
    %c0_410 = arith.constant 0 : index
    %461 = vector.load %arg17[%c0_409, %c0_410] : memref<10x16xf32, #tpu.memory_space<vmem>>, vector<10x16xf32>
    tpu.vector_store %arg17[%c0_409, %c0_410], %460 {strides = array<i32>} : memref<10x16xf32, #tpu.memory_space<vmem>>, vector<10x16xf32>,
    %c0_411 = arith.constant 0 : index
    %c0_412 = arith.constant 0 : index
    %462 = tpu.strided_load %arg17[%c0_411, %c0_412] {strides = array<i32: 2, 1>} : memref<10x16xf32, #tpu.memory_space<vmem>>, vector<5x16xf32>
    %c1_413 = arith.constant 1 : index
    %c0_414 = arith.constant 0 : index
    %463 = tpu.strided_load %arg17[%c1_413, %c0_414] {strides = array<i32: 2, 1>} : memref<10x16xf32, #tpu.memory_space<vmem>>, vector<5x16xf32>
    %464 = arith.maximumf %462, %463 : vector<5x16xf32>
    %465 = vector.broadcast %323 : vector<1x16xf32> to vector<5x16xf32>
    %466 = arith.addf %464, %465 : vector<5x16xf32>
    %cst_415 = arith.constant 2.000000e+01 : f32
    %467 = vector.broadcast %cst_415 : f32 to vector<5x16xf32>
    %468 = arith.cmpf ogt, %466, %467 : vector<5x16xf32>
    %cst_416 = arith.constant 2.000000e+01 : f32
    %469 = vector.broadcast %cst_416 : f32 to vector<5x16xf32>
    %470 = arith.minimumf %466, %469 : vector<5x16xf32>
    %471 = math.exp %470 : vector<5x16xf32>
    %472 = math.log1p %471 : vector<5x16xf32>
    %473 = arith.select %468, %466, %472 : vector<5x16xi1>, vector<5x16xf32>
    %474 = vector.extract_strided_slice %473 {offsets = [0, 0], sizes = [1, 16], strides = [1, 1]} : vector<5x16xf32> to vector<1x16xf32>
    %c0_417 = arith.constant 0 : index
    %c320 = arith.constant 320 : index
    %475 = vector.load %arg18[%c0_417, %c320] : memref<1x400xf32, #tpu.memory_space<vmem>>, vector<1x16xf32>
    tpu.vector_store %arg18[%c0_417, %c320], %474 {strides = array<i32>} : memref<1x400xf32, #tpu.memory_space<vmem>>, vector<1x16xf32>,
    %476 = vector.extract_strided_slice %473 {offsets = [1, 0], sizes = [1, 16], strides = [1, 1]} : vector<5x16xf32> to vector<1x16xf32>
    %c0_418 = arith.constant 0 : index
    %c336_419 = arith.constant 336 : index
    %477 = vector.load %arg18[%c0_418, %c336_419] : memref<1x400xf32, #tpu.memory_space<vmem>>, vector<1x16xf32>
    tpu.vector_store %arg18[%c0_418, %c336_419], %476 {strides = array<i32>} : memref<1x400xf32, #tpu.memory_space<vmem>>, vector<1x16xf32>,
    %478 = vector.extract_strided_slice %473 {offsets = [2, 0], sizes = [1, 16], strides = [1, 1]} : vector<5x16xf32> to vector<1x16xf32>
    %c0_420 = arith.constant 0 : index
    %c352 = arith.constant 352 : index
    %479 = vector.load %arg18[%c0_420, %c352] : memref<1x400xf32, #tpu.memory_space<vmem>>, vector<1x16xf32>
    tpu.vector_store %arg18[%c0_420, %c352], %478 {strides = array<i32>} : memref<1x400xf32, #tpu.memory_space<vmem>>, vector<1x16xf32>,
    %480 = vector.extract_strided_slice %473 {offsets = [3, 0], sizes = [1, 16], strides = [1, 1]} : vector<5x16xf32> to vector<1x16xf32>
    %c0_421 = arith.constant 0 : index
    %c368 = arith.constant 368 : index
    %481 = vector.load %arg18[%c0_421, %c368] : memref<1x400xf32, #tpu.memory_space<vmem>>, vector<1x16xf32>
    tpu.vector_store %arg18[%c0_421, %c368], %480 {strides = array<i32>} : memref<1x400xf32, #tpu.memory_space<vmem>>, vector<1x16xf32>,
    %482 = vector.extract_strided_slice %473 {offsets = [4, 0], sizes = [1, 16], strides = [1, 1]} : vector<5x16xf32> to vector<1x16xf32>
    %c0_422 = arith.constant 0 : index
    %c384 = arith.constant 384 : index
    %483 = vector.load %arg18[%c0_422, %c384] : memref<1x400xf32, #tpu.memory_space<vmem>>, vector<1x16xf32>
    tpu.vector_store %arg18[%c0_422, %c384], %482 {strides = array<i32>} : memref<1x400xf32, #tpu.memory_space<vmem>>, vector<1x16xf32>,
    %c0_423 = arith.constant 0 : index
    %c0_424 = arith.constant 0 : index
    %484 = vector.load %arg18[%c0_423, %c0_424] : memref<1x400xf32, #tpu.memory_space<vmem>>, vector<1x400xf32>
    %485 = arith.truncf %484 : vector<1x400xf32> to vector<1x400xbf16>
    %c0_425 = arith.constant 0 : index
    %c0_426 = arith.constant 0 : index
    %486 = vector.load %arg6[%c0_425, %c0_426] : memref<400x120xbf16, #tpu.memory_space<vmem>>, vector<400x120xbf16>
    %cst_427 = arith.constant dense<0.000000e+00> : vector<1x120xf32>
    %487 = tpu.matmul %485, %486, %cst_427 {dimension_numbers = #tpu.dot_dimension_numbers<[1], [0], [0], [1], [0, 0, 1, 1], [], []>} : vector<1x400xbf16>, vector<400x120xbf16>, vector<1x120xf32> -> vector<1x120xf32>
    %c0_428 = arith.constant 0 : index
    %c0_429 = arith.constant 0 : index
    %488 = vector.load %arg7[%c0_428, %c0_429] : memref<1x120xf32, #tpu.memory_space<vmem>>, vector<1x120xf32>
    %489 = arith.addf %487, %488 : vector<1x120xf32>
    %cst_430 = arith.constant 2.000000e+01 : f32
    %490 = vector.broadcast %cst_430 : f32 to vector<1x120xf32>
    %491 = arith.cmpf ogt, %489, %490 : vector<1x120xf32>
    %cst_431 = arith.constant 2.000000e+01 : f32
    %492 = vector.broadcast %cst_431 : f32 to vector<1x120xf32>
    %493 = arith.minimumf %489, %492 : vector<1x120xf32>
    %494 = math.exp %493 : vector<1x120xf32>
    %495 = math.log1p %494 : vector<1x120xf32>
    %496 = arith.select %491, %489, %495 : vector<1x120xi1>, vector<1x120xf32>
    %497 = arith.truncf %496 : vector<1x120xf32> to vector<1x120xbf16>
    %c0_432 = arith.constant 0 : index
    %c0_433 = arith.constant 0 : index
    %498 = vector.load %arg8[%c0_432, %c0_433] : memref<120x84xbf16, #tpu.memory_space<vmem>>, vector<120x84xbf16>
    %cst_434 = arith.constant dense<0.000000e+00> : vector<1x84xf32>
    %499 = tpu.matmul %497, %498, %cst_434 {dimension_numbers = #tpu.dot_dimension_numbers<[1], [0], [0], [1], [0, 0, 1, 1], [], []>} : vector<1x120xbf16>, vector<120x84xbf16>, vector<1x84xf32> -> vector<1x84xf32>
    %c0_435 = arith.constant 0 : index
    %c0_436 = arith.constant 0 : index
    %500 = vector.load %arg9[%c0_435, %c0_436] : memref<1x84xf32, #tpu.memory_space<vmem>>, vector<1x84xf32>
    %501 = arith.addf %499, %500 : vector<1x84xf32>
    %cst_437 = arith.constant 2.000000e+01 : f32
    %502 = vector.broadcast %cst_437 : f32 to vector<1x84xf32>
    %503 = arith.cmpf ogt, %501, %502 : vector<1x84xf32>
    %cst_438 = arith.constant 2.000000e+01 : f32
    %504 = vector.broadcast %cst_438 : f32 to vector<1x84xf32>
    %505 = arith.minimumf %501, %504 : vector<1x84xf32>
    %506 = math.exp %505 : vector<1x84xf32>
    %507 = math.log1p %506 : vector<1x84xf32>
    %508 = arith.select %503, %501, %507 : vector<1x84xi1>, vector<1x84xf32>
    %509 = arith.truncf %508 : vector<1x84xf32> to vector<1x84xbf16>
    %c0_439 = arith.constant 0 : index
    %c0_440 = arith.constant 0 : index
    %510 = vector.load %arg10[%c0_439, %c0_440] : memref<84x10xbf16, #tpu.memory_space<vmem>>, vector<84x10xbf16>
    %cst_441 = arith.constant dense<0.000000e+00> : vector<1x10xf32>
    %511 = tpu.matmul %509, %510, %cst_441 {dimension_numbers = #tpu.dot_dimension_numbers<[1], [0], [0], [1], [0, 0, 1, 1], [], []>} : vector<1x84xbf16>, vector<84x10xbf16>, vector<1x10xf32> -> vector<1x10xf32>
    %c0_442 = arith.constant 0 : index
    %c0_443 = arith.constant 0 : index
    %512 = vector.load %arg11[%c0_442, %c0_443] : memref<1x10xf32, #tpu.memory_space<vmem>>, vector<1x10xf32>
    %513 = arith.addf %511, %512 : vector<1x10xf32>
    %c0_444 = arith.constant 0 : index
    %c0_445 = arith.constant 0 : index
    %c0_446 = arith.constant 0 : index
    %514 = vector.load %arg12[%c0_444, %c0_445, %c0_446] : memref<1x1x10xf32, #tpu.memory_space<vmem>>, vector<1x1x10xf32>
    %515 = vector.shape_cast %514 : vector<1x1x10xf32> to vector<1x10xf32>
    %516 = vector.shape_cast %513 : vector<1x10xf32> to vector<1x1x10xf32>
    tpu.vector_store %arg12[%c0_444, %c0_445, %c0_446], %516 {strides = array<i32>} : memref<1x1x10xf32, #tpu.memory_space<vmem>>, vector<1x1x10xf32>,
    return
  }
  func.func @transform_0(%arg0: i32) -> (i32, i32, i32) {
    %c0_i32 = arith.constant 0 : i32
    %c0_i32_0 = arith.constant 0 : i32
    %c0_i32_1 = arith.constant 0 : i32
    return %arg0, %c0_i32, %c0_i32_0 : i32, i32, i32
  }
  func.func @transform_1(%arg0: i32) -> (i32, i32) {
    %c0_i32 = arith.constant 0 : i32
    %c0_i32_0 = arith.constant 0 : i32
    %c0_i32_1 = arith.constant 0 : i32
    return %c0_i32, %c0_i32_0 : i32, i32
  }
  func.func @transform_2(%arg0: i32) -> (i32, i32) {
    %c0_i32 = arith.constant 0 : i32
    %c0_i32_0 = arith.constant 0 : i32
    %c0_i32_1 = arith.constant 0 : i32
    return %c0_i32, %c0_i32_0 : i32, i32
  }
  func.func @transform_3(%arg0: i32) -> (i32, i32) {
    %c0_i32 = arith.constant 0 : i32
    %c0_i32_0 = arith.constant 0 : i32
    %c0_i32_1 = arith.constant 0 : i32
    return %c0_i32, %c0_i32_0 : i32, i32
  }
  func.func @transform_4(%arg0: i32) -> (i32, i32) {
    %c0_i32 = arith.constant 0 : i32
    %c0_i32_0 = arith.constant 0 : i32
    %c0_i32_1 = arith.constant 0 : i32
    return %c0_i32, %c0_i32_0 : i32, i32
  }
  func.func @transform_5(%arg0: i32) -> (i32, i32) {
    %c0_i32 = arith.constant 0 : i32
    %c0_i32_0 = arith.constant 0 : i32
    %c0_i32_1 = arith.constant 0 : i32
    return %c0_i32, %c0_i32_0 : i32, i32
  }
  func.func @transform_6(%arg0: i32) -> (i32, i32) {
    %c0_i32 = arith.constant 0 : i32
    %c0_i32_0 = arith.constant 0 : i32
    %c0_i32_1 = arith.constant 0 : i32
    return %c0_i32, %c0_i32_0 : i32, i32
  }
  func.func @transform_7(%arg0: i32) -> (i32, i32) {
    %c0_i32 = arith.constant 0 : i32
    %c0_i32_0 = arith.constant 0 : i32
    %c0_i32_1 = arith.constant 0 : i32
    return %c0_i32, %c0_i32_0 : i32, i32
  }
  func.func @transform_8(%arg0: i32) -> (i32, i32) {
    %c0_i32 = arith.constant 0 : i32
    %c0_i32_0 = arith.constant 0 : i32
    %c0_i32_1 = arith.constant 0 : i32
    return %c0_i32, %c0_i32_0 : i32, i32
  }
  func.func @transform_9(%arg0: i32) -> (i32, i32) {
    %c0_i32 = arith.constant 0 : i32
    %c0_i32_0 = arith.constant 0 : i32
    %c0_i32_1 = arith.constant 0 : i32
    return %c0_i32, %c0_i32_0 : i32, i32
  }
  func.func @transform_10(%arg0: i32) -> (i32, i32) {
    %c0_i32 = arith.constant 0 : i32
    %c0_i32_0 = arith.constant 0 : i32
    %c0_i32_1 = arith.constant 0 : i32
    return %c0_i32, %c0_i32_0 : i32, i32
  }
  func.func @transform_11(%arg0: i32) -> (i32, i32, i32) {
    %c0_i32 = arith.constant 0 : i32
    %c0_i32_0 = arith.constant 0 : i32
    %c0_i32_1 = arith.constant 0 : i32
    return %arg0, %c0_i32, %c0_i32_0 : i32, i32, i32
  }
}

</mosaic_0001>

<bundles_post_ra>
// kernel: _bbb_lenet_forward.1
= control target key start
LH: loop header
LB: loop body
LE: loop exit
PB: predicated region body
PF: predicated region fallthrough
CT: control target
= control target key end

     0   :  { %s10887_s0 = inlined_call_operand.vmem [shape: bf16[2,784,75], index: 0, kind: input, shape index: {}]   ;;  %s10888_s1 = inlined_call_operand.vmem [shape: bf16[75,6], index: 1, kind: input, shape index: {}]   ;;  %s10889_s2 = inlined_call_operand.vmem [shape: f32[1,6], index: 2, kind: input, shape index: {}]   ;;  %s10890_s3 = inlined_call_operand.vmem [shape: bf16[150,16], index: 3, kind: input, shape index: {}]   ;;  %s10891_s4 = inlined_call_operand.vmem [shape: f32[1,16], index: 4, kind: input, shape index: {}]   ;;  %s10892_s5 = inlined_call_operand.vmem [shape: bf16[400,120], index: 5, kind: input, shape index: {}]   ;;  %s10893_s6 = inlined_call_operand.vmem [shape: f32[1,120], index: 6, kind: input, shape index: {}]   ;;  %s10894_s7 = inlined_call_operand.vmem [shape: bf16[120,84], index: 7, kind: input, shape index: {}]   ;;  %s10895_s8 = inlined_call_operand.vmem [shape: f32[1,84], index: 8, kind: input, shape index: {}]   ;;  %s10896_s9 = inlined_call_operand.vmem [shape: bf16[84,10], index: 9, kind: input, shape index: {}]   ;;  %s10897_s10 = inlined_call_operand.vmem [shape: f32[1,10], index: 10, kind: input, shape index: {}]   ;;  %s10898_s11 = inlined_call_operand.hbm [shape: f32[2,1,10], index: 11, kind: output, shape index: {}]  }
   0x1   :  { %11012 = sst [smem:[#allocation20_spill]] %s10887_s0 }
   0x2   :  { %11013 = sst [smem:[#allocation21_spill]] %s10888_s1 }
   0x3   :  { %11014 = sst [smem:[#allocation22_spill]] %s10893_s6 }
   0x4   :  { %11015 = sst [smem:[#allocation23_spill]] %s10894_s7 }
   0x5   :  { %11016 = sst [smem:[#allocation24_spill]] %s10895_s8 }
   0x6   :  { %11017 = sst [smem:[#allocation25_spill]] %s10896_s9 }
   0x7   :  { %11018 = sst [smem:[#allocation26_spill]] %s10897_s10 }
   0x8   :  { %11019 = sst [smem:[#allocation27_spill]] %s10898_s11 }
   0x9   :  { %16 = vsyncpa [#allocation9], 0 }
   0xa   :  { %18 = vsyncpa [#allocation9 + $0x1], 0  ;;  %s7885_s17 = smov 0   ;;  %s7887_s18 = smov 0  }
   0xb   :  { %s7889_s19 = smov 0   ;;  %s7891_s20 = smov 0  }
   0xc LB: > { %11020 = sst [smem:[#allocation11_spill]] %s7777_s17  ;;  %s7906_s21 = sadd.s32 4294967295, %s7789_s20   ;;  %s7789_s20 = sphi %s7891_s20, %s11524_s20   ;;  %s7785_s19 = sphi %s7889_s19, %s11527_s19   ;;  %s7781_s18 = sphi %s7887_s18, %s11526_s18   ;;  %s7777_s17 = sphi %s7885_s17, %s11525_s17  }
   0xd   : > { %11021 = sst [smem:[#allocation12_spill]] %s7781_s18  ;;  %s6856_s22 = sadd.s32 4294967294, %s7789_s20  }
   0xe   : > { %11022 = sst [smem:[#allocation13_spill]] %s7785_s19  ;;  %s7910_s23 = sadd.s32 1, %s7789_s20  }
   0xf   : > { %11023 = sst [smem:[#allocation14_spill]] %s7789_s20  ;;  %s267_s24 = sadd.s32 1, %s7785_s19 }
  0x10   : > { %11024 = sst [smem:[#allocation15_spill]] %s7906_s21  ;;  %s264_s25 = ssub.s32 %s7789_s20, %s7910_s23 }
  0x11   : > { %11025 = sst [smem:[#allocation16_spill]] %s7910_s23  ;;  %p277_p0 = scmp.ne.s32.totalorder %s7785_s19, %s7781_s18 }
  0x12   : > { %p265_p1 = scmp.eq.s32.totalorder %s264_s25, 0  ;;  %p278_p2 = scmp.eq.s32.totalorder %s7906_s21, 1 }
  0x13   : > { %p283_p3 = scmp.ne.s32.totalorder %s7781_s18, %s7777_s17  ;;  %p284_p4 = scmp.eq.s32.totalorder %s6856_s22, 1 }
  0x14   : > { %s7921_s26 = scalar_select %p265_p1, %s7785_s19, %s267_s24  }
  0x15   : > { %p7923_p5 = por %p278_p2, %p277_p0  ;;  %p7927_p6 = por %p284_p4, %p283_p3 }
  0x16   : > { %11026 = sst [smem:[#allocation17_spill]] %s7921_s26  ;;  %p6859_p7 = scmp.ge.s32.totalorder %s7789_s20, 1 }
  0x17   : > { %s11027_s27 = scalar_select %p7923_p5, 1, 0 }
  0x18   : > { %s11029_s28 = scalar_select %p7927_p6, 1, 0 }
  0x19   : > { %11028 = sst [smem:[#allocation18_spill]] %s11027_s27  ;;  %p340_p8 = scmp.lt.s32.totalorder %s7789_s20, 3 }
  0x1a   : > { %11030 = sst [smem:[#allocation19_spill]] %s11029_s28 }
  0x1b   : > { %p341_p9 = pnand %p6859_p7, %p340_p8 }
  0x1c   : > { %s11031_s1 = sld [smem:[#allocation21_spill]] (!%p341_p9)  ;;  %v7791_v1 = vmov (!%p341_p9), 0.0   ;;  %vm915_vm0 = vcmask (!%p341_p9), 1044480   ;;  %p379_p10 = scmp.lt.s32.totalorder (!%p341_p9), %s7906_s21, 1  ;;  %vm916_vm1 = vcmask (!%p341_p9), 1045504   ;;  %v7792_v4 = vmov (!%p341_p9), 65535  }
  0x1d   : > { %344 = sbr.rel (%p341_p9) target bundleno = 2574 (0xa0e), region = 64  ;;  %7123 = vmatprep.subr.bf16.mxu0 (!%p341_p9), %v7791_v1  ;;  %v917_v5 = vsel (!%p341_p9), %vm915_vm0, 4294967295, %v7792_v4  ;;  %vm10923_vm2 = vmmov (!%p341_p9), 0   ;;  %s11032_s0 = sld [smem:[#allocation20_spill]] (!%p341_p9)  ;;  %vm10982_vm3 = vcmask (!%p341_p9), 613376   ;;  %vm1347_vm4 = vcmask (!%p341_p9), 48128  }
  0x1e   : > { %7133 = vmatprep.mubr.msk.bf16.mxu0 (!%p341_p9), %vm10923_vm2, %v7791_v1  ;;  %v918_v8 = vsel (!%p341_p9), %vm916_vm1, %v917_v5, 0  ;;  %vm10951_vm5 = vcmask (!%p341_p9), 44032   ;;  %vm10930_vm9 = vcmask (!%p341_p9), 46080   ;;  %s10913_s22 = smov (!%p341_p9), 12   ;;  %s10915_s24 = smov (!%p341_p9), 6   ;;  %vm10946_vm11 = vcmask (!%p341_p9), 41984  }
  0x1f   : > { %s10899_s25 = smov (!%p341_p9), 18   ;;  %s10903_s29 = smov (!%p341_p9), 24  }
  0x20   : > { %s10921_s12 = smov (!%p341_p9), 36   ;;  %s10911_s13 = smov (!%p341_p9), 42  }
  0x21   : > { %s10909_s15 = smov (!%p341_p9), 48   ;;  %s11049_s19 = smov (!%p341_p9), 12  }
  0x22   : > { %v7438_v0 = vld [vmem:[%s11031_s1] sm:$0xff] (!%p341_p9)   ;;  %v7439_v2 = vld [vmem:[%s11031_s1 + $0x8] sm:$0xff] (!%p341_p9)   ;;  %v7440_v3 = vld [vmem:[%s11031_s1 + $0x10] sm:$0xff] (!%p341_p9)   ;;  %s10960_s23 = smov (!%p341_p9), 120   ;;  %s11050_s28 = smov (!%p341_p9), 90  }
  0x23   : > { %7124 = vmatpush3.bf16.msra.mxu0 (!%p341_p9), %v7438_v0  ;;  %v7441_v6 = vld [vmem:[%s11031_s1 + $0x18] sm:$0xff] (!%p341_p9)   ;;  %v7442_v7 = vld [vmem:[%s11031_s1 + $0x20] sm:$0x3f] (!%p341_p9)   ;;  %s10965_s1 = smov (!%p341_p9), 126   ;;  %s11055_s17 = smov (!%p341_p9), 30  }
  0x24   : > { %7125 = vmatprep.subr.bf16.mxu0 %v7791_v1  ;;  %s380_s16 = scalar_select %p379_p10, %s7906_s21, 1  ;;  %v920_v9 = vand.u32 %v7442_v7, %v918_v8  ;;  %v8087_v8 = vld [vmem:[%s10889_s2] ss:$0 sm:$0xff] }
  0x25   : > { %s11058_s20 = smov 126   ;;  %s11063_s27 = smov 4  }
  0x26   : > { %s7365_s30 = smul.u32 392, %s380_s16  ;;  %s10917_s16 = smov 54  }
  0x27   : > { %7126 = vmatpush3.bf16.msra.mxu0 %v7439_v2  ;;  %s11066_s10 = smov 96   ;;  %s11067_s11 = smov 16  }
  0x28   : > { %7127 = vmatprep.subr.bf16.mxu0 %v7791_v1  ;;  %s7959_s14 = scalar_lea.vmem %s11032_s0, %s7365_s30  ;;  %s10944_s30 = smov 30  }
  0x29   : > { %v7443_v10 = vld [vmem:[%s7959_s14] sm:$0xff]   ;;  %v7444_v11 = vld [vmem:[%s7959_s14 + $0x8] sm:$0xff]   ;;  %v7445_v12 = vld [vmem:[%s7959_s14 + $0x10] sm:$0xff]   ;;  %s11048_s0 = smov 6   ;;  %s11069_s26 = smov 102  }
  0x2a   : > { %v7446_v13 = vld [vmem:[%s7959_s14 + $0x18] sm:$0xff]   ;;  %v7447_v14 = vld [vmem:[%s7959_s14 + $0x20] sm:$0xff]   ;;  %v7448_v15 = vld [vmem:[%s7959_s14 + $0x28] sm:$0xff]   ;;  %s11072_s21 = smov 108   ;;  %s11074_s18 = smov 114  }
  0x2b   : > { %7128 = vmatpush3.bf16.msra.mxu0 %v7440_v3  ;;  %v7449_v16 = vld [vmem:[%s7959_s14 + $0x30] sm:$0xff]   ;;  %v7450_v17 = vld [vmem:[%s7959_s14 + $0x38] sm:$0xff]   ;;  %v7451_v18 = vld [vmem:[%s7959_s14 + $0x40] sm:$0xff]   ;;  %s11082_s8 = smov 78   ;;  %s11083_s9 = smov 84  }
  0x2c   : > { %7129 = vmatprep.subr.bf16.mxu0 %v7791_v1  ;;  %v7452_v19 = vld [vmem:[%s7959_s14 + $0x48] sm:$0xff]   ;;  %v7453_v20 = vld [vmem:[%s7959_s14 + $0x50] sm:$0xff]   ;;  %v7454_v21 = vld [vmem:[%s7959_s14 + $0x58] sm:$0xff]   ;;  %s11512_s7 = sld [smem:[#allocation22_spill]] }
  0x2d   : > { %v7455_v22 = vld [vmem:[%s7959_s14 + $0x60] sm:$0xff]   ;;  %v7456_v23 = vld [vmem:[%s7959_s14 + $0x68] sm:$0xff]   ;;  %v7457_v24 = vld [vmem:[%s7959_s14 + $0x70] sm:$0xff]  }
  0x2e   : > { %v7458_v25 = vld [vmem:[%s7959_s14 + $0x78] sm:$0xff]   ;;  %v7459_v26 = vld [vmem:[%s7959_s14 + $0x80] sm:$0xff]   ;;  %v7460_v27 = vld [vmem:[%s7959_s14 + $0x88] sm:$0xff]  }
  0x2f   : > { %7130 = vmatpush3.bf16.msra.mxu0 %v7441_v6  ;;  %v7461_v28 = vld [vmem:[%s7959_s14 + $0x90] sm:$0xff]   ;;  %v7462_v29 = vld [vmem:[%s7959_s14 + $0x98] sm:$0xff]   ;;  %v7463_v30 = vld [vmem:[%s7959_s14 + $0xa0] sm:$0xff]  }
  0x30   : > { %7131 = vmatprep.subr.bf16.mxu0 %v7791_v1  ;;  %v7464_v31 = vld [vmem:[%s7959_s14 + $0xa8] sm:$0xff]   ;;  %v7465_v32 = vld [vmem:[%s7959_s14 + $0xb0] sm:$0xff]   ;;  %v7466_v37 = vld [vmem:[%s7959_s14 + $0xb8] sm:$0xff]  }
  0x31   : > { %v7467_v42 = vld [vmem:[%s7959_s14 + $0xc0] sm:$0xff]   ;;  %v7468_v47 = vld [vmem:[%s7959_s14 + $0xc8] sm:$0xff]   ;;  %v7469_v59 = vld [vmem:[%s7959_s14 + $0xd0] sm:$0xff]  }
  0x33   : > { %7132 = vmatpush3.bf16.msra.mxu0 %v920_v9 }
  0x36   : > { %7134 = vmatmul.mubr.msk.bf16.vlgmr.msra.gmra.mrb[0].mxu0 %vm10982_vm3, %v7443_v10 }
  0x37   : > { %7137 = vmatprep.mubr.msk.bf16.mxu0 %vm10923_vm2, %v7791_v1 }
  0x3e   : > { %7138 = vmatmul.mubr.msk.bf16.gmra.mrb[4].mxu0 %vm10982_vm3, %v7444_v11  ;;  %v7470_v11 = vld [vmem:[%s7959_s14 + $0xd8] sm:$0xff]  }
  0x3f   : > { %7141 = vmatprep.mubr.msk.bf16.mxu0 %vm10923_vm2, %v7791_v1 }
  0x46   : > { %7142 = vmatmul.mubr.msk.bf16.gmra.mrb[8].mxu0 %vm10982_vm3, %v7445_v12 }
  0x47   : > { %7145 = vmatprep.mubr.msk.bf16.mxu0 %vm10923_vm2, %v7791_v1 }
  0x4e   : > { %7146 = vmatmul.mubr.msk.bf16.gmra.mrb[12].mxu0 %vm10982_vm3, %v7446_v13 }
  0x4f   : > { %7149 = vmatprep.mubr.msk.bf16.mxu0 %vm10923_vm2, %v7791_v1 }
  0x56   : > { %7150 = vmatmul.mubr.msk.bf16.gmra.mrb[16].mxu0 %vm10982_vm3, %v7447_v14 }
  0x57   : > { %7153 = vmatprep.mubr.msk.bf16.mxu0 %vm10923_vm2, %v7791_v1 }
  0x5e   : > { %7154 = vmatmul.mubr.msk.bf16.gmra.mrb[20].mxu0 %vm10982_vm3, %v7448_v15 }
  0x5f   : > { %7157 = vmatprep.mubr.msk.bf16.mxu0 %vm10923_vm2, %v7791_v1 }
  0x66   : > { %7158 = vmatmul.mubr.msk.bf16.gmra.mrb[24].mxu0 %vm10982_vm3, %v7449_v16 }
  0x67   : > { %7161 = vmatprep.mubr.msk.bf16.mxu0 %vm10923_vm2, %v7791_v1 }
  0x6e   : > { %7162 = vmatmul.mubr.msk.bf16.gmra.mrb[28].mxu0 %vm10982_vm3, %v7450_v17 }
  0x6f   : > { %7165 = vmatprep.mubr.msk.bf16.mxu0 %vm10923_vm2, %v7791_v1 }
  0x76   : > { %7166 = vmatmul.mubr.msk.bf16.gmra.mrb[32].mxu0 %vm10982_vm3, %v7451_v18 }
  0x77   : > { %7169 = vmatprep.mubr.msk.bf16.mxu0 %vm10923_vm2, %v7791_v1 }
  0x7e   : > { %7170 = vmatmul.mubr.msk.bf16.gmra.mrb[36].mxu0 %vm10982_vm3, %v7452_v19 }
  0x7f   : > { %7173 = vmatprep.mubr.msk.bf16.mxu0 %vm10923_vm2, %v7791_v1 }
  0x86   : > { %7174 = vmatmul.mubr.msk.bf16.gmra.mrb[40].mxu0 %vm10982_vm3, %v7453_v20 }
  0x87   : > { %7177 = vmatprep.mubr.msk.bf16.mxu0 %vm10923_vm2, %v7791_v1 }
  0x8e   : > { %7178 = vmatmul.mubr.msk.bf16.gmra.mrb[44].mxu0 %vm10982_vm3, %v7454_v21 }
  0x8f   : > { %7181 = vmatprep.mubr.msk.bf16.mxu0 %vm10923_vm2, %v7791_v1 }
  0x96   : > { %7182 = vmatmul.mubr.msk.bf16.gmra.mrb[48].mxu0 %vm10982_vm3, %v7455_v22 }
  0x97   : > { %7185 = vmatprep.mubr.msk.bf16.mxu0 %vm10923_vm2, %v7791_v1 }
  0x9e   : > { %7186 = vmatmul.mubr.msk.bf16.gmra.mrb[52].mxu0 %vm10982_vm3, %v7456_v23 }
  0x9f   : > { %7189 = vmatprep.mubr.msk.bf16.mxu0 %vm10923_vm2, %v7791_v1 }
  0xa6   : > { %7190 = vmatmul.mubr.msk.bf16.gmra.mrb[56].mxu0 %vm10982_vm3, %v7457_v24 }
  0xa7   : > { %7193 = vmatprep.mubr.msk.bf16.mxu0 %vm10923_vm2, %v7791_v1 }
  0xae   : > { %7194 = vmatmul.mubr.msk.bf16.gmra.mrb[60].mxu0 %vm10982_vm3, %v7458_v25 }
  0xaf   : > { %7197 = vmatprep.mubr.msk.bf16.mxu0 %vm10923_vm2, %v7791_v1 }
  0xb6   : > { %7198 = vmatmul.mubr.msk.bf16.gmra.mrb[64].mxu0 %vm10982_vm3, %v7459_v26 }
  0xb7   : > { %7201 = vmatprep.mubr.msk.bf16.mxu0 %vm10923_vm2, %v7791_v1 }
  0xbe   : > { %7202 = vmatmul.mubr.msk.bf16.gmra.mrb[68].mxu0 %vm10982_vm3, %v7460_v27 }
  0xbf   : > { %7205 = vmatprep.mubr.msk.bf16.mxu0 %vm10923_vm2, %v7791_v1 }
  0xc6   : > { %7206 = vmatmul.mubr.msk.bf16.gmra.mrb[72].mxu0 %vm10982_vm3, %v7461_v28 }
  0xc7   : > { %7209 = vmatprep.mubr.msk.bf16.mxu0 %vm10923_vm2, %v7791_v1 }
  0xce   : > { %7210 = vmatmul.mubr.msk.bf16.gmra.mrb[76].mxu0 %vm10982_vm3, %v7462_v29 }
  0xcf   : > { %7213 = vmatprep.mubr.msk.bf16.mxu0 %vm10923_vm2, %v7791_v1 }
  0xd6   : > { %7214 = vmatmul.mubr.msk.bf16.gmra.mrb[80].mxu0 %vm10982_vm3, %v7463_v30 }
  0xd7   : > { %7217 = vmatprep.mubr.msk.bf16.mxu0 %vm10923_vm2, %v7791_v1 }
  0xde   : > { %7218 = vmatmul.mubr.msk.bf16.gmra.mrb[84].mxu0 %vm10982_vm3, %v7464_v31 }
  0xdf   : > { %7221 = vmatprep.mubr.msk.bf16.mxu0 %vm10923_vm2, %v7791_v1 }
  0xe6   : > { %7222 = vmatmul.mubr.msk.bf16.gmra.mrb[88].mxu0 %vm10982_vm3, %v7465_v32 }
  0xe7   : > { %7225 = vmatprep.mubr.msk.bf16.mxu0 %vm10923_vm2, %v7791_v1 }
  0xee   : > { %7226 = vmatmul.mubr.msk.bf16.gmra.mrb[92].mxu0 %vm10982_vm3, %v7466_v37 }
  0xef   : > { %7229 = vmatprep.mubr.msk.bf16.mxu0 %vm10923_vm2, %v7791_v1 }
  0xf6   : > { %7230 = vmatmul.mubr.msk.bf16.gmra.mrb[96].mxu0 %vm10982_vm3, %v7467_v42 }
  0xf7   : > { %7233 = vmatprep.mubr.msk.bf16.mxu0 %vm10923_vm2, %v7791_v1 }
  0xfe   : > { %7234 = vmatmul.mubr.msk.bf16.gmra.mrb[100].mxu0 %vm10982_vm3, %v7468_v47 }
  0xff   : > { %7237 = vmatprep.mubr.msk.bf16.mxu0 %vm10923_vm2, %v7791_v1 }
 0x106   : > { %7238 = vmatmul.mubr.msk.bf16.gmra.mrb[104].mxu0 %vm10982_vm3, %v7469_v59 }
 0x107   : > { %7241 = vmatprep.mubr.msk.bf16.mxu0 %vm10923_vm2, %v7791_v1 }
 0x109   : > { %v956_v33 = vpop.f32.mrb[0].mxu0 }
 0x10a   : > { %1348 = vst.msk [vmem:[#allocation2] sm:$0xff] %vm1347_vm4, %v956_v33  ;;  %v7135_v34 = vpop.f32.mrb[1].mxu0 }
 0x10b   : > { %v959_v35 = vpop.f32.mrb[2].mxu0 }
 0x10c   : > { %1349 = vst.msk [vmem:[#allocation2 + $0x8] sm:$0xff] %vm1347_vm4, %v959_v35  ;;  %v7136_v36 = vpop.f32.mrb[3].mxu0 }
 0x10e   : > { %7242 = vmatmul.mubr.msk.bf16.gmra.mrb[108].mxu0 %vm10982_vm3, %v7470_v11 }
 0x10f   : > { %7245 = vmatprep.mubr.msk.bf16.mxu0 %vm10923_vm2, %v7791_v1 }
 0x111   : > { %v964_v38 = vpop.f32.mrb[4].mxu0  ;;  %v1447_v48 = vld [vmem:[#allocation2] sm:$0xff] }
 0x112   : > { %1350 = vst.msk [vmem:[#allocation2 + $0x10] sm:$0xff] %vm1347_vm4, %v964_v38  ;;  %v7139_v39 = vpop.f32.mrb[5].mxu0 }
 0x113   : > { %v967_v40 = vpop.f32.mrb[6].mxu0  ;;  %v1448_v53 = vld [vmem:[#allocation2 + $0x8] sm:$0xff] }
 0x114   : > { %1351 = vst.msk [vmem:[#allocation2 + $0x18] sm:$0xff] %vm1347_vm4, %v967_v40  ;;  %v7140_v41 = vpop.f32.mrb[7].mxu0 }
 0x119   : > { %v972_v43 = vpop.f32.mrb[8].mxu0  ;;  %v1449_v58 = vld [vmem:[#allocation2 + $0x10] sm:$0xff] }
 0x11a   : > { %1352 = vst.msk [vmem:[#allocation2 + $0x20] sm:$0xff] %vm1347_vm4, %v972_v43  ;;  %v7143_v44 = vpop.f32.mrb[9].mxu0 }
 0x11b   : > { %v975_v45 = vpop.f32.mrb[10].mxu0  ;;  %v1450_v60 = vld [vmem:[#allocation2 + $0x18] sm:$0xf] }
 0x11c   : > { %1353 = vst.msk [vmem:[#allocation2 + $0x28] sm:$0xff] %vm1347_vm4, %v975_v45  ;;  %v7144_v46 = vpop.f32.mrb[11].mxu0 }
 0x121   : > { %v1451_v49 = vld [vmem:[#allocation2 + $0x1c] sm:$0xff]  ;;  %v980_v50 = vpop.f32.mrb[12].mxu0 }
 0x122   : > { %v1455_v51 = vmax.f32 %v1447_v48, %v1451_v49  ;;  %1354 = vst.msk [vmem:[#allocation2 + $0x30] sm:$0xff] %vm1347_vm4, %v980_v50  ;;  %v7147_v52 = vpop.f32.mrb[13].mxu0 }
 0x123   : > { %v1452_v54 = vld [vmem:[#allocation2 + $0x24] sm:$0xff]  ;;  %v983_v55 = vpop.f32.mrb[14].mxu0 }
 0x124   : > { %1459 = vst.msk [vmem:[#allocation5] sm:$0xff] %vm1347_vm4, %v1455_v51  ;;  %v1456_v56 = vmax.f32 %v1448_v53, %v1452_v54  ;;  %1355 = vst.msk [vmem:[#allocation2 + $0x38] sm:$0xff] %vm1347_vm4, %v983_v55  ;;  %v7148_v57 = vpop.f32.mrb[15].mxu0 }
 0x126   : > { %1460 = vst.msk [vmem:[#allocation5 + $0x8] sm:$0xff] %vm1347_vm4, %v1456_v56 }
 0x129   : > { %v1453_v61 = vld [vmem:[#allocation2 + $0x2c] sm:$0xff]  ;;  %v1454_v62 = vld [vmem:[#allocation2 + $0x34] sm:$0xf]  ;;  %v988_v63 = vpop.f32.mrb[16].mxu0 }
 0x12a   : > { %v1457_v0 = vmax.f32 %v1449_v58, %v1453_v61  ;;  %v1458_v2 = vmax.f32 %v1450_v60, %v1454_v62  ;;  %1356 = vst.msk [vmem:[#allocation2 + $0x40] sm:$0xff] %vm1347_vm4, %v988_v63  ;;  %v7151_v3 = vpop.f32.mrb[17].mxu0 }
 0x12b   : > { %v991_v4 = vpop.f32.mrb[18].mxu0  ;;  %v1512_v27 = vld [vmem:[#allocation2 + $0x38] sm:$0xff] }
 0x12c   : > { %1461 = vst.msk [vmem:[#allocation5 + $0x10] sm:$0xff] %vm1347_vm4, %v1457_v0  ;;  %1357 = vst.msk [vmem:[#allocation2 + $0x48] sm:$0xff] %vm1347_vm4, %v991_v4  ;;  %v7152_v5 = vpop.f32.mrb[19].mxu0 }
 0x12d   : > { %1463 = vst.msk [vmem:[#allocation5 + $0x18] sm:$0xf] %vm10951_vm5, %v1458_v2  ;;  %v1464_v6 = vld [vmem:[#allocation5] ss:$2 sm:$0xff]  ;;  %v1468_v7 = vld [vmem:[#allocation5 + $0x1] ss:$2 sm:$0xff] }
 0x12e   : > { %v1471_v9 = vmax.f32 %v1464_v6, %v1468_v7 }
 0x130   : > { %v8090_v10 = vadd.f32 %v8087_v8, %v1471_v9 }
 0x131   : > { %v996_v12 = vpop.f32.mrb[20].mxu0  ;;  %v1513_v32 = vld [vmem:[#allocation2 + $0x40] sm:$0xff] }
 0x132   : > { %1358 = vst.msk [vmem:[#allocation2 + $0x50] sm:$0xff] %vm1347_vm4, %v996_v12  ;;  %v7155_v13 = vpop.f32.mrb[21].mxu0  ;;  %v1483_v14 = vmin.f32 %v8090_v10, 20.0  ;;  %vm1481_vm6 = vcmp.gt.f32.partialorder %v8090_v10, 20.0 }
 0x133   : > { %v999_v17 = vpop.f32.mrb[22].mxu0  ;;  %v1514_v36 = vld [vmem:[#allocation2 + $0x48] sm:$0xff] }
 0x134   : > { %v1466_v15 = vld [vmem:[#allocation5 + $0x10] ss:$2 sm:$0x3f]  ;;  %v1470_v16 = vld [vmem:[#allocation5 + $0x11] ss:$2 sm:$0x3f] }
 0x135   : > { %v1472_v18 = vmax.f32 %v1466_v15, %v1470_v16  ;;  %v1485_v19 = vmul.f32 1.442695, %v1483_v14  ;;  %1359 = vst.msk [vmem:[#allocation2 + $0x58] sm:$0xff] %vm1347_vm4, %v999_v17  ;;  %v7156_v20 = vpop.f32.mrb[23].mxu0 }
 0x137   : > { %v8100_v21 = vadd.f32 %v8087_v8, %v1472_v18  ;;  %7541 = vpow2.f32 %v1485_v19 }
 0x139   : > { %v1484_v22 = vmin.f32 %v8100_v21, 20.0  ;;  %v1004_v23 = vpop.f32.mrb[24].mxu0  ;;  %v1515_v39 = vld [vmem:[#allocation2 + $0x50] sm:$0xf]  ;;  %vm1482_vm10 = vcmp.gt.f32.partialorder %v8100_v21, 20.0 }
 0x13a   : > { %1360 = vst.msk [vmem:[#allocation2 + $0x60] sm:$0xff] %vm1347_vm4, %v1004_v23  ;;  %v7159_v24 = vpop.f32.mrb[25].mxu0 }
 0x13b   : > { %v1487_v25 = vmul.f32 1.442695, %v1484_v22  ;;  %v1007_v26 = vpop.f32.mrb[26].mxu0 }
 0x13c   : > { %v1516_v28 = vld [vmem:[#allocation2 + $0x54] sm:$0xff]  ;;  %1361 = vst.msk [vmem:[#allocation2 + $0x68] sm:$0xff] %vm1347_vm4, %v1007_v26  ;;  %v7160_v29 = vpop.f32.mrb[27].mxu0 }
 0x13d   : > { %7543 = vpow2.f32 %v1487_v25  ;;  %v1520_v30 = vmax.f32 %v1512_v27, %v1516_v28 }
 0x13f   : > { %1524 = vst.msk [vmem:[#allocation5] sm:$0xff] %vm1347_vm4, %v1520_v30 }
 0x141   : > { %v7542_v31 = vpop.eup %7541  ;;  %v1517_v33 = vld [vmem:[#allocation2 + $0x5c] sm:$0xff]  ;;  %v1012_v34 = vpop.f32.mrb[28].mxu0 }
 0x142   : > { %v1489_v35 = vadd.f32 1.0, %v7542_v31  ;;  %v1521_v37 = vmax.f32 %v1513_v32, %v1517_v33  ;;  %1362 = vst.msk [vmem:[#allocation2 + $0x70] sm:$0xff] %vm1347_vm4, %v1012_v34  ;;  %v7163_v38 = vpop.f32.mrb[29].mxu0  ;;  %v1492_v47 = vmul.f32 -0.5, %v7542_v31  ;;  %v1495_v52 = vand.u32 2147483647, %v7542_v31 }
 0x143   : > { %v1518_v40 = vld [vmem:[#allocation2 + $0x64] sm:$0xff]  ;;  %v1519_v41 = vld [vmem:[#allocation2 + $0x6c] sm:$0xf]  ;;  %v1015_v42 = vpop.f32.mrb[30].mxu0 }
 0x144   : > { %7545 = vlog2.f32 %v1489_v35  ;;  %1525 = vst.msk [vmem:[#allocation5 + $0x8] sm:$0xff] %vm1347_vm4, %v1521_v37  ;;  %v1522_v43 = vmax.f32 %v1514_v36, %v1518_v40  ;;  %v1523_v44 = vmax.f32 %v1515_v39, %v1519_v41  ;;  %1363 = vst.msk [vmem:[#allocation2 + $0x78] sm:$0xff] %vm1347_vm4, %v1015_v42  ;;  %v7164_v45 = vpop.f32.mrb[31].mxu0  ;;  %v1493_v51 = vadd.f32 1.0, %v1492_v47 }
 0x145   : > { %vm1496_vm7 = vcmp.lt.f32.partialorder %v1495_v52, 0.0004427343 }
 0x146   : > { %1526 = vst.msk [vmem:[#allocation5 + $0x10] sm:$0xff] %vm1347_vm4, %v1522_v43  ;;  %v1494_v63 = vmul.f32 %v7542_v31, %v1493_v51 }
 0x147   : > { %v7544_v46 = vpop.eup %7543  ;;  %1527 = vst.msk [vmem:[#allocation5 + $0x18] sm:$0xf] %vm10951_vm5, %v1523_v44 }
 0x148   : > { %v1498_v48 = vadd.f32 1.0, %v7544_v46  ;;  %v1501_v57 = vmul.f32 -0.5, %v7544_v46  ;;  %v1504_v9 = vand.u32 2147483647, %v7544_v46 }
 0x149   : > { %v1020_v49 = vpop.f32.mrb[32].mxu0  ;;  %v1567_v23 = vld [vmem:[#allocation2 + $0x70] sm:$0xff] }
 0x14a   : > { %7547 = vlog2.f32 %v1498_v48  ;;  %1364 = vst.msk [vmem:[#allocation2 + $0x80] sm:$0xff] %vm1347_vm4, %v1020_v49  ;;  %v7167_v50 = vpop.f32.mrb[33].mxu0  ;;  %v1502_v4 = vadd.f32 1.0, %v1501_v57  ;;  %vm1505_vm8 = vcmp.lt.f32.partialorder %v1504_v9, 0.0004427343 }
 0x14b   : > { %v1528_v53 = vld [vmem:[#allocation5] ss:$2 sm:$0xff]  ;;  %v1530_v54 = vld [vmem:[#allocation5 + $0x1] ss:$2 sm:$0xff]  ;;  %v1023_v55 = vpop.f32.mrb[34].mxu0 }
 0x14c   : > { %1365 = vst.msk [vmem:[#allocation2 + $0x88] sm:$0xff] %vm1347_vm4, %v1023_v55  ;;  %v7168_v56 = vpop.f32.mrb[35].mxu0  ;;  %v1532_v58 = vmax.f32 %v1528_v53, %v1530_v54  ;;  %v1503_v19 = vmul.f32 %v7544_v46, %v1502_v4  ;;  %v1568_v29 = vld [vmem:[#allocation2 + $0x78] sm:$0xff] }
 0x14e   : > { %v7546_v59 = vpop.eup %7545  ;;  %v1529_v60 = vld [vmem:[#allocation5 + $0x10] ss:$2 sm:$0x3f]  ;;  %v1531_v61 = vld [vmem:[#allocation5 + $0x11] ss:$2 sm:$0x3f]  ;;  %v8114_v0 = vadd.f32 %v8087_v8, %v1532_v58 }
 0x14f   : > { %v1491_v62 = vmul.f32 0.6931472, %v7546_v59  ;;  %v1533_v2 = vmax.f32 %v1529_v60, %v1531_v61 }
 0x150   : > { %v1538_v5 = vmin.f32 %v8114_v0, 20.0  ;;  %vm1536_vm13 = vcmp.gt.f32.partialorder %v8114_v0, 20.0 }
 0x151   : > { %v1497_v3 = vsel %vm1496_vm7, %v1494_v63, %v1491_v62  ;;  %v8119_v6 = vadd.f32 %v8087_v8, %v1533_v2  ;;  %v1028_v7 = vpop.f32.mrb[36].mxu0  ;;  %v1569_v38 = vld [vmem:[#allocation2 + $0x80] sm:$0xff] }
 0x152   : > { %v1507_v11 = vsel %vm1481_vm6, %v8090_v10, %v1497_v3  ;;  %1366 = vst.msk [vmem:[#allocation2 + $0x90] sm:$0xff] %vm1347_vm4, %v1028_v7  ;;  %v7171_v12 = vpop.f32.mrb[37].mxu0  ;;  %v1540_v13 = vmul.f32 1.442695, %v1538_v5 }
 0x153   : > { %1509 = vst.msk [vmem:[#allocation3] sm:$0xff] %vm1347_vm4, %v1507_v11  ;;  %v1539_v14 = vmin.f32 %v8119_v6, 20.0  ;;  %v1031_v16 = vpop.f32.mrb[38].mxu0  ;;  %v1570_v39 = vld [vmem:[#allocation2 + $0x88] sm:$0xf]  ;;  %vm1537_vm15 = vcmp.gt.f32.partialorder %v8119_v6, 20.0 }
 0x154   : > { %v7548_v15 = vpop.eup %7547  ;;  %1367 = vst.msk [vmem:[#allocation2 + $0x98] sm:$0xff] %vm1347_vm4, %v1031_v16  ;;  %v7172_v17 = vpop.f32.mrb[39].mxu0  ;;  %7549 = vpow2.f32 %v1540_v13 }
 0x155   : > { %v1500_v18 = vmul.f32 0.6931472, %v7548_v15  ;;  %v1542_v20 = vmul.f32 1.442695, %v1539_v14 }
 0x157   : > { %v1506_v10 = vsel %vm1505_vm8, %v1503_v19, %v1500_v18  ;;  %7551 = vpow2.f32 %v1542_v20 }
 0x158   : > { %v1508_v22 = vsel %vm1482_vm10, %v8100_v21, %v1506_v10 }
 0x159   : > { %1511 = vst.msk [vmem:[#allocation3 + $0x8] sm:$0x3f] %vm10930_vm9, %v1508_v22  ;;  %v1571_v24 = vld [vmem:[#allocation2 + $0x8c] sm:$0xff]  ;;  %v1036_v25 = vpop.f32.mrb[40].mxu0 }
 0x15a   : > { %v2227_v26 = vld [vmem:[#allocation3] sm:$0xff]  ;;  %v1575_v27 = vmax.f32 %v1567_v23, %v1571_v24  ;;  %1368 = vst.msk [vmem:[#allocation2 + $0xa0] sm:$0xff] %vm1347_vm4, %v1036_v25  ;;  %v7175_v28 = vpop.f32.mrb[41].mxu0 }
 0x15b   : > { %2247 = vst.msk [vmem:[#allocation4] sm:$0xff] %vm1347_vm4, %v2227_v26  ;;  %v1572_v30 = vld [vmem:[#allocation2 + $0x94] sm:$0xff]  ;;  %v1039_v31 = vpop.f32.mrb[42].mxu0 }
 0x15c   : > { %1579 = vst.msk [vmem:[#allocation5] sm:$0xff] %vm1347_vm4, %v1575_v27  ;;  %v1576_v32 = vmax.f32 %v1568_v29, %v1572_v30  ;;  %1369 = vst.msk [vmem:[#allocation2 + $0xa8] sm:$0xff] %vm1347_vm4, %v1039_v31  ;;  %v7176_v21 = vpop.f32.mrb[43].mxu0 }
 0x15e   : > { %v8133_v33 = vpop.eup %7549  ;;  %1580 = vst.msk [vmem:[#allocation5 + $0x8] sm:$0xff] %vm1347_vm4, %v1576_v32 }
 0x15f   : > { %v1544_v36 = vadd.f32 1.0, %v8133_v33  ;;  %v1547_v49 = vmul.f32 -0.5, %v8133_v33  ;;  %v1550_v62 = vand.u32 2147483647, %v8133_v33 }
 0x160   : > { %v2390_v34 = vld [vmem:[#allocation3 + $0x2] sm:$0xff]  ;;  %v2391_v45 = vld [vmem:[#allocation3 + $0xa] sm:$0x3]  ;;  %v2635_v2 = vld [vmem:[#allocation3 + $0xc] sm:$0x3] }
 0x161   : > { %v2268_v35 = vld [vmem:[#allocation3 + $0x1] sm:$0xff]  ;;  %v8137_v37 = vpop.eup %7551  ;;  %2430 = vrot.lane.b32.xlu1 %v2390_v34, %s10913_s22  ;;  %v1573_v40 = vld [vmem:[#allocation2 + $0x9c] sm:$0xff]  ;;  %v1574_v41 = vld [vmem:[#allocation2 + $0xa4] sm:$0xf]  ;;  %v1044_v42 = vpop.f32.mrb[44].mxu0  ;;  %7553 = vlog2.f32 %v1544_v36  ;;  %v1548_v58 = vadd.f32 1.0, %v1547_v49 }
 0x162   : > { %2308 = vrot.lane.b32.xlu0 %v2268_v35, %s10915_s24  ;;  %v1577_v43 = vmax.f32 %v1569_v38, %v1573_v40  ;;  %v1578_v44 = vmax.f32 %v1570_v39, %v1574_v41  ;;  %1370 = vst.msk [vmem:[#allocation2 + $0xb0] sm:$0xff] %vm1347_vm4, %v1044_v42  ;;  %v7179_v46 = vpop.f32.mrb[45].mxu0  ;;  %v2269_v47 = vld [vmem:[#allocation3 + $0x9] sm:$0x3]  ;;  %v1553_v50 = vadd.f32 1.0, %v8137_v37  ;;  %v1556_v59 = vmul.f32 -0.5, %v8137_v37 }
 0x163   : > { %v1047_v48 = vpop.f32.mrb[46].mxu0  ;;  %v2228_v52 = vld [vmem:[#allocation3 + $0x8] sm:$0x3]  ;;  %v2513_v56 = vld [vmem:[#allocation3 + $0xb] sm:$0x3]  ;;  %v1549_v11 = vmul.f32 %v8133_v33, %v1548_v58 }
 0x164   : > { %1581 = vst.msk [vmem:[#allocation5 + $0x10] sm:$0xff] %vm1347_vm4, %v1577_v43  ;;  %1371 = vst.msk [vmem:[#allocation2 + $0xb8] sm:$0xff] %vm1347_vm4, %v1047_v48  ;;  %v7180_v51 = vpop.f32.mrb[47].mxu0  ;;  %7555 = vlog2.f32 %v1553_v50  ;;  %v2512_v57 = vld [vmem:[#allocation3 + $0x3] sm:$0xff]  ;;  %v1557_v14 = vadd.f32 1.0, %v1556_v59 }
 0x165   : > { %1582 = vst.msk [vmem:[#allocation5 + $0x18] sm:$0xf] %vm10951_vm5, %v1578_v44  ;;  %2432 = vrot.lane.b32.xlu1 %v2391_v45, %s10913_s22  ;;  %v1583_v53 = vld [vmem:[#allocation5] ss:$2 sm:$0xff]  ;;  %v1585_v54 = vld [vmem:[#allocation5 + $0x1] ss:$2 sm:$0xff] }
 0x166   : > { %2310 = vrot.lane.b32.xlu0 %v2269_v47, %s10915_s24  ;;  %2249 = vst.msk [vmem:[#allocation4 + $0x10] sm:$0x3] %vm10946_vm11, %v2228_v52  ;;  %v1587_v55 = vmax.f32 %v1583_v53, %v1585_v54  ;;  %v2634_v3 = vld [vmem:[#allocation3 + $0x4] sm:$0xff]  ;;  %vm1551_vm12 = vcmp.lt.f32.partialorder %v1550_v62, 0.0004427343  ;;  %v1558_v24 = vmul.f32 %v8137_v37, %v1557_v14 }
 0x167   : > { %v1559_v18 = vand.u32 2147483647, %v8137_v37 }
 0x168   : > { %v8154_v60 = vadd.f32 %v8087_v8, %v1587_v55 }
 0x169   : > { %2554 = vrot.lane.b32.xlu1 %v2513_v56, %s10899_s25  ;;  %v1052_v61 = vpop.f32.mrb[48].mxu0  ;;  %vm1560_vm14 = vcmp.lt.f32.partialorder %v1559_v18, 0.0004427343  ;;  %v1623_v34 = vld [vmem:[#allocation2 + $0xb0] sm:$0xff] }
 0x16a   : > { %2552 = vrot.lane.b32.xlu0 %v2512_v57, %s10899_s25  ;;  %1372 = vst.msk [vmem:[#allocation2 + $0xc0] sm:$0xff] %vm1347_vm4, %v1052_v61  ;;  %v7183_v63 = vpop.f32.mrb[49].mxu0  ;;  %v1593_v4 = vmin.f32 %v8154_v60, 20.0  ;;  %vm1591_vm1 = vcmp.gt.f32.partialorder %v8154_v60, 20.0 }
 0x16b   : > { %v7554_v5 = vpop.eup %7553  ;;  %v1055_v12 = vpop.f32.mrb[50].mxu0 }
 0x16c   : > { %v1584_v7 = vld [vmem:[#allocation5 + $0x10] ss:$2 sm:$0x3f]  ;;  %v1586_v9 = vld [vmem:[#allocation5 + $0x11] ss:$2 sm:$0x3f] }
 0x16d   : > { %2676 = vrot.lane.b32.xlu1 %v2635_v2, %s10903_s29  ;;  %v1546_v13 = vmul.f32 0.6931472, %v7554_v5  ;;  %v1595_v15 = vmul.f32 1.442695, %v1593_v4  ;;  %v1588_v16 = vmax.f32 %v1584_v7, %v1586_v9  ;;  %1373 = vst.msk [vmem:[#allocation2 + $0xc8] sm:$0xff] %vm1347_vm4, %v1055_v12 }
 0x16e   : > { %2674 = vrot.lane.b32.xlu0 %v2634_v3, %s10903_s29  ;;  %v7184_v17 = vpop.f32.mrb[51].mxu0  ;;  %v7556_v10 = vpop.eup %7555 }
 0x16f   : > { %v1552_v19 = vsel %vm1551_vm12, %v1549_v11, %v1546_v13  ;;  %7557 = vpow2.f32 %v1595_v15  ;;  %v8166_v20 = vadd.f32 %v8087_v8, %v1588_v16  ;;  %v1555_v23 = vmul.f32 0.6931472, %v7556_v10 }
 0x170   : > { %v1562_v22 = vsel %vm1536_vm13, %v8114_v0, %v1552_v19  ;;  %v1622_v0 = vld [vmem:[#allocation2 + $0xa8] sm:$0xff] }
 0x171   : > { %1565 = vst.msk [vmem:[#allocation3 + $0x10] sm:$0xff] %vm1347_vm4, %v1562_v22  ;;  %v1594_v25 = vmin.f32 %v8166_v20, 20.0  ;;  %v1060_v26 = vpop.f32.mrb[52].mxu0  ;;  %v1561_v28 = vsel %vm1560_vm14, %v1558_v24, %v1555_v23  ;;  %v1625_v37 = vld [vmem:[#allocation2 + $0xc0] sm:$0xf]  ;;  %vm1592_vm7 = vcmp.gt.f32.partialorder %v8166_v20, 20.0 }
 0x172   : > { %1374 = vst.msk [vmem:[#allocation2 + $0xd0] sm:$0xff] %vm1347_vm4, %v1060_v26  ;;  %v7187_v27 = vpop.f32.mrb[53].mxu0  ;;  %v1563_v31 = vsel %vm1537_vm15, %v8119_v6, %v1561_v28  ;;  %v1624_v6 = vld [vmem:[#allocation2 + $0xb8] sm:$0xff] }
 0x173   : > { %v1597_v29 = vmul.f32 1.442695, %v1594_v25  ;;  %v1063_v30 = vpop.f32.mrb[54].mxu0  ;;  %1566 = vst.msk [vmem:[#allocation3 + $0x18] sm:$0x3f] %vm10930_vm9, %v1563_v31 }
 0x174   : > { %v1626_v32 = vld [vmem:[#allocation2 + $0xc4] sm:$0xff]  ;;  %1375 = vst.msk [vmem:[#allocation2 + $0xd8] sm:$0xff] %vm1347_vm4, %v1063_v30  ;;  %v7188_v21 = vpop.f32.mrb[55].mxu0 }
 0x175   : > { %7559 = vpow2.f32 %v1597_v29  ;;  %v1630_v33 = vmax.f32 %v1622_v0, %v1626_v32  ;;  %v7471_v21 = vld [vmem:[%s7959_s14 + $0xe0] sm:$0xff]  }
 0x176   : > { %7246 = vmatmul.mubr.msk.bf16.gmra.mrb[112].mxu0 %vm10982_vm3, %v7471_v21 }
 0x177   : > { %1634 = vst.msk [vmem:[#allocation5] sm:$0xff] %vm1347_vm4, %v1630_v33  ;;  %7249 = vmatprep.mubr.msk.bf16.mxu0 %vm10923_vm2, %v7791_v1 }
 0x178   : > { %v2756_v35 = vld [vmem:[#allocation3 + $0x10] sm:$0xff] }
 0x179   : > { %v8178_v36 = vpop.eup %7557  ;;  %2796 = vrot.lane.b32.xlu0 %v2756_v35, %s10944_s30  ;;  %2250 = vst.msk [vmem:[#allocation4 + $0x20] sm:$0xff] %vm1347_vm4, %v2756_v35  ;;  %v1627_v38 = vld [vmem:[#allocation2 + $0xcc] sm:$0xff]  ;;  %v1068_v40 = vpop.f32.mrb[56].mxu0 }
 0x17a   : > { %v1599_v39 = vadd.f32 1.0, %v8178_v36  ;;  %v1631_v41 = vmax.f32 %v1623_v34, %v1627_v38  ;;  %1376 = vst.msk [vmem:[#allocation2 + $0xe0] sm:$0xff] %vm1347_vm4, %v1068_v40  ;;  %v7191_v42 = vpop.f32.mrb[57].mxu0  ;;  %v2757_v45 = vld [vmem:[#allocation3 + $0x18] sm:$0x3]  ;;  %v1602_v51 = vmul.f32 -0.5, %v8178_v36 }
 0x17b   : > { %v1628_v43 = vld [vmem:[#allocation2 + $0xd4] sm:$0xff]  ;;  %v1629_v44 = vld [vmem:[#allocation2 + $0xdc] sm:$0xf]  ;;  %2798 = vrot.lane.b32.xlu1 %v2757_v45, %s10944_s30  ;;  %v8186_v48 = vld [vmem:[#allocation3 + $0x11] sm:$0xff]  ;;  %v1071_v49 = vpop.f32.mrb[58].mxu0 }
 0x17c   : > { %7561 = vlog2.f32 %v1599_v39  ;;  %1635 = vst.msk [vmem:[#allocation5 + $0x8] sm:$0xff] %vm1347_vm4, %v1631_v41  ;;  %v1632_v46 = vmax.f32 %v1624_v6, %v1628_v43  ;;  %v1633_v47 = vmax.f32 %v1625_v37, %v1629_v44  ;;  %1377 = vst.msk [vmem:[#allocation2 + $0xe8] sm:$0xff] %vm1347_vm4, %v1071_v49  ;;  %v7192_v52 = vpop.f32.mrb[59].mxu0  ;;  %v2879_v53 = vld [vmem:[#allocation3 + $0x19] sm:$0x3]  ;;  %v1603_v59 = vadd.f32 1.0, %v1602_v51 }
 0x17d   : > { %2918 = vrot.lane.b32.xlu0 %v8186_v48, %s10921_s12  ;;  %v8197_v54 = vld [vmem:[#allocation3 + $0x12] sm:$0xff]  ;;  %v3001_v58 = vld [vmem:[#allocation3 + $0x1a] sm:$0x3]  ;;  %v1605_v61 = vand.u32 2147483647, %v8178_v36 }
 0x17e   : > { %1636 = vst.msk [vmem:[#allocation5 + $0x10] sm:$0xff] %vm1347_vm4, %v1632_v46  ;;  %v2230_v57 = vld [vmem:[#allocation3 + $0x18] sm:$0x3]  ;;  %v1604_v15 = vmul.f32 %v8178_v36, %v1603_v59  ;;  %v3123_v18 = vld [vmem:[#allocation3 + $0x1b] sm:$0x3] }
 0x17f   : > { %v8190_v50 = vpop.eup %7559  ;;  %1637 = vst.msk [vmem:[#allocation5 + $0x18] sm:$0xf] %vm10951_vm5, %v1633_v47  ;;  %2920 = vrot.lane.b32.xlu1 %v2879_v53, %s10921_s12  ;;  %v8206_v4 = vld [vmem:[#allocation3 + $0x13] sm:$0xff]  ;;  %vm1606_vm0 = vcmp.lt.f32.partialorder %v1605_v61, 0.0004427343 }
 0x180   : > { %v1608_v55 = vadd.f32 1.0, %v8190_v50  ;;  %2251 = vst.msk [vmem:[#allocation4 + $0x30] sm:$0x3] %vm10946_vm11, %v2230_v57  ;;  %v1611_v5 = vmul.f32 -0.5, %v8190_v50  ;;  %v8217_v19 = vld [vmem:[#allocation3 + $0x14] sm:$0xff] }
 0x181   : > { %3040 = vrot.lane.b32.xlu0 %v8197_v54, %s10911_s13  ;;  %v1076_v56 = vpop.f32.mrb[60].mxu0  ;;  %v1614_v27 = vand.u32 2147483647, %v8190_v50  ;;  %v3245_v30 = vld [vmem:[#allocation3 + $0x1c] sm:$0x3]  ;;  %v1677_v6 = vld [vmem:[#allocation2 + $0xe0] sm:$0xff] }
 0x182   : > { %7563 = vlog2.f32 %v1608_v55  ;;  %1378 = vst.msk [vmem:[#allocation2 + $0xf0] sm:$0xff] %vm1347_vm4, %v1076_v56  ;;  %v7195_v62 = vpop.f32.mrb[61].mxu0  ;;  %v1612_v25 = vadd.f32 1.0, %v1611_v5  ;;  %v2271_v35 = vld [vmem:[#allocation3 + $0x19] sm:$0x3] }
 0x183   : > { %v1638_v63 = vld [vmem:[#allocation5] ss:$2 sm:$0xff]  ;;  %v1640_v2 = vld [vmem:[#allocation5 + $0x1] ss:$2 sm:$0xff]  ;;  %v1079_v3 = vpop.f32.mrb[62].mxu0  ;;  %3042 = vrot.lane.b32.xlu1 %v3001_v58, %s10911_s13  ;;  %v1678_v40 = vld [vmem:[#allocation2 + $0xe8] sm:$0xff] }
 0x184   : > { %1379 = vst.msk [vmem:[#allocation2 + $0xf8] sm:$0xff] %vm1347_vm4, %v1079_v3  ;;  %v7196_v7 = vpop.f32.mrb[63].mxu0  ;;  %v1642_v9 = vmax.f32 %v1638_v63, %v1640_v2  ;;  %v1613_v34 = vmul.f32 %v8190_v50, %v1612_v25  ;;  %vm1615_vm6 = vcmp.lt.f32.partialorder %v1614_v27, 0.0004427343  ;;  %v2393_v45 = vld [vmem:[#allocation3 + $0x1a] sm:$0x3] }
 0x185   : > { %3162 = vrot.lane.b32.xlu0 %v8206_v4, %s10909_s15  ;;  %v7472_v49 = vld [vmem:[%s7959_s14 + $0xe8] sm:$0xff]  }
 0x186   : > { %v7562_v11 = vpop.eup %7561  ;;  %v1639_v12 = vld [vmem:[#allocation5 + $0x10] ss:$2 sm:$0x3f]  ;;  %v1641_v13 = vld [vmem:[#allocation5 + $0x11] ss:$2 sm:$0x3f]  ;;  %v8214_v16 = vadd.f32 %v8087_v8, %v1642_v9  ;;  %7250 = vmatmul.mubr.msk.bf16.gmra.mrb[116].mxu0 %vm10982_vm3, %v7472_v49 }
 0x187   : > { %v1601_v14 = vmul.f32 0.6931472, %v7562_v11  ;;  %v1643_v17 = vmax.f32 %v1639_v12, %v1641_v13  ;;  %3164 = vrot.lane.b32.xlu1 %v3123_v18, %s10909_s15  ;;  %v2515_v51 = vld [vmem:[#allocation3 + $0x1b] sm:$0x3]  ;;  %7253 = vmatprep.mubr.msk.bf16.mxu0 %vm10923_vm2, %v7791_v1  ;;  %v7473_v13 = vld [vmem:[%s7959_s14 + $0xf0] sm:$0xff]  }
 0x188   : > { %v1648_v22 = vmin.f32 %v8214_v16, 20.0  ;;  %v2637_v59 = vld [vmem:[#allocation3 + $0x1c] sm:$0x3]  ;;  %vm1646_vm8 = vcmp.gt.f32.partialorder %v8214_v16, 20.0 }
 0x189   : > { %v1607_v10 = vsel %vm1606_vm0, %v1604_v15, %v1601_v14  ;;  %v8222_v23 = vadd.f32 %v8087_v8, %v1643_v17  ;;  %3284 = vrot.lane.b32.xlu0 %v8217_v19, %s10917_s16  ;;  %v1084_v26 = vpop.f32.mrb[64].mxu0  ;;  %v1679_v53 = vld [vmem:[#allocation2 + $0xf0] sm:$0xff] }
 0x18a   : > { %v1617_v24 = vsel %vm1591_vm1, %v8154_v60, %v1607_v10  ;;  %1380 = vst.msk [vmem:[#allocation2 + $0x100] sm:$0xff] %vm1347_vm4, %v1084_v26  ;;  %v7199_v28 = vpop.f32.mrb[65].mxu0  ;;  %v1650_v29 = vmul.f32 1.442695, %v1648_v22 }
 0x18b   : > { %1620 = vst.msk [vmem:[#allocation3 + $0x20] sm:$0xff] %vm1347_vm4, %v1617_v24  ;;  %v1087_v31 = vpop.f32.mrb[66].mxu0  ;;  %v1649_v0 = vmin.f32 %v8222_v23, 20.0  ;;  %3286 = vrot.lane.b32.xlu1 %v3245_v30, %s10917_s16  ;;  %vm1647_vm13 = vcmp.gt.f32.partialorder %v8222_v23, 20.0 }
 0x18c   : > { %v7564_v32 = vpop.eup %7563  ;;  %1381 = vst.msk [vmem:[#allocation2 + $0x108] sm:$0xff] %vm1347_vm4, %v1087_v31  ;;  %v7200_v60 = vpop.f32.mrb[67].mxu0  ;;  %7565 = vpow2.f32 %v1650_v29 }
 0x18d   : > { %2312 = vrot.lane.b32.xlu0 %v8186_v48, %s10915_s24  ;;  %v1610_v33 = vmul.f32 0.6931472, %v7564_v32  ;;  %v1652_v37 = vmul.f32 1.442695, %v1649_v0 }
 0x18e   : > { %7254 = vmatmul.mubr.msk.bf16.gmra.mrb[120].mxu0 %vm10982_vm3, %v7473_v13 }
 0x18f   : > { %v1616_v36 = vsel %vm1615_vm6, %v1613_v34, %v1610_v33  ;;  %2314 = vrot.lane.b32.xlu1 %v2271_v35, %s10915_s24  ;;  %7567 = vpow2.f32 %v1652_v37  ;;  %7257 = vmatprep.mubr.msk.bf16.mxu0 %vm10923_vm2, %v7791_v1  ;;  %v7474_v33 = vld [vmem:[%s7959_s14 + $0xf8] sm:$0xff]   ;;  %vm10999_vm6 = vcmask 97328  }
 0x190   : > { %v1618_v38 = vsel %vm1592_vm7, %v8166_v20, %v1616_v36  ;;  %vm10987_vm7 = vcmask 146528  }
 0x191   : > { %2434 = vrot.lane.b32.xlu0 %v8197_v54, %s10913_s22  ;;  %1621 = vst.msk [vmem:[#allocation3 + $0x28] sm:$0x3f] %vm10930_vm9, %v1618_v38  ;;  %v1681_v41 = vld [vmem:[#allocation2 + $0xfc] sm:$0xff]  ;;  %v1092_v42 = vpop.f32.mrb[68].mxu0  ;;  %v1680_v54 = vld [vmem:[#allocation2 + $0xf8] sm:$0xf] }
 0x192   : > { %v3366_v39 = vld [vmem:[#allocation3 + $0x20] sm:$0xff]  ;;  %v1685_v43 = vmax.f32 %v1677_v6, %v1681_v41  ;;  %1382 = vst.msk [vmem:[#allocation2 + $0x110] sm:$0xff] %vm1347_vm4, %v1092_v42  ;;  %v7203_v44 = vpop.f32.mrb[69].mxu0 }
 0x193   : > { %2252 = vst.msk [vmem:[#allocation4 + $0x40] sm:$0xff] %vm1347_vm4, %v3366_v39  ;;  %v1682_v46 = vld [vmem:[#allocation2 + $0x104] sm:$0xff]  ;;  %v1095_v47 = vpop.f32.mrb[70].mxu0  ;;  %2436 = vrot.lane.b32.xlu1 %v2393_v45, %s10913_s22 }
 0x194   : > { %1689 = vst.msk [vmem:[#allocation5] sm:$0xff] %vm1347_vm4, %v1685_v43  ;;  %v1686_v20 = vmax.f32 %v1678_v40, %v1682_v46  ;;  %1383 = vst.msk [vmem:[#allocation2 + $0x118] sm:$0xff] %vm1347_vm4, %v1095_v47  ;;  %v7204_v48 = vpop.f32.mrb[71].mxu0 }
 0x195   : > { %2556 = vrot.lane.b32.xlu0 %v8206_v4, %s10899_s25 }
 0x196   : > { %v8254_v50 = vpop.eup %7565  ;;  %1690 = vst.msk [vmem:[#allocation5 + $0x8] sm:$0xff] %vm1347_vm4, %v1686_v20  ;;  %7258 = vmatmul.mubr.msk.bf16.gmra.mrb[124].mxu0 %vm10982_vm3, %v7474_v33 }
 0x197   : > { %v1654_v52 = vadd.f32 1.0, %v8254_v50  ;;  %2558 = vrot.lane.b32.xlu1 %v2515_v51, %s10899_s25  ;;  %s10901_s25 = smov 60   ;;  %v1657_v7 = vmul.f32 -0.5, %v8254_v50  ;;  %7261 = vmatprep.mubr.msk.bf16.mxu0 %vm10923_vm2, %v7791_v1  ;;  %v7475_v51 = vld [vmem:[%s7959_s14 + $0x100] sm:$0xff]  }
 0x198   : > { %v3367_v11 = vld [vmem:[#allocation3 + $0x28] sm:$0x3]  ;;  %v3611_v34 = vld [vmem:[#allocation3 + $0x2a] sm:$0x3] }
 0x199   : > { %2678 = vrot.lane.b32.xlu0 %v8217_v19, %s10903_s29  ;;  %v1100_v55 = vpop.f32.mrb[72].mxu0  ;;  %7569 = vlog2.f32 %v1654_v52  ;;  %v1683_v56 = vld [vmem:[#allocation2 + $0x10c] sm:$0xff]  ;;  %v1684_v57 = vld [vmem:[#allocation2 + $0x114] sm:$0xf]  ;;  %v8267_v3 = vpop.eup %7567  ;;  %v1658_v15 = vadd.f32 1.0, %v1657_v7 }
 0x19a   : > { %1384 = vst.msk [vmem:[#allocation2 + $0x120] sm:$0xff] %vm1347_vm4, %v1100_v55  ;;  %v7207_v58 = vpop.f32.mrb[73].mxu0  ;;  %v1687_v61 = vmax.f32 %v1679_v53, %v1683_v56  ;;  %v1688_v62 = vmax.f32 %v1680_v54, %v1684_v57  ;;  %v1663_v12 = vadd.f32 1.0, %v8267_v3  ;;  %v1660_v19 = vand.u32 2147483647, %v8254_v50  ;;  %v8283_v25 = vld [vmem:[#allocation3 + $0x21] sm:$0xff] }
 0x19b   : > { %v1103_v63 = vpop.f32.mrb[74].mxu0  ;;  %2680 = vrot.lane.b32.xlu1 %v2637_v59, %s10903_s29  ;;  %v2232_v10 = vld [vmem:[#allocation3 + $0x28] sm:$0x3]  ;;  %v1666_v27 = vmul.f32 -0.5, %v8267_v3  ;;  %v1659_v32 = vmul.f32 %v8254_v50, %v1658_v15  ;;  %s10905_s29 = smov 72  }
 0x19c   : > { %1385 = vst.msk [vmem:[#allocation2 + $0x128] sm:$0xff] %vm1347_vm4, %v1103_v63  ;;  %v7208_v2 = vpop.f32.mrb[75].mxu0  ;;  %1691 = vst.msk [vmem:[#allocation5 + $0x10] sm:$0xff] %vm1347_vm4, %v1687_v61  ;;  %7571 = vlog2.f32 %v1663_v12  ;;  %v3489_v24 = vld [vmem:[#allocation3 + $0x29] sm:$0x3] }
 0x19d   : > { %3406 = vrot.lane.b32.xlu0 %v3366_v39, %s10901_s25  ;;  %v1693_v4 = vld [vmem:[#allocation5] ss:$2 sm:$0xff]  ;;  %v1695_v5 = vld [vmem:[#allocation5 + $0x1] ss:$2 sm:$0xff]  ;;  %1692 = vst.msk [vmem:[#allocation5 + $0x18] sm:$0xf] %vm10951_vm5, %v1688_v62 }
 0x19e   : > { %v1697_v9 = vmax.f32 %v1693_v4, %v1695_v5  ;;  %2253 = vst.msk [vmem:[#allocation4 + $0x50] sm:$0x3] %vm10946_vm11, %v2232_v10  ;;  %vm1661_vm10 = vcmp.lt.f32.partialorder %v1660_v19, 0.0004427343  ;;  %v1667_v36 = vadd.f32 1.0, %v1666_v27  ;;  %v8301_v37 = vld [vmem:[#allocation3 + $0x22] sm:$0xff]  ;;  %7262 = vmatmul.mubr.msk.bf16.gmra.mrb[128].mxu0 %vm10982_vm3, %v7475_v51 }
 0x19f   : > { %3408 = vrot.lane.b32.xlu1 %v3367_v11, %s10901_s25  ;;  %s10907_s25 = smov 66   ;;  %v1732_v40 = vld [vmem:[#allocation2 + $0x118] sm:$0xff]  ;;  %7265 = vmatprep.mubr.msk.bf16.mxu0 %vm10923_vm2, %v7791_v1  ;;  %v7476_v11 = vld [vmem:[%s7959_s14 + $0x108] sm:$0xff]  }
 0x1a0   : > { %v8278_v17 = vadd.f32 %v8087_v8, %v1697_v9  ;;  %v3733_v43 = vld [vmem:[#allocation3 + $0x2b] sm:$0x3]  ;;  %v8315_v20 = vld [vmem:[#allocation3 + $0x23] sm:$0xff] }
 0x1a1   : > { %2800 = vrot.lane.b32.xlu0 %v3366_v39, %s10944_s30  ;;  %v1108_v14 = vpop.f32.mrb[76].mxu0  ;;  %v1669_v39 = vand.u32 2147483647, %v8267_v3  ;;  %v3855_v52 = vld [vmem:[#allocation3 + $0x2c] sm:$0x3]  ;;  %v1733_v53 = vld [vmem:[#allocation2 + $0x120] sm:$0xff] }
 0x1a2   : > { %1386 = vst.msk [vmem:[#allocation2 + $0x130] sm:$0xff] %vm1347_vm4, %v1108_v14  ;;  %v7211_v18 = vpop.f32.mrb[77].mxu0  ;;  %v1703_v28 = vmin.f32 %v8278_v17, 20.0  ;;  %v8324_v55 = vld [vmem:[#allocation3 + $0x24] sm:$0xff]  ;;  %vm1701_vm15 = vcmp.gt.f32.partialorder %v8278_v17, 20.0 }
 0x1a3   : > { %v7570_v22 = vpop.eup %7569  ;;  %v1111_v26 = vpop.f32.mrb[78].mxu0  ;;  %3530 = vrot.lane.b32.xlu1 %v3489_v24, %s10907_s25  ;;  %vm1670_vm12 = vcmp.lt.f32.partialorder %v1669_v39, 0.0004427343  ;;  %v1734_v59 = vld [vmem:[#allocation2 + $0x128] sm:$0xff]  ;;  %v2881_v13 = vld [vmem:[#allocation3 + $0x29] sm:$0x3] }
 0x1a4   : > { %v1694_v29 = vld [vmem:[#allocation5 + $0x10] ss:$2 sm:$0x3f]  ;;  %v1696_v30 = vld [vmem:[#allocation5 + $0x11] ss:$2 sm:$0x3f] }
 0x1a5   : > { %1387 = vst.msk [vmem:[#allocation2 + $0x138] sm:$0xff] %vm1347_vm4, %v1111_v26  ;;  %3528 = vrot.lane.b32.xlu0 %v8283_v25, %s10907_s25  ;;  %v7212_v31 = vpop.f32.mrb[79].mxu0  ;;  %v1656_v0 = vmul.f32 0.6931472, %v7570_v22  ;;  %v1698_v21 = vmax.f32 %v1694_v29, %v1696_v30  ;;  %s10938_s25 = smov 84   ;;  %v7477_v30 = vld [vmem:[%s7959_s14 + $0x110] sm:$0xff]  }
 0x1a6   : > { %v1705_v60 = vmul.f32 1.442695, %v1703_v28  ;;  %v7572_v47 = vpop.eup %7571  ;;  %7266 = vmatmul.mubr.msk.bf16.gmra.mrb[132].mxu0 %vm10982_vm3, %v7476_v11  ;;  %v3003_v19 = vld [vmem:[#allocation3 + $0x2a] sm:$0x3]  ;;  %v2639_v51 = vld [vmem:[#allocation3 + $0x2c] sm:$0x3] }
 0x1a7   : > { %v1662_v35 = vsel %vm1661_vm10, %v1659_v32, %v1656_v0  ;;  %v8298_v6 = vadd.f32 %v8087_v8, %v1698_v21  ;;  %3652 = vrot.lane.b32.xlu1 %v3611_v34, %s10905_s29  ;;  %v1665_v50 = vmul.f32 0.6931472, %v7572_v47  ;;  %7269 = vmatprep.mubr.msk.bf16.mxu0 %vm10923_vm2, %v7791_v1  ;;  %v3125_v26 = vld [vmem:[#allocation3 + $0x2b] sm:$0x3]  ;;  %vm10986_vm10 = vcmask 140384  }
 0x1a8   : > { %7573 = vpow2.f32 %v1705_v60  ;;  %v1672_v38 = vsel %vm1646_vm8, %v8214_v16, %v1662_v35  ;;  %v1668_v16 = vmul.f32 %v8267_v3, %v1667_v36  ;;  %v2759_v3 = vld [vmem:[#allocation3 + $0x28] sm:$0x3]  ;;  %v3247_v35 = vld [vmem:[#allocation3 + $0x2c] sm:$0x3]  ;;  %vm10998_vm8 = vcmask 91184  }
 0x1a9   : > { %3650 = vrot.lane.b32.xlu0 %v8301_v37, %s10905_s29  ;;  %v1116_v41 = vpop.f32.mrb[80].mxu0  ;;  %1675 = vst.msk [vmem:[#allocation3 + $0x30] sm:$0xff] %vm1347_vm4, %v1672_v38  ;;  %v1704_v42 = vmin.f32 %v8298_v6, 20.0  ;;  %s10940_s29 = smov 78   ;;  %v1735_v61 = vld [vmem:[#allocation2 + $0x130] sm:$0xf] }
 0x1aa   : > { %1388 = vst.msk [vmem:[#allocation2 + $0x140] sm:$0xff] %vm1347_vm4, %v1116_v41  ;;  %v7215_v8 = vpop.f32.mrb[81].mxu0  ;;  %v1671_v54 = vsel %vm1670_vm12, %v1668_v16, %v1665_v50  ;;  %vm1702_vm1 = vcmp.gt.f32.partialorder %v8298_v6, 20.0  ;;  %v2517_v50 = vld [vmem:[#allocation3 + $0x2b] sm:$0x3]  ;;  %vm10947_vm12 = vcmask 189584  }
 0x1ab   : > { %v1119_v45 = vpop.f32.mrb[82].mxu0  ;;  %v1707_v46 = vmul.f32 1.442695, %v1704_v42  ;;  %3774 = vrot.lane.b32.xlu1 %v3733_v43, %s10940_s29  ;;  %v1673_v56 = vsel %vm1647_vm13, %v8222_v23, %v1671_v54  ;;  %vm10949_vm13 = vcmask 195728  }
 0x1ac   : > { %v1736_v44 = vld [vmem:[#allocation2 + $0x134] sm:$0xff]  ;;  %1389 = vst.msk [vmem:[#allocation2 + $0x148] sm:$0xff] %vm1347_vm4, %v1119_v45  ;;  %v7216_v49 = vpop.f32.mrb[83].mxu0 }
 0x1ad   : > { %v1740_v48 = vmax.f32 %v1732_v40, %v1736_v44  ;;  %3772 = vrot.lane.b32.xlu0 %v8315_v20, %s10940_s29  ;;  %7575 = vpow2.f32 %v1707_v46  ;;  %1676 = vst.msk [vmem:[#allocation3 + $0x38] sm:$0x3f] %vm10930_vm9, %v1673_v56  ;;  %v8364_v40 = vld [vmem:[%s10889_s2] ss:$0 sm:$0xff]  ;;  %v2273_v44 = vld [vmem:[#allocation3 + $0x29] sm:$0x3] }
 0x1ae   : > { %7270 = vmatmul.mubr.msk.bf16.gmra.mrb[136].mxu0 %vm10982_vm3, %v7477_v30  ;;  %v2395_v49 = vld [vmem:[#allocation3 + $0x2a] sm:$0x3] }
 0x1af   : > { %1744 = vst.msk [vmem:[#allocation5] sm:$0xff] %vm1347_vm4, %v1740_v48  ;;  %3896 = vrot.lane.b32.xlu1 %v3855_v52, %s10938_s25  ;;  %7273 = vmatprep.mubr.msk.bf16.mxu0 %vm10923_vm2, %v7791_v1 }
 0x1b0   : > { %v2233_v57 = vld [vmem:[#allocation3 + $0x30] sm:$0xff] }
 0x1b1   : > { %3894 = vrot.lane.b32.xlu0 %v8324_v55, %s10938_s25  ;;  %v1737_v62 = vld [vmem:[#allocation2 + $0x13c] sm:$0xff]  ;;  %2254 = vst.msk [vmem:[#allocation4 + $0x60] sm:$0xff] %vm1347_vm4, %v2233_v57 }
 0x1b2   : > { %v7574_v58 = vpop.eup %7573  ;;  %v1741_v63 = vmax.f32 %v1733_v53, %v1737_v62  ;;  %v3976_v53 = vld [vmem:[#allocation3 + $0x30] sm:$0xff] }
 0x1b3   : > { %v1709_v2 = vadd.f32 1.0, %v7574_v58  ;;  %v1738_v4 = vld [vmem:[#allocation2 + $0x144] sm:$0xff]  ;;  %v1739_v23 = vld [vmem:[#allocation2 + $0x14c] sm:$0xf]  ;;  %2802 = vrot.lane.b32.xlu1 %v2759_v3, %s10944_s30  ;;  %v1712_v9 = vmul.f32 -0.5, %v7574_v58 }
 0x1b4   : > { %1745 = vst.msk [vmem:[#allocation5 + $0x8] sm:$0xff] %vm1347_vm4, %v1741_v63  ;;  %v1742_v5 = vmax.f32 %v1734_v59, %v1738_v4  ;;  %v1743_v7 = vmax.f32 %v1735_v61, %v1739_v23  ;;  %v1715_v18 = vand.u32 2147483647, %v7574_v58  ;;  %v2234_v38 = vld [vmem:[#allocation3 + $0x38] sm:$0x3] }
 0x1b5   : > { %7577 = vlog2.f32 %v1709_v2  ;;  %2922 = vrot.lane.b32.xlu0 %v8283_v25, %s10921_s12  ;;  %v1713_v14 = vadd.f32 1.0, %v1712_v9  ;;  %2255 = vst.msk [vmem:[#allocation4 + $0x70] sm:$0x3] %vm10946_vm11, %v2234_v38  ;;  %v4099_v62 = vld [vmem:[#allocation3 + $0x39] sm:$0x3]  ;;  %v8406_v11 = vld [vmem:[#allocation3 + $0x31] sm:$0xff] }
 0x1b6   : > { %1746 = vst.msk [vmem:[#allocation5 + $0x10] sm:$0xff] %vm1347_vm4, %v1742_v5  ;;  %vm1716_vm14 = vcmp.lt.f32.partialorder %v1715_v18, 0.0004427343  ;;  %v1124_v18 = vpop.f32.mrb[84].mxu0 }
 0x1b7   : > { %1747 = vst.msk [vmem:[#allocation5 + $0x18] sm:$0xf] %vm10951_vm5, %v1743_v7  ;;  %v7576_v12 = vpop.eup %7575  ;;  %2924 = vrot.lane.b32.xlu1 %v2881_v13, %s10921_s12  ;;  %v1714_v22 = vmul.f32 %v7574_v58, %v1713_v14  ;;  %v4221_v7 = vld [vmem:[#allocation3 + $0x3a] sm:$0x3]  ;;  %s10928_s12 = smov 108  }
 0x1b8   : > { %v1718_v15 = vadd.f32 1.0, %v7576_v12  ;;  %v1721_v10 = vmul.f32 -0.5, %v7576_v12  ;;  %v1724_v29 = vand.u32 2147483647, %v7576_v12  ;;  %1390 = vst.msk [vmem:[#allocation2 + $0x150] sm:$0xff] %vm1347_vm4, %v1124_v18 }
 0x1b9   : > { %3044 = vrot.lane.b32.xlu0 %v8301_v37, %s10911_s13 }
 0x1ba   : > { %7579 = vlog2.f32 %v1718_v15  ;;  %v1722_v28 = vadd.f32 1.0, %v1721_v10  ;;  %vm1725_vm0 = vcmp.lt.f32.partialorder %v1724_v29, 0.0004427343 }
 0x1bb   : > { %3046 = vrot.lane.b32.xlu1 %v3003_v19, %s10911_s13  ;;  %v1748_v31 = vld [vmem:[#allocation5] ss:$2 sm:$0xff]  ;;  %v1750_v32 = vld [vmem:[#allocation5 + $0x1] ss:$2 sm:$0xff]  ;;  %s11033_s13 = smov 18  }
 0x1bc   : > { %v1752_v33 = vmax.f32 %v1748_v31, %v1750_v32  ;;  %v1723_v39 = vmul.f32 %v7576_v12, %v1722_v28  ;;  %v4343_v12 = vld [vmem:[#allocation3 + $0x3b] sm:$0x3]  ;;  %v2761_v19 = vld [vmem:[#allocation3 + $0x38] sm:$0x3] }
 0x1bd   : > { %3166 = vrot.lane.b32.xlu0 %v8315_v20, %s10909_s15 }
 0x1be   : > { %v1749_v60 = vld [vmem:[#allocation5 + $0x10] ss:$2 sm:$0x3f]  ;;  %v1751_v34 = vld [vmem:[#allocation5 + $0x11] ss:$2 sm:$0x3f] }
 0x1bf   : > { %v7578_v24 = vpop.eup %7577  ;;  %3168 = vrot.lane.b32.xlu1 %v3125_v26, %s10909_s15  ;;  %v1753_v36 = vmax.f32 %v1749_v60, %v1751_v34  ;;  %s11034_s15 = smov 24  }
 0x1c0   : > { %v1711_v27 = vmul.f32 0.6931472, %v7578_v24  ;;  %v7219_v24 = vpop.f32.mrb[85].mxu0 }
 0x1c1   : > { %3288 = vrot.lane.b32.xlu0 %v8324_v55, %s10917_s16  ;;  %v8373_v42 = vadd.f32 %v8364_v40, %v1753_v36 }
 0x1c2   : > { %v1717_v0 = vsel %vm1716_vm14, %v1714_v22, %v1711_v27  ;;  %vm10927_vm14 = vcmask 238784   ;;  %v8415_v22 = vld [vmem:[#allocation3 + $0x32] sm:$0xff]  ;;  %v1127_v27 = vpop.f32.mrb[86].mxu0 }
 0x1c3   : > { %v1727_v21 = vsel %vm1701_vm15, %v8278_v17, %v1717_v0  ;;  %3290 = vrot.lane.b32.xlu1 %v3247_v35, %s10917_s16  ;;  %v8367_v17 = vadd.f32 %v8364_v40, %v1752_v33  ;;  %v1759_v45 = vmin.f32 %v8373_v42, 20.0  ;;  %s10925_s16 = smov 96   ;;  %vm10948_vm15 = vcmask 244928   ;;  %1391 = vst.msk [vmem:[#allocation2 + $0x158] sm:$0xff] %vm1347_vm4, %v1127_v27  ;;  %v7220_v28 = vpop.f32.mrb[87].mxu0  ;;  %v8430_v33 = vld [vmem:[#allocation3 + $0x33] sm:$0xff] }
 0x1c4   : > { %1730 = vst.msk [vmem:[#allocation3 + $0x40] sm:$0xff] %vm1347_vm4, %v1727_v21  ;;  %v7580_v41 = vpop.eup %7579  ;;  %v4465_v0 = vld [vmem:[#allocation3 + $0x3c] sm:$0x3]  ;;  %v1132_v32 = vpop.f32.mrb[88].mxu0 }
 0x1c5   : > { %2316 = vrot.lane.b32.xlu0 %v8283_v25, %s10915_s24  ;;  %v1720_v8 = vmul.f32 0.6931472, %v7580_v41  ;;  %v1758_v43 = vmin.f32 %v8367_v17, 20.0  ;;  %v1762_v47 = vmul.f32 1.442695, %v1759_v45  ;;  %1392 = vst.msk [vmem:[#allocation2 + $0x160] sm:$0xff] %vm1347_vm4, %v1132_v32 }
 0x1c6   : > { %v7223_v34 = vpop.f32.mrb[89].mxu0  ;;  %v3369_v41 = vld [vmem:[#allocation3 + $0x38] sm:$0x3] }
 0x1c7   : > { %2318 = vrot.lane.b32.xlu1 %v2273_v44, %s10915_s24  ;;  %v1726_v16 = vsel %vm1725_vm0, %v1723_v39, %v1720_v8  ;;  %v1760_v46 = vmul.f32 1.442695, %v1758_v43  ;;  %s11035_s24 = smov 60   ;;  %v1135_v36 = vpop.f32.mrb[90].mxu0  ;;  %v8443_v44 = vld [vmem:[#allocation3 + $0x34] sm:$0xff] }
 0x1c8   : > { %v1728_v25 = vsel %vm1702_vm1, %v8298_v6, %v1726_v16  ;;  %vm1756_vm1 = vcmp.gt.f32.partialorder %v8367_v17, 20.0  ;;  %1393 = vst.msk [vmem:[#allocation2 + $0x168] sm:$0xff] %vm1347_vm4, %v1135_v36  ;;  %v7224_v39 = vpop.f32.mrb[91].mxu0  ;;  %v3005_v36 = vld [vmem:[#allocation3 + $0x3a] sm:$0x3] }
 0x1c9   : > { %2438 = vrot.lane.b32.xlu0 %v8301_v37, %s10913_s22  ;;  %1731 = vst.msk [vmem:[#allocation3 + $0x48] sm:$0x3f] %vm10930_vm9, %v1728_v25  ;;  %7581 = vpow2.f32 %v1760_v46  ;;  %v1140_v8 = vpop.f32.mrb[92].mxu0 }
 0x1ca   : > { %7583 = vpow2.f32 %v1762_v47  ;;  %1394 = vst.msk [vmem:[#allocation2 + $0x170] sm:$0xff] %vm1347_vm4, %v1140_v8  ;;  %v7227_v45 = vpop.f32.mrb[93].mxu0  ;;  %v3491_v47 = vld [vmem:[#allocation3 + $0x39] sm:$0x3] }
 0x1cb   : > { %v2235_v48 = vld [vmem:[#allocation3 + $0x40] sm:$0xff]  ;;  %2440 = vrot.lane.b32.xlu1 %v2395_v49, %s10913_s22  ;;  %s10919_s22 = smov 90   ;;  %v1143_v16 = vpop.f32.mrb[94].mxu0 }
 0x1cc   : > { %2256 = vst.msk [vmem:[#allocation4 + $0x80] sm:$0xff] %vm1347_vm4, %v2235_v48  ;;  %1395 = vst.msk [vmem:[#allocation2 + $0x178] sm:$0xff] %vm1347_vm4, %v1143_v16  ;;  %v7228_v25 = vpop.f32.mrb[95].mxu0 }
 0x1cd   : > { %2560 = vrot.lane.b32.xlu0 %v8315_v20, %s11033_s13  ;;  %v1148_v48 = vpop.f32.mrb[96].mxu0 }
 0x1ce   : > { %1396 = vst.msk [vmem:[#allocation2 + $0x180] sm:$0xff] %vm1347_vm4, %v1148_v48 }
 0x1cf   : > { %2562 = vrot.lane.b32.xlu1 %v2517_v50, %s11033_s13  ;;  %v7231_v50 = vpop.f32.mrb[97].mxu0 }
 0x1d0   : > { %v2236_v2 = vld [vmem:[#allocation3 + $0x48] sm:$0x3] }
 0x1d1   : > { %2682 = vrot.lane.b32.xlu0 %v8324_v55, %s11034_s15  ;;  %v3977_v55 = vld [vmem:[#allocation3 + $0x38] sm:$0x3]  ;;  %2257 = vst.msk [vmem:[#allocation4 + $0x90] sm:$0x3] %vm10946_vm11, %v2236_v2 }
 0x1d3   : > { %v2431_v6 = vpop.permute.xlu1 %2430  ;;  %v7582_v52 = vpop.eup %7581  ;;  %2684 = vrot.lane.b32.xlu1 %v2639_v51, %s11034_s15 }
 0x1d4   : > { %v2309_v37 = vpop.permute.xlu0 %2308  ;;  %v1764_v56 = vadd.f32 1.0, %v7582_v52  ;;  %v7584_v57 = vpop.eup %7583  ;;  %v1767_v61 = vmul.f32 -0.5, %v7582_v52  ;;  %v1770_v9 = vand.u32 2147483647, %v7582_v52 }
 0x1d5   : > { %2369 = vst.msk [vmem:[#allocation4] sm:$0xff] %vm10999_vm6, %v2309_v37  ;;  %4016 = vrot.lane.b32.xlu0 %v3976_v53, %s10919_s22  ;;  %v1773_v63 = vadd.f32 1.0, %v7584_v57  ;;  %v1776_v5 = vmul.f32 -0.5, %v7584_v57  ;;  %v1779_v10 = vand.u32 2147483647, %v7584_v57 }
 0x1d6   : > { %2491 = vst.msk [vmem:[#allocation4] sm:$0xff] %vm10987_vm7, %v2431_v6  ;;  %7585 = vlog2.f32 %v1764_v56  ;;  %v1768_v23 = vadd.f32 1.0, %v1767_v61  ;;  %vm8410_vm0 = vcmp.lt.f32.partialorder %v1770_v9, 0.0004427343  ;;  %v1787_v6 = vld [vmem:[#allocation2 + $0x150] sm:$0xff]  ;;  %v1151_v9 = vpop.f32.mrb[98].mxu0 }
 0x1d7   : > { %v2433_v20 = vpop.permute.xlu1 %2432  ;;  %4018 = vrot.lane.b32.xlu1 %v3977_v55, %s10919_s22  ;;  %7587 = vlog2.f32 %v1773_v63  ;;  %s10942_s22 = smov 102   ;;  %v1777_v14 = vadd.f32 1.0, %v1776_v5  ;;  %vm8425_vm2 = vcmp.lt.f32.partialorder %v1779_v10, 0.0004427343  ;;  %v1789_v55 = vld [vmem:[#allocation2 + $0x160] sm:$0xff]  ;;  %1397 = vst.msk [vmem:[#allocation2 + $0x188] sm:$0xff] %vm1347_vm4, %v1151_v9 }
 0x1d8   : > { %v2311_v54 = vpop.permute.xlu0 %2310  ;;  %v1769_v13 = vmul.f32 %v7582_v52, %v1768_v23  ;;  %v3613_v52 = vld [vmem:[#allocation3 + $0x3a] sm:$0x3]  ;;  %v1793_v63 = vld [vmem:[#allocation2 + $0x17c] sm:$0xff]  ;;  %v1794_v2 = vld [vmem:[#allocation2 + $0x184] sm:$0xf] }
 0x1d9   : > { %2371 = vst.msk [vmem:[#allocation4 + $0x10] sm:$0x3] %vm10998_vm8, %v2311_v54  ;;  %3410 = vrot.lane.b32.xlu0 %v3976_v53, %s11035_s24  ;;  %v1778_v30 = vmul.f32 %v7584_v57, %v1777_v14  ;;  %v1790_v56 = vld [vmem:[#allocation2 + $0x168] sm:$0xf]  ;;  %v1792_v57 = vld [vmem:[#allocation2 + $0x174] sm:$0xff] }
 0x1da   : > { %2493 = vst.msk [vmem:[#allocation4 + $0x10] sm:$0x3] %vm10986_vm10, %v2433_v20  ;;  %v1791_v20 = vld [vmem:[#allocation2 + $0x16c] sm:$0xff] }
 0x1db   : > { %v2555_v58 = vpop.permute.xlu1 %2554  ;;  %4140 = vrot.lane.b32.xlu1 %v4099_v62, %s10925_s16  ;;  %v1795_v54 = vmax.f32 %v1787_v6, %v1791_v20  ;;  %v3735_v62 = vld [vmem:[#allocation3 + $0x3b] sm:$0x3] }
 0x1dc   : > { %v2553_v59 = vpop.permute.xlu0 %2552  ;;  %2615 = vst.msk [vmem:[#allocation4 + $0x10] sm:$0x3] %vm10947_vm12, %v2555_v58 }
 0x1dd   : > { %2613 = vst.msk [vmem:[#allocation4] sm:$0xff] %vm10949_vm13, %v2553_v59  ;;  %2804 = vrot.lane.b32.xlu0 %v3976_v53, %s10944_s30  ;;  %v1788_v53 = vld [vmem:[#allocation2 + $0x158] sm:$0xff] }
 0x1de   : > { %v1796_v59 = vmax.f32 %v1788_v53, %v1792_v57  ;;  %1799 = vst.msk [vmem:[#allocation5] sm:$0xff] %vm1347_vm4, %v1795_v54 }
 0x1df   : > { %v2677_v3 = vpop.permute.xlu1 %2676  ;;  %4262 = vrot.lane.b32.xlu1 %v4221_v7, %s10942_s22  ;;  %v3857_v7 = vld [vmem:[#allocation3 + $0x3c] sm:$0x3] }
 0x1e0   : > { %v2675_v4 = vpop.permute.xlu0 %2674  ;;  %2737 = vst.msk [vmem:[#allocation4 + $0x10] sm:$0x3] %vm10927_vm14, %v2677_v3  ;;  %v7586_v15 = vpop.eup %7585  ;;  %vm10955_vm14 = vcmask 294128   ;;  %v1797_v3 = vmax.f32 %v1789_v55, %v1793_v63  ;;  %v2275_v63 = vld [vmem:[#allocation3 + $0x39] sm:$0x3] }
 0x1e1   : > { %2735 = vst.msk [vmem:[#allocation4] sm:$0xff] %vm10948_vm15, %v2675_v4  ;;  %4138 = vrot.lane.b32.xlu0 %v8406_v11, %s10925_s16  ;;  %v1766_v26 = vmul.f32 0.6931472, %v7586_v15  ;;  %v7588_v31 = vpop.eup %7587  ;;  %s10931_s16 = smov 114   ;;  %v1798_v4 = vmax.f32 %v1790_v56, %v1794_v2  ;;  %v7813_v2 = vmov 0  }
 0x1e2   : > { %v1775_v35 = vmul.f32 0.6931472, %v7588_v31  ;;  %1800 = vst.msk [vmem:[#allocation5 + $0x8] sm:$0xff] %vm1347_vm4, %v1796_v59  ;;  %1801 = vst.msk [vmem:[#allocation5 + $0x10] sm:$0xff] %vm1347_vm4, %v1797_v3  ;;  %v2883_v31 = vld [vmem:[#allocation3 + $0x39] sm:$0x3]  ;;  %5309 = vmatprep.subr.bf16.mxu1 %v7813_v2 }
 0x1e3   : > { %4384 = vrot.lane.b32.xlu1 %v4343_v12, %s10928_s12  ;;  %v1772_v29 = vsel %vm8410_vm0, %v1769_v13, %v1766_v26  ;;  %vm1757_vm0 = vcmp.gt.f32.partialorder %v8373_v42, 20.0  ;;  %1802 = vst.msk [vmem:[#allocation5 + $0x18] sm:$0xf] %vm10951_vm5, %v1798_v4  ;;  %v7232_v12 = vpop.f32.mrb[99].mxu0  ;;  %v7479_v3 = vld [vmem:[%s7959_s14 + $0x120] sm:$0xff]  }
 0x1e4   : > { %v1782_v60 = vsel %vm1756_vm1, %v8367_v17, %v1772_v29  ;;  %v1781_v17 = vsel %vm8425_vm2, %v1778_v30, %v1775_v35  ;;  %vm10934_vm1 = vcmask 287984   ;;  %vm10933_vm2 = vcmask 343328   ;;  %v1156_v13 = vpop.f32.mrb[100].mxu0  ;;  %v7480_v4 = vld [vmem:[%s10890_s3] sm:$0xff]  }
 0x1e5   : > { %4260 = vrot.lane.b32.xlu0 %v8415_v22, %s10942_s22  ;;  %1785 = vst.msk [vmem:[#allocation3 + $0x50] sm:$0xff] %vm1347_vm4, %v1782_v60  ;;  %v1783_v43 = vsel %vm1757_vm0, %v8373_v42, %v1781_v17  ;;  %vm10936_vm0 = vcmask 337184   ;;  %1398 = vst.msk [vmem:[#allocation2 + $0x190] sm:$0xff] %vm1347_vm4, %v1156_v13  ;;  %v7235_v15 = vpop.f32.mrb[101].mxu0  ;;  %s11044_s22 = smov 48   ;;  %5310 = vmatpush1.bf16.msra.mxu1 %v7480_v4 }
 0x1e6   : > { %1786 = vst.msk [vmem:[#allocation3 + $0x58] sm:$0x3f] %vm10930_vm9, %v1783_v43  ;;  %vm10935_vm9 = vcmask 392528   ;;  %v1159_v10 = vpop.f32.mrb[102].mxu0  ;;  %v3127_v43 = vld [vmem:[#allocation3 + $0x3b] sm:$0x3]  ;;  %5311 = vmatprep.subr.bf16.mxu1 %v7813_v2 }
 0x1e7   : > { %4506 = vrot.lane.b32.xlu1 %v4465_v0, %s10931_s16  ;;  %1399 = vst.msk [vmem:[#allocation2 + $0x198] sm:$0xff] %vm1347_vm4, %v1159_v10  ;;  %v7236_v26 = vpop.f32.mrb[103].mxu0  ;;  %v2397_v13 = vld [vmem:[#allocation3 + $0x3a] sm:$0x3] }
 0x1e8   : > { %v1164_v27 = vpop.f32.mrb[104].mxu0  ;;  %v2519_v10 = vld [vmem:[#allocation3 + $0x3b] sm:$0x3] }
 0x1e9   : > { %4382 = vrot.lane.b32.xlu0 %v8430_v33, %s10928_s12  ;;  %s11040_s12 = smov 66   ;;  %1400 = vst.msk [vmem:[#allocation2 + $0x1a0] sm:$0xff] %vm1347_vm4, %v1164_v27  ;;  %v7239_v29 = vpop.f32.mrb[105].mxu0  ;;  %v1803_v54 = vld [vmem:[#allocation5] ss:$2 sm:$0xff] }
 0x1ea   : > { %v1167_v0 = vpop.f32.mrb[106].mxu0  ;;  %v1805_v55 = vld [vmem:[#allocation5 + $0x1] ss:$2 sm:$0xff]  ;;  %v1804_v57 = vld [vmem:[#allocation5 + $0x10] ss:$2 sm:$0x3f] }
 0x1eb   : > { %v2797_v38 = vpop.permute.xlu0 %2796  ;;  %3412 = vrot.lane.b32.xlu1 %v3369_v41, %s11035_s24  ;;  %1401 = vst.msk [vmem:[#allocation2 + $0x1a8] sm:$0xff] %vm1347_vm4, %v1167_v0  ;;  %v7240_v32 = vpop.f32.mrb[107].mxu0  ;;  %v1842_v41 = vld [vmem:[#allocation2 + $0x188] sm:$0xff]  ;;  %v1807_v56 = vmax.f32 %v1803_v54, %v1805_v55  ;;  %v7484_v29 = vld [vmem:[%s10890_s3 + $0x18] sm:$0xff]  }
 0x1ec   : > { %2857 = vst.msk [vmem:[#allocation4] sm:$0xff] %vm10955_vm14, %v2797_v38  ;;  %v2237_v49 = vld [vmem:[#allocation3 + $0x50] sm:$0xff]  ;;  %v1172_v60 = vpop.f32.mrb[108].mxu0  ;;  %v1843_v45 = vld [vmem:[#allocation2 + $0x190] sm:$0xff]  ;;  %v4709_v32 = vld [vmem:[#allocation3 + $0x49] sm:$0x3] }
 0x1ed   : > { %4504 = vrot.lane.b32.xlu0 %v8443_v44, %s10931_s16  ;;  %v2799_v46 = vpop.permute.xlu1 %2798  ;;  %2258 = vst.msk [vmem:[#allocation4 + $0xa0] sm:$0xff] %vm1347_vm4, %v2237_v49  ;;  %s11041_s16 = smov 72   ;;  %v2238_v24 = vld [vmem:[#allocation3 + $0x58] sm:$0x3]  ;;  %1402 = vst.msk [vmem:[#allocation2 + $0x1b0] sm:$0xff] %vm1347_vm4, %v1172_v60  ;;  %v7243_v34 = vpop.f32.mrb[109].mxu0 }
 0x1ee   : > { %2859 = vst.msk [vmem:[#allocation4 + $0x10] sm:$0x3] %vm10934_vm1, %v2799_v46  ;;  %vm10937_vm1 = vcmask 441728   ;;  %v1175_v38 = vpop.f32.mrb[110].mxu0  ;;  %v7478_v46 = vld [vmem:[%s7959_s14 + $0x118] sm:$0xff]   ;;  %v7486_v34 = vld [vmem:[%s10890_s3 + $0x20] sm:$0xff]  }
 0x1ef   : > { %v2919_v42 = vpop.permute.xlu0 %2918  ;;  %3534 = vrot.lane.b32.xlu1 %v3491_v47, %s11040_s12  ;;  %2259 = vst.msk [vmem:[#allocation4 + $0xb0] sm:$0x3] %vm10946_vm11, %v2238_v24  ;;  %v7244_v39 = vpop.f32.mrb[111].mxu0  ;;  %vm10984_vm11 = vcmask 540128   ;;  %v1844_v25 = vld [vmem:[#allocation2 + $0x198] sm:$0xff]  ;;  %7274 = vmatmul.mubr.msk.bf16.gmra.mrb[140].mxu0 %vm10982_vm3, %v7478_v46  ;;  %v7482_v24 = vld [vmem:[%s7959_s14 + $0x128] sm:$0xff]  }
 0x1f0   : > { %2979 = vst.msk [vmem:[#allocation4] sm:$0xff] %vm10933_vm2, %v2919_v42  ;;  %vm10973_vm2 = vcmask 386384   ;;  %v1845_v42 = vld [vmem:[#allocation2 + $0x1a0] sm:$0xf]  ;;  %v4587_v54 = vld [vmem:[#allocation3 + $0x48] sm:$0x3] }
 0x1f1   : > { %3532 = vrot.lane.b32.xlu0 %v8406_v11, %s11040_s12  ;;  %v2921_v37 = vpop.permute.xlu1 %2920  ;;  %1403 = vst.msk [vmem:[#allocation2 + $0x1b8] sm:$0xff] %vm1347_vm4, %v1175_v38 }
 0x1f2   : > { %2981 = vst.msk [vmem:[#allocation4 + $0x10] sm:$0x3] %vm10936_vm0, %v2921_v37  ;;  %vm3344_vm0 = vcmask 490928   ;;  %v1846_v16 = vld [vmem:[#allocation2 + $0x1a4] sm:$0xff]  ;;  %v3249_v37 = vld [vmem:[#allocation3 + $0x3c] sm:$0x3] }
 0x1f3   : > { %v3041_v51 = vpop.permute.xlu0 %3040  ;;  %3656 = vrot.lane.b32.xlu1 %v3613_v52, %s11041_s16  ;;  %v1850_v47 = vmax.f32 %v1842_v41, %v1846_v16  ;;  %v7487_v41 = vld [vmem:[%s10890_s3 + $0x28] sm:$0xff]  }
 0x1f4   : > { %3101 = vst.msk [vmem:[#allocation4] sm:$0xff] %vm10935_vm9, %v3041_v51  ;;  %vm3224_vm9 = vcmask 435584   ;;  %v1847_v48 = vld [vmem:[#allocation2 + $0x1ac] sm:$0xff] }
 0x1f5   : > { %3654 = vrot.lane.b32.xlu0 %v8415_v22, %s11041_s16  ;;  %v3043_v58 = vpop.permute.xlu1 %3042  ;;  %v1851_v50 = vmax.f32 %v1843_v45, %v1847_v48  ;;  %1854 = vst.msk [vmem:[#allocation5] sm:$0xff] %vm1347_vm4, %v1850_v47  ;;  %v4975_v48 = vld [vmem:[#allocation3 + $0x4b] sm:$0x3] }
 0x1f6   : > { %3103 = vst.msk [vmem:[#allocation4 + $0x10] sm:$0x3] %vm10973_vm2, %v3043_v58  ;;  %v1806_v58 = vld [vmem:[#allocation5 + $0x11] ss:$2 sm:$0x3f] }
 0x1f7   : > { %v3163_v61 = vpop.permute.xlu0 %3162  ;;  %3778 = vrot.lane.b32.xlu1 %v3735_v62, %s10940_s29  ;;  %1855 = vst.msk [vmem:[#allocation5 + $0x8] sm:$0xff] %vm1347_vm4, %v1851_v50  ;;  %v7488_v50 = vld [vmem:[%s7959_s14 + $0x138] sm:$0xff]  }
 0x1f8   : > { %3223 = vst.msk [vmem:[#allocation4] sm:$0xff] %vm10937_vm1, %v3163_v61  ;;  %vm3346_vm1 = vcmask 484784   ;;  %v1848_v51 = vld [vmem:[#allocation2 + $0x1b4] sm:$0xff]  ;;  %v1849_v52 = vld [vmem:[#allocation2 + $0x1bc] sm:$0xf]  ;;  %v1808_v61 = vmax.f32 %v1804_v57, %v1806_v58 }
 0x1f9   : > { %3776 = vrot.lane.b32.xlu0 %v8430_v33, %s10940_s29  ;;  %v3165_v23 = vpop.permute.xlu1 %3164  ;;  %s11043_s29 = smov 42   ;;  %v1852_v53 = vmax.f32 %v1844_v25, %v1848_v51  ;;  %v1853_v20 = vmax.f32 %v1845_v42, %v1849_v52 }
 0x1fa   : > { %3225 = vst.msk [vmem:[#allocation4 + $0x10] sm:$0x3] %vm3224_vm9, %v3165_v23  ;;  %v8529_v23 = vadd.f32 %v8364_v40, %v1808_v61  ;;  %v8620_v61 = vld [vmem:[#allocation3 + $0x41] sm:$0xff] }
 0x1fb   : > { %v3285_v5 = vpop.permute.xlu0 %3284  ;;  %3900 = vrot.lane.b32.xlu1 %v3857_v7, %s10938_s25  ;;  %1856 = vst.msk [vmem:[#allocation5 + $0x10] sm:$0xff] %vm1347_vm4, %v1852_v53 }
 0x1fc   : > { %3345 = vst.msk [vmem:[#allocation4] sm:$0xff] %vm3344_vm0, %v3285_v5  ;;  %v1814_v9 = vmin.f32 %v8529_v23, 20.0 }
 0x1fd   : > { %3898 = vrot.lane.b32.xlu0 %v8443_v44, %s10938_s25  ;;  %v3287_v14 = vpop.permute.xlu1 %3286  ;;  %s11042_s25 = smov 36   ;;  %1857 = vst.msk [vmem:[#allocation5 + $0x18] sm:$0xf] %vm10951_vm5, %v1853_v20  ;;  %vm10954_vm5 = vcmask 589328  }
 0x1fe   : > { %3347 = vst.msk [vmem:[#allocation4 + $0x10] sm:$0x3] %vm3346_vm1, %v3287_v14  ;;  %v1817_v15 = vmul.f32 1.442695, %v1814_v9 }
 0x1ff   : > { %v2313_v18 = vpop.permute.xlu0 %2312  ;;  %2806 = vrot.lane.b32.xlu1 %v2761_v19, %s10944_s30  ;;  %s11045_s30 = smov 54  }
 0x200   : > { %2372 = vst.msk [vmem:[#allocation4 + $0x20] sm:$0xff] %vm10999_vm6, %v2313_v18 }
 0x201   : > { %2926 = vrot.lane.b32.xlu0 %v8406_v11, %s11042_s25  ;;  %v2315_v28 = vpop.permute.xlu1 %2314 }
 0x202   : > { %2373 = vst.msk [vmem:[#allocation4 + $0x30] sm:$0x3] %vm10998_vm8, %v2315_v28  ;;  %v2641_v28 = vld [vmem:[#allocation3 + $0x3c] sm:$0x3] }
 0x203   : > { %v2435_v30 = vpop.permute.xlu0 %2434  ;;  %2928 = vrot.lane.b32.xlu1 %v2883_v31, %s11042_s25 }
 0x204   : > { %2494 = vst.msk [vmem:[#allocation4 + $0x20] sm:$0xff] %vm10987_vm7, %v2435_v30  ;;  %v1859_v16 = vld [vmem:[#allocation5 + $0x10] ss:$2 sm:$0x3f] }
 0x205   : > { %3048 = vrot.lane.b32.xlu0 %v8415_v22, %s11043_s29  ;;  %v2437_v21 = vpop.permute.xlu1 %2436  ;;  %v1861_v46 = vld [vmem:[#allocation5 + $0x11] ss:$2 sm:$0x3f] }
 0x206   : > { %2495 = vst.msk [vmem:[#allocation4 + $0x30] sm:$0x3] %vm10986_vm10, %v2437_v21  ;;  %v7485_v21 = vld [vmem:[%s7959_s14 + $0x130] sm:$0xff]   ;;  %v1863_v42 = vmax.f32 %v1859_v16, %v1861_v46 }
 0x207   : > { %v2557_v35 = vpop.permute.xlu0 %2556  ;;  %3050 = vrot.lane.b32.xlu1 %v3005_v36, %s11043_s29 }
 0x208   : > { %2616 = vst.msk [vmem:[#allocation4 + $0x20] sm:$0xff] %vm10949_vm13, %v2557_v35  ;;  %vm10952_vm13 = vcmask 533984  }
 0x209   : > { %3170 = vrot.lane.b32.xlu0 %v8430_v33, %s11044_s22  ;;  %v2559_v17 = vpop.permute.xlu1 %2558 }
 0x20a   : > { %2617 = vst.msk [vmem:[#allocation4 + $0x30] sm:$0x3] %vm10947_vm12, %v2559_v17  ;;  %vm11046_vm12 = vcmask 238784   ;;  %v4853_v17 = vld [vmem:[#allocation3 + $0x4a] sm:$0x3] }
 0x20b   : > { %v2679_v8 = vpop.permute.xlu0 %2678  ;;  %3172 = vrot.lane.b32.xlu1 %v3127_v43, %s11044_s22  ;;  %v1860_v43 = vld [vmem:[#allocation5 + $0x1] ss:$2 sm:$0xff] }
 0x20c   : > { %2738 = vst.msk [vmem:[#allocation4 + $0x20] sm:$0xff] %vm10948_vm15, %v2679_v8  ;;  %vm11047_vm15 = vmmov 0   ;;  %v1858_v8 = vld [vmem:[#allocation5] ss:$2 sm:$0xff] }
 0x20d   : > { %3292 = vrot.lane.b32.xlu0 %v8443_v44, %s11045_s30  ;;  %v2681_v49 = vpop.permute.xlu1 %2680  ;;  %7277 = vmatprep.mubr.msk.bf16.mxu0 %vm11047_vm15, %v7791_v1  ;;  %v1862_v45 = vmax.f32 %v1858_v8, %v1860_v43  ;;  %v4223_v43 = vld [vmem:[#allocation3 + $0x4a] sm:$0x3] }
 0x20e   : > { %2739 = vst.msk [vmem:[#allocation4 + $0x30] sm:$0x3] %vm11046_vm12, %v2681_v49  ;;  %vm10953_vm12 = vcmask 583184   ;;  %7278 = vmatmul.mubr.msk.bf16.gmra.mrb[144].mxu0 %vm10982_vm3, %v7479_v3 }
 0x20f   : > { %v3407_v6 = vpop.permute.xlu0 %3406  ;;  %3294 = vrot.lane.b32.xlu1 %v3249_v37, %s11045_s30  ;;  %7281 = vmatprep.mubr.msk.bf16.mxu0 %vm11047_vm15, %v7791_v1  ;;  %v8597_v49 = vadd.f32 %v8364_v40, %v1862_v45  ;;  %v8606_v37 = vadd.f32 %v8364_v40, %v1863_v42 }
 0x210   : > { %3467 = vst.msk [vmem:[#allocation4] sm:$0xff] %vm10984_vm11, %v3407_v6  ;;  %v7489_v6 = vld [vmem:[%s10890_s3 + $0x30] sm:$0xff]  }
 0x211   : > { %2320 = vrot.lane.b32.xlu0 %v8406_v11, %s11048_s0  ;;  %v3409_v59 = vpop.permute.xlu1 %3408  ;;  %v8519_v11 = vadd.f32 %v8364_v40, %v1807_v56  ;;  %v1868_v53 = vmin.f32 %v8597_v49, 20.0  ;;  %v1869_v58 = vmin.f32 %v8606_v37, 20.0 }
 0x212   : > { %3469 = vst.msk [vmem:[#allocation4 + $0x10] sm:$0x3] %vm10952_vm13, %v3409_v59  ;;  %vm10992_vm13 = vcmask 632384  }
 0x213   : > { %v2801_v62 = vpop.permute.xlu0 %2800  ;;  %2322 = vrot.lane.b32.xlu1 %v2275_v63, %s11048_s0  ;;  %v1813_v5 = vmin.f32 %v8519_v11, 20.0  ;;  %v1870_v57 = vmul.f32 1.442695, %v1868_v53 }
 0x214   : > { %2860 = vst.msk [vmem:[#allocation4 + $0x20] sm:$0xff] %vm10955_vm14, %v2801_v62  ;;  %vm10974_vm14 = vcmask 687728   ;;  %v7490_v62 = vld [vmem:[%s10890_s3 + $0x38] sm:$0xff]  }
 0x215   : > { %2442 = vrot.lane.b32.xlu0 %v8415_v22, %s11049_s19  ;;  %v3531_v7 = vpop.permute.xlu1 %3530  ;;  %v1815_v14 = vmul.f32 1.442695, %v1813_v5  ;;  %v7481_v22 = vld [vmem:[%s10890_s3 + $0x8] sm:$0xff]  }
 0x216   : > { %3591 = vst.msk [vmem:[#allocation4 + $0x10] sm:$0x3] %vm10953_vm12, %v3531_v7  ;;  %vm10956_vm12 = vcmask 638528   ;;  %5312 = vmatpush1.bf16.msra.mxu1 %v7481_v22  ;;  %7282 = vmatmul.mubr.msk.bf16.gmra.mrb[148].mxu0 %vm10982_vm3, %v7482_v24  ;;  %v8647_v24 = vld [vmem:[#allocation3 + $0x42] sm:$0xff] }
 0x217   : > { %v3529_v12 = vpop.permute.xlu0 %3528  ;;  %2444 = vrot.lane.b32.xlu1 %v2397_v13, %s11049_s19  ;;  %7589 = vpow2.f32 %v1815_v14  ;;  %5313 = vmatprep.subr.bf16.mxu1 %v7813_v2 }
 0x218   : > { %3589 = vst.msk [vmem:[#allocation4] sm:$0xff] %vm10954_vm5, %v3529_v12  ;;  %7591 = vpow2.f32 %v1817_v15  ;;  %vm10959_vm5 = vcmask 681584   ;;  %7285 = vmatprep.mubr.msk.bf16.mxu0 %vm11047_vm15, %v7791_v1 }
 0x219   : > { %2564 = vrot.lane.b32.xlu0 %v8430_v33, %s11033_s13  ;;  %v3653_v18 = vpop.permute.xlu1 %3652  ;;  %v7483_v33 = vld [vmem:[%s10890_s3 + $0x10] sm:$0xff]  }
 0x21a   : > { %3713 = vst.msk [vmem:[#allocation4 + $0x10] sm:$0x3] %vm10992_vm13, %v3653_v18  ;;  %5314 = vmatpush1.bf16.msra.mxu1 %v7483_v33  ;;  %v5097_v18 = vld [vmem:[#allocation3 + $0x4c] sm:$0x3]  ;;  %v7491_v33 = vld [vmem:[%s7959_s14 + $0x140] sm:$0xff]  }
 0x21b   : > { %v3651_v19 = vpop.permute.xlu0 %3650  ;;  %2566 = vrot.lane.b32.xlu1 %v2519_v10, %s11033_s13  ;;  %5315 = vmatprep.subr.bf16.mxu1 %v7813_v2  ;;  %v1872_v10 = vmul.f32 1.442695, %v1869_v58 }
 0x21c   : > { %3711 = vst.msk [vmem:[#allocation4] sm:$0xff] %vm10956_vm12, %v3651_v19  ;;  %vm10964_vm12 = vcmask 730784  }
 0x21d   : > { %2686 = vrot.lane.b32.xlu0 %v8443_v44, %s11034_s15  ;;  %v3775_v26 = vpop.permute.xlu1 %3774  ;;  %v4586_v44 = vld [vmem:[#allocation3 + $0x40] sm:$0xff] }
 0x21e   : > { %3835 = vst.msk [vmem:[#allocation4 + $0x10] sm:$0x3] %vm10959_vm5, %v3775_v26  ;;  %vm10963_vm5 = vcmask 736928   ;;  %5316 = vmatpush1.bf16.msra.mxu1 %v7484_v29  ;;  %7286 = vmatmul.mubr.msk.bf16.gmra.mrb[152].mxu0 %vm10982_vm3, %v7485_v21  ;;  %v7492_v26 = vld [vmem:[%s10890_s3 + $0x40] sm:$0xff]  }
 0x21f   : > { %v3773_v27 = vpop.permute.xlu0 %3772  ;;  %2688 = vrot.lane.b32.xlu1 %v2641_v28, %s11034_s15  ;;  %5317 = vmatprep.subr.bf16.mxu1 %v7813_v2 }
 0x220   : > { %3833 = vst.msk [vmem:[#allocation4] sm:$0xff] %vm10974_vm14, %v3773_v27  ;;  %7289 = vmatprep.mubr.msk.bf16.mxu0 %vm11047_vm15, %v7791_v1  ;;  %vm1812_vm14 = vcmp.gt.f32.partialorder %v8529_v23, 20.0 }
 0x221   : > { %4626 = vrot.lane.b32.xlu0 %v4586_v44, %s10960_s23  ;;  %v3897_v30 = vpop.permute.xlu1 %3896  ;;  %v8568_v31 = vpop.eup %7589  ;;  %s10967_s23 = smov 4  }
 0x222   : > { %3957 = vst.msk [vmem:[#allocation4 + $0x10] sm:$0x3] %vm10964_vm12, %v3897_v30  ;;  %v8572_v60 = vpop.eup %7591  ;;  %v1819_v35 = vadd.f32 1.0, %v8568_v31  ;;  %5318 = vmatpush1.bf16.msra.mxu1 %v7486_v34  ;;  %vm11052_vm12 = vcmask 343328   ;;  %v1822_v51 = vmul.f32 -0.5, %v8568_v31 }
 0x223   : > { %v3895_v0 = vpop.permute.xlu0 %3894  ;;  %4750 = vrot.lane.b32.xlu1 %v4709_v32, %s10965_s1  ;;  %v1828_v36 = vadd.f32 1.0, %v8572_v60  ;;  %5319 = vmatprep.subr.bf16.mxu1 %v7813_v2  ;;  %s10970_s1 = smov 10   ;;  %v1831_v52 = vmul.f32 -0.5, %v8572_v60  ;;  %v1825_v63 = vand.u32 2147483647, %v8568_v31 }
 0x224   : > { %3955 = vst.msk [vmem:[#allocation4] sm:$0xff] %vm10963_vm5, %v3895_v0  ;;  %7593 = vlog2.f32 %v1819_v35  ;;  %vm11051_vm5 = vcmask 287984   ;;  %v1823_v40 = vadd.f32 1.0, %v1822_v51  ;;  %v1834_v3 = vand.u32 2147483647, %v8572_v60  ;;  %v8683_v35 = vld [vmem:[#allocation3 + $0x44] sm:$0xff] }
 0x225   : > { %4020 = vrot.lane.b32.xlu0 %v4586_v44, %s11050_s28  ;;  %v2803_v38 = vpop.permute.xlu1 %2802  ;;  %7595 = vlog2.f32 %v1828_v36  ;;  %v1832_v56 = vadd.f32 1.0, %v1831_v52  ;;  %v3979_v30 = vld [vmem:[#allocation3 + $0x48] sm:$0x3]  ;;  %v7494_v36 = vld [vmem:[%s7959_s14 + $0x148] sm:$0xff]  }
 0x226   : > { %2861 = vst.msk [vmem:[#allocation4 + $0x30] sm:$0x3] %vm11051_vm5, %v2803_v38  ;;  %5320 = vmatpush1.bf16.msra.mxu1 %v7487_v41  ;;  %vm11053_vm5 = vcmask 337184   ;;  %7290 = vmatmul.mubr.msk.bf16.gmra.mrb[156].mxu0 %vm10982_vm3, %v7488_v50  ;;  %v1824_v7 = vmul.f32 %v8568_v31, %v1823_v40  ;;  %7597 = vpow2.f32 %v1870_v57  ;;  %v7493_v31 = vld [vmem:[%s10890_s3 + $0x48] ss:$0 sps:$4 sm:$0x77]  }
 0x227   : > { %v2923_v39 = vpop.permute.xlu0 %2922  ;;  %4894 = vrot.lane.b32.xlu1 %v4853_v17, %s10967_s23  ;;  %5321 = vmatprep.subr.bf16.mxu1 %v7813_v2  ;;  %s11057_s23 = smov 120   ;;  %v1833_v9 = vmul.f32 %v8572_v60, %v1832_v56  ;;  %7599 = vpow2.f32 %v1872_v10  ;;  %v4101_v34 = vld [vmem:[#allocation3 + $0x49] sm:$0x3] }
 0x228   : > { %2982 = vst.msk [vmem:[#allocation4 + $0x20] sm:$0xff] %vm11052_vm12, %v2923_v39  ;;  %vm11054_vm12 = vcmask 392528   ;;  %7293 = vmatprep.mubr.msk.bf16.mxu0 %vm11047_vm15, %v7791_v1  ;;  %v3371_v52 = vld [vmem:[#allocation3 + $0x48] sm:$0x3] }
 0x229   : > { %3414 = vrot.lane.b32.xlu0 %v4586_v44, %s11035_s24  ;;  %v2925_v25 = vpop.permute.xlu1 %2924  ;;  %v3493_v56 = vld [vmem:[#allocation3 + $0x49] sm:$0x3] }
 0x22a   : > { %2983 = vst.msk [vmem:[#allocation4 + $0x30] sm:$0x3] %vm11053_vm5, %v2925_v25  ;;  %5322 = vmatpush1.bf16.msra.mxu1 %v7489_v6  ;;  %vm11056_vm5 = vcmask 441728   ;;  %v4345_v25 = vld [vmem:[#allocation3 + $0x4b] sm:$0x3] }
 0x22b   : > { %v3045_v47 = vpop.permute.xlu0 %3044  ;;  %5016 = vrot.lane.b32.xlu1 %v4975_v48, %s10970_s1  ;;  %5323 = vmatprep.subr.bf16.mxu1 %v7813_v2  ;;  %s10978_s1 = smov 16   ;;  %v4467_v48 = vld [vmem:[#allocation3 + $0x4c] sm:$0x3] }
 0x22c   : > { %3104 = vst.msk [vmem:[#allocation4 + $0x20] sm:$0xff] %vm11054_vm12, %v3045_v47  ;;  %vm8631_vm12 = vcmp.lt.f32.partialorder %v1825_v63, 0.0004427343 }
 0x22d   : > { %2808 = vrot.lane.b32.xlu0 %v4586_v44, %s11055_s17  ;;  %v3047_v20 = vpop.permute.xlu1 %3046 }
 0x22e   : > { %3105 = vst.msk [vmem:[#allocation4 + $0x30] sm:$0x3] %vm10973_vm2, %v3047_v20  ;;  %v7594_v59 = vpop.eup %7593  ;;  %5324 = vmatpush1.bf16.msra.mxu1 %v7490_v62  ;;  %vm1811_vm2 = vcmp.gt.f32.partialorder %v8519_v11, 20.0  ;;  %7294 = vmatmul.mubr.msk.bf16.gmra.mrb[160].mxu0 %vm10982_vm3, %v7491_v33 }
 0x22f   : > { %v3167_v55 = vpop.permute.xlu0 %3166  ;;  %4628 = vrot.lane.b32.xlu1 %v4587_v54, %s11057_s23  ;;  %v7596_v4 = vpop.eup %7595  ;;  %v1821_v5 = vmul.f32 0.6931472, %v7594_v59  ;;  %5325 = vmatprep.subr.bf16.mxu1 %v7813_v2 }
 0x230   : > { %3226 = vst.msk [vmem:[#allocation4 + $0x20] sm:$0xff] %vm11056_vm5, %v3167_v55  ;;  %v1830_v14 = vmul.f32 0.6931472, %v7596_v4  ;;  %vm8635_vm5 = vcmp.lt.f32.partialorder %v1834_v3, 0.0004427343  ;;  %7297 = vmatprep.mubr.msk.bf16.mxu0 %vm11047_vm15, %v7791_v1  ;;  %v8677_v60 = vpop.eup %7597 }
 0x231   : > { %4748 = vrot.lane.b32.xlu0 %v8620_v61, %s11058_s20  ;;  %v3169_v12 = vpop.permute.xlu1 %3168  ;;  %v1827_v19 = vsel %vm8631_vm12, %v1824_v7, %v1821_v5  ;;  %vm11064_vm12 = vcmask 46080   ;;  %v1874_v38 = vadd.f32 1.0, %v8677_v60  ;;  %v7600_v41 = vpop.eup %7599  ;;  %v1877_v53 = vmul.f32 -0.5, %v8677_v60 }
 0x232   : > { %3227 = vst.msk [vmem:[#allocation4 + $0x30] sm:$0x3] %vm3224_vm9, %v3169_v12  ;;  %v1837_v27 = vsel %vm1811_vm2, %v8519_v11, %v1827_v19  ;;  %v1836_v28 = vsel %vm8635_vm5, %v1833_v9, %v1830_v14  ;;  %5326 = vmatpush1.bf16.msra.mxu1 %v7492_v26  ;;  %vm11068_vm2 = vcmask 195728   ;;  %v1883_v45 = vadd.f32 1.0, %v7600_v41  ;;  %v3615_v19 = vld [vmem:[#allocation3 + $0x4a] sm:$0x3] }
 0x233   : > { %v3289_v15 = vpop.permute.xlu0 %3288  ;;  %5138 = vrot.lane.b32.xlu1 %v5097_v18, %s10978_s1  ;;  %1840 = vst.msk [vmem:[#allocation3 + $0x60] sm:$0xff] %vm1347_vm4, %v1837_v27  ;;  %v1838_v44 = vsel %vm1812_vm14, %v8529_v23, %v1836_v28  ;;  %5327 = vmatprep.subr.bf16.mxu1 %v7813_v2  ;;  %v8668_v23 = vld [vmem:[#allocation3 + $0x43] sm:$0xff]  ;;  %vm5305_vm14 = vcmask 1042432   ;;  %s11065_s1 = smov 10   ;;  %7601 = vlog2.f32 %v1874_v38  ;;  %vm11070_vm5 = vcmask 189584  }
 0x234   : > { %3348 = vst.msk [vmem:[#allocation4 + $0x20] sm:$0xff] %vm3344_vm0, %v3289_v15  ;;  %v8675_v32 = vsel %vm5305_vm14, %v7493_v31, 0  ;;  %7603 = vlog2.f32 %v1883_v45  ;;  %vm10985_vm14 = vcmask 786128   ;;  %v1880_v20 = vand.u32 2147483647, %v8677_v60 }
 0x235   : > { %4892 = vrot.lane.b32.xlu0 %v8647_v24, %s11063_s27  ;;  %v3291_v29 = vpop.permute.xlu1 %3290  ;;  %1841 = vst.msk [vmem:[#allocation3 + $0x68] sm:$0x3f] %vm11064_vm12, %v1838_v44  ;;  %vm11071_vm12 = vcmask 244928   ;;  %v1886_v55 = vmul.f32 -0.5, %v7600_v41  ;;  %v1889_v40 = vand.u32 2147483647, %v7600_v41 }
 0x236   : > { %3349 = vst.msk [vmem:[#allocation4 + $0x30] sm:$0x3] %vm3346_vm1, %v3291_v29  ;;  %5328 = vmatpush1.bf16.msra.mxu1 %v8675_v32  ;;  %7298 = vmatmul.mubr.msk.bf16.gmra.mrb[164].mxu0 %vm10982_vm3, %v7494_v36  ;;  %v1878_v58 = vadd.f32 1.0, %v1877_v53  ;;  %vm1866_vm3 = vcmp.gt.f32.partialorder %v8597_v49, 20.0  ;;  %v3737_v26 = vld [vmem:[#allocation3 + $0x4b] sm:$0x3] }
 0x237   : > { %v2317_v11 = vpop.permute.xlu0 %2316  ;;  %4022 = vrot.lane.b32.xlu1 %v3979_v30, %s11050_s28  ;;  %5360 = vmatprep.subr.bf16.mxu1 %v7813_v2  ;;  %v1887_v3 = vadd.f32 1.0, %v1886_v55  ;;  %v3859_v44 = vld [vmem:[#allocation3 + $0x4c] sm:$0x3]  ;;  %v2763_v30 = vld [vmem:[#allocation3 + $0x48] sm:$0x3] }
 0x238   : > { %2374 = vst.msk [vmem:[#allocation4 + $0x40] sm:$0xff] %vm10999_vm6, %v2317_v11  ;;  %7301 = vmatprep.mubr.msk.bf16.mxu0 %vm11047_vm15, %v7791_v1  ;;  %v1879_v5 = vmul.f32 %v8677_v60, %v1878_v58  ;;  %v2885_v60 = vld [vmem:[#allocation3 + $0x49] sm:$0x3]  ;;  %v2521_v58 = vld [vmem:[#allocation3 + $0x4b] sm:$0x3] }
 0x239   : > { %5014 = vrot.lane.b32.xlu0 %v8668_v23, %s11065_s1  ;;  %v2319_v0 = vpop.permute.xlu1 %2318  ;;  %v1888_v12 = vmul.f32 %v7600_v41, %v1887_v3  ;;  %v3007_v36 = vld [vmem:[#allocation3 + $0x4a] sm:$0x3] }
 0x23a   : > { %2375 = vst.msk [vmem:[#allocation4 + $0x50] sm:$0x3] %vm10998_vm8, %v2319_v0  ;;  %v2239_v39 = vld [vmem:[#allocation3 + $0x60] sm:$0xff] }
 0x23b   : > { %v2439_v21 = vpop.permute.xlu0 %2438  ;;  %4144 = vrot.lane.b32.xlu1 %v4101_v34, %s11066_s10  ;;  %2260 = vst.msk [vmem:[#allocation4 + $0xc0] sm:$0xff] %vm1347_vm4, %v2239_v39 }
 0x23c   : > { %2496 = vst.msk [vmem:[#allocation4 + $0x40] sm:$0xff] %vm10987_vm7, %v2439_v21  ;;  %v2240_v9 = vld [vmem:[#allocation3 + $0x68] sm:$0x3]  ;;  %vm11080_vm7 = vcmask 41984  }
 0x23d   : > { %5136 = vrot.lane.b32.xlu0 %v8683_v35, %s11067_s11  ;;  %v2441_v17 = vpop.permute.xlu1 %2440  ;;  %v7602_v50 = vpop.eup %7601  ;;  %2261 = vst.msk [vmem:[#allocation4 + $0xd0] sm:$0x3] %vm11080_vm7, %v2240_v9  ;;  %vm11081_vm7 = vcmask 46080   ;;  %v4588_v9 = vld [vmem:[#allocation3 + $0x50] sm:$0xff] }
 0x23e   : > { %2497 = vst.msk [vmem:[#allocation4 + $0x50] sm:$0x3] %vm10986_vm10, %v2441_v17  ;;  %v7604_v54 = vpop.eup %7603  ;;  %v1876_v57 = vmul.f32 0.6931472, %v7602_v50  ;;  %vm1867_vm10 = vcmp.gt.f32.partialorder %v8606_v37, 20.0 }
 0x23f   : > { %v2561_v8 = vpop.permute.xlu0 %2560  ;;  %4266 = vrot.lane.b32.xlu1 %v4223_v43, %s11069_s26  ;;  %v1885_v63 = vmul.f32 0.6931472, %v7604_v54  ;;  %v3129_v17 = vld [vmem:[#allocation3 + $0x4b] sm:$0x3] }
 0x240   : > { %2618 = vst.msk [vmem:[#allocation4 + $0x40] sm:$0xff] %vm11068_vm2, %v2561_v8  ;;  %vm11073_vm2 = vcmask 238784   ;;  %v3251_v43 = vld [vmem:[#allocation3 + $0x4c] sm:$0x3] }
 0x241   : > { %4142 = vrot.lane.b32.xlu0 %v8620_v61, %s11066_s10  ;;  %v2563_v16 = vpop.permute.xlu1 %2562 }
 0x242   : > { %2619 = vst.msk [vmem:[#allocation4 + $0x50] sm:$0x3] %vm11070_vm5, %v2563_v16  ;;  %vm10983_vm5 = vcmask 779984  }
 0x243   : > { %v2683_v46 = vpop.permute.xlu0 %2682  ;;  %4388 = vrot.lane.b32.xlu1 %v4345_v25, %s11072_s21 }
 0x244   : > { %2740 = vst.msk [vmem:[#allocation4 + $0x40] sm:$0xff] %vm11071_vm12, %v2683_v46  ;;  %vm10988_vm12 = vcmask 829184  }
 0x245   : > { %4264 = vrot.lane.b32.xlu0 %v8647_v24, %s11069_s26  ;;  %v2685_v42 = vpop.permute.xlu1 %2684 }
 0x246   : > { %2741 = vst.msk [vmem:[#allocation4 + $0x50] sm:$0x3] %vm11073_vm2, %v2685_v42  ;;  %vm8716_vm2 = vcmp.lt.f32.partialorder %v1880_v20, 0.0004427343  ;;  %v2399_v20 = vld [vmem:[#allocation3 + $0x4a] sm:$0x3] }
 0x247   : > { %v4017_v47 = vpop.permute.xlu0 %4016  ;;  %4510 = vrot.lane.b32.xlu1 %v4467_v48, %s11074_s18  ;;  %v1882_v13 = vsel %vm8716_vm2, %v1879_v5, %v1876_v57  ;;  %vm11008_vm2 = vcmask 982928   ;;  %v2277_v48 = vld [vmem:[#allocation3 + $0x49] sm:$0x3] }
 0x248   : > { %4077 = vst.msk [vmem:[#allocation4] sm:$0xff] %vm10985_vm14, %v4017_v47  ;;  %vm11009_vm14 = vcmask 878384   ;;  %v1892_v22 = vsel %vm1866_vm3, %v8597_v49, %v1882_v13  ;;  %vm11004_vm3 = vcmask 884528  }
 0x249   : > { %4386 = vrot.lane.b32.xlu0 %v8668_v23, %s11072_s21  ;;  %v4019_v6 = vpop.permute.xlu1 %4018  ;;  %1895 = vst.msk [vmem:[#allocation3 + $0x70] sm:$0xff] %vm1347_vm4, %v1892_v22  ;;  %v1180_v45 = vpop.f32.mrb[112].mxu0 }
 0x24a   : > { %4079 = vst.msk [vmem:[#allocation4 + $0x10] sm:$0x3] %vm10983_vm5, %v4019_v6  ;;  %vm8723_vm5 = vcmp.lt.f32.partialorder %v1889_v40, 0.0004427343  ;;  %v7247_v16 = vpop.f32.mrb[113].mxu0 }
 0x24b   : > { %v3411_v51 = vpop.permute.xlu0 %3410  ;;  %3416 = vrot.lane.b32.xlu1 %v3371_v52, %s11035_s24  ;;  %v1891_v15 = vsel %vm8723_vm5, %v1888_v12, %v1885_v63  ;;  %vm10990_vm5 = vcmask 933728   ;;  %1404 = vst.msk [vmem:[#allocation2 + $0x1c0] sm:$0xff] %vm1347_vm4, %v1180_v45  ;;  %v1183_v46 = vpop.f32.mrb[114].mxu0 }
 0x24c   : > { %3470 = vst.msk [vmem:[#allocation4 + $0x20] sm:$0xff] %vm10984_vm11, %v3411_v51  ;;  %vm11079_vm11 = vcmask 294128   ;;  %v1893_v10 = vsel %vm1867_vm10, %v8606_v37, %v1891_v15  ;;  %vm10991_vm10 = vcmask 976784   ;;  %v7248_v42 = vpop.f32.mrb[115].mxu0  ;;  %v4711_v15 = vld [vmem:[#allocation3 + $0x59] sm:$0x3] }
 0x24d   : > { %4508 = vrot.lane.b32.xlu0 %v8683_v35, %s11074_s18  ;;  %v4141_v59 = vpop.permute.xlu1 %4140  ;;  %1896 = vst.msk [vmem:[#allocation3 + $0x78] sm:$0x3f] %vm11081_vm7, %v1893_v10  ;;  %vm11084_vm7 = vcmask 533984   ;;  %v8839_v42 = vld [vmem:[#allocation3 + $0x52] sm:$0xff] }
 0x24e   : > { %4201 = vst.msk [vmem:[#allocation4 + $0x10] sm:$0x3] %vm10988_vm12, %v4141_v59  ;;  %vm11007_vm12 = vcmask 835328  }
 0x24f   : > { %v2805_v4 = vpop.permute.xlu0 %2804  ;;  %3538 = vrot.lane.b32.xlu1 %v3493_v56, %s11040_s12  ;;  %1405 = vst.msk [vmem:[#allocation2 + $0x1c8] sm:$0xff] %vm1347_vm4, %v1183_v46 }
 0x250   : > { %2862 = vst.msk [vmem:[#allocation4 + $0x40] sm:$0xff] %vm11079_vm11, %v2805_v4  ;;  %vm11006_vm11 = vcmask 927584   ;;  %v2241_v27 = vld [vmem:[#allocation3 + $0x70] sm:$0xff]  ;;  %v2643_v4 = vld [vmem:[#allocation3 + $0x4c] sm:$0x3] }
 0x251   : > { %3536 = vrot.lane.b32.xlu0 %v8620_v61, %s11040_s12  ;;  %v4263_v14 = vpop.permute.xlu1 %4262  ;;  %2262 = vst.msk [vmem:[#allocation4 + $0xe0] sm:$0xff] %vm1347_vm4, %v2241_v27 }
 0x252   : > { %4323 = vst.msk [vmem:[#allocation4 + $0x10] sm:$0x3] %vm11009_vm14, %v4263_v14  ;;  %v1897_v59 = vld [vmem:[#allocation2 + $0x1c0] sm:$0xff] }
 0x253   : > { %v4139_v18 = vpop.permute.xlu0 %4138  ;;  %3660 = vrot.lane.b32.xlu1 %v3615_v19, %s11041_s16 }
 0x254   : > { %4199 = vst.msk [vmem:[#allocation4] sm:$0xff] %vm11007_vm12, %v4139_v18 }
 0x255   : > { %3658 = vrot.lane.b32.xlu0 %v8647_v24, %s11041_s16  ;;  %v4385_v49 = vpop.permute.xlu1 %4384 }
 0x256   : > { %4445 = vst.msk [vmem:[#allocation4 + $0x10] sm:$0x3] %vm11006_vm11, %v4385_v49  ;;  %v1898_v5 = vld [vmem:[#allocation2 + $0x1c8] sm:$0xff] }
 0x257   : > { %v4261_v33 = vpop.permute.xlu0 %4260  ;;  %3782 = vrot.lane.b32.xlu1 %v3737_v26, %s11082_s8 }
 0x258   : > { %4321 = vst.msk [vmem:[#allocation4] sm:$0xff] %vm11004_vm3, %v4261_v33 }
 0x259   : > { %3780 = vrot.lane.b32.xlu0 %v8668_v23, %s11082_s8  ;;  %v4507_v37 = vpop.permute.xlu1 %4506  ;;  %v1188_v50 = vpop.f32.mrb[116].mxu0 }
 0x25a   : > { %4567 = vst.msk [vmem:[#allocation4 + $0x10] sm:$0x3] %vm10991_vm10, %v4507_v37  ;;  %vm11086_vm10 = vcmask 589328   ;;  %v7251_v6 = vpop.f32.mrb[117].mxu0 }
 0x25b   : > { %v4383_v28 = vpop.permute.xlu0 %4382  ;;  %3904 = vrot.lane.b32.xlu1 %v3859_v44, %s11083_s9  ;;  %1406 = vst.msk [vmem:[#allocation2 + $0x1d0] sm:$0xff] %vm1347_vm4, %v1188_v50 }
 0x25c   : > { %4443 = vst.msk [vmem:[#allocation4] sm:$0xff] %vm10990_vm5, %v4383_v28  ;;  %vm11085_vm5 = vcmask 583184   ;;  %v4855_v28 = vld [vmem:[#allocation3 + $0x5a] sm:$0x3] }
 0x25d   : > { %3902 = vrot.lane.b32.xlu0 %v8683_v35, %s11083_s9  ;;  %v3413_v29 = vpop.permute.xlu1 %3412 }
 0x25e   : > { %3471 = vst.msk [vmem:[#allocation4 + $0x30] sm:$0x3] %vm11084_vm7, %v3413_v29  ;;  %vm11087_vm7 = vcmask 638528  }
 0x25f   : > { %v4505_v11 = vpop.permute.xlu0 %4504  ;;  %2810 = vrot.lane.b32.xlu1 %v2763_v30, %s11055_s17 }
 0x260   : > { %4565 = vst.msk [vmem:[#allocation4] sm:$0xff] %vm11008_vm2, %v4505_v11 }
 0x261   : > { %2930 = vrot.lane.b32.xlu0 %v8620_v61, %s11042_s25  ;;  %v3535_v31 = vpop.permute.xlu1 %3534 }
 0x262   : > { %3593 = vst.msk [vmem:[#allocation4 + $0x30] sm:$0x3] %vm11085_vm5, %v3535_v31  ;;  %vm11088_vm5 = vcmask 681584   ;;  %v1899_v18 = vld [vmem:[#allocation2 + $0x1d0] sm:$0xff] }
 0x263   : > { %v3533_v0 = vpop.permute.xlu0 %3532  ;;  %2932 = vrot.lane.b32.xlu1 %v2885_v60, %s11042_s25  ;;  %v4977_v60 = vld [vmem:[#allocation3 + $0x5b] sm:$0x3] }
 0x264   : > { %3592 = vst.msk [vmem:[#allocation4 + $0x20] sm:$0xff] %vm11086_vm10, %v3533_v0  ;;  %vm11089_vm10 = vcmask 687728  }
 0x265   : > { %3052 = vrot.lane.b32.xlu0 %v8647_v24, %s11043_s29  ;;  %v3657_v21 = vpop.permute.xlu1 %3656 }
 0x266   : > { %3715 = vst.msk [vmem:[#allocation4 + $0x30] sm:$0x3] %vm10992_vm13, %v3657_v21  ;;  %vm11090_vm13 = vcmask 730784  }
 0x267   : > { %v3655_v34 = vpop.permute.xlu0 %3654  ;;  %3054 = vrot.lane.b32.xlu1 %v3007_v36, %s11043_s29 }
 0x268   : > { %3714 = vst.msk [vmem:[#allocation4 + $0x20] sm:$0xff] %vm11087_vm7, %v3655_v34  ;;  %vm11091_vm7 = vcmask 736928  }
 0x269   : > { %3174 = vrot.lane.b32.xlu0 %v8668_v23, %s11044_s22  ;;  %v3779_v38 = vpop.permute.xlu1 %3778 }
 0x26a   : > { %3837 = vst.msk [vmem:[#allocation4 + $0x30] sm:$0x3] %vm11088_vm5, %v3779_v38  ;;  %vm11092_vm5 = vcmask 287984  }
 0x26b   : > { %v3777_v39 = vpop.permute.xlu0 %3776  ;;  %3176 = vrot.lane.b32.xlu1 %v3129_v17, %s11044_s22 }
 0x26c   : > { %3836 = vst.msk [vmem:[#allocation4 + $0x20] sm:$0xff] %vm11089_vm10, %v3777_v39  ;;  %vm11094_vm10 = vcmask 337184  }
 0x26d   : > { %3296 = vrot.lane.b32.xlu0 %v8683_v35, %s11045_s30  ;;  %v3901_v41 = vpop.permute.xlu1 %3900 }
 0x26e   : > { %3959 = vst.msk [vmem:[#allocation4 + $0x30] sm:$0x3] %vm11090_vm13, %v3901_v41  ;;  %vm11093_vm13 = vcmask 343328   ;;  %v4589_v41 = vld [vmem:[#allocation3 + $0x58] sm:$0x3] }
 0x26f   : > { %v3899_v8 = vpop.permute.xlu0 %3898  ;;  %3298 = vrot.lane.b32.xlu1 %v3251_v43, %s11045_s30  ;;  %v8831_v43 = vld [vmem:[#allocation3 + $0x51] sm:$0xff] }
 0x270   : > { %3958 = vst.msk [vmem:[#allocation4 + $0x20] sm:$0xff] %vm11091_vm7, %v3899_v8  ;;  %vm11095_vm7 = vcmask 392528  }
 0x271   : > { %2324 = vrot.lane.b32.xlu0 %v8620_v61, %s11048_s0  ;;  %v2807_v25 = vpop.permute.xlu1 %2806  ;;  %v1191_v61 = vpop.f32.mrb[118].mxu0 }
 0x272   : > { %2863 = vst.msk [vmem:[#allocation4 + $0x50] sm:$0x3] %vm11092_vm5, %v2807_v25  ;;  %v7252_v52 = vpop.f32.mrb[119].mxu0  ;;  %vm11096_vm5 = vcmask 386384   ;;  %v5099_v25 = vld [vmem:[#allocation3 + $0x5c] sm:$0x3] }
 0x273   : > { %v2927_v47 = vpop.permute.xlu0 %2926  ;;  %2326 = vrot.lane.b32.xlu1 %v2277_v48, %s11048_s0  ;;  %1407 = vst.msk [vmem:[#allocation2 + $0x1d8] sm:$0xff] %vm1347_vm4, %v1191_v61  ;;  %v1196_v54 = vpop.f32.mrb[120].mxu0 }
 0x274   : > { %2984 = vst.msk [vmem:[#allocation4 + $0x40] sm:$0xff] %vm11093_vm13, %v2927_v47  ;;  %v7255_v55 = vpop.f32.mrb[121].mxu0  ;;  %vm11097_vm13 = vcmask 441728  }
 0x275   : > { %2446 = vrot.lane.b32.xlu0 %v8647_v24, %s11049_s19  ;;  %v2929_v51 = vpop.permute.xlu1 %2928  ;;  %1408 = vst.msk [vmem:[#allocation2 + $0x1e0] sm:$0xff] %vm1347_vm4, %v1196_v54  ;;  %v1199_v24 = vpop.f32.mrb[122].mxu0 }
 0x276   : > { %2985 = vst.msk [vmem:[#allocation4 + $0x50] sm:$0x3] %vm11094_vm10, %v2929_v51  ;;  %v7256_v56 = vpop.f32.mrb[123].mxu0  ;;  %vm11098_vm10 = vcmask 146528   ;;  %v3981_v51 = vld [vmem:[#allocation3 + $0x58] sm:$0x3] }
 0x277   : > { %v3049_v53 = vpop.permute.xlu0 %3048  ;;  %2448 = vrot.lane.b32.xlu1 %v2399_v20, %s11049_s19  ;;  %1409 = vst.msk [vmem:[#allocation2 + $0x1e8] sm:$0xff] %vm1347_vm4, %v1199_v24  ;;  %v1204_v62 = vpop.f32.mrb[124].mxu0  ;;  %v8850_v20 = vld [vmem:[#allocation3 + $0x53] sm:$0xff] }
 0x278   : > { %3106 = vst.msk [vmem:[#allocation4 + $0x40] sm:$0xff] %vm11095_vm7, %v3049_v53  ;;  %vm11099_vm7 = vcmask 44032  }
 0x279   : > { %2568 = vrot.lane.b32.xlu0 %v8668_v23, %s11033_s13  ;;  %v3051_v40 = vpop.permute.xlu1 %3050  ;;  %1410 = vst.msk [vmem:[#allocation2 + $0x1f0] sm:$0xff] %vm1347_vm4, %v1204_v62  ;;  %v7259_v23 = vpop.f32.mrb[125].mxu0 }
 0x27a   : > { %3107 = vst.msk [vmem:[#allocation4 + $0x50] sm:$0x3] %vm11096_vm5, %v3051_v40  ;;  %v1900_v19 = vld [vmem:[#allocation2 + $0x1d8] sm:$0xf]  ;;  %v1207_v44 = vpop.f32.mrb[126].mxu0  ;;  %vm11100_vm5 = vcmask 140384  }
 0x27b   : > { %v3171_v57 = vpop.permute.xlu0 %3170  ;;  %2570 = vrot.lane.b32.xlu1 %v2521_v58, %s11033_s13  ;;  %1411 = vst.msk [vmem:[#allocation2 + $0x1f8] sm:$0xff] %vm1347_vm4, %v1207_v44  ;;  %v7260_v29 = vpop.f32.mrb[127].mxu0  ;;  %v4103_v40 = vld [vmem:[#allocation3 + $0x59] sm:$0x3]  ;;  %v4347_v44 = vld [vmem:[#allocation3 + $0x5b] sm:$0x3] }
 0x27c   : > { %3228 = vst.msk [vmem:[#allocation4 + $0x40] sm:$0xff] %vm11097_vm13, %v3171_v57  ;;  %v1901_v7 = vld [vmem:[#allocation2 + $0x1dc] sm:$0xff]  ;;  %v1212_v11 = vpop.f32.mrb[128].mxu0  ;;  %vm11101_vm13 = vcmask 195728   ;;  %v8856_v57 = vld [vmem:[#allocation3 + $0x54] sm:$0xff] }
 0x27d   : > { %2690 = vrot.lane.b32.xlu0 %v8683_v35, %s11034_s15  ;;  %v3173_v63 = vpop.permute.xlu1 %3172  ;;  %v1905_v12 = vmax.f32 %v1897_v59, %v1901_v7  ;;  %1412 = vst.msk [vmem:[#allocation2 + $0x200] sm:$0xff] %vm1347_vm4, %v1212_v11  ;;  %v7263_v31 = vpop.f32.mrb[129].mxu0  ;;  %v2242_v23 = vld [vmem:[#allocation3 + $0x78] sm:$0x3] }
 0x27e   : > { %3229 = vst.msk [vmem:[#allocation4 + $0x50] sm:$0x3] %vm3224_vm9, %v3173_v63  ;;  %v1902_v35 = vld [vmem:[#allocation2 + $0x1e4] sm:$0xff]  ;;  %v1215_v21 = vpop.f32.mrb[130].mxu0 }
 0x27f   : > { %v3293_v3 = vpop.permute.xlu0 %3292  ;;  %2692 = vrot.lane.b32.xlu1 %v2643_v4, %s11034_s15  ;;  %v1906_v14 = vmax.f32 %v1898_v5, %v1902_v35  ;;  %1909 = vst.msk [vmem:[#allocation5] sm:$0xff] %vm1347_vm4, %v1905_v12  ;;  %1413 = vst.msk [vmem:[#allocation2 + $0x208] sm:$0xff] %vm1347_vm4, %v1215_v21  ;;  %v7264_v34 = vpop.f32.mrb[131].mxu0 }
 0x280   : > { %3350 = vst.msk [vmem:[#allocation4 + $0x40] sm:$0xff] %vm3344_vm0, %v3293_v3  ;;  %v1903_v10 = vld [vmem:[#allocation2 + $0x1ec] sm:$0xff]  ;;  %v1904_v49 = vld [vmem:[#allocation2 + $0x1f4] sm:$0xf]  ;;  %v1220_v36 = vpop.f32.mrb[132].mxu0 }
 0x281   : > { %4630 = vrot.lane.b32.xlu0 %v4588_v9, %s11057_s23  ;;  %v3295_v13 = vpop.permute.xlu1 %3294  ;;  %1910 = vst.msk [vmem:[#allocation5 + $0x8] sm:$0xff] %vm1347_vm4, %v1906_v14  ;;  %v1907_v26 = vmax.f32 %v1899_v18, %v1903_v10  ;;  %v1908_v37 = vmax.f32 %v1900_v19, %v1904_v49  ;;  %1414 = vst.msk [vmem:[#allocation2 + $0x210] sm:$0xff] %vm1347_vm4, %v1220_v36  ;;  %v7267_v39 = vpop.f32.mrb[133].mxu0  ;;  %v4225_v14 = vld [vmem:[#allocation3 + $0x5a] sm:$0x3] }
 0x282   : > { %3351 = vst.msk [vmem:[#allocation4 + $0x50] sm:$0x3] %vm3346_vm1, %v3295_v13  ;;  %v1223_v8 = vpop.f32.mrb[134].mxu0  ;;  %v1952_v50 = vld [vmem:[#allocation2 + $0x1f8] sm:$0xff]  ;;  %v8868_v18 = vld [vmem:[%s10889_s2] ss:$0 sm:$0xff] }
 0x283   : > { %v2321_v22 = vpop.permute.xlu0 %2320  ;;  %4754 = vrot.lane.b32.xlu1 %v4711_v15, %s11058_s20  ;;  %1911 = vst.msk [vmem:[#allocation5 + $0x10] sm:$0xff] %vm1347_vm4, %v1907_v26  ;;  %1415 = vst.msk [vmem:[#allocation2 + $0x218] sm:$0xff] %vm1347_vm4, %v1223_v8  ;;  %v7268_v45 = vpop.f32.mrb[135].mxu0  ;;  %v3373_v36 = vld [vmem:[#allocation3 + $0x58] sm:$0x3] }
 0x284   : > { %2376 = vst.msk [vmem:[#allocation4 + $0x60] sm:$0xff] %vm10999_vm6, %v2321_v22  ;;  %v1228_v47 = vpop.f32.mrb[136].mxu0  ;;  %v1953_v58 = vld [vmem:[#allocation2 + $0x200] sm:$0xff]  ;;  %vm11002_vm6 = vcmask 173184  }
 0x285   : > { %4024 = vrot.lane.b32.xlu0 %v4588_v9, %s11050_s28  ;;  %v2323_v33 = vpop.permute.xlu1 %2322  ;;  %1912 = vst.msk [vmem:[#allocation5 + $0x18] sm:$0xf] %vm11099_vm7, %v1908_v37  ;;  %vm11103_vm7 = vcmask 244928   ;;  %v7271_v6 = vpop.f32.mrb[137].mxu0 }
 0x286   : > { %2377 = vst.msk [vmem:[#allocation4 + $0x70] sm:$0x3] %vm10998_vm8, %v2323_v33  ;;  %v1231_v53 = vpop.f32.mrb[138].mxu0  ;;  %v1954_v59 = vld [vmem:[#allocation2 + $0x208] sm:$0xff]  ;;  %vm11000_vm8 = vcmask 31744  }
 0x287   : > { %v2443_v27 = vpop.permute.xlu0 %2442  ;;  %4898 = vrot.lane.b32.xlu1 %v4855_v28, %s11063_s27  ;;  %1416 = vst.msk [vmem:[#allocation2 + $0x220] sm:$0xff] %vm1347_vm4, %v1228_v47  ;;  %1417 = vst.msk [vmem:[#allocation2 + $0x228] sm:$0xff] %vm1347_vm4, %v1231_v53  ;;  %v7272_v54 = vpop.f32.mrb[139].mxu0  ;;  %v3617_v47 = vld [vmem:[#allocation3 + $0x5a] sm:$0x3] }
 0x288   : > { %2498 = vst.msk [vmem:[#allocation4 + $0x60] sm:$0xff] %vm11098_vm10, %v2443_v27  ;;  %vm11102_vm10 = vcmask 189584   ;;  %v1913_v62 = vld [vmem:[#allocation5] ss:$2 sm:$0xff]  ;;  %v1915_v63 = vld [vmem:[#allocation5 + $0x1] ss:$2 sm:$0xff] }
 0x289   : > { %3418 = vrot.lane.b32.xlu0 %v4588_v9, %s11035_s24  ;;  %v2445_v30 = vpop.permute.xlu1 %2444  ;;  %v1955_v3 = vld [vmem:[#allocation2 + $0x210] sm:$0xf]  ;;  %v1917_v5 = vmax.f32 %v1913_v62, %v1915_v63 }
 0x28a   : > { %2499 = vst.msk [vmem:[#allocation4 + $0x70] sm:$0x3] %vm11100_vm5, %v2445_v30  ;;  %vm10996_vm5 = vcmask 1032128   ;;  %v1956_v52 = vld [vmem:[#allocation2 + $0x214] sm:$0xff] }
 0x28b   : > { %v2565_v0 = vpop.permute.xlu0 %2564  ;;  %5020 = vrot.lane.b32.xlu1 %v4977_v60, %s11065_s1  ;;  %v1960_v55 = vmax.f32 %v1952_v50, %v1956_v52  ;;  %v8871_v19 = vadd.f32 %v8868_v18, %v1917_v5  ;;  %v4469_v60 = vld [vmem:[#allocation3 + $0x5c] sm:$0x3] }
 0x28c   : > { %2620 = vst.msk [vmem:[#allocation4 + $0x60] sm:$0xff] %vm11101_vm13, %v2565_v0  ;;  %vm11104_vm13 = vcmask 238784   ;;  %v1914_v7 = vld [vmem:[#allocation5 + $0x10] ss:$2 sm:$0x3f] }
 0x28d   : > { %2812 = vrot.lane.b32.xlu0 %v4588_v9, %s11055_s17  ;;  %v2567_v38 = vpop.permute.xlu1 %2566  ;;  %1964 = vst.msk [vmem:[#allocation5] sm:$0xff] %vm1347_vm4, %v1960_v55  ;;  %v1916_v35 = vld [vmem:[#allocation5 + $0x11] ss:$2 sm:$0x3f]  ;;  %v1923_v26 = vmin.f32 %v8871_v19, 20.0 }
 0x28e   : > { %2621 = vst.msk [vmem:[#allocation4 + $0x70] sm:$0x3] %vm11102_vm10, %v2567_v38  ;;  %vm10993_vm10 = vcmask 25600   ;;  %v1957_v4 = vld [vmem:[#allocation2 + $0x21c] sm:$0xff]  ;;  %v1958_v22 = vld [vmem:[#allocation2 + $0x224] sm:$0xff]  ;;  %v1918_v10 = vmax.f32 %v1914_v7, %v1916_v35 }
 0x28f   : > { %v2687_v17 = vpop.permute.xlu0 %2686  ;;  %4632 = vrot.lane.b32.xlu1 %v4589_v41, %s11057_s23  ;;  %v1961_v12 = vmax.f32 %v1953_v58, %v1957_v4  ;;  %v1959_v15 = vld [vmem:[#allocation2 + $0x22c] sm:$0xf]  ;;  %v1962_v49 = vmax.f32 %v1954_v59, %v1958_v22  ;;  %v1925_v29 = vmul.f32 1.442695, %v1923_v26  ;;  %v3495_v41 = vld [vmem:[#allocation3 + $0x59] sm:$0x3] }
 0x290   : > { %2742 = vst.msk [vmem:[#allocation4 + $0x60] sm:$0xff] %vm11103_vm7, %v2687_v17  ;;  %vm11105_vm7 = vcmask 786128   ;;  %v1963_v33 = vmax.f32 %v1955_v3, %v1959_v15  ;;  %v8880_v37 = vadd.f32 %v8868_v18, %v1918_v10  ;;  %v3861_v35 = vld [vmem:[#allocation3 + $0x5c] sm:$0x3]  ;;  %v8941_v10 = vld [vmem:[%s10890_s3] sm:$0xff]  }
 0x291   : > { %4752 = vrot.lane.b32.xlu0 %v8831_v43, %s11058_s20  ;;  %v2689_v16 = vpop.permute.xlu1 %2688  ;;  %1965 = vst.msk [vmem:[#allocation5 + $0x8] sm:$0xff] %vm1347_vm4, %v1961_v12  ;;  %1966 = vst.msk [vmem:[#allocation5 + $0x10] sm:$0xff] %vm1347_vm4, %v1962_v49  ;;  %7605 = vpow2.f32 %v1925_v29 }
 0x292   : > { %2743 = vst.msk [vmem:[#allocation4 + $0x70] sm:$0x3] %vm11104_vm13, %v2689_v16  ;;  %vm10994_vm13 = vcmask 74784   ;;  %v1924_v11 = vmin.f32 %v8880_v37, 20.0 }
 0x293   : > { %v4627_v46 = vpop.permute.xlu0 %4626  ;;  %5142 = vrot.lane.b32.xlu1 %v5099_v25, %s11067_s11 }
 0x294   : > { %4687 = vst.msk [vmem:[#allocation4] sm:$0xff] %vm10996_vm5, %v4627_v46  ;;  %vm4812_vm5 = vcmask 1042416   ;;  %v1927_v30 = vmul.f32 1.442695, %v1924_v11 }
 0x295   : > { %4896 = vrot.lane.b32.xlu0 %v8839_v42, %s11063_s27  ;;  %v8843_v48 = vpop.permute.xlu1 %4750 }
 0x296   : > { %4815 = vst.msk [vmem:[#allocation4 + $0x18] sm:$0x3] %vm10993_vm10, %v8843_v48  ;;  %vm10997_vm10 = vcmask 123984   ;;  %7607 = vpow2.f32 %v1927_v30 }
 0x297   : > { %v4021_v61 = vpop.permute.xlu0 %4020  ;;  %4026 = vrot.lane.b32.xlu1 %v3981_v51, %s11050_s28 }
 0x298   : > { %4080 = vst.msk [vmem:[#allocation4 + $0x20] sm:$0xff] %vm11105_vm7, %v4021_v61  ;;  %vm11106_vm7 = vcmask 540128   ;;  %v1970_v50 = vld [vmem:[#allocation5 + $0x1] ss:$2 sm:$0xff] }
 0x299   : > { %5018 = vrot.lane.b32.xlu0 %v8850_v20, %s11065_s1  ;;  %v4895_v24 = vpop.permute.xlu1 %4894 }
 0x29a   : > { %4955 = vst.msk [vmem:[#allocation4 + $0x18] sm:$0x3] %vm10994_vm13, %v4895_v24  ;;  %vm11107_vm13 = vcmask 41984  }
 0x29b   : > { %v3415_v56 = vpop.permute.xlu0 %3414  ;;  %4148 = vrot.lane.b32.xlu1 %v4103_v40, %s11066_s10  ;;  %2263 = vst.msk [vmem:[#allocation4 + $0xf0] sm:$0x3] %vm11107_vm13, %v2242_v23  ;;  %vm4688_vm13 = vcmask 1025984   ;;  %v8903_v39 = vpop.eup %7605  ;;  %v3739_v40 = vld [vmem:[#allocation3 + $0x5b] sm:$0x3] }
 0x29c   : > { %3472 = vst.msk [vmem:[#allocation4 + $0x40] sm:$0xff] %vm11106_vm7, %v3415_v56  ;;  %vm11108_vm7 = vcmask 294128   ;;  %v1929_v8 = vadd.f32 1.0, %v8903_v39  ;;  %v1932_v3 = vmul.f32 -0.5, %v8903_v39  ;;  %v1935_v49 = vand.u32 2147483647, %v8903_v39 }
 0x29d   : > { %5140 = vrot.lane.b32.xlu0 %v8856_v57, %s11067_s11  ;;  %v5017_v9 = vpop.permute.xlu1 %5016 }
 0x29e   : > { %5077 = vst.msk [vmem:[#allocation4 + $0x18] sm:$0x3] %vm10997_vm10, %v5017_v9  ;;  %vm11001_vm10 = vcmask 1048560   ;;  %7609 = vlog2.f32 %v1929_v8  ;;  %v2887_v8 = vld [vmem:[#allocation3 + $0x59] sm:$0x3] }
 0x29f   : > { %v2809_v13 = vpop.permute.xlu0 %2808  ;;  %4270 = vrot.lane.b32.xlu1 %v4225_v14, %s11069_s26 }
 0x2a0   : > { %2864 = vst.msk [vmem:[#allocation4 + $0x60] sm:$0xff] %vm11108_vm7, %v2809_v13  ;;  %vm11109_vm7 = vcmask 44032   ;;  %v8909_v45 = vpop.eup %7607  ;;  %v1933_v13 = vadd.f32 1.0, %v1932_v3 }
 0x2a1   : > { %4146 = vrot.lane.b32.xlu0 %v8831_v43, %s11066_s10  ;;  %v4629_v27 = vpop.permute.xlu1 %4628  ;;  %1967 = vst.msk [vmem:[#allocation5 + $0x18] sm:$0xf] %vm11109_vm7, %v1963_v33  ;;  %vm11003_vm7 = vcmask 80928   ;;  %v1938_v46 = vadd.f32 1.0, %v8909_v45  ;;  %v1941_v4 = vmul.f32 -0.5, %v8909_v45 }
 0x2a2   : > { %4689 = vst.msk [vmem:[#allocation4 + $0x10] sm:$0x3] %vm4688_vm13, %v4629_v27  ;;  %v1944_v33 = vand.u32 2147483647, %v8909_v45 }
 0x2a3   : > { %v4749_v28 = vpop.permute.xlu0 %4748  ;;  %4813 = vst.msk [vmem:[#allocation4 + $0x10] sm:$0x3] %vm4812_vm5, %v8843_v48  ;;  %4392 = vrot.lane.b32.xlu1 %v4347_v44, %s11072_s21  ;;  %7611 = vlog2.f32 %v1938_v46  ;;  %v1968_v48 = vld [vmem:[#allocation5] ss:$2 sm:$0xff]  ;;  %v1942_v14 = vadd.f32 1.0, %v1941_v4 }
 0x2a4   : > { %4809 = vst.msk [vmem:[#allocation4] sm:$0xff] %vm11001_vm10, %v4749_v28  ;;  %vm11110_vm10 = vcmask 779984   ;;  %v1972_v6 = vmax.f32 %v1968_v48, %v1970_v50  ;;  %v3009_v46 = vld [vmem:[#allocation3 + $0x5a] sm:$0x3] }
 0x2a5   : > { %4811 = vst.msk [vmem:[#allocation4 + $0x8] sm:$0xff] %vm11000_vm8, %v4749_v28  ;;  %4268 = vrot.lane.b32.xlu0 %v8839_v42, %s11069_s26  ;;  %v5139_v31 = vpop.permute.xlu1 %5138  ;;  %vm5074_vm8 = vcmask 130128   ;;  %v1934_v28 = vmul.f32 %v8903_v39, %v1933_v13  ;;  %v1943_v44 = vmul.f32 %v8909_v45, %v1942_v14 }
 0x2a6   : > { %5199 = vst.msk [vmem:[#allocation4 + $0x18] sm:$0x3] %vm11002_vm6, %v5139_v31  ;;  %vm5196_vm6 = vcmask 179328   ;;  %v8921_v59 = vadd.f32 %v8868_v18, %v1972_v6 }
 0x2a7   : > { %v4893_v0 = vpop.permute.xlu0 %4892  ;;  %4514 = vrot.lane.b32.xlu1 %v4469_v60, %s11074_s18 }
 0x2a8   : > { %4953 = vst.msk [vmem:[#allocation4 + $0x8] sm:$0xff] %vm11003_vm7, %v4893_v0  ;;  %vm11111_vm7 = vcmask 829184   ;;  %v1969_v61 = vld [vmem:[#allocation5 + $0x10] ss:$2 sm:$0x3f]  ;;  %v1978_v5 = vmin.f32 %v8921_v59, 20.0  ;;  %v7610_v15 = vpop.eup %7609 }
 0x2a9   : > { %4390 = vrot.lane.b32.xlu0 %v8850_v20, %s11072_s21  ;;  %v4023_v21 = vpop.permute.xlu1 %4022  ;;  %v1971_v51 = vld [vmem:[#allocation5 + $0x11] ss:$2 sm:$0x3f]  ;;  %v1931_v27 = vmul.f32 0.6931472, %v7610_v15 }
 0x2aa   : > { %4081 = vst.msk [vmem:[#allocation4 + $0x30] sm:$0x3] %vm11110_vm10, %v4023_v21  ;;  %v5240_v54 = vld [vmem:[#allocation4 + $0x10] sm:$0x3]  ;;  %v1973_v55 = vmax.f32 %v1969_v61, %v1971_v51  ;;  %vm11005_vm10 = vcmask 179200  }
 0x2ab   : > { %v5015_v34 = vpop.permute.xlu0 %5014  ;;  %3420 = vrot.lane.b32.xlu1 %v3373_v36, %s11035_s24  ;;  %v5238_v53 = vld [vmem:[#allocation4] sm:$0xff]  ;;  %v1980_v22 = vmul.f32 1.442695, %v1978_v5  ;;  %v2765_v0 = vld [vmem:[#allocation3 + $0x58] sm:$0x3] }
 0x2ac   : > { %5075 = vst.msk [vmem:[#allocation4 + $0x8] sm:$0xff] %vm5074_vm8, %v5015_v34  ;;  %v8926_v63 = vadd.f32 %v8868_v18, %v1973_v55  ;;  %v5242_v23 = vpack.c.bf16 %v5240_v54, %v5238_v53  ;;  %v8963_v34 = vld [vmem:[%s10890_s3 + $0x8] sm:$0xff]   ;;  %v9012_v53 = vld [vmem:[%s10890_s3 + $0x20] sm:$0xff]   ;;  %v7495_v54 = vld [vmem:[%s7959_s14 + $0x150] sm:$0xff]  }
 0x2ad   : > { %4512 = vrot.lane.b32.xlu0 %v8856_v57, %s11074_s18  ;;  %v4145_v38 = vpop.permute.xlu1 %4144  ;;  %v5241_v58 = vld [vmem:[#allocation4 + $0x18] sm:$0x3]  ;;  %7613 = vpow2.f32 %v1980_v22  ;;  %v7612_v29 = vpop.eup %7611 }
 0x2ae   : > { %4203 = vst.msk [vmem:[#allocation4 + $0x30] sm:$0x3] %vm11111_vm7, %v4145_v38  ;;  %v1979_v9 = vmin.f32 %v8926_v63, 20.0  ;;  %vm11112_vm7 = vcmask 976784   ;;  %v1940_v21 = vmul.f32 0.6931472, %v7612_v29 }
 0x2af   : > { %v5137_v17 = vpop.permute.xlu0 %5136  ;;  %3542 = vrot.lane.b32.xlu1 %v3495_v41, %s11040_s12  ;;  %v9072_v29 = vld [vmem:[%s10890_s3 + $0x38] sm:$0xff]  }
 0x2b0   : > { %5197 = vst.msk [vmem:[#allocation4 + $0x8] sm:$0xff] %vm5196_vm6, %v5137_v17  ;;  %v1982_v26 = vmul.f32 1.442695, %v1979_v9 }
 0x2b1   : > { %3540 = vrot.lane.b32.xlu0 %v8831_v43, %s11040_s12  ;;  %v4267_v16 = vpop.permute.xlu1 %4266 }
 0x2b2   : > { %4325 = vst.msk [vmem:[#allocation4 + $0x30] sm:$0x3] %vm11009_vm14, %v4267_v16  ;;  %7615 = vpow2.f32 %v1982_v26  ;;  %vm11137_vm14 = vcmask 441728   ;;  %v9155_v26 = vld [vmem:[#allocation3 + $0x63] sm:$0xff] }
 0x2b3   : > { %v4143_v25 = vpop.permute.xlu0 %4142  ;;  %3664 = vrot.lane.b32.xlu1 %v3617_v47, %s11041_s16  ;;  %v8997_v47 = vld [vmem:[%s10890_s3 + $0x18] sm:$0xff]  }
 0x2b4   : > { %4202 = vst.msk [vmem:[#allocation4 + $0x20] sm:$0xff] %vm11007_vm12, %v4143_v25  ;;  %vm1922_vm12 = vcmp.gt.f32.partialorder %v8880_v37, 20.0 }
 0x2b5   : > { %3662 = vrot.lane.b32.xlu0 %v8839_v42, %s11041_s16  ;;  %v4389_v52 = vpop.permute.xlu1 %4388 }
 0x2b6   : > { %4447 = vst.msk [vmem:[#allocation4 + $0x30] sm:$0x3] %vm11006_vm11, %v4389_v52  ;;  %vm1921_vm11 = vcmp.gt.f32.partialorder %v8871_v19, 20.0  ;;  %v3131_v52 = vld [vmem:[#allocation3 + $0x5b] sm:$0x3] }
 0x2b7   : > { %v4265_v24 = vpop.permute.xlu0 %4264  ;;  %v5239_v56 = vld [vmem:[#allocation4 + $0x8] sm:$0xff]  ;;  %3786 = vrot.lane.b32.xlu1 %v3739_v40, %s11082_s8  ;;  %v8987_v45 = vpop.eup %7613  ;;  %v3253_v40 = vld [vmem:[#allocation3 + $0x5c] sm:$0x3] }
 0x2b8   : > { %4324 = vst.msk [vmem:[#allocation4 + $0x20] sm:$0xff] %vm11004_vm3, %v4265_v24  ;;  %v5243_v62 = vpack.c.bf16 %v5241_v58, %v5239_v56  ;;  %vm11113_vm3 = vcmask 933728   ;;  %v1984_v48 = vadd.f32 1.0, %v8987_v45  ;;  %v9028_v56 = vld [vmem:[%s10890_s3 + $0x28] sm:$0xff]   ;;  %v1987_v3 = vmul.f32 -0.5, %v8987_v45 }
 0x2b9   : > { %3784 = vrot.lane.b32.xlu0 %v8850_v20, %s11082_s8  ;;  %v4511_v7 = vpop.permute.xlu1 %4510  ;;  %v1990_v9 = vand.u32 2147483647, %v8987_v45 }
 0x2ba   : > { %6975 = vmatprep.mubr.msk.bf16.mxu1 %vm11005_vm10, %v5243_v62  ;;  %4569 = vst.msk [vmem:[#allocation4 + $0x30] sm:$0x3] %vm11112_vm7, %v4511_v7  ;;  %vm8951_vm7 = vcmp.lt.f32.partialorder %v1944_v33, 0.0004427343  ;;  %vm11116_vm10 = vcmask 533984   ;;  %7617 = vlog2.f32 %v1984_v48  ;;  %v7496_v7 = vld [vmem:[%s7959_s14 + $0x158] sm:$0xff]  }
 0x2bb   : > { %5342 = vmatmul.mubr.bf16.vlgmr.msra.gmra.mrb[0].mxu1 %v5242_v23  ;;  %v4387_v12 = vpop.permute.xlu0 %4386  ;;  %3908 = vrot.lane.b32.xlu1 %v3861_v35, %s11083_s9  ;;  %v1946_v38 = vsel %vm8951_vm7, %v1943_v44, %v1940_v21  ;;  %vm11121_vm7 = vcmask 638528   ;;  %v2279_v23 = vld [vmem:[#allocation3 + $0x59] sm:$0x3]  ;;  %v1988_v14 = vadd.f32 1.0, %v1987_v3  ;;  %v4857_v48 = vld [vmem:[#allocation3 + $0x6a] sm:$0x3] }
 0x2bc   : > { %4446 = vst.msk [vmem:[#allocation4 + $0x20] sm:$0xff] %vm11113_vm3, %v4387_v12  ;;  %5361 = vmatpush1.bf16.msra.mxu1 %v8941_v10  ;;  %vm1936_vm3 = vcmp.lt.f32.partialorder %v1935_v49, 0.0004427343  ;;  %v1948_v17 = vsel %vm1922_vm12, %v8880_v37, %v1946_v38  ;;  %vm11120_vm12 = vcmask 632384   ;;  %v8990_v25 = vpop.eup %7615  ;;  %v9092_v38 = vld [vmem:[%s10890_s3 + $0x40] sm:$0xff]  }
 0x2bd   : > { %3906 = vrot.lane.b32.xlu0 %v8856_v57, %s11083_s9  ;;  %5362 = vmatprep.subr.bf16.mxu1 %v7813_v2  ;;  %v3417_v11 = vpop.permute.xlu1 %3416  ;;  %v1937_v60 = vsel %vm1936_vm3, %v1934_v28, %v1931_v27  ;;  %vm11118_vm3 = vcmask 46080   ;;  %v1993_v6 = vadd.f32 1.0, %v8990_v25  ;;  %v1996_v4 = vmul.f32 -0.5, %v8990_v25  ;;  %v2401_v27 = vld [vmem:[#allocation3 + $0x5a] sm:$0x3] }
 0x2be   : > { %3473 = vst.msk [vmem:[#allocation4 + $0x50] sm:$0x3] %vm11116_vm10, %v3417_v11  ;;  %v1947_v36 = vsel %vm1921_vm11, %v8871_v19, %v1937_v60  ;;  %vm11117_vm10 = vcmask 583184   ;;  %vm11119_vm11 = vcmask 589328   ;;  %v8981_v19 = vld [vmem:[%s10890_s3 + $0x10] sm:$0xff]   ;;  %v1989_v28 = vmul.f32 %v8987_v45, %v1988_v14  ;;  %v7498_v45 = vld [vmem:[%s7959_s14 + $0x168] sm:$0xff]  }
 0x2bf   : > { %v4509_v31 = vpop.permute.xlu0 %4508  ;;  %2814 = vrot.lane.b32.xlu1 %v2765_v0, %s11055_s17  ;;  %1950 = vst.msk [vmem:[#allocation3 + $0x80] sm:$0xff] %vm1347_vm4, %v1947_v36  ;;  %7619 = vlog2.f32 %v1993_v6  ;;  %v1999_v12 = vand.u32 2147483647, %v8990_v25  ;;  %v1997_v22 = vadd.f32 1.0, %v1996_v4  ;;  %v2523_v36 = vld [vmem:[#allocation3 + $0x5b] sm:$0x3] }
 0x2c0   : > { %4568 = vst.msk [vmem:[#allocation4 + $0x20] sm:$0xff] %vm11008_vm2, %v4509_v31  ;;  %5363 = vmatpush1.bf16.msra.mxu1 %v8963_v34  ;;  %vm11134_vm2 = vcmask 392528   ;;  %v3983_v49 = vld [vmem:[#allocation3 + $0x68] sm:$0x3] }
 0x2c1   : > { %2934 = vrot.lane.b32.xlu0 %v8831_v43, %s11042_s25  ;;  %5364 = vmatprep.subr.bf16.mxu1 %v7813_v2  ;;  %v3539_v39 = vpop.permute.xlu1 %3538  ;;  %1951 = vst.msk [vmem:[#allocation3 + $0x88] sm:$0x3f] %vm11118_vm3, %v1948_v17  ;;  %vm11123_vm3 = vcmask 687728   ;;  %v1998_v44 = vmul.f32 %v8990_v25, %v1997_v22  ;;  %v2645_v17 = vld [vmem:[#allocation3 + $0x5c] sm:$0x3] }
 0x2c2   : > { %3595 = vst.msk [vmem:[#allocation4 + $0x50] sm:$0x3] %vm11117_vm10, %v3539_v39  ;;  %vm11122_vm10 = vcmask 681584  }
 0x2c3   : > { %v3537_v41 = vpop.permute.xlu0 %3536  ;;  %2936 = vrot.lane.b32.xlu1 %v2887_v8, %s11042_s25 }
 0x2c4   : > { %3594 = vst.msk [vmem:[#allocation4 + $0x40] sm:$0xff] %vm11119_vm11, %v3537_v41  ;;  %5365 = vmatpush1.bf16.msra.mxu1 %v8981_v19  ;;  %vm11124_vm11 = vcmask 613376   ;;  %v7618_v5 = vpop.eup %7617  ;;  %v4590_v41 = vld [vmem:[#allocation3 + $0x60] sm:$0xff] }
 0x2c5   : > { %3056 = vrot.lane.b32.xlu0 %v8839_v42, %s11043_s29  ;;  %5366 = vmatprep.subr.bf16.mxu1 %v7813_v2  ;;  %v3661_v37 = vpop.permute.xlu1 %3660  ;;  %v1986_v13 = vmul.f32 0.6931472, %v7618_v5  ;;  %v5101_v5 = vld [vmem:[#allocation3 + $0x6c] sm:$0x3] }
 0x2c6   : > { %3717 = vst.msk [vmem:[#allocation4 + $0x50] sm:$0x3] %vm11120_vm12, %v3661_v37  ;;  %v2243_v50 = vld [vmem:[#allocation3 + $0x80] sm:$0xff]  ;;  %7302 = vmatmul.mubr.msk.bf16.gmra.mrb[168].mxu0 %vm11124_vm11, %v7495_v54  ;;  %vm11125_vm12 = vcmask 730784   ;;  %v4713_v37 = vld [vmem:[#allocation3 + $0x69] sm:$0x3] }
 0x2c7   : > { %v3659_v16 = vpop.permute.xlu0 %3658  ;;  %3058 = vrot.lane.b32.xlu1 %v3009_v46, %s11043_s29  ;;  %2264 = vst.msk [vmem:[#allocation4 + $0x100] sm:$0xff] %vm1347_vm4, %v2243_v50  ;;  %7305 = vmatprep.mubr.msk.bf16.mxu0 %vm11047_vm15, %v7791_v1 }
 0x2c8   : > { %3716 = vst.msk [vmem:[#allocation4 + $0x40] sm:$0xff] %vm11121_vm7, %v3659_v16  ;;  %5367 = vmatpush1.bf16.msra.mxu1 %v8997_v47  ;;  %vm11126_vm7 = vcmask 736928  }
 0x2c9   : > { %3178 = vrot.lane.b32.xlu0 %v8850_v20, %s11044_s22  ;;  %5368 = vmatprep.subr.bf16.mxu1 %v7813_v2  ;;  %v3783_v61 = vpop.permute.xlu1 %3782  ;;  %v7620_v35 = vpop.eup %7619 }
 0x2ca   : > { %3839 = vst.msk [vmem:[#allocation4 + $0x50] sm:$0x3] %vm11122_vm10, %v3783_v61  ;;  %vm11127_vm10 = vcmask 287984   ;;  %v1995_v33 = vmul.f32 0.6931472, %v7620_v35  ;;  %v7500_v35 = vld [vmem:[%s7959_s14 + $0x178] sm:$0xff]  }
 0x2cb   : > { %v3781_v51 = vpop.permute.xlu0 %3780  ;;  %3180 = vrot.lane.b32.xlu1 %v3131_v52, %s11044_s22  ;;  %v4979_v61 = vld [vmem:[#allocation3 + $0x6b] sm:$0x3] }
 0x2cc   : > { %3838 = vst.msk [vmem:[#allocation4 + $0x40] sm:$0xff] %vm11123_vm3, %v3781_v51  ;;  %5369 = vmatpush1.bf16.msra.mxu1 %v9012_v53  ;;  %vm11128_vm3 = vcmask 343328   ;;  %v7499_v51 = vld [vmem:[%s7959_s14 + $0x170] sm:$0xff]  }
 0x2cd   : > { %3300 = vrot.lane.b32.xlu0 %v8856_v57, %s11045_s30  ;;  %5370 = vmatprep.subr.bf16.mxu1 %v7813_v2  ;;  %v3905_v55 = vpop.permute.xlu1 %3904 }
 0x2ce   : > { %3961 = vst.msk [vmem:[#allocation4 + $0x50] sm:$0x3] %vm11125_vm12, %v3905_v55  ;;  %7306 = vmatmul.mubr.msk.bf16.gmra.mrb[172].mxu0 %vm11124_vm11, %v7496_v7  ;;  %vm9052_vm12 = vcmp.lt.f32.partialorder %v1990_v9, 0.0004427343  ;;  %vm1977_vm11 = vcmp.gt.f32.partialorder %v8926_v63, 20.0  ;;  %v9142_v9 = vld [vmem:[#allocation3 + $0x62] sm:$0xff] }
 0x2cf   : > { %v3903_v24 = vpop.permute.xlu0 %3902  ;;  %3302 = vrot.lane.b32.xlu1 %v3253_v40, %s11045_s30  ;;  %7309 = vmatprep.mubr.msk.bf16.mxu0 %vm11047_vm15, %v7791_v1  ;;  %v1992_v11 = vsel %vm9052_vm12, %v1989_v28, %v1986_v13  ;;  %vm11138_vm12 = vcmask 41984   ;;  %v4591_v55 = vld [vmem:[#allocation3 + $0x68] sm:$0x3] }
 0x2d0   : > { %3960 = vst.msk [vmem:[#allocation4 + $0x40] sm:$0xff] %vm11126_vm7, %v3903_v24  ;;  %5371 = vmatpush1.bf16.msra.mxu1 %v9028_v56  ;;  %vm9056_vm7 = vcmp.lt.f32.partialorder %v1999_v12, 0.0004427343  ;;  %v1236_v24 = vpop.f32.mrb[140].mxu0  ;;  %v9133_v40 = vld [vmem:[#allocation3 + $0x61] sm:$0xff] }
 0x2d1   : > { %2328 = vrot.lane.b32.xlu0 %v8831_v43, %s11048_s0  ;;  %5372 = vmatprep.subr.bf16.mxu1 %v7813_v2  ;;  %v2811_v58 = vpop.permute.xlu1 %2810  ;;  %v9042_v43 = vld [vmem:[%s10890_s3 + $0x30] sm:$0xff]   ;;  %v2001_v30 = vsel %vm9056_vm7, %v1998_v44, %v1995_v33  ;;  %vm11139_vm7 = vcmask 613376   ;;  %1418 = vst.msk [vmem:[#allocation2 + $0x230] sm:$0xff] %vm1347_vm4, %v1236_v24 }
 0x2d2   : > { %2865 = vst.msk [vmem:[#allocation4 + $0x70] sm:$0x3] %vm11127_vm10, %v2811_v58  ;;  %vm11133_vm10 = vcmask 337184   ;;  %v2003_v60 = vsel %vm1977_vm11, %v8926_v63, %v2001_v30  ;;  %vm11142_vm11 = vcmask 91184   ;;  %v7275_v58 = vpop.f32.mrb[141].mxu0 }
 0x2d3   : > { %v2931_v62 = vpop.permute.xlu0 %2930  ;;  %2330 = vrot.lane.b32.xlu1 %v2279_v23, %s11048_s0  ;;  %v4105_v30 = vld [vmem:[#allocation3 + $0x69] sm:$0x3] }
 0x2d4   : > { %2986 = vst.msk [vmem:[#allocation4 + $0x60] sm:$0xff] %vm11128_vm3, %v2931_v62  ;;  %5373 = vmatpush1.bf16.msra.mxu1 %v9042_v43  ;;  %vm1976_vm3 = vcmp.gt.f32.partialorder %v8921_v59, 20.0  ;;  %v1239_v62 = vpop.f32.mrb[142].mxu0 }
 0x2d5   : > { %2450 = vrot.lane.b32.xlu0 %v8839_v42, %s11049_s19  ;;  %5374 = vmatprep.subr.bf16.mxu1 %v7813_v2  ;;  %v2933_v15 = vpop.permute.xlu1 %2932  ;;  %v2002_v0 = vsel %vm1976_vm3, %v8921_v59, %v1992_v11  ;;  %v7497_v59 = vld [vmem:[%s7959_s14 + $0x160] sm:$0xff]   ;;  %vm11141_vm3 = vmmov %vm11139_vm7  ;;  %1419 = vst.msk [vmem:[#allocation2 + $0x238] sm:$0xff] %vm1347_vm4, %v1239_v62  ;;  %v7276_v3 = vpop.f32.mrb[143].mxu0 }
 0x2d6   : > { %2987 = vst.msk [vmem:[#allocation4 + $0x70] sm:$0x3] %vm11133_vm10, %v2933_v15  ;;  %vm11136_vm10 = vcmask 46080   ;;  %7310 = vmatmul.mubr.msk.bf16.gmra.mrb[176].mxu0 %vm11139_vm7, %v7497_v59  ;;  %vm11146_vm7 = vmmov %vm11141_vm3 }
 0x2d7   : > { %v3053_v42 = vpop.permute.xlu0 %3052  ;;  %2452 = vrot.lane.b32.xlu1 %v2401_v27, %s11049_s19  ;;  %2005 = vst.msk [vmem:[#allocation3 + $0x90] sm:$0xff] %vm1347_vm4, %v2002_v0  ;;  %7313 = vmatprep.mubr.msk.bf16.mxu0 %vm11047_vm15, %v7791_v1  ;;  %v9164_v0 = vld [vmem:[#allocation3 + $0x64] sm:$0xff] }
 0x2d8   : > { %3108 = vst.msk [vmem:[#allocation4 + $0x60] sm:$0xff] %vm11134_vm2, %v3053_v42  ;;  %5375 = vmatpush1.bf16.msra.mxu1 %v9072_v29  ;;  %vm11135_vm2 = vcmask 386384  }
 0x2d9   : > { %2572 = vrot.lane.b32.xlu0 %v8850_v20, %s11033_s13  ;;  %5376 = vmatprep.subr.bf16.mxu1 %v7813_v2  ;;  %v3055_v31 = vpop.permute.xlu1 %3054  ;;  %2006 = vst.msk [vmem:[#allocation3 + $0x98] sm:$0x3f] %vm11136_vm10, %v2003_v60  ;;  %v2244_v20 = vld [vmem:[#allocation3 + $0x88] sm:$0x3]  ;;  %vm11144_vm10 = vcmask 140384   ;;  %v7501_v60 = vld [vmem:[%s7959_s14 + $0x180] sm:$0xff]  }
 0x2da   : > { %3109 = vst.msk [vmem:[#allocation4 + $0x70] sm:$0x3] %vm11135_vm2, %v3055_v31  ;;  %vm11143_vm2 = vcmask 146528  }
 0x2db   : > { %v3175_v21 = vpop.permute.xlu0 %3174  ;;  %2574 = vrot.lane.b32.xlu1 %v2523_v36, %s11033_s13  ;;  %2265 = vst.msk [vmem:[#allocation4 + $0x110] sm:$0x3] %vm11138_vm12, %v2244_v20  ;;  %vm11145_vm12 = vcmask 195728   ;;  %v2007_v36 = vld [vmem:[#allocation2 + $0x230] sm:$0xff] }
 0x2dc   : > { %3230 = vst.msk [vmem:[#allocation4 + $0x60] sm:$0xff] %vm11137_vm14, %v3175_v21  ;;  %5377 = vmatpush1.bf16.msra.mxu1 %v9092_v38  ;;  %vm11140_vm14 = vcmask 97328  }
 0x2dd   : > { %2694 = vrot.lane.b32.xlu0 %v8856_v57, %s11034_s15  ;;  %5378 = vmatprep.subr.bf16.mxu1 %v7813_v2  ;;  %v3177_v63 = vpop.permute.xlu1 %3176 }
 0x2de   : > { %3231 = vst.msk [vmem:[#allocation4 + $0x70] sm:$0x3] %vm3224_vm9, %v3177_v63  ;;  %v2245_v16 = vld [vmem:[#allocation3 + $0x90] sm:$0xff]  ;;  %7314 = vmatmul.mubr.msk.bf16.gmra.mrb[180].mxu0 %vm11141_vm3, %v7498_v45  ;;  %vm11148_vm3 = vcmask 244928   ;;  %v4227_v63 = vld [vmem:[#allocation3 + $0x6a] sm:$0x3] }
 0x2df   : > { %v3297_v39 = vpop.permute.xlu0 %3296  ;;  %2696 = vrot.lane.b32.xlu1 %v2645_v17, %s11034_s15  ;;  %2266 = vst.msk [vmem:[#allocation4 + $0x120] sm:$0xff] %vm1347_vm4, %v2245_v16  ;;  %7317 = vmatprep.mubr.msk.bf16.mxu0 %vm11047_vm15, %v7791_v1 }
 0x2e0   : > { %3352 = vst.msk [vmem:[#allocation4 + $0x60] sm:$0xff] %vm3344_vm0, %v3297_v39  ;;  %5379 = vmatpush1.bf16.msra.mxu1 %v8675_v32  ;;  %v2008_v39 = vld [vmem:[#allocation2 + $0x238] sm:$0xff]  ;;  %v2246_v45 = vld [vmem:[#allocation3 + $0x98] sm:$0x3] }
 0x2e1   : > { %4634 = vrot.lane.b32.xlu0 %v4590_v41, %s11057_s23  ;;  %5515 = vmatprep.subr.bf16.mxu1 %v7813_v2  ;;  %v3299_v57 = vpop.permute.xlu1 %3298  ;;  %v1244_v7 = vpop.f32.mrb[144].mxu0 }
 0x2e2   : > { %3353 = vst.msk [vmem:[#allocation4 + $0x70] sm:$0x3] %vm3346_vm1, %v3299_v57  ;;  %v7279_v12 = vpop.f32.mrb[145].mxu0 }
 0x2e3   : > { %v2325_v8 = vpop.permute.xlu0 %2324  ;;  %4758 = vrot.lane.b32.xlu1 %v4713_v37, %s11058_s20  ;;  %1420 = vst.msk [vmem:[#allocation2 + $0x240] sm:$0xff] %vm1347_vm4, %v1244_v7  ;;  %v1247_v13 = vpop.f32.mrb[146].mxu0 }
 0x2e4   : > { %2378 = vst.msk [vmem:[#allocation4 + $0x80] sm:$0xff] %vm11140_vm14, %v2325_v8  ;;  %vm11147_vm14 = vcmask 189584   ;;  %v7280_v22 = vpop.f32.mrb[147].mxu0 }
 0x2e5   : > { %4028 = vrot.lane.b32.xlu0 %v4590_v41, %s11050_s28  ;;  %v2327_v46 = vpop.permute.xlu1 %2326  ;;  %1421 = vst.msk [vmem:[#allocation2 + $0x248] sm:$0xff] %vm1347_vm4, %v1247_v13 }
 0x2e6   : > { %2379 = vst.msk [vmem:[#allocation4 + $0x90] sm:$0x3] %vm11142_vm11, %v2327_v46  ;;  %7318 = vmatmul.mubr.msk.bf16.gmra.mrb[184].mxu0 %vm11146_vm7, %v7499_v51  ;;  %vm11149_vm11 = vcmask 238784  }
 0x2e7   : > { %v2447_v25 = vpop.permute.xlu0 %2446  ;;  %4902 = vrot.lane.b32.xlu1 %v4857_v48, %s11063_s27  ;;  %7321 = vmatprep.mubr.msk.bf16.mxu0 %vm11047_vm15, %v7791_v1  ;;  %v4349_v48 = vld [vmem:[#allocation3 + $0x6b] sm:$0x3] }
 0x2e8   : > { %2500 = vst.msk [vmem:[#allocation4 + $0x80] sm:$0xff] %vm11143_vm2, %v2447_v25  ;;  %vm11150_vm2 = vcmask 1032128  }
 0x2e9   : > { %3422 = vrot.lane.b32.xlu0 %v4590_v41, %s11035_s24  ;;  %v2449_v50 = vpop.permute.xlu1 %2448  ;;  %v1252_v33 = vpop.f32.mrb[148].mxu0 }
 0x2ea   : > { %2501 = vst.msk [vmem:[#allocation4 + $0x90] sm:$0x3] %vm11144_vm10, %v2449_v50  ;;  %vm11151_vm10 = vmmov %vm11146_vm7  ;;  %vm11153_vm7 = vcmask 786128   ;;  %v7283_v42 = vpop.f32.mrb[149].mxu0 }
 0x2eb   : > { %v2569_v6 = vpop.permute.xlu0 %2568  ;;  %5024 = vrot.lane.b32.xlu1 %v4979_v61, %s11065_s1  ;;  %1422 = vst.msk [vmem:[#allocation2 + $0x250] sm:$0xff] %vm1347_vm4, %v1252_v33  ;;  %v1255_v27 = vpop.f32.mrb[150].mxu0 }
 0x2ec   : > { %2622 = vst.msk [vmem:[#allocation4 + $0x80] sm:$0xff] %vm11145_vm12, %v2569_v6  ;;  %vm11152_vm12 = vcmask 25600   ;;  %v7284_v44 = vpop.f32.mrb[151].mxu0  ;;  %v2010_v8 = vld [vmem:[#allocation2 + $0x248] sm:$0xf] }
 0x2ed   : > { %2816 = vrot.lane.b32.xlu0 %v4590_v41, %s11055_s17  ;;  %v2571_v52 = vpop.permute.xlu1 %2570  ;;  %1423 = vst.msk [vmem:[#allocation2 + $0x258] sm:$0xff] %vm1347_vm4, %v1255_v27  ;;  %v2009_v41 = vld [vmem:[#allocation2 + $0x240] sm:$0xff] }
 0x2ee   : > { %2623 = vst.msk [vmem:[#allocation4 + $0x90] sm:$0x3] %vm11147_vm14, %v2571_v52  ;;  %7322 = vmatmul.mubr.msk.bf16.gmra.mrb[188].mxu0 %vm11151_vm10, %v7500_v35  ;;  %vm11154_vm14 = vcmask 74784  }
 0x2ef   : > { %v2691_v54 = vpop.permute.xlu0 %2690  ;;  %4636 = vrot.lane.b32.xlu1 %v4591_v55, %s11057_s23  ;;  %7325 = vmatprep.mubr.msk.bf16.mxu0 %vm11047_vm15, %v7791_v1  ;;  %v4471_v55 = vld [vmem:[#allocation3 + $0x6c] sm:$0x3] }
 0x2f0   : > { %2744 = vst.msk [vmem:[#allocation4 + $0x80] sm:$0xff] %vm11148_vm3, %v2691_v54  ;;  %vm11155_vm3 = vcmask 540128  }
 0x2f1   : > { %4756 = vrot.lane.b32.xlu0 %v9133_v40, %s11058_s20  ;;  %v2693_v23 = vpop.permute.xlu1 %2692  ;;  %v1260_v31 = vpop.f32.mrb[152].mxu0 }
 0x2f2   : > { %2745 = vst.msk [vmem:[#allocation4 + $0x90] sm:$0x3] %vm11149_vm11, %v2693_v23  ;;  %v7287_v21 = vpop.f32.mrb[153].mxu0  ;;  %vm11156_vm11 = vmmov %vm11151_vm10  ;;  %v2011_v17 = vld [vmem:[#allocation2 + $0x24c] sm:$0xff]  ;;  %vm11158_vm10 = vcmask 294128  }
 0x2f3   : > { %v4631_v4 = vpop.permute.xlu0 %4630  ;;  %5146 = vrot.lane.b32.xlu1 %v5101_v5, %s11067_s11  ;;  %1424 = vst.msk [vmem:[#allocation2 + $0x260] sm:$0xff] %vm1347_vm4, %v1260_v31  ;;  %v2015_v57 = vmax.f32 %v2007_v36, %v2011_v17  ;;  %v1263_v24 = vpop.f32.mrb[154].mxu0  ;;  %v3375_v5 = vld [vmem:[#allocation3 + $0x68] sm:$0x3] }
 0x2f4   : > { %4690 = vst.msk [vmem:[#allocation4 + $0x20] sm:$0xff] %vm11150_vm2, %v4631_v4  ;;  %vm11157_vm2 = vcmask 123984   ;;  %v2012_v37 = vld [vmem:[#allocation2 + $0x254] sm:$0xff]  ;;  %v7288_v58 = vpop.f32.mrb[155].mxu0 }
 0x2f5   : > { %4900 = vrot.lane.b32.xlu0 %v9142_v9, %s11063_s27  ;;  %v4755_v14 = vpop.permute.xlu1 %4754  ;;  %v2016_v46 = vmax.f32 %v2008_v39, %v2012_v37  ;;  %2019 = vst.msk [vmem:[#allocation5] sm:$0xff] %vm1347_vm4, %v2015_v57  ;;  %1425 = vst.msk [vmem:[#allocation2 + $0x268] sm:$0xff] %vm1347_vm4, %v1263_v24 }
 0x2f6   : > { %4819 = vst.msk [vmem:[#allocation4 + $0x38] sm:$0x3] %vm11152_vm12, %v4755_v14  ;;  %7326 = vmatmul.mubr.msk.bf16.gmra.mrb[192].mxu0 %vm11156_vm11, %v7501_v60  ;;  %vm11159_vm12 = vcmask 41984   ;;  %vm11163_vm11 = vcmask 173184   ;;  %v3741_v60 = vld [vmem:[#allocation3 + $0x6b] sm:$0x3] }
 0x2f7   : > { %v4025_v15 = vpop.permute.xlu0 %4024  ;;  %4030 = vrot.lane.b32.xlu1 %v3983_v49, %s11050_s28  ;;  %2267 = vst.msk [vmem:[#allocation4 + $0x130] sm:$0x3] %vm11159_vm12, %v2246_v45  ;;  %vm11166_vm12 = vcmask 829184  }
 0x2f8   : > { %4082 = vst.msk [vmem:[#allocation4 + $0x40] sm:$0xff] %vm11153_vm7, %v4025_v15  ;;  %vm11160_vm7 = vcmask 1048560   ;;  %v3497_v15 = vld [vmem:[#allocation3 + $0x69] sm:$0x3] }
 0x2f9   : > { %5022 = vrot.lane.b32.xlu0 %v9155_v26, %s11065_s1  ;;  %v4899_v28 = vpop.permute.xlu1 %4898  ;;  %2020 = vst.msk [vmem:[#allocation5 + $0x8] sm:$0xff] %vm1347_vm4, %v2016_v46  ;;  %v1268_v62 = vpop.f32.mrb[156].mxu0 }
 0x2fa   : > { %4957 = vst.msk [vmem:[#allocation4 + $0x38] sm:$0x3] %vm11154_vm14, %v4899_v28  ;;  %v2013_v50 = vld [vmem:[#allocation2 + $0x25c] sm:$0xff]  ;;  %v2014_v6 = vld [vmem:[#allocation2 + $0x264] sm:$0xf]  ;;  %vm11161_vm14 = vcmask 31744  }
 0x2fb   : > { %v3419_v11 = vpop.permute.xlu0 %3418  ;;  %4152 = vrot.lane.b32.xlu1 %v4105_v30, %s11066_s10  ;;  %v2017_v61 = vmax.f32 %v2009_v41, %v2013_v50  ;;  %v2018_v51 = vmax.f32 %v2010_v8, %v2014_v6  ;;  %1426 = vst.msk [vmem:[#allocation2 + $0x270] sm:$0xff] %vm1347_vm4, %v1268_v62  ;;  %v7291_v3 = vpop.f32.mrb[157].mxu0 }
 0x2fc   : > { %3474 = vst.msk [vmem:[#allocation4 + $0x60] sm:$0xff] %vm11155_vm3, %v3419_v11  ;;  %vm11162_vm3 = vcmask 44032   ;;  %v1271_v7 = vpop.f32.mrb[158].mxu0  ;;  %v3619_v11 = vld [vmem:[#allocation3 + $0x6a] sm:$0x3] }
 0x2fd   : > { %5144 = vrot.lane.b32.xlu0 %v9164_v0, %s11067_s11  ;;  %v5021_v20 = vpop.permute.xlu1 %5020  ;;  %2021 = vst.msk [vmem:[#allocation5 + $0x10] sm:$0xff] %vm1347_vm4, %v2017_v61  ;;  %1427 = vst.msk [vmem:[#allocation2 + $0x278] sm:$0xff] %vm1347_vm4, %v1271_v7  ;;  %v7292_v12 = vpop.f32.mrb[159].mxu0  ;;  %v3863_v61 = vld [vmem:[#allocation3 + $0x6c] sm:$0x3] }
 0x2fe   : > { %5079 = vst.msk [vmem:[#allocation4 + $0x38] sm:$0x3] %vm11157_vm2, %v5021_v20  ;;  %vm11164_vm2 = vcmask 80928   ;;  %v2767_v7 = vld [vmem:[#allocation3 + $0x68] sm:$0x3] }
 0x2ff   : > { %v2813_v59 = vpop.permute.xlu0 %2812  ;;  %4274 = vrot.lane.b32.xlu1 %v4227_v63, %s11069_s26  ;;  %2022 = vst.msk [vmem:[#allocation5 + $0x18] sm:$0xf] %vm11162_vm3, %v2018_v51  ;;  %v2062_v63 = vld [vmem:[#allocation2 + $0x268] sm:$0xff]  ;;  %vm11169_vm3 = vcmask 927584  }
 0x300   : > { %2866 = vst.msk [vmem:[#allocation4 + $0x80] sm:$0xff] %vm11158_vm10, %v2813_v59  ;;  %vm11165_vm10 = vcmask 779984   ;;  %v2023_v24 = vld [vmem:[#allocation5] ss:$2 sm:$0xff]  ;;  %v2025_v62 = vld [vmem:[#allocation5 + $0x1] ss:$2 sm:$0xff] }
 0x301   : > { %4150 = vrot.lane.b32.xlu0 %v9133_v40, %s11066_s10  ;;  %v4633_v16 = vpop.permute.xlu1 %4632  ;;  %v1276_v35 = vpop.f32.mrb[160].mxu0 }
 0x302   : > { %4691 = vst.msk [vmem:[#allocation4 + $0x30] sm:$0x3] %vm4688_vm13, %v4633_v16  ;;  %v2063_v41 = vld [vmem:[#allocation2 + $0x270] sm:$0xff] }
 0x303   : > { %v4753_v25 = vpop.permute.xlu0 %4752  ;;  %4818 = vst.msk [vmem:[#allocation4 + $0x30] sm:$0x3] %vm4812_vm5, %v4755_v14  ;;  %4396 = vrot.lane.b32.xlu1 %v4349_v48, %s11072_s21  ;;  %v7295_v14 = vpop.f32.mrb[161].mxu0 }
 0x304   : > { %4816 = vst.msk [vmem:[#allocation4 + $0x20] sm:$0xff] %vm11160_vm7, %v4753_v25  ;;  %v1279_v49 = vpop.f32.mrb[162].mxu0  ;;  %vm11167_vm7 = vcmask 878384   ;;  %v2064_v45 = vld [vmem:[#allocation2 + $0x278] sm:$0xff] }
 0x305   : > { %4817 = vst.msk [vmem:[#allocation4 + $0x28] sm:$0xff] %vm11161_vm14, %v4753_v25  ;;  %4272 = vrot.lane.b32.xlu0 %v9142_v9, %s11069_s26  ;;  %v5143_v52 = vpop.permute.xlu1 %5142  ;;  %v7296_v33 = vpop.f32.mrb[163].mxu0  ;;  %vm11168_vm14 = vcmask 835328  }
 0x306   : > { %5201 = vst.msk [vmem:[#allocation4 + $0x38] sm:$0x3] %vm11163_vm11, %v5143_v52  ;;  %vm11170_vm11 = vcmask 884528   ;;  %v2024_v58 = vld [vmem:[#allocation5 + $0x10] ss:$2 sm:$0x3f] }
 0x307   : > { %v4897_v54 = vpop.permute.xlu0 %4896  ;;  %4518 = vrot.lane.b32.xlu1 %v4471_v55, %s11074_s18  ;;  %1428 = vst.msk [vmem:[#allocation2 + $0x280] sm:$0xff] %vm1347_vm4, %v1276_v35  ;;  %1429 = vst.msk [vmem:[#allocation2 + $0x288] sm:$0xff] %vm1347_vm4, %v1279_v49 }
 0x308   : > { %4956 = vst.msk [vmem:[#allocation4 + $0x28] sm:$0xff] %vm11164_vm2, %v4897_v54  ;;  %vm11171_vm2 = vcmask 179200  }
 0x309   : > { %4394 = vrot.lane.b32.xlu0 %v9155_v26, %s11072_s21  ;;  %v4027_v23 = vpop.permute.xlu1 %4026  ;;  %v1284_v42 = vpop.f32.mrb[164].mxu0 }
 0x30a   : > { %4083 = vst.msk [vmem:[#allocation4 + $0x50] sm:$0x3] %vm11165_vm10, %v4027_v23  ;;  %v7299_v28 = vpop.f32.mrb[165].mxu0  ;;  %v5353_v59 = vld [vmem:[#allocation4 + $0x30] sm:$0x3]  ;;  %vm11172_vm10 = vcmask 976784  }
 0x30b   : > { %v5019_v4 = vpop.permute.xlu0 %5018  ;;  %3424 = vrot.lane.b32.xlu1 %v3375_v5, %s11035_s24  ;;  %1430 = vst.msk [vmem:[#allocation2 + $0x290] sm:$0xff] %vm1347_vm4, %v1284_v42  ;;  %v1287_v30 = vpop.f32.mrb[166].mxu0  ;;  %v5351_v21 = vld [vmem:[#allocation4 + $0x20] sm:$0xff]  ;;  %v2026_v23 = vld [vmem:[#allocation5 + $0x11] ss:$2 sm:$0x3f] }
 0x30c   : > { %5078 = vst.msk [vmem:[#allocation4 + $0x28] sm:$0xff] %vm5074_vm8, %v5019_v4  ;;  %v7300_v31 = vpop.f32.mrb[167].mxu0  ;;  %v5355_v37 = vpack.c.bf16 %v5353_v59, %v5351_v21  ;;  %v2027_v4 = vmax.f32 %v2023_v24, %v2025_v62  ;;  %v2028_v5 = vmax.f32 %v2024_v58, %v2026_v23  ;;  %v3011_v42 = vld [vmem:[#allocation3 + $0x6a] sm:$0x3]  ;;  %v3255_v28 = vld [vmem:[#allocation3 + $0x6c] sm:$0x3] }
 0x30d   : > { %4516 = vrot.lane.b32.xlu0 %v9164_v0, %s11074_s18  ;;  %v4149_v13 = vpop.permute.xlu1 %4148  ;;  %1431 = vst.msk [vmem:[#allocation2 + $0x298] sm:$0xff] %vm1347_vm4, %v1287_v30  ;;  %v5354_v20 = vld [vmem:[#allocation4 + $0x38] sm:$0x3] }
 0x30e   : > { %4205 = vst.msk [vmem:[#allocation4 + $0x50] sm:$0x3] %vm11166_vm12, %v4149_v13  ;;  %v2066_v57 = vld [vmem:[#allocation2 + $0x284] sm:$0xff]  ;;  %v2065_v16 = vld [vmem:[#allocation2 + $0x280] sm:$0xf]  ;;  %vm11173_vm12 = vcmask 933728   ;;  %v9237_v12 = vadd.f32 %v8868_v18, %v2027_v4  ;;  %v9240_v35 = vadd.f32 %v8868_v18, %v2028_v5 }
 0x30f   : > { %v5141_v22 = vpop.permute.xlu0 %5140  ;;  %3546 = vrot.lane.b32.xlu1 %v3497_v15, %s11040_s12  ;;  %v2070_v48 = vmax.f32 %v2062_v63, %v2066_v57  ;;  %v4715_v21 = vld [vmem:[#allocation3 + $0x79] sm:$0x3] }
 0x310   : > { %5200 = vst.msk [vmem:[#allocation4 + $0x28] sm:$0xff] %vm5196_vm6, %v5141_v22  ;;  %v2033_v14 = vmin.f32 %v9237_v12, 20.0  ;;  %v2034_v22 = vmin.f32 %v9240_v35, 20.0  ;;  %v4859_v57 = vld [vmem:[#allocation3 + $0x7a] sm:$0x3] }
 0x311   : > { %3544 = vrot.lane.b32.xlu0 %v9133_v40, %s11040_s12  ;;  %v4271_v27 = vpop.permute.xlu1 %4270  ;;  %2074 = vst.msk [vmem:[#allocation5] sm:$0xff] %vm1347_vm4, %v2070_v48 }
 0x312   : > { %4327 = vst.msk [vmem:[#allocation4 + $0x50] sm:$0x3] %vm11167_vm7, %v4271_v27  ;;  %v2067_v46 = vld [vmem:[#allocation2 + $0x28c] sm:$0xff]  ;;  %vm11174_vm7 = vcmask 44032   ;;  %v2035_v18 = vmul.f32 1.442695, %v2033_v14 }
 0x313   : > { %v4147_v44 = vpop.permute.xlu0 %4146  ;;  %3668 = vrot.lane.b32.xlu1 %v3619_v11, %s11041_s16  ;;  %v2071_v50 = vmax.f32 %v2063_v41, %v2067_v46  ;;  %v2037_v49 = vmul.f32 1.442695, %v2034_v22  ;;  %v3133_v27 = vld [vmem:[#allocation3 + $0x6b] sm:$0x3]  ;;  %v4592_v11 = vld [vmem:[#allocation3 + $0x70] sm:$0xff] }
 0x314   : > { %4204 = vst.msk [vmem:[#allocation4 + $0x40] sm:$0xff] %vm11168_vm14, %v4147_v44  ;;  %v2068_v51 = vld [vmem:[#allocation2 + $0x294] sm:$0xff]  ;;  %v2069_v52 = vld [vmem:[#allocation2 + $0x29c] sm:$0xf]  ;;  %vm11175_vm14 = vcmask 533984   ;;  %7621 = vpow2.f32 %v2035_v18  ;;  %v9323_v22 = vld [vmem:[#allocation3 + $0x72] sm:$0xff] }
 0x315   : > { %3666 = vrot.lane.b32.xlu0 %v9142_v9, %s11041_s16  ;;  %v4393_v36 = vpop.permute.xlu1 %4392  ;;  %v2072_v54 = vmax.f32 %v2064_v45, %v2068_v51  ;;  %v2073_v55 = vmax.f32 %v2065_v16, %v2069_v52  ;;  %2075 = vst.msk [vmem:[#allocation5 + $0x8] sm:$0xff] %vm1347_vm4, %v2071_v50  ;;  %7623 = vpow2.f32 %v2037_v49  ;;  %v4981_v50 = vld [vmem:[#allocation3 + $0x7b] sm:$0x3] }
 0x316   : > { %4449 = vst.msk [vmem:[#allocation4 + $0x50] sm:$0x3] %vm11169_vm3, %v4393_v36  ;;  %vm11176_vm3 = vcmask 982928  }
 0x317   : > { %v4269_v39 = vpop.permute.xlu0 %4268  ;;  %v5352_v17 = vld [vmem:[#allocation4 + $0x28] sm:$0xff]  ;;  %3790 = vrot.lane.b32.xlu1 %v3741_v60, %s11082_s8  ;;  %2076 = vst.msk [vmem:[#allocation5 + $0x10] sm:$0xff] %vm1347_vm4, %v2072_v54 }
 0x318   : > { %4326 = vst.msk [vmem:[#allocation4 + $0x40] sm:$0xff] %vm11170_vm11, %v4269_v39  ;;  %v5356_v8 = vpack.c.bf16 %v5354_v20, %v5352_v17  ;;  %vm11177_vm11 = vcmask 583184  }
 0x319   : > { %3788 = vrot.lane.b32.xlu0 %v9155_v26, %s11082_s8  ;;  %v4515_v25 = vpop.permute.xlu1 %4514  ;;  %2077 = vst.msk [vmem:[#allocation5 + $0x18] sm:$0xf] %vm11174_vm7, %v2073_v55  ;;  %vm11181_vm7 = vcmask 681584  }
 0x31a   : > { %6976 = vmatprep.mubr.msk.bf16.mxu1 %vm11171_vm2, %v5356_v8  ;;  %4571 = vst.msk [vmem:[#allocation4 + $0x50] sm:$0x3] %vm11172_vm10, %v4515_v25  ;;  %vm11178_vm2 = vcmask 589328   ;;  %vm11179_vm10 = vcmask 632384  }
 0x31b   : > { %5393 = vmatmul.mubr.bf16.vlgmr.msra.gmra.mrb[4].mxu1 %v5355_v37  ;;  %v4391_v6 = vpop.permute.xlu0 %4390  ;;  %3912 = vrot.lane.b32.xlu1 %v3863_v61, %s11083_s9 }
 0x31c   : > { %4448 = vst.msk [vmem:[#allocation4 + $0x40] sm:$0xff] %vm11173_vm12, %v4391_v6  ;;  %5516 = vmatpush1.bf16.msra.mxu1 %v8941_v10  ;;  %vm11180_vm12 = vcmask 638528   ;;  %v2080_v20 = vld [vmem:[#allocation5 + $0x1] ss:$2 sm:$0xff]  ;;  %v9300_v6 = vld [vmem:[#allocation3 + $0x71] sm:$0xff] }
 0x31d   : > { %3910 = vrot.lane.b32.xlu0 %v9164_v0, %s11083_s9  ;;  %5517 = vmatprep.subr.bf16.mxu1 %v7813_v2  ;;  %v3421_v3 = vpop.permute.xlu1 %3420 }
 0x31e   : > { %3475 = vst.msk [vmem:[#allocation4 + $0x70] sm:$0x3] %vm11175_vm14, %v3421_v3  ;;  %vm11182_vm14 = vcmask 687728   ;;  %v9269_v44 = vpop.eup %7621 }
 0x31f   : > { %v4513_v10 = vpop.permute.xlu0 %4512  ;;  %2818 = vrot.lane.b32.xlu1 %v2767_v7, %s11055_s17  ;;  %v2042_v45 = vmul.f32 -0.5, %v9269_v44  ;;  %v2045_v52 = vand.u32 2147483647, %v9269_v44 }
 0x320   : > { %4570 = vst.msk [vmem:[#allocation4 + $0x40] sm:$0xff] %vm11176_vm3, %v4513_v10  ;;  %5518 = vmatpush1.bf16.msra.mxu1 %v8963_v34  ;;  %v2889_v34 = vld [vmem:[#allocation3 + $0x69] sm:$0x3]  ;;  %vm11183_vm3 = vcmask 730784  }
 0x321   : > { %2938 = vrot.lane.b32.xlu0 %v9133_v40, %s11042_s25  ;;  %5519 = vmatprep.subr.bf16.mxu1 %v7813_v2  ;;  %v3543_v13 = vpop.permute.xlu1 %3542  ;;  %v2079_v36 = vld [vmem:[#allocation5 + $0x10] ss:$2 sm:$0x3f]  ;;  %v2081_v59 = vld [vmem:[#allocation5 + $0x11] ss:$2 sm:$0x3f] }
 0x322   : > { %3597 = vst.msk [vmem:[#allocation4 + $0x70] sm:$0x3] %vm11177_vm11, %v3543_v13  ;;  %vm11184_vm11 = vcmask 736928   ;;  %v2083_v17 = vmax.f32 %v2079_v36, %v2081_v59  ;;  %v2043_v61 = vadd.f32 1.0, %v2042_v45  ;;  %v4593_v13 = vld [vmem:[#allocation3 + $0x78] sm:$0x3] }
 0x323   : > { %v3541_v15 = vpop.permute.xlu0 %3540  ;;  %2940 = vrot.lane.b32.xlu1 %v2889_v34, %s11042_s25  ;;  %v4351_v59 = vld [vmem:[#allocation3 + $0x7b] sm:$0x3] }
 0x324   : > { %3596 = vst.msk [vmem:[#allocation4 + $0x60] sm:$0xff] %vm11178_vm2, %v3541_v15  ;;  %5520 = vmatpush1.bf16.msra.mxu1 %v8981_v19  ;;  %vm11185_vm2 = vcmask 287984   ;;  %v2044_v58 = vmul.f32 %v9269_v44, %v2043_v61 }
 0x325   : > { %3060 = vrot.lane.b32.xlu0 %v9142_v9, %s11043_s29  ;;  %5521 = vmatprep.subr.bf16.mxu1 %v7813_v2  ;;  %v3665_v40 = vpop.permute.xlu1 %3664 }
 0x326   : > { %3719 = vst.msk [vmem:[#allocation4 + $0x70] sm:$0x3] %vm11179_vm10, %v3665_v40  ;;  %vm11186_vm10 = vcmask 343328  }
 0x327   : > { %v3663_v33 = vpop.permute.xlu0 %3662  ;;  %3062 = vrot.lane.b32.xlu1 %v3011_v42, %s11043_s29  ;;  %v5103_v42 = vld [vmem:[#allocation3 + $0x7c] sm:$0x3] }
 0x328   : > { %3718 = vst.msk [vmem:[#allocation4 + $0x60] sm:$0xff] %vm11180_vm12, %v3663_v33  ;;  %5522 = vmatpush1.bf16.msra.mxu1 %v8997_v47  ;;  %vm11187_vm12 = vcmask 337184  }
 0x329   : > { %3182 = vrot.lane.b32.xlu0 %v9155_v26, %s11044_s22  ;;  %5523 = vmatprep.subr.bf16.mxu1 %v7813_v2  ;;  %v3787_v19 = vpop.permute.xlu1 %3786 }
 0x32a   : > { %3841 = vst.msk [vmem:[#allocation4 + $0x70] sm:$0x3] %vm11181_vm7, %v3787_v19  ;;  %vm11188_vm7 = vcmask 392528   ;;  %v9340_v19 = vld [vmem:[#allocation3 + $0x73] sm:$0xff] }
 0x32b   : > { %v3785_v9 = vpop.permute.xlu0 %3784  ;;  %3184 = vrot.lane.b32.xlu1 %v3133_v27, %s11044_s22 }
 0x32c   : > { %3840 = vst.msk [vmem:[#allocation4 + $0x60] sm:$0xff] %vm11182_vm14, %v3785_v9  ;;  %5524 = vmatpush1.bf16.msra.mxu1 %v9012_v53  ;;  %v7624_v53 = vpop.eup %7623  ;;  %vm11189_vm14 = vcmask 386384   ;;  %v3985_v9 = vld [vmem:[#allocation3 + $0x78] sm:$0x3] }
 0x32d   : > { %3304 = vrot.lane.b32.xlu0 %v9164_v0, %s11045_s30  ;;  %5525 = vmatprep.subr.bf16.mxu1 %v7813_v2  ;;  %v3909_v47 = vpop.permute.xlu1 %3908  ;;  %v2039_v0 = vadd.f32 1.0, %v9269_v44  ;;  %v2048_v31 = vadd.f32 1.0, %v7624_v53  ;;  %v2051_v16 = vmul.f32 -0.5, %v7624_v53  ;;  %v2054_v54 = vand.u32 2147483647, %v7624_v53 }
 0x32e   : > { %3963 = vst.msk [vmem:[#allocation4 + $0x70] sm:$0x3] %vm11183_vm3, %v3909_v47  ;;  %vm11190_vm3 = vcmask 441728   ;;  %v9347_v47 = vld [vmem:[#allocation3 + $0x74] sm:$0xff] }
 0x32f   : > { %v3907_v26 = vpop.permute.xlu0 %3906  ;;  %3306 = vrot.lane.b32.xlu1 %v3255_v28, %s11045_s30  ;;  %7625 = vlog2.f32 %v2039_v0  ;;  %v2052_v51 = vadd.f32 1.0, %v2051_v16  ;;  %v4107_v0 = vld [vmem:[#allocation3 + $0x79] sm:$0x3]  ;;  %v4473_v16 = vld [vmem:[#allocation3 + $0x7c] sm:$0x3] }
 0x330   : > { %3962 = vst.msk [vmem:[#allocation4 + $0x60] sm:$0xff] %vm11184_vm11, %v3907_v26  ;;  %5526 = vmatpush1.bf16.msra.mxu1 %v9028_v56  ;;  %7627 = vlog2.f32 %v2048_v31  ;;  %v2078_v56 = vld [vmem:[#allocation5] ss:$2 sm:$0xff]  ;;  %vm9310_vm11 = vcmp.lt.f32.partialorder %v2045_v52, 0.0004427343 }
 0x331   : > { %4638 = vrot.lane.b32.xlu0 %v4592_v11, %s11057_s23  ;;  %5527 = vmatprep.subr.bf16.mxu1 %v7813_v2  ;;  %v2815_v30 = vpop.permute.xlu1 %2814  ;;  %v2082_v39 = vmax.f32 %v2078_v56, %v2080_v20  ;;  %v2053_v62 = vmul.f32 %v7624_v53, %v2052_v51 }
 0x332   : > { %2867 = vst.msk [vmem:[#allocation4 + $0x90] sm:$0x3] %vm11185_vm2, %v2815_v30  ;;  %vm9314_vm2 = vcmp.lt.f32.partialorder %v2054_v54, 0.0004427343 }
 0x333   : > { %v2935_v60 = vpop.permute.xlu0 %2934  ;;  %4762 = vrot.lane.b32.xlu1 %v4715_v21, %s11058_s20 }
 0x334   : > { %2988 = vst.msk [vmem:[#allocation4 + $0x80] sm:$0xff] %vm11186_vm10, %v2935_v60  ;;  %5528 = vmatpush1.bf16.msra.mxu1 %v9042_v43  ;;  %v7692_v43 = vld [vmem:[%s10889_s2] ss:$0 sm:$0xff]  ;;  %vm2031_vm10 = vcmp.gt.f32.partialorder %v9237_v12, 20.0  ;;  %v4229_v60 = vld [vmem:[#allocation3 + $0x7a] sm:$0x3] }
 0x335   : > { %4032 = vrot.lane.b32.xlu0 %v4592_v11, %s11050_s28  ;;  %5529 = vmatprep.subr.bf16.mxu1 %v7813_v2  ;;  %v2937_v63 = vpop.permute.xlu1 %2936  ;;  %v9290_v8 = vadd.f32 %v7692_v43, %v2082_v39  ;;  %v9292_v37 = vadd.f32 %v7692_v43, %v2083_v17 }
 0x336   : > { %2989 = vst.msk [vmem:[#allocation4 + $0x90] sm:$0x3] %vm11187_vm12, %v2937_v63  ;;  %vm2032_vm12 = vcmp.gt.f32.partialorder %v9240_v35, 20.0 }
 0x337   : > { %v3057_v41 = vpop.permute.xlu0 %3056  ;;  %4906 = vrot.lane.b32.xlu1 %v4859_v57, %s11063_s27  ;;  %v2088_v25 = vmin.f32 %v9290_v8, 20.0 }
 0x338   : > { %3110 = vst.msk [vmem:[#allocation4 + $0x80] sm:$0xff] %vm11188_vm7, %v3057_v41  ;;  %5530 = vmatpush1.bf16.msra.mxu1 %v9072_v29  ;;  %v2089_v29 = vmin.f32 %v9292_v37, 20.0  ;;  %vm11195_vm7 = vcmask 46080  }
 0x339   : > { %3426 = vrot.lane.b32.xlu0 %v4592_v11, %s11035_s24  ;;  %5531 = vmatprep.subr.bf16.mxu1 %v7813_v2  ;;  %v3059_v46 = vpop.permute.xlu1 %3058  ;;  %v2090_v55 = vmul.f32 1.442695, %v2088_v25  ;;  %v7626_v24 = vpop.eup %7625 }
 0x33a   : > { %3111 = vst.msk [vmem:[#allocation4 + $0x90] sm:$0x3] %vm11189_vm14, %v3059_v46  ;;  %v2092_v23 = vmul.f32 1.442695, %v2089_v29  ;;  %v7628_v3 = vpop.eup %7627  ;;  %v2041_v5 = vmul.f32 0.6931472, %v7626_v24 }
 0x33b   : > { %v3179_v48 = vpop.permute.xlu0 %3178  ;;  %5028 = vrot.lane.b32.xlu1 %v4981_v50, %s11065_s1  ;;  %7629 = vpow2.f32 %v2090_v55  ;;  %v2050_v14 = vmul.f32 0.6931472, %v7628_v3  ;;  %vm11196_vm14 = vcmask 97328  }
 0x33c   : > { %3232 = vst.msk [vmem:[#allocation4 + $0x80] sm:$0xff] %vm11190_vm3, %v3179_v48  ;;  %5532 = vmatpush1.bf16.msra.mxu1 %v9092_v38  ;;  %7631 = vpow2.f32 %v2092_v23  ;;  %v2047_v15 = vsel %vm9310_vm11, %v2044_v58, %v2041_v5  ;;  %vm11197_vm3 = vcmask 91184   ;;  %vm11198_vm11 = vcmask 146528   ;;  %v3377_v58 = vld [vmem:[#allocation3 + $0x78] sm:$0x3] }
 0x33d   : > { %4760 = vrot.lane.b32.xlu0 %v9300_v6, %s11058_s20  ;;  %5533 = vmatprep.subr.bf16.mxu1 %v7813_v2  ;;  %v3181_v4 = vpop.permute.xlu1 %3180  ;;  %v2056_v34 = vsel %vm9314_vm2, %v2053_v62, %v2050_v14  ;;  %v2057_v18 = vsel %vm2031_vm10, %v9237_v12, %v2047_v15  ;;  %vm11199_vm2 = vcmask 140384   ;;  %vm11200_vm10 = vcmask 195728   ;;  %v3743_v38 = vld [vmem:[#allocation3 + $0x7b] sm:$0x3]  ;;  %v9402_v15 = vld [vmem:[#allocation3 + $0x80] sm:$0xff] }
 0x33e   : > { %3233 = vst.msk [vmem:[#allocation4 + $0x90] sm:$0x3] %vm3224_vm9, %v3181_v4  ;;  %v2058_v40 = vsel %vm2032_vm12, %v9240_v35, %v2056_v34  ;;  %vm11201_vm12 = vcmask 189584   ;;  %v3621_v4 = vld [vmem:[#allocation3 + $0x7a] sm:$0x3] }
 0x33f   : > { %v3301_v7 = vpop.permute.xlu0 %3300  ;;  %4640 = vrot.lane.b32.xlu1 %v4593_v13, %s11057_s23  ;;  %2060 = vst.msk [vmem:[#allocation3 + $0xa0] sm:$0xff] %vm1347_vm4, %v2057_v18  ;;  %v3865_v14 = vld [vmem:[#allocation3 + $0x7c] sm:$0x3] }
 0x340   : > { %3354 = vst.msk [vmem:[#allocation4 + $0x80] sm:$0xff] %vm3344_vm0, %v3301_v7  ;;  %5534 = vmatpush1.bf16.msra.mxu1 %v8675_v32 }
 0x341   : > { %4904 = vrot.lane.b32.xlu0 %v9323_v22, %s11063_s27  ;;  %5566 = vmatprep.subr.bf16.mxu1 %v7813_v2  ;;  %v3303_v49 = vpop.permute.xlu1 %3302  ;;  %2061 = vst.msk [vmem:[#allocation3 + $0xa8] sm:$0x3f] %vm11195_vm7, %v2058_v40  ;;  %vm11202_vm7 = vcmask 244928  }
 0x342   : > { %3355 = vst.msk [vmem:[#allocation4 + $0x90] sm:$0x3] %vm3346_vm1, %v3303_v49  ;;  %v4717_v49 = vld [vmem:[#allocation3 + $0x89] sm:$0x3] }
 0x343   : > { %v2329_v33 = vpop.permute.xlu0 %2328  ;;  %5150 = vrot.lane.b32.xlu1 %v5103_v42, %s11067_s11  ;;  %v4861_v42 = vld [vmem:[#allocation3 + $0x8a] sm:$0x3] }
 0x344   : > { %2380 = vst.msk [vmem:[#allocation4 + $0xa0] sm:$0xff] %vm11196_vm14, %v2329_v33  ;;  %vm11203_vm14 = vcmask 238784  }
 0x345   : > { %5026 = vrot.lane.b32.xlu0 %v9340_v19, %s11065_s1  ;;  %v2331_v12 = vpop.permute.xlu1 %2330  ;;  %v7630_v27 = vpop.eup %7629 }
 0x346   : > { %2381 = vst.msk [vmem:[#allocation4 + $0xb0] sm:$0x3] %vm11197_vm3, %v2331_v12  ;;  %v7632_v26 = vpop.eup %7631  ;;  %v2094_v28 = vadd.f32 1.0, %v7630_v27  ;;  %v2097_v56 = vmul.f32 -0.5, %v7630_v27  ;;  %vm11204_vm3 = vcmask 1032128   ;;  %v9414_v12 = vld [vmem:[#allocation3 + $0x81] sm:$0xff] }
 0x347   : > { %v2451_v35 = vpop.permute.xlu0 %2450  ;;  %4034 = vrot.lane.b32.xlu1 %v3985_v9, %s11050_s28  ;;  %v2103_v11 = vadd.f32 1.0, %v7632_v26  ;;  %v2106_v36 = vmul.f32 -0.5, %v7632_v26  ;;  %v2100_v39 = vand.u32 2147483647, %v7630_v27  ;;  %v2109_v41 = vand.u32 2147483647, %v7632_v26 }
 0x348   : > { %2502 = vst.msk [vmem:[#allocation4 + $0xa0] sm:$0xff] %vm11198_vm11, %v2451_v35  ;;  %7633 = vlog2.f32 %v2094_v28  ;;  %v2098_v63 = vadd.f32 1.0, %v2097_v56  ;;  %v4983_v28 = vld [vmem:[#allocation3 + $0x8b] sm:$0x3]  ;;  %v9429_v56 = vld [vmem:[#allocation3 + $0x83] sm:$0xff] }
 0x349   : > { %5148 = vrot.lane.b32.xlu0 %v9347_v47, %s11067_s11  ;;  %v2453_v44 = vpop.permute.xlu1 %2452  ;;  %7635 = vlog2.f32 %v2103_v11  ;;  %v2107_v17 = vadd.f32 1.0, %v2106_v36  ;;  %vm2101_vm11 = vcmp.lt.f32.partialorder %v2100_v39, 0.0004427343  ;;  %v9434_v36 = vld [vmem:[%s10890_s3] sm:$0xff]   ;;  %v9443_v39 = vld [vmem:[#allocation3 + $0x84] sm:$0xff] }
 0x34a   : > { %2503 = vst.msk [vmem:[#allocation4 + $0xb0] sm:$0x3] %vm11199_vm2, %v2453_v44  ;;  %v2099_v25 = vmul.f32 %v7630_v27, %v2098_v63  ;;  %vm11205_vm2 = vcmask 25600   ;;  %v5105_v63 = vld [vmem:[#allocation3 + $0x8c] sm:$0x3] }
 0x34b   : > { %v2573_v53 = vpop.permute.xlu0 %2572  ;;  %4156 = vrot.lane.b32.xlu1 %v4107_v0, %s11066_s10  ;;  %v2108_v29 = vmul.f32 %v7632_v26, %v2107_v17  ;;  %v9448_v17 = vld [vmem:[%s10890_s3 + $0x8] sm:$0xff]  }
 0x34c   : > { %2624 = vst.msk [vmem:[#allocation4 + $0xa0] sm:$0xff] %vm11200_vm10, %v2573_v53  ;;  %vm2086_vm10 = vcmp.gt.f32.partialorder %v9290_v8, 20.0  ;;  %v9421_v53 = vld [vmem:[#allocation3 + $0x82] sm:$0xff] }
 0x34d   : > { %4154 = vrot.lane.b32.xlu0 %v9300_v6, %s11066_s10  ;;  %v2575_v30 = vpop.permute.xlu1 %2574 }
 0x34e   : > { %2625 = vst.msk [vmem:[#allocation4 + $0xb0] sm:$0x3] %vm11201_vm12, %v2575_v30  ;;  %vm2087_vm12 = vcmp.gt.f32.partialorder %v9292_v37, 20.0 }
 0x34f   : > { %v2695_v31 = vpop.permute.xlu0 %2694  ;;  %4278 = vrot.lane.b32.xlu1 %v4229_v60, %s11069_s26 }
 0x350   : > { %2746 = vst.msk [vmem:[#allocation4 + $0xa0] sm:$0xff] %vm11202_vm7, %v2695_v31  ;;  %vm2110_vm7 = vcmp.lt.f32.partialorder %v2109_v41, 0.0004427343 }
 0x351   : > { %4276 = vrot.lane.b32.xlu0 %v9323_v22, %s11069_s26  ;;  %v2697_v21 = vpop.permute.xlu1 %2696 }
 0x352   : > { %2747 = vst.msk [vmem:[#allocation4 + $0xb0] sm:$0x3] %vm11203_vm14, %v2697_v21  ;;  %v7634_v57 = vpop.eup %7633  ;;  %vm11206_vm14 = vcmask 786128   ;;  %v4595_v21 = vld [vmem:[#allocation3 + $0x88] sm:$0x3] }
 0x353   : > { %v4635_v20 = vpop.permute.xlu0 %4634  ;;  %4400 = vrot.lane.b32.xlu1 %v4351_v59, %s11072_s21  ;;  %v7636_v43 = vpop.eup %7635  ;;  %v2096_v46 = vmul.f32 0.6931472, %v7634_v57 }
 0x354   : > { %4692 = vst.msk [vmem:[#allocation4 + $0x40] sm:$0xff] %vm11204_vm3, %v4635_v20  ;;  %v2105_v50 = vmul.f32 0.6931472, %v7636_v43  ;;  %vm11207_vm3 = vcmask 74784   ;;  %v3987_v43 = vld [vmem:[#allocation3 + $0x88] sm:$0x3] }
 0x355   : > { %4398 = vrot.lane.b32.xlu0 %v9340_v19, %s11072_s21  ;;  %v4759_v45 = vpop.permute.xlu1 %4758  ;;  %v2102_v61 = vsel %vm2101_vm11, %v2099_v25, %v2096_v46  ;;  %vm11210_vm11 = vcmask 123984   ;;  %v4109_v25 = vld [vmem:[#allocation3 + $0x89] sm:$0x3] }
 0x356   : > { %4823 = vst.msk [vmem:[#allocation4 + $0x58] sm:$0x3] %vm11205_vm2, %v4759_v45  ;;  %v2111_v51 = vsel %vm2110_vm7, %v2108_v29, %v2105_v50  ;;  %v2112_v52 = vsel %vm2086_vm10, %v9290_v8, %v2102_v61  ;;  %vm11208_vm2 = vcmask 46080   ;;  %vm11211_vm10 = vcmask 294128   ;;  %v9472_v29 = vld [vmem:[%s10890_s3 + $0x18] sm:$0xff]  }
 0x357   : > { %v4029_v48 = vpop.permute.xlu0 %4028  ;;  %4522 = vrot.lane.b32.xlu1 %v4473_v16, %s11074_s18  ;;  %v2113_v55 = vsel %vm2087_vm12, %v9292_v37, %v2111_v51  ;;  %2115 = vst.msk [vmem:[#allocation3 + $0xb0] sm:$0xff] %vm1347_vm4, %v2112_v52  ;;  %v3499_v37 = vld [vmem:[#allocation3 + $0x79] sm:$0x3]  ;;  %vm11212_vm12 = vcmask 1048560   ;;  %vm11213_vm7 = vcmask 31744   ;;  %v9484_v51 = vld [vmem:[%s10890_s3 + $0x20] sm:$0xff]  }
 0x358   : > { %4084 = vst.msk [vmem:[#allocation4 + $0x60] sm:$0xff] %vm11206_vm14, %v4029_v48  ;;  %vm11209_vm14 = vcmask 540128   ;;  %v4231_v61 = vld [vmem:[#allocation3 + $0x8a] sm:$0x3] }
 0x359   : > { %4520 = vrot.lane.b32.xlu0 %v9347_v47, %s11074_s18  ;;  %v4903_v54 = vpop.permute.xlu1 %4902  ;;  %2116 = vst.msk [vmem:[#allocation3 + $0xb8] sm:$0x3f] %vm11208_vm2, %v2113_v55  ;;  %vm11215_vm2 = vcmask 80928  }
 0x35a   : > { %4959 = vst.msk [vmem:[#allocation4 + $0x58] sm:$0x3] %vm11207_vm3, %v4903_v54  ;;  %vm11214_vm3 = vcmask 173184  }
 0x35b   : > { %v3423_v24 = vpop.permute.xlu0 %3422  ;;  %3428 = vrot.lane.b32.xlu1 %v3377_v58, %s11035_s24  ;;  %v4353_v58 = vld [vmem:[#allocation3 + $0x8b] sm:$0x3] }
 0x35c   : > { %3476 = vst.msk [vmem:[#allocation4 + $0x80] sm:$0xff] %vm11209_vm14, %v3423_v24  ;;  %vm11216_vm14 = vcmask 779984  }
 0x35d   : > { %3548 = vrot.lane.b32.xlu0 %v9300_v6, %s11040_s12  ;;  %v5025_v62 = vpop.permute.xlu1 %5024 }
 0x35e   : > { %5081 = vst.msk [vmem:[#allocation4 + $0x58] sm:$0x3] %vm11210_vm11, %v5025_v62  ;;  %vm11217_vm11 = vcmask 829184  }
 0x35f   : > { %v2817_v8 = vpop.permute.xlu0 %2816  ;;  %3550 = vrot.lane.b32.xlu1 %v3499_v37, %s11040_s12 }
 0x360   : > { %2868 = vst.msk [vmem:[#allocation4 + $0xa0] sm:$0xff] %vm11211_vm10, %v2817_v8  ;;  %vm11218_vm10 = vcmask 878384   ;;  %v9500_v8 = vld [vmem:[%s10890_s3 + $0x28] sm:$0xff]  }
 0x361   : > { %3670 = vrot.lane.b32.xlu0 %v9323_v22, %s11041_s16  ;;  %v4637_v23 = vpop.permute.xlu1 %4636 }
 0x362   : > { %4693 = vst.msk [vmem:[#allocation4 + $0x50] sm:$0x3] %vm4688_vm13, %v4637_v23 }
 0x363   : > { %v4757_v3 = vpop.permute.xlu0 %4756  ;;  %4822 = vst.msk [vmem:[#allocation4 + $0x50] sm:$0x3] %vm4812_vm5, %v4759_v45  ;;  %3672 = vrot.lane.b32.xlu1 %v3621_v4, %s11041_s16  ;;  %v9460_v45 = vld [vmem:[%s10890_s3 + $0x10] sm:$0xff]   ;;  %v4475_v4 = vld [vmem:[#allocation3 + $0x8c] sm:$0x3] }
 0x364   : > { %4820 = vst.msk [vmem:[#allocation4 + $0x40] sm:$0xff] %vm11212_vm12, %v4757_v3  ;;  %vm11219_vm12 = vcmask 835328  }
 0x365   : > { %4821 = vst.msk [vmem:[#allocation4 + $0x48] sm:$0xff] %vm11213_vm7, %v4757_v3  ;;  %3792 = vrot.lane.b32.xlu0 %v9340_v19, %s11082_s8  ;;  %v5147_v5 = vpop.permute.xlu1 %5146  ;;  %vm11220_vm7 = vcmask 927584  }
 0x366   : > { %5203 = vst.msk [vmem:[#allocation4 + $0x58] sm:$0x3] %vm11214_vm3, %v5147_v5  ;;  %vm11221_vm3 = vcmask 884528   ;;  %v9509_v5 = vld [vmem:[#allocation3 + $0x90] sm:$0xff] }
 0x367   : > { %v4901_v10 = vpop.permute.xlu0 %4900  ;;  %3794 = vrot.lane.b32.xlu1 %v3743_v38, %s11082_s8 }
 0x368   : > { %4958 = vst.msk [vmem:[#allocation4 + $0x48] sm:$0xff] %vm11215_vm2, %v4901_v10  ;;  %vm11222_vm2 = vcmask 179200   ;;  %v9514_v10 = vld [vmem:[%s10890_s3 + $0x30] sm:$0xff]  }
 0x369   : > { %3914 = vrot.lane.b32.xlu0 %v9347_v47, %s11083_s9  ;;  %v4031_v7 = vpop.permute.xlu1 %4030 }
 0x36a   : > { %4085 = vst.msk [vmem:[#allocation4 + $0x70] sm:$0x3] %vm11216_vm14, %v4031_v7  ;;  %v5508_v27 = vld [vmem:[#allocation4 + $0x50] sm:$0x3]  ;;  %vm11223_vm14 = vcmask 976784  }
 0x36b   : > { %v5023_v13 = vpop.permute.xlu0 %5022  ;;  %3916 = vrot.lane.b32.xlu1 %v3865_v14, %s11083_s9  ;;  %v5506_v9 = vld [vmem:[#allocation4 + $0x40] sm:$0xff]  ;;  %v9523_v14 = vld [vmem:[#allocation3 + $0x91] sm:$0xff] }
 0x36c   : > { %5080 = vst.msk [vmem:[#allocation4 + $0x48] sm:$0xff] %vm5074_vm8, %v5023_v13  ;;  %v5510_v30 = vpack.c.bf16 %v5508_v27, %v5506_v9  ;;  %v4719_v13 = vld [vmem:[#allocation3 + $0x99] sm:$0x3]  ;;  %v4985_v27 = vld [vmem:[#allocation3 + $0x9b] sm:$0x3] }
 0x36d   : > { %4642 = vrot.lane.b32.xlu0 %v9402_v15, %s11057_s23  ;;  %v4153_v34 = vpop.permute.xlu1 %4152  ;;  %v5509_v11 = vld [vmem:[#allocation4 + $0x58] sm:$0x3] }
 0x36e   : > { %4207 = vst.msk [vmem:[#allocation4 + $0x70] sm:$0x3] %vm11217_vm11, %v4153_v34  ;;  %vm11224_vm11 = vcmask 933728   ;;  %v9528_v34 = vld [vmem:[%s10890_s3 + $0x38] sm:$0xff]  }
 0x36f   : > { %v5145_v18 = vpop.permute.xlu0 %5144  ;;  %4766 = vrot.lane.b32.xlu1 %v4717_v49, %s11058_s20 }
 0x370   : > { %5202 = vst.msk [vmem:[#allocation4 + $0x48] sm:$0xff] %vm5196_vm6, %v5145_v18 }
 0x371   : > { %4036 = vrot.lane.b32.xlu0 %v9402_v15, %s11050_s28  ;;  %v4275_v40 = vpop.permute.xlu1 %4274 }
 0x372   : > { %4329 = vst.msk [vmem:[#allocation4 + $0x70] sm:$0x3] %vm11218_vm10, %v4275_v40  ;;  %vm11225_vm10 = vcmask 533984   ;;  %v4863_v40 = vld [vmem:[#allocation3 + $0x9a] sm:$0x3] }
 0x373   : > { %v4151_v33 = vpop.permute.xlu0 %4150  ;;  %4910 = vrot.lane.b32.xlu1 %v4861_v42, %s11063_s27  ;;  %v9542_v42 = vld [vmem:[%s10890_s3 + $0x40] sm:$0xff]  }
 0x374   : > { %4206 = vst.msk [vmem:[#allocation4 + $0x60] sm:$0xff] %vm11219_vm12, %v4151_v33  ;;  %vm11226_vm12 = vcmask 982928   ;;  %v9537_v33 = vld [vmem:[#allocation3 + $0x92] sm:$0xff] }
 0x375   : > { %4764 = vrot.lane.b32.xlu0 %v9414_v12, %s11058_s20  ;;  %v4397_v35 = vpop.permute.xlu1 %4396 }
 0x376   : > { %4451 = vst.msk [vmem:[#allocation4 + $0x70] sm:$0x3] %vm11220_vm7, %v4397_v35  ;;  %vm11227_vm7 = vcmask 583184  }
 0x377   : > { %v4273_v26 = vpop.permute.xlu0 %4272  ;;  %v5507_v44 = vld [vmem:[#allocation4 + $0x48] sm:$0xff]  ;;  %5032 = vrot.lane.b32.xlu1 %v4983_v28, %s11065_s1 }
 0x378   : > { %4328 = vst.msk [vmem:[#allocation4 + $0x60] sm:$0xff] %vm11221_vm3, %v4273_v26  ;;  %v5511_v0 = vpack.c.bf16 %v5509_v11, %v5507_v44  ;;  %vm11228_vm3 = vcmask 589328   ;;  %v9551_v26 = vld [vmem:[#allocation3 + $0x93] sm:$0xff] }
 0x379   : > { %4908 = vrot.lane.b32.xlu0 %v9421_v53, %s11063_s27  ;;  %v4519_v31 = vpop.permute.xlu1 %4518  ;;  %v4597_v11 = vld [vmem:[#allocation3 + $0x98] sm:$0x3] }
 0x37a   : > { %6978 = vmatprep.mubr.msk.bf16.mxu1 %vm11222_vm2, %v5511_v0  ;;  %4573 = vst.msk [vmem:[#allocation4 + $0x70] sm:$0x3] %vm11223_vm14, %v4519_v31  ;;  %vm11229_vm2 = vcmask 632384   ;;  %vm11230_vm14 = vcmask 638528   ;;  %v9560_v0 = vld [vmem:[#allocation3 + $0x94] sm:$0xff] }
 0x37b   : > { %5548 = vmatmul.mubr.bf16.vlgmr.msra.gmra.mrb[8].mxu1 %v5510_v30  ;;  %v4395_v60 = vpop.permute.xlu0 %4394  ;;  %4644 = vrot.lane.b32.xlu1 %v4595_v21, %s11057_s23  ;;  %v2280_v21 = vld [vmem:[#allocation3 + $0x61] sm:$0xff] }
 0x37c   : > { %4450 = vst.msk [vmem:[#allocation4 + $0x60] sm:$0xff] %vm11224_vm11, %v4395_v60  ;;  %5567 = vmatpush1.bf16.msra.mxu1 %v9434_v36  ;;  %vm11231_vm11 = vcmask 681584   ;;  %v5107_v60 = vld [vmem:[#allocation3 + $0x9c] sm:$0x3] }
 0x37d   : > { %5030 = vrot.lane.b32.xlu0 %v9429_v56, %s11065_s1  ;;  %5568 = vmatprep.subr.bf16.mxu1 %v7813_v2  ;;  %v3425_v20 = vpop.permute.xlu1 %3424 }
 0x37e   : > { %3477 = vst.msk [vmem:[#allocation4 + $0x90] sm:$0x3] %vm11225_vm10, %v3425_v20  ;;  %vm11232_vm10 = vcmask 687728  }
 0x37f   : > { %v4517_v59 = vpop.permute.xlu0 %4516  ;;  %5154 = vrot.lane.b32.xlu1 %v5105_v63, %s11067_s11  ;;  %v2281_v63 = vld [vmem:[#allocation3 + $0x69] sm:$0x3] }
 0x380   : > { %4572 = vst.msk [vmem:[#allocation4 + $0x60] sm:$0xff] %vm11226_vm12, %v4517_v59  ;;  %5569 = vmatpush1.bf16.msra.mxu1 %v9448_v17  ;;  %vm11233_vm12 = vcmask 730784  }
 0x381   : > { %5152 = vrot.lane.b32.xlu0 %v9443_v39, %s11067_s11  ;;  %5570 = vmatprep.subr.bf16.mxu1 %v7813_v2  ;;  %v3547_v41 = vpop.permute.xlu1 %3546 }
 0x382   : > { %3599 = vst.msk [vmem:[#allocation4 + $0x90] sm:$0x3] %vm11227_vm7, %v3547_v41  ;;  %vm11234_vm7 = vcmask 736928   ;;  %v2402_v41 = vld [vmem:[#allocation3 + $0x62] sm:$0xff] }
 0x383   : > { %v3545_v57 = vpop.permute.xlu0 %3544  ;;  %4038 = vrot.lane.b32.xlu1 %v3987_v43, %s11050_s28 }
 0x384   : > { %3598 = vst.msk [vmem:[#allocation4 + $0x80] sm:$0xff] %vm11228_vm3, %v3545_v57  ;;  %5571 = vmatpush1.bf16.msra.mxu1 %v9460_v45  ;;  %vm11235_vm3 = vcmask 287984  }
 0x385   : > { %4158 = vrot.lane.b32.xlu0 %v9414_v12, %s11066_s10  ;;  %5572 = vmatprep.subr.bf16.mxu1 %v7813_v2  ;;  %v3669_v16 = vpop.permute.xlu1 %3668 }
 0x386   : > { %3721 = vst.msk [vmem:[#allocation4 + $0x90] sm:$0x3] %vm11229_vm2, %v3669_v16  ;;  %vm11236_vm2 = vcmask 343328   ;;  %v2403_v16 = vld [vmem:[#allocation3 + $0x6a] sm:$0x3] }
 0x387   : > { %v3667_v46 = vpop.permute.xlu0 %3666  ;;  %4160 = vrot.lane.b32.xlu1 %v4109_v25, %s11066_s10  ;;  %v2524_v25 = vld [vmem:[#allocation3 + $0x63] sm:$0xff] }
 0x388   : > { %3720 = vst.msk [vmem:[#allocation4 + $0x80] sm:$0xff] %vm11230_vm14, %v3667_v46  ;;  %5573 = vmatpush1.bf16.msra.mxu1 %v9472_v29  ;;  %vm11237_vm14 = vcmask 337184  }
 0x389   : > { %4280 = vrot.lane.b32.xlu0 %v9421_v53, %s11069_s26  ;;  %5574 = vmatprep.subr.bf16.mxu1 %v7813_v2  ;;  %v3791_v48 = vpop.permute.xlu1 %3790 }
 0x38a   : > { %3843 = vst.msk [vmem:[#allocation4 + $0x90] sm:$0x3] %vm11231_vm11, %v3791_v48  ;;  %vm11238_vm11 = vcmask 392528  }
 0x38b   : > { %v3789_v50 = vpop.permute.xlu0 %3788  ;;  %4282 = vrot.lane.b32.xlu1 %v4231_v61, %s11069_s26 }
 0x38c   : > { %3842 = vst.msk [vmem:[#allocation4 + $0x80] sm:$0xff] %vm11232_vm10, %v3789_v50  ;;  %5575 = vmatpush1.bf16.msra.mxu1 %v9484_v51  ;;  %vm11239_vm10 = vcmask 386384  }
 0x38d   : > { %4402 = vrot.lane.b32.xlu0 %v9429_v56, %s11072_s21  ;;  %5576 = vmatprep.subr.bf16.mxu1 %v7813_v2  ;;  %v3913_v52 = vpop.permute.xlu1 %3912 }
 0x38e   : > { %v9490_v54 = vpop.f32.mrb[0].mxu1  ;;  %3965 = vst.msk [vmem:[#allocation4 + $0x90] sm:$0x3] %vm11233_vm12, %v3913_v52  ;;  %vm11240_vm12 = vcmask 441728  }
 0x38f   : > { %v5345_v55 = vpop.f32.mrb[1].mxu1  ;;  %v3911_v24 = vpop.permute.xlu0 %3910  ;;  %4404 = vrot.lane.b32.xlu1 %v4353_v58, %s11072_s21 }
 0x390   : > { %3964 = vst.msk [vmem:[#allocation4 + $0x80] sm:$0xff] %vm11234_vm7, %v3911_v24  ;;  %v9495_v62 = vpop.f32.mrb[2].mxu1  ;;  %5577 = vmatpush1.bf16.msra.mxu1 %v9500_v8  ;;  %vm11241_vm7 = vcmask 1032128   ;;  %v2525_v24 = vld [vmem:[#allocation3 + $0x6b] sm:$0x3] }
 0x391   : > { %v5348_v37 = vpop.f32.mrb[3].mxu1  ;;  %4524 = vrot.lane.b32.xlu0 %v9443_v39, %s11074_s18  ;;  %5578 = vmatprep.subr.bf16.mxu1 %v7813_v2  ;;  %v2819_v23 = vpop.permute.xlu1 %2818 }
 0x392   : > { %2869 = vst.msk [vmem:[#allocation4 + $0xb0] sm:$0x3] %vm11235_vm3, %v2819_v23  ;;  %vm11242_vm3 = vcmask 25600   ;;  %v2646_v37 = vld [vmem:[#allocation3 + $0x64] sm:$0xff] }
 0x393   : > { %v2939_v3 = vpop.permute.xlu0 %2938  ;;  %4526 = vrot.lane.b32.xlu1 %v4475_v4, %s11074_s18 }
 0x394   : > { %2990 = vst.msk [vmem:[#allocation4 + $0xa0] sm:$0xff] %vm11236_vm2, %v2939_v3  ;;  %5579 = vmatpush1.bf16.msra.mxu1 %v9514_v10  ;;  %vm11243_vm2 = vcmask 786128  }
 0x395   : > { %4646 = vrot.lane.b32.xlu0 %v9509_v5, %s11057_s23  ;;  %5580 = vmatprep.subr.bf16.mxu1 %v7813_v2  ;;  %v2941_v38 = vpop.permute.xlu1 %2940 }
 0x396   : > { %2991 = vst.msk [vmem:[#allocation4 + $0xb0] sm:$0x3] %vm11237_vm14, %v2941_v38  ;;  %vm11244_vm14 = vcmask 74784  }
 0x397   : > { %v3061_v7 = vpop.permute.xlu0 %3060  ;;  %4770 = vrot.lane.b32.xlu1 %v4719_v13, %s11058_s20  ;;  %v2647_v13 = vld [vmem:[#allocation3 + $0x6c] sm:$0x3] }
 0x398   : > { %3112 = vst.msk [vmem:[#allocation4 + $0xa0] sm:$0xff] %vm11238_vm11, %v3061_v7  ;;  %5581 = vmatpush1.bf16.msra.mxu1 %v9528_v34  ;;  %vm11245_vm11 = vcmask 540128  }
 0x399   : > { %4768 = vrot.lane.b32.xlu0 %v9523_v14, %s11058_s20  ;;  %5582 = vmatprep.subr.bf16.mxu1 %v7813_v2  ;;  %v3063_v18 = vpop.permute.xlu1 %3062  ;;  %v1292_v46 = vpop.f32.mrb[168].mxu0 }
 0x39a   : > { %3113 = vst.msk [vmem:[#allocation4 + $0xb0] sm:$0x3] %vm11239_vm10, %v3063_v18  ;;  %vm11246_vm10 = vcmask 123984   ;;  %v7303_v48 = vpop.f32.mrb[169].mxu0 }
 0x39b   : > { %v3183_v49 = vpop.permute.xlu0 %3182  ;;  %4914 = vrot.lane.b32.xlu1 %v4863_v40, %s11063_s27  ;;  %1432 = vst.msk [vmem:[#allocation2 + $0x2a0] sm:$0xff] %vm1347_vm4, %v1292_v46  ;;  %v1295_v50 = vpop.f32.mrb[170].mxu0  ;;  %v3013_v46 = vld [vmem:[#allocation3 + $0x7a] sm:$0x3] }
 0x39c   : > { %3234 = vst.msk [vmem:[#allocation4 + $0xa0] sm:$0xff] %vm11240_vm12, %v3183_v49  ;;  %5583 = vmatpush1.bf16.msra.mxu1 %v9542_v42  ;;  %vm11247_vm12 = vcmask 1048560   ;;  %v7304_v52 = vpop.f32.mrb[171].mxu0  ;;  %v2768_v49 = vld [vmem:[#allocation3 + $0x70] sm:$0xff] }
 0x39d   : > { %4912 = vrot.lane.b32.xlu0 %v9537_v33, %s11063_s27  ;;  %5584 = vmatprep.subr.bf16.mxu1 %v7813_v2  ;;  %v3185_v35 = vpop.permute.xlu1 %3184  ;;  %1433 = vst.msk [vmem:[#allocation2 + $0x2a8] sm:$0xff] %vm1347_vm4, %v1295_v50 }
 0x39e   : > { %3235 = vst.msk [vmem:[#allocation4 + $0xb0] sm:$0x3] %vm3224_vm9, %v3185_v35 }
 0x39f   : > { %v3305_v9 = vpop.permute.xlu0 %3304  ;;  %5036 = vrot.lane.b32.xlu1 %v4985_v27, %s11065_s1 }
 0x3a0   : > { %3356 = vst.msk [vmem:[#allocation4 + $0xa0] sm:$0xff] %vm3344_vm0, %v3305_v9  ;;  %5585 = vmatpush1.bf16.msra.mxu1 %v8675_v32 }
 0x3a1   : > { %5034 = vrot.lane.b32.xlu0 %v9551_v26, %s11065_s1  ;;  %5706 = vmatprep.subr.bf16.mxu1 %v7813_v2  ;;  %v3307_v28 = vpop.permute.xlu1 %3306  ;;  %v1300_v58 = vpop.f32.mrb[172].mxu0 }
 0x3a2   : > { %3357 = vst.msk [vmem:[#allocation4 + $0xb0] sm:$0x3] %vm3346_vm1, %v3307_v28  ;;  %v7307_v23 = vpop.f32.mrb[173].mxu0 }
 0x3a3   : > { %v4639_v44 = vpop.permute.xlu0 %4638  ;;  %4648 = vrot.lane.b32.xlu1 %v4597_v11, %s11057_s23  ;;  %1434 = vst.msk [vmem:[#allocation2 + $0x2b0] sm:$0xff] %vm1347_vm4, %v1300_v58  ;;  %v1303_v3 = vpop.f32.mrb[174].mxu0 }
 0x3a4   : > { %4694 = vst.msk [vmem:[#allocation4 + $0x60] sm:$0xff] %vm11241_vm7, %v4639_v44  ;;  %vm11248_vm7 = vcmask 31744   ;;  %v7308_v38 = vpop.f32.mrb[175].mxu0  ;;  %v2769_v44 = vld [vmem:[#allocation3 + $0x78] sm:$0x3] }
 0x3a5   : > { %5156 = vrot.lane.b32.xlu0 %v9560_v0, %s11067_s11  ;;  %v4763_v30 = vpop.permute.xlu1 %4762  ;;  %1435 = vst.msk [vmem:[#allocation2 + $0x2b8] sm:$0xff] %vm1347_vm4, %v1303_v3 }
 0x3a6   : > { %4827 = vst.msk [vmem:[#allocation4 + $0x78] sm:$0x3] %vm11242_vm3, %v4763_v30  ;;  %vm11249_vm3 = vcmask 80928  }
 0x3a7   : > { %v4033_v31 = vpop.permute.xlu0 %4032  ;;  %5158 = vrot.lane.b32.xlu1 %v5107_v60, %s11067_s11 }
 0x3a8   : > { %4086 = vst.msk [vmem:[#allocation4 + $0x80] sm:$0xff] %vm11243_vm2, %v4033_v31  ;;  %vm11250_vm2 = vcmask 173184   ;;  %v2117_v31 = vld [vmem:[#allocation2 + $0x2a0] sm:$0xff] }
 0x3a9   : > { %2332 = vrot.lane.b32.xlu0 %v2280_v21, %s11048_s0  ;;  %v4907_v20 = vpop.permute.xlu1 %4906  ;;  %v1308_v18 = vpop.f32.mrb[176].mxu0 }
 0x3aa   : > { %4961 = vst.msk [vmem:[#allocation4 + $0x78] sm:$0x3] %vm11244_vm14, %v4907_v20  ;;  %v7311_v40 = vpop.f32.mrb[177].mxu0  ;;  %vm11251_vm14 = vcmask 779984   ;;  %v2891_v20 = vld [vmem:[#allocation3 + $0x79] sm:$0x3] }
 0x3ab   : > { %v3427_v59 = vpop.permute.xlu0 %3426  ;;  %2334 = vrot.lane.b32.xlu1 %v2281_v63, %s11048_s0  ;;  %1436 = vst.msk [vmem:[#allocation2 + $0x2c0] sm:$0xff] %vm1347_vm4, %v1308_v18  ;;  %v1311_v35 = vpop.f32.mrb[178].mxu0 }
 0x3ac   : > { %3478 = vst.msk [vmem:[#allocation4 + $0xa0] sm:$0xff] %vm11245_vm11, %v3427_v59  ;;  %v7312_v27 = vpop.f32.mrb[179].mxu0  ;;  %vm11252_vm11 = vcmask 829184   ;;  %v2118_v59 = vld [vmem:[#allocation2 + $0x2a8] sm:$0xff] }
 0x3ad   : > { %2454 = vrot.lane.b32.xlu0 %v2402_v41, %s11049_s19  ;;  %v5029_v57 = vpop.permute.xlu1 %5028  ;;  %1437 = vst.msk [vmem:[#allocation2 + $0x2c8] sm:$0xff] %vm1347_vm4, %v1311_v35 }
 0x3ae   : > { %5083 = vst.msk [vmem:[#allocation4 + $0x78] sm:$0x3] %vm11246_vm10, %v5029_v57  ;;  %vm11253_vm10 = vcmask 835328   ;;  %v2119_v57 = vld [vmem:[#allocation2 + $0x2b0] sm:$0xff] }
 0x3af   : > { %v4761_v43 = vpop.permute.xlu0 %4760  ;;  %2456 = vrot.lane.b32.xlu1 %v2403_v16, %s11049_s19 }
 0x3b0   : > { %4824 = vst.msk [vmem:[#allocation4 + $0x60] sm:$0xff] %vm11247_vm12, %v4761_v43  ;;  %vm11254_vm12 = vcmask 878384  }
 0x3b1   : > { %4825 = vst.msk [vmem:[#allocation4 + $0x68] sm:$0xff] %vm11248_vm7, %v4761_v43  ;;  %2576 = vrot.lane.b32.xlu0 %v2524_v25, %s11033_s13  ;;  %v4641_v61 = vpop.permute.xlu1 %4640  ;;  %v1316_v11 = vpop.f32.mrb[180].mxu0  ;;  %v2120_v43 = vld [vmem:[#allocation2 + $0x2b8] sm:$0xf]  ;;  %vm11255_vm7 = vcmask 884528  }
 0x3b2   : > { %4695 = vst.msk [vmem:[#allocation4 + $0x70] sm:$0x3] %vm4688_vm13, %v4641_v61  ;;  %v2121_v63 = vld [vmem:[#allocation2 + $0x2bc] sm:$0xff] }
 0x3b3   : > { %v4905_v55 = vpop.permute.xlu0 %4904  ;;  %4826 = vst.msk [vmem:[#allocation4 + $0x70] sm:$0x3] %vm4812_vm5, %v4763_v30  ;;  %2578 = vrot.lane.b32.xlu1 %v2525_v24, %s11033_s13  ;;  %v7315_v30 = vpop.f32.mrb[181].mxu0  ;;  %v2125_v41 = vmax.f32 %v2117_v31, %v2121_v63  ;;  %v3379_v31 = vld [vmem:[#allocation3 + $0x88] sm:$0x3] }
 0x3b4   : > { %4960 = vst.msk [vmem:[#allocation4 + $0x68] sm:$0xff] %vm11249_vm3, %v4905_v55  ;;  %v2122_v16 = vld [vmem:[#allocation2 + $0x2c4] sm:$0xff]  ;;  %vm11256_vm3 = vcmask 179200  }
 0x3b5   : > { %2698 = vrot.lane.b32.xlu0 %v2646_v37, %s11034_s15  ;;  %v5151_v4 = vpop.permute.xlu1 %5150  ;;  %1438 = vst.msk [vmem:[#allocation2 + $0x2d0] sm:$0xff] %vm1347_vm4, %v1316_v11  ;;  %v2126_v50 = vmax.f32 %v2118_v59, %v2122_v16  ;;  %2129 = vst.msk [vmem:[#allocation5] sm:$0xff] %vm1347_vm4, %v2125_v41  ;;  %v3501_v41 = vld [vmem:[#allocation3 + $0x89] sm:$0x3] }
 0x3b6   : > { %5205 = vst.msk [vmem:[#allocation4 + $0x78] sm:$0x3] %vm11250_vm2, %v5151_v4  ;;  %vm11257_vm2 = vcmask 44032   ;;  %v3623_v16 = vld [vmem:[#allocation3 + $0x8a] sm:$0x3] }
 0x3b7   : > { %v5027_v7 = vpop.permute.xlu0 %5026  ;;  %2700 = vrot.lane.b32.xlu1 %v2647_v13, %s11034_s15  ;;  %v5557_v58 = vld [vmem:[#allocation4 + $0x60] sm:$0xff]  ;;  %2130 = vst.msk [vmem:[#allocation5 + $0x8] sm:$0xff] %vm1347_vm4, %v2126_v50  ;;  %v1319_v13 = vpop.f32.mrb[182].mxu0 }
 0x3b8   : > { %5082 = vst.msk [vmem:[#allocation4 + $0x68] sm:$0xff] %vm5074_vm8, %v5027_v7  ;;  %v3135_v7 = vld [vmem:[#allocation3 + $0x7b] sm:$0x3] }
 0x3b9   : > { %2820 = vrot.lane.b32.xlu0 %v2768_v49, %s11055_s17  ;;  %v4035_v9 = vpop.permute.xlu1 %4034  ;;  %1439 = vst.msk [vmem:[#allocation2 + $0x2d8] sm:$0xff] %vm1347_vm4, %v1319_v13 }
 0x3ba   : > { %4087 = vst.msk [vmem:[#allocation4 + $0x90] sm:$0x3] %vm11251_vm14, %v4035_v9  ;;  %v5559_v48 = vld [vmem:[#allocation4 + $0x70] sm:$0x3]  ;;  %vm11258_vm14 = vcmask 927584  }
 0x3bb   : > { %v5149_v28 = vpop.permute.xlu0 %5148  ;;  %2822 = vrot.lane.b32.xlu1 %v2769_v44, %s11055_s17  ;;  %v5561_v3 = vpack.c.bf16 %v5559_v48, %v5557_v58  ;;  %v3257_v9 = vld [vmem:[#allocation3 + $0x7c] sm:$0x3]  ;;  %v3745_v58 = vld [vmem:[#allocation3 + $0x8b] sm:$0x3] }
 0x3bc   : > { %5204 = vst.msk [vmem:[#allocation4 + $0x68] sm:$0xff] %vm5196_vm6, %v5149_v28  ;;  %v2123_v55 = vld [vmem:[#allocation2 + $0x2cc] sm:$0xff]  ;;  %v2124_v24 = vld [vmem:[#allocation2 + $0x2d4] sm:$0xf] }
 0x3bd   : > { %2942 = vrot.lane.b32.xlu0 %v9300_v6, %s11042_s25  ;;  %v4157_v60 = vpop.permute.xlu1 %4156  ;;  %v5560_v25 = vld [vmem:[#allocation4 + $0x78] sm:$0x3]  ;;  %v2127_v37 = vmax.f32 %v2119_v57, %v2123_v55  ;;  %v2128_v23 = vmax.f32 %v2120_v43, %v2124_v24 }
 0x3be   : > { %4209 = vst.msk [vmem:[#allocation4 + $0x90] sm:$0x3] %vm11252_vm11, %v4157_v60  ;;  %vm11259_vm11 = vcmask 933728  }
 0x3bf   : > { %v4155_v21 = vpop.permute.xlu0 %4154  ;;  %2944 = vrot.lane.b32.xlu1 %v2891_v20, %s11042_s25  ;;  %2131 = vst.msk [vmem:[#allocation5 + $0x10] sm:$0xff] %vm1347_vm4, %v2127_v37 }
 0x3c0   : > { %4208 = vst.msk [vmem:[#allocation4 + $0x80] sm:$0xff] %vm11253_vm10, %v4155_v21  ;;  %vm11260_vm10 = vcmask 976784  }
 0x3c1   : > { %3064 = vrot.lane.b32.xlu0 %v9323_v22, %s11043_s29  ;;  %v4279_v6 = vpop.permute.xlu1 %4278  ;;  %2132 = vst.msk [vmem:[#allocation5 + $0x18] sm:$0xf] %vm11257_vm2, %v2128_v23  ;;  %vm11264_vm2 = vcmask 583184  }
 0x3c2   : > { %4331 = vst.msk [vmem:[#allocation4 + $0x90] sm:$0x3] %vm11254_vm12, %v4279_v6  ;;  %vm11261_vm12 = vcmask 982928  }
 0x3c3   : > { %v4277_v61 = vpop.permute.xlu0 %4276  ;;  %v5558_v52 = vld [vmem:[#allocation4 + $0x68] sm:$0xff]  ;;  %3066 = vrot.lane.b32.xlu1 %v3013_v46, %s11043_s29 }
 0x3c4   : > { %4330 = vst.msk [vmem:[#allocation4 + $0x80] sm:$0xff] %vm11255_vm7, %v4277_v61  ;;  %v5562_v22 = vpack.c.bf16 %v5560_v25, %v5558_v52  ;;  %vm11262_vm7 = vcmask 533984   ;;  %v2172_v46 = vld [vmem:[#allocation2 + $0x2d8] sm:$0xff] }
 0x3c5   : > { %3186 = vrot.lane.b32.xlu0 %v9340_v19, %s11044_s22  ;;  %v4401_v4 = vpop.permute.xlu1 %4400  ;;  %v7316_v19 = vpop.f32.mrb[183].mxu0 }
 0x3c6   : > { %6979 = vmatprep.mubr.msk.bf16.mxu1 %vm11256_vm3, %v5562_v22  ;;  %4453 = vst.msk [vmem:[#allocation4 + $0x90] sm:$0x3] %vm11258_vm14, %v4401_v4  ;;  %v1324_v18 = vpop.f32.mrb[184].mxu0  ;;  %vm11263_vm3 = vcmask 589328   ;;  %vm11265_vm14 = vcmask 638528  }
 0x3c7   : > { %5599 = vmatmul.mubr.bf16.vlgmr.msra.gmra.mrb[12].mxu1 %v5561_v3  ;;  %v4399_v38 = vpop.permute.xlu0 %4398  ;;  %3188 = vrot.lane.b32.xlu1 %v3135_v7, %s11044_s22  ;;  %1440 = vst.msk [vmem:[#allocation2 + $0x2e0] sm:$0xff] %vm1347_vm4, %v1324_v18  ;;  %v7319_v40 = vpop.f32.mrb[185].mxu0  ;;  %v2133_v4 = vld [vmem:[#allocation5] ss:$2 sm:$0xff]  ;;  %v2135_v7 = vld [vmem:[#allocation5 + $0x1] ss:$2 sm:$0xff] }
 0x3c8   : > { %4452 = vst.msk [vmem:[#allocation4 + $0x80] sm:$0xff] %vm11259_vm11, %v4399_v38  ;;  %5707 = vmatpush1.bf16.msra.mxu1 %v9434_v36  ;;  %v1327_v27 = vpop.f32.mrb[186].mxu0  ;;  %vm11266_vm11 = vcmask 632384   ;;  %v2134_v38 = vld [vmem:[#allocation5 + $0x10] ss:$2 sm:$0x3f]  ;;  %v2137_v18 = vmax.f32 %v2133_v4, %v2135_v7 }
 0x3c9   : > { %3308 = vrot.lane.b32.xlu0 %v9347_v47, %s11045_s30  ;;  %5708 = vmatprep.subr.bf16.mxu1 %v7813_v2  ;;  %v4523_v49 = vpop.permute.xlu1 %4522  ;;  %1441 = vst.msk [vmem:[#allocation2 + $0x2e8] sm:$0xff] %vm1347_vm4, %v1327_v27  ;;  %v7320_v47 = vpop.f32.mrb[187].mxu0  ;;  %v2136_v13 = vld [vmem:[#allocation5 + $0x11] ss:$2 sm:$0x3f] }
 0x3ca   : > { %4575 = vst.msk [vmem:[#allocation4 + $0x90] sm:$0x3] %vm11260_vm10, %v4523_v49  ;;  %v1332_v28 = vpop.f32.mrb[188].mxu0  ;;  %vm11267_vm10 = vcmask 687728   ;;  %v2138_v49 = vmax.f32 %v2134_v38, %v2136_v13  ;;  %v4865_v4 = vld [vmem:[#allocation3 + $0xaa] sm:$0x3] }
 0x3cb   : > { %v4521_v35 = vpop.permute.xlu0 %4520  ;;  %3310 = vrot.lane.b32.xlu1 %v3257_v9, %s11045_s30  ;;  %1442 = vst.msk [vmem:[#allocation2 + $0x2f0] sm:$0xff] %vm1347_vm4, %v1332_v28  ;;  %v7323_v11 = vpop.f32.mrb[189].mxu0 }
 0x3cc   : > { %4574 = vst.msk [vmem:[#allocation4 + $0x80] sm:$0xff] %vm11261_vm12, %v4521_v35  ;;  %5709 = vmatpush1.bf16.msra.mxu1 %v9448_v17  ;;  %v1335_v60 = vpop.f32.mrb[190].mxu0  ;;  %vm11268_vm12 = vcmask 681584   ;;  %v3867_v35 = vld [vmem:[#allocation3 + $0x8c] sm:$0x3] }
 0x3cd   : > { %3430 = vrot.lane.b32.xlu0 %v9402_v15, %s11035_s24  ;;  %5710 = vmatprep.subr.bf16.mxu1 %v7813_v2  ;;  %v3429_v44 = vpop.permute.xlu1 %3428  ;;  %1443 = vst.msk [vmem:[#allocation2 + $0x2f8] sm:$0xff] %vm1347_vm4, %v1335_v60  ;;  %v7324_v15 = vpop.f32.mrb[191].mxu0 }
 0x3ce   : > { %3479 = vst.msk [vmem:[#allocation4 + $0xb0] sm:$0x3] %vm11262_vm7, %v3429_v44  ;;  %v1340_v21 = vpop.f32.mrb[192].mxu0  ;;  %v2173_v25 = vld [vmem:[#allocation2 + $0x2e0] sm:$0xff]  ;;  %vm11269_vm7 = vcmask 736928  }
 0x3cf   : > { %v3549_v30 = vpop.permute.xlu0 %3548  ;;  %3432 = vrot.lane.b32.xlu1 %v3379_v31, %s11035_s24  ;;  %1444 = vst.msk [vmem:[#allocation2 + $0x300] sm:$0xff] %vm1347_vm4, %v1340_v21  ;;  %v7327_v59 = vpop.f32.mrb[193].mxu0  ;;  %v4111_v21 = vld [vmem:[#allocation3 + $0x99] sm:$0x3] }
 0x3d0   : > { %3600 = vst.msk [vmem:[#allocation4 + $0xa0] sm:$0xff] %vm11263_vm3, %v3549_v30  ;;  %5711 = vmatpush1.bf16.msra.mxu1 %v9460_v45  ;;  %v1343_v57 = vpop.f32.mrb[194].mxu0  ;;  %vm11270_vm3 = vcmask 44032   ;;  %v3989_v30 = vld [vmem:[#allocation3 + $0x98] sm:$0x3] }
 0x3d1   : > { %3552 = vrot.lane.b32.xlu0 %v9414_v12, %s11040_s12  ;;  %5712 = vmatprep.subr.bf16.mxu1 %v7813_v2  ;;  %v3551_v20 = vpop.permute.xlu1 %3550  ;;  %1445 = vst.msk [vmem:[#allocation2 + $0x308] sm:$0xff] %vm1347_vm4, %v1343_v57  ;;  %v7328_v12 = vpop.f32.mrb[195].mxu0  ;;  %v4233_v59 = vld [vmem:[#allocation3 + $0x9a] sm:$0x3] }
 0x3d2   : > { %3601 = vst.msk [vmem:[#allocation4 + $0xb0] sm:$0x3] %vm11264_vm2, %v3551_v20  ;;  %v2175_v50 = vld [vmem:[#allocation2 + $0x2f0] sm:$0xf]  ;;  %vm11271_vm2 = vcmask 730784  }
 0x3d3   : > { %v3671_v63 = vpop.permute.xlu0 %3670  ;;  %3554 = vrot.lane.b32.xlu1 %v3501_v41, %s11040_s12 }
 0x3d4   : > { %3722 = vst.msk [vmem:[#allocation4 + $0xa0] sm:$0xff] %vm11265_vm14, %v3671_v63  ;;  %5713 = vmatpush1.bf16.msra.mxu1 %v9472_v29  ;;  %v2176_v48 = vld [vmem:[#allocation2 + $0x2f4] sm:$0xff]  ;;  %vm11272_vm14 = vcmask 1032128  }
 0x3d5   : > { %3674 = vrot.lane.b32.xlu0 %v9421_v53, %s11041_s16  ;;  %5714 = vmatprep.subr.bf16.mxu1 %v7813_v2  ;;  %v3673_v43 = vpop.permute.xlu1 %3672  ;;  %v2174_v53 = vld [vmem:[#allocation2 + $0x2e8] sm:$0xff]  ;;  %v2180_v55 = vmax.f32 %v2172_v46, %v2176_v48  ;;  %v9704_v63 = vld [vmem:[#allocation3 + $0xa1] sm:$0xff] }
 0x3d6   : > { %3723 = vst.msk [vmem:[#allocation4 + $0xb0] sm:$0x3] %vm11266_vm11, %v3673_v43  ;;  %v2177_v61 = vld [vmem:[#allocation2 + $0x2fc] sm:$0xff]  ;;  %vm11273_vm11 = vcmask 25600  }
 0x3d7   : > { %v3793_v6 = vpop.permute.xlu0 %3792  ;;  %3676 = vrot.lane.b32.xlu1 %v3623_v16, %s11041_s16  ;;  %v2181_v24 = vmax.f32 %v2173_v25, %v2177_v61  ;;  %2184 = vst.msk [vmem:[#allocation5] sm:$0xff] %vm1347_vm4, %v2180_v55  ;;  %v4721_v16 = vld [vmem:[#allocation3 + $0xa9] sm:$0x3]  ;;  %v4355_v55 = vld [vmem:[#allocation3 + $0x9b] sm:$0x3] }
 0x3d8   : > { %3844 = vst.msk [vmem:[#allocation4 + $0xa0] sm:$0xff] %vm11267_vm10, %v3793_v6  ;;  %5715 = vmatpush1.bf16.msra.mxu1 %v9484_v51  ;;  %v2178_v37 = vld [vmem:[#allocation2 + $0x304] sm:$0xff]  ;;  %v2179_v23 = vld [vmem:[#allocation2 + $0x30c] sm:$0xf]  ;;  %vm11274_vm10 = vcmask 786128  }
 0x3d9   : > { %3796 = vrot.lane.b32.xlu0 %v9429_v56, %s11082_s8  ;;  %5716 = vmatprep.subr.bf16.mxu1 %v7813_v2  ;;  %v3795_v52 = vpop.permute.xlu1 %3794  ;;  %v2182_v56 = vmax.f32 %v2174_v53, %v2178_v37  ;;  %v2183_v3 = vmax.f32 %v2175_v50, %v2179_v23  ;;  %2185 = vst.msk [vmem:[#allocation5 + $0x8] sm:$0xff] %vm1347_vm4, %v2181_v24 }
 0x3da   : > { %3845 = vst.msk [vmem:[#allocation4 + $0xb0] sm:$0x3] %vm11268_vm12, %v3795_v52  ;;  %vm11275_vm12 = vcmask 74784  }
 0x3db   : > { %v3915_v22 = vpop.permute.xlu0 %3914  ;;  %3798 = vrot.lane.b32.xlu1 %v3745_v58, %s11082_s8  ;;  %2186 = vst.msk [vmem:[#allocation5 + $0x10] sm:$0xff] %vm1347_vm4, %v2182_v56 }
 0x3dc   : > { %3966 = vst.msk [vmem:[#allocation4 + $0xa0] sm:$0xff] %vm11269_vm7, %v3915_v22  ;;  %5717 = vmatpush1.bf16.msra.mxu1 %v9500_v8  ;;  %vm11276_vm7 = vcmask 1048560  }
 0x3dd   : > { %3918 = vrot.lane.b32.xlu0 %v9443_v39, %s11083_s9  ;;  %5718 = vmatprep.subr.bf16.mxu1 %v7813_v2  ;;  %v3917_v19 = vpop.permute.xlu1 %3916  ;;  %2187 = vst.msk [vmem:[#allocation5 + $0x18] sm:$0xf] %vm11270_vm3, %v2183_v3  ;;  %v9673_v39 = vld [vmem:[%s10889_s2] ss:$0 sm:$0xff]  ;;  %vm11277_vm3 = vcmask 31744  }
 0x3de   : > { %3967 = vst.msk [vmem:[#allocation4 + $0xb0] sm:$0x3] %vm11271_vm2, %v3917_v19  ;;  %v9676_v9 = vadd.f32 %v9673_v39, %v2137_v18  ;;  %v9679_v27 = vadd.f32 %v9673_v39, %v2138_v49  ;;  %vm11278_vm2 = vcmask 123984   ;;  %v4477_v19 = vld [vmem:[#allocation3 + $0x9c] sm:$0x3] }
 0x3df   : > { %v4643_v40 = vpop.permute.xlu0 %4642  ;;  %3920 = vrot.lane.b32.xlu1 %v3867_v35, %s11083_s9 }
 0x3e0   : > { %4696 = vst.msk [vmem:[#allocation4 + $0x80] sm:$0xff] %vm11272_vm14, %v4643_v40  ;;  %5719 = vmatpush1.bf16.msra.mxu1 %v9514_v10  ;;  %v2143_v28 = vmin.f32 %v9676_v9, 20.0  ;;  %v2144_v44 = vmin.f32 %v9679_v27, 20.0  ;;  %vm11279_vm14 = vcmask 80928   ;;  %v2190_v22 = vld [vmem:[#allocation5 + $0x1] ss:$2 sm:$0xff] }
 0x3e1   : > { %4040 = vrot.lane.b32.xlu0 %v9509_v5, %s11050_s28  ;;  %5720 = vmatprep.subr.bf16.mxu1 %v7813_v2  ;;  %v4767_v47 = vpop.permute.xlu1 %4766 }
 0x3e2   : > { %4831 = vst.msk [vmem:[#allocation4 + $0x98] sm:$0x3] %vm11273_vm11, %v4767_v47  ;;  %v2145_v31 = vmul.f32 1.442695, %v2143_v28  ;;  %v2147_v60 = vmul.f32 1.442695, %v2144_v44 }
 0x3e3   : > { %v4037_v11 = vpop.permute.xlu0 %4036  ;;  %4042 = vrot.lane.b32.xlu1 %v3989_v30, %s11050_s28  ;;  %vm11011_vm11 = vcmask 130048  }
 0x3e4   : > { %4088 = vst.msk [vmem:[#allocation4 + $0xa0] sm:$0xff] %vm11274_vm10, %v4037_v11  ;;  %5721 = vmatpush1.bf16.msra.mxu1 %v9528_v34  ;;  %7637 = vpow2.f32 %v2145_v31  ;;  %vm11010_vm10 = vcmask 123904   ;;  %v2189_v24 = vld [vmem:[#allocation5 + $0x10] ss:$2 sm:$0x3f] }
 0x3e5   : > { %4162 = vrot.lane.b32.xlu0 %v9523_v14, %s11066_s10  ;;  %5722 = vmatprep.subr.bf16.mxu1 %v7813_v2  ;;  %v4911_v5 = vpop.permute.xlu1 %4910  ;;  %7639 = vpow2.f32 %v2147_v60  ;;  %v2191_v58 = vld [vmem:[#allocation5 + $0x11] ss:$2 sm:$0x3f] }
 0x3e6   : > { %4963 = vst.msk [vmem:[#allocation4 + $0x98] sm:$0x3] %vm11275_vm12, %v4911_v5  ;;  %vm11280_vm12 = vcmask 173184   ;;  %v2193_v56 = vmax.f32 %v2189_v24, %v2191_v58 }
 0x3e7   : > { %v4765_v15 = vpop.permute.xlu0 %4764  ;;  %4164 = vrot.lane.b32.xlu1 %v4111_v21, %s11066_s10 }
 0x3e8   : > { %4828 = vst.msk [vmem:[#allocation4 + $0x80] sm:$0xff] %vm11276_vm7, %v4765_v15  ;;  %5723 = vmatpush1.bf16.msra.mxu1 %v9542_v42  ;;  %vm11281_vm7 = vcmask 779984   ;;  %v9740_v13 = vadd.f32 %v9673_v39, %v2193_v56  ;;  %v4599_v56 = vld [vmem:[#allocation3 + $0xa8] sm:$0x3] }
 0x3e9   : > { %4829 = vst.msk [vmem:[#allocation4 + $0x88] sm:$0xff] %vm11277_vm3, %v4765_v15  ;;  %4284 = vrot.lane.b32.xlu0 %v9537_v33, %s11069_s26  ;;  %5724 = vmatprep.subr.bf16.mxu1 %v7813_v2  ;;  %v5033_v14 = vpop.permute.xlu1 %5032  ;;  %vm11282_vm3 = vcmask 835328  }
 0x3ea   : > { %5085 = vst.msk [vmem:[#allocation4 + $0x98] sm:$0x3] %vm11278_vm2, %v5033_v14  ;;  %vm11283_vm2 = vcmask 829184  }
 0x3eb   : > { %v4909_v20 = vpop.permute.xlu0 %4908  ;;  %4286 = vrot.lane.b32.xlu1 %v4233_v59, %s11069_s26 }
 0x3ec   : > { %4962 = vst.msk [vmem:[#allocation4 + $0x88] sm:$0xff] %vm11279_vm14, %v4909_v20  ;;  %5725 = vmatpush1.bf16.msra.mxu1 %v8675_v32  ;;  %vm11284_vm14 = vcmask 884528   ;;  %v2199_v20 = vmin.f32 %v9740_v13, 20.0 }
 0x3ed   : > { %4772 = vrot.lane.b32.xlu0 %v9704_v63, %s11058_s20  ;;  %5757 = vmatprep.subr.bf16.mxu1 %v7813_v2  ;;  %v4645_v33 = vpop.permute.xlu1 %4644 }
 0x3ee   : > { %v5394_v41 = vpop.f32.mrb[4].mxu1  ;;  %4697 = vst.msk [vmem:[#allocation4 + $0x90] sm:$0x3] %vm4688_vm13, %v4645_v33  ;;  %v9712_v6 = vpop.eup %7637 }
 0x3ef   : > { %v5401_v57 = vmax.f32 %v9490_v54, %v5394_v41  ;;  %v5396_v12 = vpop.f32.mrb[5].mxu1  ;;  %v5031_v43 = vpop.permute.xlu0 %5030  ;;  %4830 = vst.msk [vmem:[#allocation4 + $0x90] sm:$0x3] %vm4812_vm5, %v4767_v47  ;;  %4774 = vrot.lane.b32.xlu1 %v4721_v16, %s11058_s20  ;;  %v2149_v53 = vadd.f32 1.0, %v9712_v6  ;;  %v5697_v18 = vld [vmem:[#allocation4 + $0x80] sm:$0xff]  ;;  %v2152_v49 = vmul.f32 -0.5, %v9712_v6 }
 0x3f0   : > { %5084 = vst.msk [vmem:[#allocation4 + $0x88] sm:$0xff] %vm5074_vm8, %v5031_v43  ;;  %v5397_v46 = vpop.f32.mrb[6].mxu1  ;;  %v9717_v25 = vpop.eup %7639  ;;  %v2155_v21 = vand.u32 2147483647, %v9712_v6  ;;  %v9762_v12 = vld [vmem:[%s10891_s4] ss:$0 sm:$0xff] }
 0x3f1   : > { %5404 = vst.msk [vmem:[#allocation6] sm:$0xff] %vm11011_vm11, %v5401_v57  ;;  %v5402_v48 = vmax.f32 %v9495_v62, %v5397_v46  ;;  %v5399_v54 = vpop.f32.mrb[7].mxu1  ;;  %4406 = vrot.lane.b32.xlu0 %v9551_v26, %s11072_s21  ;;  %v5155_v50 = vpop.permute.xlu1 %5154  ;;  %v2158_v61 = vadd.f32 1.0, %v9717_v25  ;;  %7641 = vlog2.f32 %v2149_v53  ;;  %v9729_v62 = vld [vmem:[#allocation3 + $0xa2] sm:$0xff]  ;;  %v2161_v40 = vmul.f32 -0.5, %v9717_v25 }
 0x3f2   : > { %5207 = vst.msk [vmem:[#allocation4 + $0x98] sm:$0x3] %vm11280_vm12, %v5155_v50  ;;  %v2188_v26 = vld [vmem:[#allocation5] ss:$2 sm:$0xff]  ;;  %v2153_v60 = vadd.f32 1.0, %v2152_v49  ;;  %vm11285_vm12 = vcmask 179200  }
 0x3f3   : > { %5406 = vst.msk [vmem:[#allocation6 + $0x8] sm:$0x3] %vm11010_vm10, %v5402_v48  ;;  %v5153_v52 = vpop.permute.xlu0 %5152  ;;  %4408 = vrot.lane.b32.xlu1 %v4355_v55, %s11072_s21  ;;  %7643 = vlog2.f32 %v2158_v61  ;;  %v2192_v23 = vmax.f32 %v2188_v26, %v2190_v22  ;;  %v2162_v5 = vadd.f32 1.0, %v2161_v40  ;;  %v2164_v14 = vand.u32 2147483647, %v9717_v25  ;;  %v9779_v61 = vld [vmem:[#allocation3 + $0xa0] sm:$0xff] }
 0x3f4   : > { %5206 = vst.msk [vmem:[#allocation4 + $0x88] sm:$0xff] %vm5196_vm6, %v5153_v52  ;;  %v2154_v33 = vmul.f32 %v9712_v6, %v2153_v60  ;;  %v4987_v53 = vld [vmem:[#allocation3 + $0xab] sm:$0x3]  ;;  %vm2142_vm10 = vcmp.gt.f32.partialorder %v9679_v27, 20.0  ;;  %v2202_v55 = vmul.f32 1.442695, %v2199_v20 }
 0x3f5   : > { %4916 = vrot.lane.b32.xlu0 %v9729_v62, %s11063_s27  ;;  %v4039_v37 = vpop.permute.xlu1 %4038  ;;  %v9737_v7 = vadd.f32 %v9673_v39, %v2192_v23  ;;  %v2163_v41 = vmul.f32 %v9717_v25, %v2162_v5  ;;  %v2770_v6 = vld [vmem:[#allocation3 + $0x80] sm:$0xff] }
 0x3f6   : > { %4089 = vst.msk [vmem:[#allocation4 + $0xb0] sm:$0x3] %vm11281_vm7, %v4039_v37  ;;  %v5699_v38 = vld [vmem:[#allocation4 + $0x90] sm:$0x3]  ;;  %vm9765_vm7 = vcmp.lt.f32.partialorder %v2155_v21, 0.0004427343 }
 0x3f7   : > { %v4159_v3 = vpop.permute.xlu0 %4158  ;;  %4918 = vrot.lane.b32.xlu1 %v4865_v4, %s11063_s27  ;;  %v2198_v44 = vmin.f32 %v9737_v7, 20.0  ;;  %v5701_v39 = vpack.c.bf16 %v5699_v38, %v5697_v18  ;;  %v5109_v38 = vld [vmem:[#allocation3 + $0xac] sm:$0x3]  ;;  %v2527_v21 = vld [vmem:[#allocation3 + $0x7b] sm:$0x3] }
 0x3f8   : > { %4210 = vst.msk [vmem:[#allocation4 + $0xa0] sm:$0xff] %vm11282_vm3, %v4159_v3  ;;  %vm9769_vm3 = vcmp.lt.f32.partialorder %v2164_v14, 0.0004427343 }
 0x3f9   : > { %4528 = vrot.lane.b32.xlu0 %v9560_v0, %s11074_s18  ;;  %v4161_v35 = vpop.permute.xlu1 %4160  ;;  %v5700_v47 = vld [vmem:[#allocation4 + $0x98] sm:$0x3]  ;;  %v9750_v0 = vld [vmem:[#allocation3 + $0xa3] sm:$0xff]  ;;  %v2200_v57 = vmul.f32 1.442695, %v2198_v44 }
 0x3fa   : > { %v5407_v28 = vld [vmem:[#allocation6] ss:$2 sm:$0x1f]  ;;  %4211 = vst.msk [vmem:[#allocation4 + $0xb0] sm:$0x3] %vm11283_vm2, %v4161_v35  ;;  %vm11290_vm2 = vcmask 878384  }
 0x3fb   : > { %v4281_v11 = vpop.permute.xlu0 %4280  ;;  %v5698_v30 = vld [vmem:[#allocation4 + $0x88] sm:$0xff]  ;;  %4530 = vrot.lane.b32.xlu1 %v4477_v19, %s11074_s18  ;;  %v7642_v59 = vpop.eup %7641  ;;  %7645 = vpow2.f32 %v2200_v57  ;;  %v2283_v35 = vld [vmem:[#allocation3 + $0x79] sm:$0x3] }
 0x3fc   : > { %v5409_v31 = vld [vmem:[#allocation6 + $0x1] ss:$2 sm:$0x1f]  ;;  %4332 = vst.msk [vmem:[#allocation4 + $0xa0] sm:$0xff] %vm11284_vm14, %v4281_v11  ;;  %v5702_v15 = vpack.c.bf16 %v5700_v47, %v5698_v30  ;;  %v2151_v48 = vmul.f32 0.6931472, %v7642_v59  ;;  %7647 = vpow2.f32 %v2202_v55 }
 0x3fd   : > { %5038 = vrot.lane.b32.xlu0 %v9750_v0, %s11065_s1  ;;  %v5410_v43 = vmax.f32 %v5407_v28, %v5409_v31  ;;  %v7644_v16 = vpop.eup %7643  ;;  %v4283_v46 = vpop.permute.xlu1 %4282  ;;  %vm2141_vm14 = vcmp.gt.f32.partialorder %v9676_v9, 20.0  ;;  %v2405_v30 = vld [vmem:[#allocation3 + $0x7a] sm:$0x3]  ;;  %v9956_v55 = vld [vmem:[%s10890_s3 + $0x20] sm:$0xff]  }
 0x3fe   : > { %6980 = vmatprep.mubr.msk.bf16.mxu1 %vm11285_vm12, %v5702_v15  ;;  %4333 = vst.msk [vmem:[#allocation4 + $0xb0] sm:$0x3] %vm11290_vm2, %v4283_v46  ;;  %v2160_v50 = vmul.f32 0.6931472, %v7644_v16  ;;  %vm11291_vm12 = vcmask 933728   ;;  %v2157_v52 = vsel %vm9765_vm7, %v2154_v33, %v2151_v48  ;;  %vm11292_vm7 = vcmask 927584  }
 0x3ff   : > { %5739 = vmatmul.mubr.bf16.vlgmr.msra.gmra.mrb[16].mxu1 %v5701_v39  ;;  %v4403_v25 = vpop.permute.xlu0 %4402  ;;  %5040 = vrot.lane.b32.xlu1 %v4987_v53, %s11065_s1  ;;  %v9784_v26 = vadd.f32 %v9762_v12, %v5410_v43  ;;  %v2167_v24 = vsel %vm2141_vm14, %v9676_v9, %v2157_v52  ;;  %vm11293_vm2 = vcmask 46080   ;;  %v9800_v9 = vld [vmem:[#allocation3 + $0xa4] sm:$0xff]  ;;  %vm11297_vm14 = vcmask 25600   ;;  %v2526_v39 = vld [vmem:[#allocation3 + $0x73] sm:$0xff]  ;;  %v2649_v48 = vld [vmem:[#allocation3 + $0x7c] sm:$0x3] }
 0x400   : > { %5758 = vmatpush1.bf16.msra.mxu1 %v9434_v36  ;;  %4454 = vst.msk [vmem:[#allocation4 + $0xa0] sm:$0xff] %vm11291_vm12, %v4403_v25  ;;  %v2166_v36 = vsel %vm9769_vm3, %v2163_v41, %v2160_v50  ;;  %vm11294_vm12 = vcmask 982928   ;;  %vm11296_vm3 = vcmask 1032128   ;;  %v7707_v46 = vld [vmem:[#allocation3 + $0x91] sm:$0xff] }
 0x401   : > { %4650 = vrot.lane.b32.xlu0 %v9779_v61, %s11057_s23  ;;  %5759 = vmatprep.subr.bf16.mxu1 %v7813_v2  ;;  %v4405_v22 = vpop.permute.xlu1 %4404  ;;  %v2168_v58 = vsel %vm2142_vm10, %v9679_v27, %v2166_v36  ;;  %2170 = vst.msk [vmem:[#allocation3 + $0xc0] sm:$0xff] %vm1347_vm4, %v2167_v24  ;;  %v5419_v37 = vmin.f32 %v9784_v26, 20.0  ;;  %vm11295_vm10 = vcmask 976784  }
 0x402   : > { %4455 = vst.msk [vmem:[#allocation4 + $0xb0] sm:$0x3] %vm11292_vm7, %v4405_v22  ;;  %vm11298_vm7 = vcmask 1048560  }
 0x403   : > { %v4525_v23 = vpop.permute.xlu0 %4524  ;;  %2171 = vst.msk [vmem:[#allocation3 + $0xc8] sm:$0x3f] %vm11293_vm2, %v2168_v58  ;;  %4652 = vrot.lane.b32.xlu1 %v4599_v56, %s11057_s23  ;;  %v5420_v27 = vmul.f32 1.442695, %v5419_v37  ;;  %vm11299_vm2 = vcmask 31744   ;;  %v9861_v37 = vld [vmem:[#allocation3 + $0x81] sm:$0xff] }
 0x404   : > { %5760 = vmatpush1.bf16.msra.mxu1 %v9448_v17  ;;  %4576 = vst.msk [vmem:[#allocation4 + $0xa0] sm:$0xff] %vm11294_vm12, %v4525_v23  ;;  %v2282_v17 = vld [vmem:[#allocation3 + $0x71] sm:$0xff]  ;;  %vm11300_vm12 = vcmask 74784   ;;  %v2771_v58 = vld [vmem:[#allocation3 + $0x88] sm:$0x3] }
 0x405   : > { %5160 = vrot.lane.b32.xlu0 %v9800_v9, %s11067_s11  ;;  %5761 = vmatprep.subr.bf16.mxu1 %v7813_v2  ;;  %v4527_v3 = vpop.permute.xlu1 %4526  ;;  %7649 = vpow2.f32 %v5420_v27  ;;  %v7646_v19 = vpop.eup %7645 }
 0x406   : > { %4577 = vst.msk [vmem:[#allocation4 + $0xb0] sm:$0x3] %vm11295_vm10, %v4527_v3  ;;  %v2204_v49 = vadd.f32 1.0, %v7646_v19  ;;  %v7648_v47 = vpop.eup %7647  ;;  %vm11301_vm10 = vcmask 80928   ;;  %v2207_v60 = vmul.f32 -0.5, %v7646_v19 }
 0x407   : > { %v4647_v4 = vpop.permute.xlu0 %4646  ;;  %5162 = vrot.lane.b32.xlu1 %v5109_v38, %s11067_s11  ;;  %v2213_v28 = vadd.f32 1.0, %v7648_v47  ;;  %v2216_v5 = vmul.f32 -0.5, %v7648_v47  ;;  %v2210_v59 = vand.u32 2147483647, %v7646_v19  ;;  %v2219_v41 = vand.u32 2147483647, %v7648_v47 }
 0x408   : > { %5762 = vmatpush1.bf16.msra.mxu1 %v9460_v45  ;;  %4698 = vst.msk [vmem:[#allocation4 + $0xa0] sm:$0xff] %vm11296_vm3, %v4647_v4  ;;  %v2404_v45 = vld [vmem:[#allocation3 + $0x72] sm:$0xff]  ;;  %7651 = vlog2.f32 %v2204_v49  ;;  %vm11302_vm3 = vcmask 123984   ;;  %v2208_v20 = vadd.f32 1.0, %v2207_v60  ;;  %v2893_v38 = vld [vmem:[#allocation3 + $0x89] sm:$0x3] }
 0x409   : > { %2336 = vrot.lane.b32.xlu0 %v2282_v17, %s11048_s0  ;;  %5763 = vmatprep.subr.bf16.mxu1 %v7813_v2  ;;  %v4771_v18 = vpop.permute.xlu1 %4770  ;;  %7653 = vlog2.f32 %v2213_v28  ;;  %v2217_v33 = vadd.f32 1.0, %v2216_v5  ;;  %v5432_v17 = vlaneseq  ;;  %v3137_v5 = vld [vmem:[#allocation3 + $0x8b] sm:$0x3] }
 0x40a   : > { %4835 = vst.msk [vmem:[#allocation4 + $0xb8] sm:$0x3] %vm11297_vm14, %v4771_v18  ;;  %v2209_v16 = vmul.f32 %v7646_v19, %v2208_v20  ;;  %vm9833_vm14 = vcmp.lt.f32.partialorder %v2210_v59, 0.0004427343  ;;  %v9875_v19 = vld [vmem:[#allocation3 + $0x82] sm:$0xff]  ;;  %v9923_v59 = vld [vmem:[%s10890_s3 + $0x8] sm:$0xff]  }
 0x40b   : > { %v4769_v40 = vpop.permute.xlu0 %4768  ;;  %2338 = vrot.lane.b32.xlu1 %v2283_v35, %s11048_s0  ;;  %v2218_v25 = vmul.f32 %v7648_v47, %v2217_v33  ;;  %v3259_v20 = vld [vmem:[#allocation3 + $0x8c] sm:$0x3]  ;;  %v7705_v33 = vld [vmem:[#allocation3 + $0x90] sm:$0xff] }
 0x40c   : > { %5764 = vmatpush1.bf16.msra.mxu1 %v9472_v29  ;;  %4832 = vst.msk [vmem:[#allocation4 + $0xa0] sm:$0xff] %vm11298_vm7, %v4769_v40  ;;  %vm2196_vm7 = vcmp.gt.f32.partialorder %v9737_v7, 20.0 }
 0x40d   : > { %4833 = vst.msk [vmem:[#allocation4 + $0xa8] sm:$0xff] %vm11299_vm2, %v4769_v40  ;;  %2458 = vrot.lane.b32.xlu0 %v2404_v45, %s11049_s19  ;;  %5765 = vmatprep.subr.bf16.mxu1 %v7813_v2  ;;  %v4915_v44 = vpop.permute.xlu1 %4914  ;;  %vm9848_vm2 = vcmp.lt.f32.partialorder %v2219_v41, 0.0004427343 }
 0x40e   : > { %4965 = vst.msk [vmem:[#allocation4 + $0xb8] sm:$0x3] %vm11300_vm12, %v4915_v44  ;;  %vm2197_vm12 = vcmp.gt.f32.partialorder %v9740_v13, 20.0  ;;  %v3015_v44 = vld [vmem:[#allocation3 + $0x8a] sm:$0x3] }
 0x40f   : > { %v4913_v11 = vpop.permute.xlu0 %4912  ;;  %v9819_v29 = vpop.eup %7649  ;;  %2460 = vrot.lane.b32.xlu1 %v2405_v30, %s11049_s19 }
 0x410   : > { %5766 = vmatpush1.bf16.msra.mxu1 %v9484_v51  ;;  %4964 = vst.msk [vmem:[#allocation4 + $0xa8] sm:$0xff] %vm11301_vm10, %v4913_v11  ;;  %v5422_v14 = vadd.f32 1.0, %v9819_v29  ;;  %v2648_v51 = vld [vmem:[#allocation3 + $0x74] sm:$0xff]  ;;  %v5425_v53 = vmul.f32 -0.5, %v9819_v29  ;;  %vm11307_vm10 = vcmask 173184  }
 0x411   : > { %2580 = vrot.lane.b32.xlu0 %v2526_v39, %s11033_s13  ;;  %5767 = vmatprep.subr.bf16.mxu1 %v7813_v2  ;;  %v5037_v31 = vpop.permute.xlu1 %5036  ;;  %v5428_v27 = vand.u32 2147483647, %v9819_v29 }
 0x412   : > { %5087 = vst.msk [vmem:[#allocation4 + $0xb8] sm:$0x3] %vm11302_vm3, %v5037_v31  ;;  %7655 = vlog2.f32 %v5422_v14  ;;  %v7652_v57 = vpop.eup %7651  ;;  %vm11308_vm3 = vcmask 97328   ;;  %v5426_v56 = vadd.f32 1.0, %v5425_v53 }
 0x413   : > { %v5035_v15 = vpop.permute.xlu0 %5034  ;;  %2582 = vrot.lane.b32.xlu1 %v2527_v21, %s11033_s13  ;;  %v2206_v54 = vmul.f32 0.6931472, %v7652_v57  ;;  %v7654_v50 = vpop.eup %7653  ;;  %v5748_v39 = vld [vmem:[#allocation4 + $0xa0] sm:$0xff]  ;;  %v9911_v21 = vld [vmem:[%s10890_s3] sm:$0xff]  }
 0x414   : > { %5768 = vmatpush1.bf16.msra.mxu1 %v9500_v8  ;;  %5086 = vst.msk [vmem:[#allocation4 + $0xa8] sm:$0xff] %vm5074_vm8, %v5035_v15  ;;  %v2215_v36 = vmul.f32 0.6931472, %v7654_v50  ;;  %v9906_v15 = vld [vmem:[#allocation3 + $0x84] sm:$0xff] }
 0x415   : > { %2702 = vrot.lane.b32.xlu0 %v2648_v51, %s11034_s15  ;;  %5769 = vmatprep.subr.bf16.mxu1 %v7813_v2  ;;  %v4649_v43 = vpop.permute.xlu1 %4648  ;;  %v2212_v52 = vsel %vm9833_vm14, %v2209_v16, %v2206_v54  ;;  %vm11310_vm14 = vcmask 91184   ;;  %v9934_v16 = vld [vmem:[%s10890_s3 + $0x10] sm:$0xff]   ;;  %v3503_v54 = vld [vmem:[#allocation3 + $0x99] sm:$0x3] }
 0x416   : > { %4699 = vst.msk [vmem:[#allocation4 + $0xb0] sm:$0x3] %vm4688_vm13, %v4649_v43  ;;  %v2222_v24 = vsel %vm2196_vm7, %v9737_v7, %v2212_v52  ;;  %v2221_v23 = vsel %vm9848_vm2, %v2218_v25, %v2215_v36  ;;  %vm11311_vm7 = vcmask 146528   ;;  %vm5429_vm2 = vcmp.lt.f32.partialorder %v5428_v27, 0.0004427343  ;;  %v7709_v25 = vld [vmem:[#allocation3 + $0x92] sm:$0xff] }
 0x417   : > { %v5157_v8 = vpop.permute.xlu0 %5156  ;;  %4834 = vst.msk [vmem:[#allocation4 + $0xb0] sm:$0x3] %vm4812_vm5, %v4771_v18  ;;  %2704 = vrot.lane.b32.xlu1 %v2649_v48, %s11034_s15  ;;  %v2223_v7 = vsel %vm2197_vm12, %v9740_v13, %v2221_v23  ;;  %v5427_v18 = vmul.f32 %v9819_v29, %v5426_v56  ;;  %vm9882_vm12 = vcmp.lt.s32.totalorder %v5432_v17, 16  ;;  %v9894_v29 = vld [vmem:[#allocation3 + $0x83] sm:$0xff]  ;;  %v3381_v43 = vld [vmem:[#allocation3 + $0x98] sm:$0x3] }
 0x418   : > { %5770 = vmatpush1.bf16.msra.mxu1 %v9514_v10  ;;  %5208 = vst.msk [vmem:[#allocation4 + $0xa8] sm:$0xff] %vm5196_vm6, %v5157_v8  ;;  %v3625_v52 = vld [vmem:[#allocation3 + $0x9a] sm:$0x3]  ;;  %v3869_v27 = vld [vmem:[#allocation3 + $0x9c] sm:$0x3] }
 0x419   : > { %2824 = vrot.lane.b32.xlu0 %v2770_v6, %s11055_s17  ;;  %5771 = vmatprep.subr.bf16.mxu1 %v7813_v2  ;;  %v5159_v10 = vpop.permute.xlu1 %5158  ;;  %2225 = vst.msk [vmem:[#allocation3 + $0xd0] sm:$0xff] %vm1347_vm4, %v2222_v24  ;;  %vm11309_vm4 = vcmask 46080   ;;  %v9945_v6 = vld [vmem:[%s10890_s3 + $0x18] sm:$0xff]   ;;  %v7713_v23 = vld [vmem:[#allocation3 + $0x94] sm:$0xff] }
 0x41a   : > { %5209 = vst.msk [vmem:[#allocation4 + $0xb8] sm:$0x3] %vm11307_vm10, %v5159_v10  ;;  %vm5418_vm10 = vcmp.gt.f32.partialorder %v9784_v26, 20.0  ;;  %v7711_v10 = vld [vmem:[#allocation3 + $0x93] sm:$0xff] }
 0x41b   : > { %v2333_v22 = vpop.permute.xlu0 %2332  ;;  %2826 = vrot.lane.b32.xlu1 %v2771_v58, %s11055_s17  ;;  %2226 = vst.msk [vmem:[#allocation3 + $0xd8] sm:$0x3f] %vm11309_vm4, %v2223_v7  ;;  %vm11315_vm4 = vcmask 195728   ;;  %v9967_v58 = vld [vmem:[%s10890_s3 + $0x28] sm:$0xff]  }
 0x41c   : > { %5772 = vmatpush1.bf16.msra.mxu1 %v9528_v34  ;;  %2382 = vst.msk [vmem:[#allocation4 + $0xc0] sm:$0xff] %vm11308_vm3, %v2333_v22  ;;  %v7656_v3 = vpop.eup %7655  ;;  %vm11314_vm3 = vcmask 140384   ;;  %v3747_v22 = vld [vmem:[#allocation3 + $0x9b] sm:$0x3] }
 0x41d   : > { %2946 = vrot.lane.b32.xlu0 %v9861_v37, %s11042_s25  ;;  %5773 = vmatprep.subr.bf16.mxu1 %v7813_v2  ;;  %v2335_v34 = vpop.permute.xlu1 %2334  ;;  %v5424_v13 = vmul.f32 0.6931472, %v7656_v3 }
 0x41e   : > { %2383 = vst.msk [vmem:[#allocation4 + $0xd0] sm:$0x3] %vm11310_vm14, %v2335_v34  ;;  %v5750_v47 = vld [vmem:[#allocation4 + $0xb0] sm:$0x3]  ;;  %vm11316_vm14 = vcmask 179200   ;;  %v9978_v34 = vld [vmem:[%s10890_s3 + $0x30] sm:$0xff]  }
 0x41f   : > { %v2455_v4 = vpop.permute.xlu0 %2454  ;;  %2948 = vrot.lane.b32.xlu1 %v2893_v38, %s11042_s25  ;;  %v5749_v40 = vld [vmem:[#allocation4 + $0xa8] sm:$0xff]  ;;  %v5430_v45 = vsel %vm5429_vm2, %v5427_v18, %v5424_v13  ;;  %vm11318_vm2 = vcmask 244928  }
 0x420   : > { %5774 = vmatpush1.bf16.msra.mxu1 %v9542_v42  ;;  %2504 = vst.msk [vmem:[#allocation4 + $0xc0] sm:$0xff] %vm11311_vm7, %v2455_v4  ;;  %v9889_v30 = vsel %vm5418_vm10, %v9784_v26, %v5430_v45  ;;  %v5752_v26 = vpack.c.bf16 %v5750_v47, %v5748_v39  ;;  %vm11317_vm7 = vcmask 189584   ;;  %vm11319_vm10 = vcmask 238784   ;;  %v3991_v38 = vld [vmem:[#allocation3 + $0xa8] sm:$0x3] }
 0x421   : > { %3068 = vrot.lane.b32.xlu0 %v9875_v19, %s11043_s29  ;;  %5775 = vmatprep.subr.bf16.mxu1 %v7813_v2  ;;  %v2457_v42 = vpop.permute.xlu1 %2456  ;;  %v5751_v35 = vld [vmem:[#allocation4 + $0xb8] sm:$0x3]  ;;  %5436 = vst.msk [vmem:[#allocation7] sm:$0x1] %vm9882_vm12, %v9889_v30  ;;  %v9990_v13 = vld [vmem:[%s10890_s3 + $0x38] sm:$0xff]  }
 0x422   : > { %2505 = vst.msk [vmem:[#allocation4 + $0xd0] sm:$0x3] %vm11314_vm3, %v2457_v42  ;;  %v5753_v11 = vpack.c.bf16 %v5751_v35, %v5749_v40  ;;  %vm11320_vm3 = vcmask 294128   ;;  %v4113_v40 = vld [vmem:[#allocation3 + $0xa9] sm:$0x3]  ;;  %v10002_v35 = vld [vmem:[%s10890_s3 + $0x40] sm:$0xff]  }
 0x423   : > { %v2577_v28 = vpop.permute.xlu0 %2576  ;;  %3070 = vrot.lane.b32.xlu1 %v3015_v44, %s11043_s29  ;;  %v4235_v45 = vld [vmem:[#allocation3 + $0xaa] sm:$0x3] }
 0x424   : > { %5776 = vmatpush1.bf16.msra.mxu1 %v8675_v32  ;;  %2626 = vst.msk [vmem:[#allocation4 + $0xc0] sm:$0xff] %vm11315_vm4, %v2577_v28  ;;  %6981 = vmatprep.mubr.msk.bf16.mxu1 %vm11316_vm14, %v5753_v11  ;;  %vm11321_vm4 = vcmask 287984   ;;  %vm11322_vm14 = vcmask 343328   ;;  %v10011_v28 = vld [vmem:[#allocation3 + $0xb1] sm:$0xff] }
 0x425   : > { %3190 = vrot.lane.b32.xlu0 %v9894_v29, %s11044_s22  ;;  %v2579_v31 = vpop.permute.xlu1 %2578  ;;  %5890 = vmatprep.subr.bf16.mxu1 %v7813_v2 }
 0x426   : > { %2627 = vst.msk [vmem:[#allocation4 + $0xd0] sm:$0x3] %vm11317_vm7, %v2579_v31  ;;  %vm11323_vm7 = vcmask 337184   ;;  %v4723_v31 = vld [vmem:[#allocation3 + $0xb9] sm:$0x3] }
 0x427   : > { %5790 = vmatmul.mubr.bf16.vlgmr.msra.gmra.mrb[20].mxu1 %v5752_v26  ;;  %v2699_v60 = vpop.permute.xlu0 %2698  ;;  %3192 = vrot.lane.b32.xlu1 %v3137_v5, %s11044_s22 }
 0x428   : > { %2748 = vst.msk [vmem:[#allocation4 + $0xc0] sm:$0xff] %vm11318_vm2, %v2699_v60  ;;  %5891 = vmatpush1.bf16.msra.mxu1 %v9911_v21  ;;  %vm11324_vm2 = vcmask 392528  }
 0x429   : > { %3312 = vrot.lane.b32.xlu0 %v9906_v15, %s11045_s30  ;;  %5892 = vmatprep.subr.bf16.mxu1 %v7813_v2  ;;  %v2701_v14 = vpop.permute.xlu1 %2700 }
 0x42a   : > { %2749 = vst.msk [vmem:[#allocation4 + $0xd0] sm:$0x3] %vm11319_vm10, %v2701_v14  ;;  %vm11325_vm10 = vcmask 386384  }
 0x42b   : > { %v2821_v51 = vpop.permute.xlu0 %2820  ;;  %3314 = vrot.lane.b32.xlu1 %v3259_v20, %s11045_s30  ;;  %v4357_v20 = vld [vmem:[#allocation3 + $0xab] sm:$0x3] }
 0x42c   : > { %2870 = vst.msk [vmem:[#allocation4 + $0xc0] sm:$0xff] %vm11320_vm3, %v2821_v51  ;;  %5893 = vmatpush1.bf16.msra.mxu1 %v9923_v59  ;;  %vm11326_vm3 = vcmask 441728  }
 0x42d   : > { %3434 = vrot.lane.b32.xlu0 %v7705_v33, %s11035_s24  ;;  %5894 = vmatprep.subr.bf16.mxu1 %v7813_v2  ;;  %v2823_v41 = vpop.permute.xlu1 %2822  ;;  %v10029_v33 = vld [vmem:[#allocation3 + $0xb2] sm:$0xff] }
 0x42e   : > { %2871 = vst.msk [vmem:[#allocation4 + $0xd0] sm:$0x3] %vm11321_vm4, %v2823_v41  ;;  %vm11327_vm4 = vcmask 540128  }
 0x42f   : > { %v2943_v57 = vpop.permute.xlu0 %2942  ;;  %3436 = vrot.lane.b32.xlu1 %v3381_v43, %s11035_s24  ;;  %v4867_v43 = vld [vmem:[#allocation3 + $0xba] sm:$0x3] }
 0x430   : > { %2992 = vst.msk [vmem:[#allocation4 + $0xc0] sm:$0xff] %vm11322_vm14, %v2943_v57  ;;  %5895 = vmatpush1.bf16.msra.mxu1 %v9934_v16  ;;  %vm11328_vm14 = vcmask 533984  }
 0x431   : > { %3556 = vrot.lane.b32.xlu0 %v7707_v46, %s11040_s12  ;;  %5896 = vmatprep.subr.bf16.mxu1 %v7813_v2  ;;  %v2945_v8 = vpop.permute.xlu1 %2944 }
 0x432   : > { %2993 = vst.msk [vmem:[#allocation4 + $0xd0] sm:$0x3] %vm11323_vm7, %v2945_v8  ;;  %vm11329_vm7 = vcmask 589328  }
 0x433   : > { %v3065_v48 = vpop.permute.xlu0 %3064  ;;  %3558 = vrot.lane.b32.xlu1 %v3503_v54, %s11040_s12  ;;  %v10041_v54 = vld [vmem:[#allocation3 + $0xb3] sm:$0xff] }
 0x434   : > { %3114 = vst.msk [vmem:[#allocation4 + $0xc0] sm:$0xff] %vm11324_vm2, %v3065_v48  ;;  %5897 = vmatpush1.bf16.msra.mxu1 %v9945_v6  ;;  %vm11330_vm2 = vcmask 583184   ;;  %v4479_v48 = vld [vmem:[#allocation3 + $0xac] sm:$0x3] }
 0x435   : > { %3678 = vrot.lane.b32.xlu0 %v7709_v25, %s11041_s16  ;;  %5898 = vmatprep.subr.bf16.mxu1 %v7813_v2  ;;  %v3067_v53 = vpop.permute.xlu1 %3066 }
 0x436   : > { %3115 = vst.msk [vmem:[#allocation4 + $0xd0] sm:$0x3] %vm11325_vm10, %v3067_v53  ;;  %vm11331_vm10 = vcmask 638528  }
 0x437   : > { %v3187_v50 = vpop.permute.xlu0 %3186  ;;  %3680 = vrot.lane.b32.xlu1 %v3625_v52, %s11041_s16  ;;  %v10048_v52 = vld [vmem:[#allocation3 + $0xb0] sm:$0xff] }
 0x438   : > { %3236 = vst.msk [vmem:[#allocation4 + $0xc0] sm:$0xff] %vm11326_vm3, %v3187_v50  ;;  %5899 = vmatpush1.bf16.msra.mxu1 %v9956_v55  ;;  %vm11332_vm3 = vcmask 632384   ;;  %v4989_v50 = vld [vmem:[#allocation3 + $0xbb] sm:$0x3] }
 0x439   : > { %3800 = vrot.lane.b32.xlu0 %v7711_v10, %s11082_s8  ;;  %5900 = vmatprep.subr.bf16.mxu1 %v7813_v2  ;;  %v3189_v36 = vpop.permute.xlu1 %3188 }
 0x43a   : > { %3237 = vst.msk [vmem:[#allocation4 + $0xd0] sm:$0x3] %vm3224_vm9, %v3189_v36 }
 0x43b   : > { %v3309_v24 = vpop.permute.xlu0 %3308  ;;  %3802 = vrot.lane.b32.xlu1 %v3747_v22, %s11082_s8  ;;  %v10055_v22 = vld [vmem:[#allocation3 + $0xb4] sm:$0xff] }
 0x43c   : > { %3358 = vst.msk [vmem:[#allocation4 + $0xc0] sm:$0xff] %vm3344_vm0, %v3309_v24  ;;  %5901 = vmatpush1.bf16.msra.mxu1 %v9967_v58  ;;  %v4601_v24 = vld [vmem:[#allocation3 + $0xb8] sm:$0x3] }
 0x43d   : > { %3922 = vrot.lane.b32.xlu0 %v7713_v23, %s11083_s9  ;;  %5902 = vmatprep.subr.bf16.mxu1 %v7813_v2  ;;  %v3311_v56 = vpop.permute.xlu1 %3310 }
 0x43e   : > { %3359 = vst.msk [vmem:[#allocation4 + $0xd0] sm:$0x3] %vm3346_vm1, %v3311_v56 }
 0x43f   : > { %v3431_v7 = vpop.permute.xlu0 %3430  ;;  %3924 = vrot.lane.b32.xlu1 %v3869_v27, %s11083_s9 }
 0x440   : > { %3480 = vst.msk [vmem:[#allocation4 + $0xc0] sm:$0xff] %vm11327_vm4, %v3431_v7  ;;  %5903 = vmatpush1.bf16.msra.mxu1 %v9978_v34  ;;  %vm11333_vm4 = vcmask 687728   ;;  %v5111_v7 = vld [vmem:[#allocation3 + $0xbc] sm:$0x3] }
 0x441   : > { %4044 = vrot.lane.b32.xlu0 %v9779_v61, %s11050_s28  ;;  %5904 = vmatprep.subr.bf16.mxu1 %v7813_v2  ;;  %v3433_v3 = vpop.permute.xlu1 %3432 }
 0x442   : > { %3481 = vst.msk [vmem:[#allocation4 + $0xd0] sm:$0x3] %vm11328_vm14, %v3433_v3  ;;  %vm11334_vm14 = vcmask 681584  }
 0x443   : > { %v3553_v4 = vpop.permute.xlu0 %3552  ;;  %4046 = vrot.lane.b32.xlu1 %v3991_v38, %s11050_s28 }
 0x444   : > { %3602 = vst.msk [vmem:[#allocation4 + $0xc0] sm:$0xff] %vm11329_vm7, %v3553_v4  ;;  %5905 = vmatpush1.bf16.msra.mxu1 %v9990_v13  ;;  %vm11335_vm7 = vcmask 736928   ;;  %v2285_v4 = vld [vmem:[#allocation3 + $0x89] sm:$0x3] }
 0x445   : > { %4166 = vrot.lane.b32.xlu0 %v9704_v63, %s11066_s10  ;;  %5906 = vmatprep.subr.bf16.mxu1 %v7813_v2  ;;  %v3555_v18 = vpop.permute.xlu1 %3554 }
 0x446   : > { %3603 = vst.msk [vmem:[#allocation4 + $0xd0] sm:$0x3] %vm11330_vm2, %v3555_v18  ;;  %vm11336_vm2 = vcmask 730784  }
 0x447   : > { %v3675_v42 = vpop.permute.xlu0 %3674  ;;  %4168 = vrot.lane.b32.xlu1 %v4113_v40, %s11066_s10 }
 0x448   : > { %3724 = vst.msk [vmem:[#allocation4 + $0xc0] sm:$0xff] %vm11331_vm10, %v3675_v42  ;;  %5907 = vmatpush1.bf16.msra.mxu1 %v10002_v35  ;;  %vm11337_vm10 = vcmask 786128   ;;  %v2407_v42 = vld [vmem:[#allocation3 + $0x8a] sm:$0x3] }
 0x449   : > { %4288 = vrot.lane.b32.xlu0 %v9729_v62, %s11069_s26  ;;  %5908 = vmatprep.subr.bf16.mxu1 %v7813_v2  ;;  %v3677_v63 = vpop.permute.xlu1 %3676 }
 0x44a   : > { %3725 = vst.msk [vmem:[#allocation4 + $0xd0] sm:$0x3] %vm11332_vm3, %v3677_v63  ;;  %vm11338_vm3 = vcmask 779984   ;;  %v2529_v63 = vld [vmem:[#allocation3 + $0x8b] sm:$0x3] }
 0x44b   : > { %v3797_v47 = vpop.permute.xlu0 %3796  ;;  %4290 = vrot.lane.b32.xlu1 %v4235_v45, %s11069_s26  ;;  %v2651_v45 = vld [vmem:[#allocation3 + $0x8c] sm:$0x3] }
 0x44c   : > { %3846 = vst.msk [vmem:[#allocation4 + $0xc0] sm:$0xff] %vm11333_vm4, %v3797_v47  ;;  %5909 = vmatpush1.bf16.msra.mxu1 %v8675_v32  ;;  %vm11339_vm4 = vcmask 835328  }
 0x44d   : > { %4776 = vrot.lane.b32.xlu0 %v10011_v28, %s11058_s20  ;;  %5941 = vmatprep.subr.bf16.mxu1 %v7813_v2  ;;  %v3799_v44 = vpop.permute.xlu1 %3798 }
 0x44e   : > { %v10017_v11 = vpop.f32.mrb[8].mxu1  ;;  %3847 = vst.msk [vmem:[#allocation4 + $0xd0] sm:$0x3] %vm11334_vm14, %v3799_v44  ;;  %vm11340_vm14 = vcmask 829184  }
 0x44f   : > { %v5551_v39 = vpop.f32.mrb[9].mxu1  ;;  %v3919_v26 = vpop.permute.xlu0 %3918  ;;  %4778 = vrot.lane.b32.xlu1 %v4723_v31, %s11058_s20 }
 0x450   : > { %3968 = vst.msk [vmem:[#allocation4 + $0xc0] sm:$0xff] %vm11335_vm7, %v3919_v26  ;;  %v10022_v60 = vpop.f32.mrb[10].mxu1  ;;  %vm11341_vm7 = vcmask 884528   ;;  %v2773_v26 = vld [vmem:[#allocation3 + $0x98] sm:$0x3] }
 0x451   : > { %v5554_v5 = vpop.f32.mrb[11].mxu1  ;;  %4410 = vrot.lane.b32.xlu0 %v9750_v0, %s11072_s21  ;;  %v3921_v14 = vpop.permute.xlu1 %3920 }
 0x452   : > { %3969 = vst.msk [vmem:[#allocation4 + $0xd0] sm:$0x3] %vm11336_vm2, %v3921_v14  ;;  %vm11342_vm2 = vcmask 878384   ;;  %v2895_v14 = vld [vmem:[#allocation3 + $0x99] sm:$0x3] }
 0x453   : > { %v4041_v51 = vpop.permute.xlu0 %4040  ;;  %4412 = vrot.lane.b32.xlu1 %v4357_v20, %s11072_s21 }
 0x454   : > { %4090 = vst.msk [vmem:[#allocation4 + $0xc0] sm:$0xff] %vm11337_vm10, %v4041_v51  ;;  %vm11343_vm10 = vcmask 31744   ;;  %v10095_v51 = vld [vmem:[#allocation3 + $0x92] sm:$0xff] }
 0x455   : > { %4920 = vrot.lane.b32.xlu0 %v10029_v33, %s11063_s27  ;;  %v4043_v41 = vpop.permute.xlu1 %4042 }
 0x456   : > { %4091 = vst.msk [vmem:[#allocation4 + $0xd0] sm:$0x3] %vm11338_vm3, %v4043_v41  ;;  %vm11344_vm3 = vcmask 25600  }
 0x457   : > { %v4163_v57 = vpop.permute.xlu0 %4162  ;;  %4922 = vrot.lane.b32.xlu1 %v4867_v43, %s11063_s27 }
 0x458   : > { %4212 = vst.msk [vmem:[#allocation4 + $0xc0] sm:$0xff] %vm11339_vm4, %v4163_v57  ;;  %vm11345_vm4 = vcmask 933728  }
 0x459   : > { %4532 = vrot.lane.b32.xlu0 %v9800_v9, %s11074_s18  ;;  %v4165_v46 = vpop.permute.xlu1 %4164 }
 0x45a   : > { %4213 = vst.msk [vmem:[#allocation4 + $0xd0] sm:$0x3] %vm11340_vm14, %v4165_v46  ;;  %vm11346_vm14 = vcmask 927584  }
 0x45b   : > { %v4285_v8 = vpop.permute.xlu0 %4284  ;;  %4534 = vrot.lane.b32.xlu1 %v4479_v48, %s11074_s18 }
 0x45c   : > { %4334 = vst.msk [vmem:[#allocation4 + $0xc0] sm:$0xff] %vm11341_vm7, %v4285_v8  ;;  %vm11347_vm7 = vcmask 80928   ;;  %v3017_v8 = vld [vmem:[#allocation3 + $0x9a] sm:$0x3] }
 0x45d   : > { %5042 = vrot.lane.b32.xlu0 %v10041_v54, %s11065_s1  ;;  %v4287_v25 = vpop.permute.xlu1 %4286 }
 0x45e   : > { %4335 = vst.msk [vmem:[#allocation4 + $0xd0] sm:$0x3] %vm11342_vm2, %v4287_v25  ;;  %vm11348_vm2 = vcmask 74784  }
 0x45f   : > { %v4773_v53 = vpop.permute.xlu0 %4772  ;;  %5044 = vrot.lane.b32.xlu1 %v4989_v50, %s11065_s1  ;;  %v10102_v50 = vld [vmem:[#allocation3 + $0x93] sm:$0xff] }
 0x460   : > { %4837 = vst.msk [vmem:[#allocation4 + $0xc8] sm:$0xff] %vm11343_vm10, %v4773_v53  ;;  %vm11349_vm10 = vcmask 982928  }
 0x461   : > { %4654 = vrot.lane.b32.xlu0 %v10048_v52, %s11057_s23  ;;  %v4775_v10 = vpop.permute.xlu1 %4774 }
 0x462   : > { %4839 = vst.msk [vmem:[#allocation4 + $0xd8] sm:$0x3] %vm11344_vm3, %v4775_v10  ;;  %vm11350_vm3 = vcmask 976784  }
 0x463   : > { %v4407_v36 = vpop.permute.xlu0 %4406  ;;  %4656 = vrot.lane.b32.xlu1 %v4601_v24, %s11057_s23  ;;  %v3139_v24 = vld [vmem:[#allocation3 + $0x9b] sm:$0x3] }
 0x464   : > { %4456 = vst.msk [vmem:[#allocation4 + $0xc0] sm:$0xff] %vm11345_vm4, %v4407_v36  ;;  %vm11351_vm4 = vcmask 123984  }
 0x465   : > { %5164 = vrot.lane.b32.xlu0 %v10055_v22, %s11067_s11  ;;  %v4409_v23 = vpop.permute.xlu1 %4408 }
 0x466   : > { %4457 = vst.msk [vmem:[#allocation4 + $0xd0] sm:$0x3] %vm11346_vm14, %v4409_v23  ;;  %vm11352_vm14 = vcmask 1032128   ;;  %v10111_v23 = vld [vmem:[#allocation3 + $0x94] sm:$0xff] }
 0x467   : > { %v4917_v56 = vpop.permute.xlu0 %4916  ;;  %5166 = vrot.lane.b32.xlu1 %v5111_v7, %s11067_s11 }
 0x468   : > { %4966 = vst.msk [vmem:[#allocation4 + $0xc8] sm:$0xff] %vm11347_vm7, %v4917_v56  ;;  %vm11353_vm7 = vcmask 1048560  }
 0x469   : > { %2340 = vrot.lane.b32.xlu0 %v9861_v37, %s11048_s0  ;;  %v4919_v27 = vpop.permute.xlu1 %4918 }
 0x46a   : > { %4967 = vst.msk [vmem:[#allocation4 + $0xd8] sm:$0x3] %vm11348_vm2, %v4919_v27  ;;  %vm11354_vm2 = vcmask 173184   ;;  %v3261_v27 = vld [vmem:[#allocation3 + $0x9c] sm:$0x3] }
 0x46b   : > { %v4529_v3 = vpop.permute.xlu0 %4528  ;;  %2342 = vrot.lane.b32.xlu1 %v2285_v4, %s11048_s0 }
 0x46c   : > { %4578 = vst.msk [vmem:[#allocation4 + $0xc0] sm:$0xff] %vm11349_vm10, %v4529_v3  ;;  %vm11355_vm10 = vcmask 97328  }
 0x46d   : > { %2462 = vrot.lane.b32.xlu0 %v9875_v19, %s11049_s19  ;;  %v4531_v38 = vpop.permute.xlu1 %4530 }
 0x46e   : > { %4579 = vst.msk [vmem:[#allocation4 + $0xd0] sm:$0x3] %vm11350_vm3, %v4531_v38  ;;  %vm11356_vm3 = vcmask 91184   ;;  %v3383_v38 = vld [vmem:[#allocation3 + $0xa8] sm:$0x3] }
 0x46f   : > { %v5039_v18 = vpop.permute.xlu0 %5038  ;;  %2464 = vrot.lane.b32.xlu1 %v2407_v42, %s11049_s19 }
 0x470   : > { %5088 = vst.msk [vmem:[#allocation4 + $0xc8] sm:$0xff] %vm5074_vm8, %v5039_v18  ;;  %v10127_v18 = vld [vmem:[#allocation3 + $0xa1] sm:$0xff] }
 0x471   : > { %2584 = vrot.lane.b32.xlu0 %v9894_v29, %s11033_s13  ;;  %v5041_v37 = vpop.permute.xlu1 %5040  ;;  %v2772_v29 = vld [vmem:[#allocation3 + $0x90] sm:$0xff] }
 0x472   : > { %5089 = vst.msk [vmem:[#allocation4 + $0xd8] sm:$0x3] %vm11351_vm4, %v5041_v37  ;;  %vm11357_vm4 = vcmask 146528   ;;  %v3505_v37 = vld [vmem:[#allocation3 + $0xa9] sm:$0x3] }
 0x473   : > { %v4651_v40 = vpop.permute.xlu0 %4650  ;;  %2586 = vrot.lane.b32.xlu1 %v2529_v63, %s11033_s13 }
 0x474   : > { %4700 = vst.msk [vmem:[#allocation4 + $0xc0] sm:$0xff] %vm11352_vm14, %v4651_v40  ;;  %vm11358_vm14 = vcmask 140384  }
 0x475   : > { %4836 = vst.msk [vmem:[#allocation4 + $0xc0] sm:$0xff] %vm11353_vm7, %v4773_v53  ;;  %2706 = vrot.lane.b32.xlu0 %v9906_v15, %s11034_s15  ;;  %v4653_v19 = vpop.permute.xlu1 %4652  ;;  %v10088_v15 = vld [vmem:[#allocation3 + $0x91] sm:$0xff]  ;;  %vm11359_vm7 = vcmask 195728  }
 0x476   : > { %4701 = vst.msk [vmem:[#allocation4 + $0xd0] sm:$0x3] %vm4688_vm13, %v4653_v19  ;;  %v3627_v19 = vld [vmem:[#allocation3 + $0xaa] sm:$0x3] }
 0x477   : > { %v5161_v47 = vpop.permute.xlu0 %5160  ;;  %4838 = vst.msk [vmem:[#allocation4 + $0xd0] sm:$0x3] %vm4812_vm5, %v4775_v10  ;;  %2708 = vrot.lane.b32.xlu1 %v2651_v45, %s11034_s15 }
 0x478   : > { %5210 = vst.msk [vmem:[#allocation4 + $0xc8] sm:$0xff] %vm5196_vm6, %v5161_v47 }
 0x479   : > { %2828 = vrot.lane.b32.xlu0 %v2772_v29, %s11055_s17  ;;  %v5163_v44 = vpop.permute.xlu1 %5162 }
 0x47a   : > { %5211 = vst.msk [vmem:[#allocation4 + $0xd8] sm:$0x3] %vm11354_vm2, %v5163_v44  ;;  %vm11360_vm2 = vcmask 179200  }
 0x47b   : > { %v2337_v39 = vpop.permute.xlu0 %2336  ;;  %2830 = vrot.lane.b32.xlu1 %v2773_v26, %s11055_s17 }
 0x47c   : > { %2384 = vst.msk [vmem:[#allocation4 + $0xe0] sm:$0xff] %vm11355_vm10, %v2337_v39  ;;  %v5881_v25 = vld [vmem:[#allocation4 + $0xc0] sm:$0xff]  ;;  %vm11361_vm10 = vcmask 189584   ;;  %v3749_v39 = vld [vmem:[#allocation3 + $0xab] sm:$0x3] }
 0x47d   : > { %2950 = vrot.lane.b32.xlu0 %v10088_v15, %s11042_s25  ;;  %v2339_v31 = vpop.permute.xlu1 %2338 }
 0x47e   : > { %2385 = vst.msk [vmem:[#allocation4 + $0xf0] sm:$0x3] %vm11356_vm3, %v2339_v31  ;;  %v5883_v20 = vld [vmem:[#allocation4 + $0xd0] sm:$0x3]  ;;  %vm11362_vm3 = vcmask 244928  }
 0x47f   : > { %v2459_v5 = vpop.permute.xlu0 %2458  ;;  %2952 = vrot.lane.b32.xlu1 %v2895_v14, %s11042_s25  ;;  %v5882_v57 = vld [vmem:[#allocation4 + $0xc8] sm:$0xff]  ;;  %v5885_v53 = vpack.c.bf16 %v5883_v20, %v5881_v25  ;;  %v3993_v20 = vld [vmem:[#allocation3 + $0xb8] sm:$0x3] }
 0x480   : > { %2506 = vst.msk [vmem:[#allocation4 + $0xe0] sm:$0xff] %vm11357_vm4, %v2459_v5  ;;  %vm11363_vm4 = vcmask 238784   ;;  %v3871_v14 = vld [vmem:[#allocation3 + $0xac] sm:$0x3] }
 0x481   : > { %3072 = vrot.lane.b32.xlu0 %v10095_v51, %s11043_s29  ;;  %v2461_v41 = vpop.permute.xlu1 %2460  ;;  %v5884_v43 = vld [vmem:[#allocation4 + $0xd8] sm:$0x3] }
 0x482   : > { %2507 = vst.msk [vmem:[#allocation4 + $0xf0] sm:$0x3] %vm11358_vm14, %v2461_v41  ;;  %v5886_v48 = vpack.c.bf16 %v5884_v43, %v5882_v57  ;;  %vm11364_vm14 = vcmask 294128  }
 0x483   : > { %v2581_v46 = vpop.permute.xlu0 %2580  ;;  %3074 = vrot.lane.b32.xlu1 %v3017_v8, %s11043_s29  ;;  %v4115_v8 = vld [vmem:[#allocation3 + $0xb9] sm:$0x3] }
 0x484   : > { %2628 = vst.msk [vmem:[#allocation4 + $0xe0] sm:$0xff] %vm11359_vm7, %v2581_v46  ;;  %6982 = vmatprep.mubr.msk.bf16.mxu1 %vm11360_vm2, %v5886_v48  ;;  %vm11365_vm7 = vcmask 287984   ;;  %vm11366_vm2 = vcmask 343328  }
 0x485   : > { %3194 = vrot.lane.b32.xlu0 %v10102_v50, %s11044_s22  ;;  %5923 = vmatmul.mubr.bf16.vlgmr.msra.gmra.mrb[24].mxu1 %v5885_v53  ;;  %v2583_v10 = vpop.permute.xlu1 %2582 }
 0x486   : > { %2629 = vst.msk [vmem:[#allocation4 + $0xf0] sm:$0x3] %vm11361_vm10, %v2583_v10  ;;  %5942 = vmatpush1.bf16.msra.mxu1 %v9911_v21  ;;  %vm11367_vm10 = vcmask 337184  }
 0x487   : > { %v2703_v36 = vpop.permute.xlu0 %2702  ;;  %3196 = vrot.lane.b32.xlu1 %v3139_v24, %s11044_s22  ;;  %5943 = vmatprep.subr.bf16.mxu1 %v7813_v2 }
 0x488   : > { %2750 = vst.msk [vmem:[#allocation4 + $0xe0] sm:$0xff] %vm11362_vm3, %v2703_v36  ;;  %vm11368_vm3 = vcmask 392528   ;;  %v4237_v36 = vld [vmem:[#allocation3 + $0xba] sm:$0x3] }
 0x489   : > { %3316 = vrot.lane.b32.xlu0 %v10111_v23, %s11045_s30  ;;  %v2705_v56 = vpop.permute.xlu1 %2704 }
 0x48a   : > { %2751 = vst.msk [vmem:[#allocation4 + $0xf0] sm:$0x3] %vm11363_vm4, %v2705_v56  ;;  %5944 = vmatpush1.bf16.msra.mxu1 %v9923_v59  ;;  %vm11369_vm4 = vcmask 386384   ;;  %v10186_v56 = vld [vmem:[#allocation3 + $0xc1] sm:$0xff] }
 0x48b   : > { %v2825_v7 = vpop.permute.xlu0 %2824  ;;  %3318 = vrot.lane.b32.xlu1 %v3261_v27, %s11045_s30  ;;  %5945 = vmatprep.subr.bf16.mxu1 %v7813_v2 }
 0x48c   : > { %2872 = vst.msk [vmem:[#allocation4 + $0xe0] sm:$0xff] %vm11364_vm14, %v2825_v7  ;;  %vm11370_vm14 = vcmask 441728  }
 0x48d   : > { %3438 = vrot.lane.b32.xlu0 %v9779_v61, %s11035_s24  ;;  %v2827_v3 = vpop.permute.xlu1 %2826 }
 0x48e   : > { %2873 = vst.msk [vmem:[#allocation4 + $0xf0] sm:$0x3] %vm11365_vm7, %v2827_v3  ;;  %5946 = vmatpush1.bf16.msra.mxu1 %v9934_v16  ;;  %vm11371_vm7 = vcmask 123904   ;;  %v4725_v3 = vld [vmem:[#allocation3 + $0xc9] sm:$0x3] }
 0x48f   : > { %v2947_v4 = vpop.permute.xlu0 %2946  ;;  %3440 = vrot.lane.b32.xlu1 %v3383_v38, %s11035_s24  ;;  %5947 = vmatprep.subr.bf16.mxu1 %v7813_v2 }
 0x490   : > { %2994 = vst.msk [vmem:[#allocation4 + $0xe0] sm:$0xff] %vm11366_vm2, %v2947_v4  ;;  %vm11372_vm2 = vcmask 540128  }
 0x491   : > { %3560 = vrot.lane.b32.xlu0 %v10127_v18, %s11040_s12  ;;  %v2949_v42 = vpop.permute.xlu1 %2948 }
 0x492   : > { %2995 = vst.msk [vmem:[#allocation4 + $0xf0] sm:$0x3] %vm11367_vm10, %v2949_v42  ;;  %5948 = vmatpush1.bf16.msra.mxu1 %v9945_v6  ;;  %vm11373_vm10 = vcmask 533984   ;;  %v4359_v42 = vld [vmem:[#allocation3 + $0xbb] sm:$0x3] }
 0x493   : > { %v3069_v61 = vpop.permute.xlu0 %3068  ;;  %3562 = vrot.lane.b32.xlu1 %v3505_v37, %s11040_s12  ;;  %5949 = vmatprep.subr.bf16.mxu1 %v7813_v2 }
 0x494   : > { %3116 = vst.msk [vmem:[#allocation4 + $0xe0] sm:$0xff] %vm11368_vm3, %v3069_v61  ;;  %vm11374_vm3 = vcmask 589328   ;;  %v10199_v61 = vld [vmem:[#allocation3 + $0xc2] sm:$0xff] }
 0x495   : > { %3682 = vrot.lane.b32.xlu0 %v9729_v62, %s11041_s16  ;;  %v3071_v40 = vpop.permute.xlu1 %3070 }
 0x496   : > { %3117 = vst.msk [vmem:[#allocation4 + $0xf0] sm:$0x3] %vm11369_vm4, %v3071_v40  ;;  %5950 = vmatpush1.bf16.msra.mxu1 %v9956_v55  ;;  %vm11375_vm4 = vcmask 583184  }
 0x497   : > { %v3191_v63 = vpop.permute.xlu0 %3190  ;;  %3684 = vrot.lane.b32.xlu1 %v3627_v19, %s11041_s16  ;;  %5951 = vmatprep.subr.bf16.mxu1 %v7813_v2 }
 0x498   : > { %3238 = vst.msk [vmem:[#allocation4 + $0xe0] sm:$0xff] %vm11370_vm14, %v3191_v63  ;;  %vm11376_vm14 = vcmask 638528   ;;  %v4869_v63 = vld [vmem:[#allocation3 + $0xca] sm:$0x3] }
 0x499   : > { %3804 = vrot.lane.b32.xlu0 %v9750_v0, %s11082_s8  ;;  %v3193_v47 = vpop.permute.xlu1 %3192 }
 0x49a   : > { %v5600_v45 = vpop.f32.mrb[12].mxu1  ;;  %3239 = vst.msk [vmem:[#allocation4 + $0xf0] sm:$0x3] %vm3224_vm9, %v3193_v47  ;;  %5952 = vmatpush1.bf16.msra.mxu1 %v9967_v58 }
 0x49b   : > { %v5607_v62 = vmax.f32 %v10017_v11, %v5600_v45  ;;  %v5602_v29 = vpop.f32.mrb[13].mxu1  ;;  %v3313_v44 = vpop.permute.xlu0 %3312  ;;  %3806 = vrot.lane.b32.xlu1 %v3749_v39, %s11082_s8  ;;  %5953 = vmatprep.subr.bf16.mxu1 %v7813_v2 }
 0x49c   : > { %3360 = vst.msk [vmem:[#allocation4 + $0xe0] sm:$0xff] %vm3344_vm0, %v3313_v44  ;;  %v5603_v26 = vpop.f32.mrb[14].mxu1  ;;  %v4481_v29 = vld [vmem:[#allocation3 + $0xbc] sm:$0x3]  ;;  %v10211_v44 = vld [vmem:[#allocation3 + $0xc3] sm:$0xff] }
 0x49d   : > { %5609 = vst.msk [vmem:[#allocation6] sm:$0xff] %vm11011_vm11, %v5607_v62  ;;  %v5608_v0 = vmax.f32 %v10022_v60, %v5603_v26  ;;  %v5605_v31 = vpop.f32.mrb[15].mxu1  ;;  %3926 = vrot.lane.b32.xlu0 %v9800_v9, %s11083_s9  ;;  %v3315_v11 = vpop.permute.xlu1 %3314 }
 0x49e   : > { %3361 = vst.msk [vmem:[#allocation4 + $0xf0] sm:$0x3] %vm3346_vm1, %v3315_v11  ;;  %5954 = vmatpush1.bf16.msra.mxu1 %v9978_v34  ;;  %v10221_v11 = vld [vmem:[#allocation3 + $0xc0] sm:$0xff] }
 0x49f   : > { %5610 = vst.msk [vmem:[#allocation6 + $0x8] sm:$0x3] %vm11371_vm7, %v5608_v0  ;;  %v3435_v5 = vpop.permute.xlu0 %3434  ;;  %3928 = vrot.lane.b32.xlu1 %v3871_v14, %s11083_s9  ;;  %5955 = vmatprep.subr.bf16.mxu1 %v7813_v2  ;;  %vm11377_vm7 = vcmask 632384   ;;  %v4991_v0 = vld [vmem:[#allocation3 + $0xcb] sm:$0x3] }
 0x4a0   : > { %3482 = vst.msk [vmem:[#allocation4 + $0xe0] sm:$0xff] %vm11372_vm2, %v3435_v5  ;;  %vm11378_vm2 = vcmask 687728   ;;  %v7819_v5 = vmov 1966171168  }
 0x4a1   : > { %4048 = vrot.lane.b32.xlu0 %v10048_v52, %s11050_s28  ;;  %v3437_v60 = vpop.permute.xlu1 %3436  ;;  %v5439_v14 = vunpack.c.l.s4 %v7819_v5 }
 0x4a2   : > { %3483 = vst.msk [vmem:[#allocation4 + $0xf0] sm:$0x3] %vm11373_vm10, %v3437_v60  ;;  %5956 = vmatpush1.bf16.msra.mxu1 %v9990_v13  ;;  %vm11379_vm10 = vcmask 681584  }
 0x4a3   : > { %v3557_v9 = vpop.permute.xlu0 %3556  ;;  %4050 = vrot.lane.b32.xlu1 %v3993_v20, %s11050_s28  ;;  %5957 = vmatprep.subr.bf16.mxu1 %v7813_v2  ;;  %v4603_v20 = vld [vmem:[#allocation3 + $0xc8] sm:$0x3] }
 0x4a4   : > { %3604 = vst.msk [vmem:[#allocation4 + $0xe0] sm:$0xff] %vm11374_vm3, %v3557_v9  ;;  %vm11380_vm3 = vcmask 736928  }
 0x4a5   : > { %4170 = vrot.lane.b32.xlu0 %v10011_v28, %s11066_s10  ;;  %v3559_v41 = vpop.permute.xlu1 %3558 }
 0x4a6   : > { %v5611_v57 = vld [vmem:[#allocation6] ss:$2 sm:$0x1f]  ;;  %v5612_v43 = vld [vmem:[#allocation6 + $0x1] ss:$2 sm:$0x1f]  ;;  %5958 = vmatpush1.bf16.msra.mxu1 %v10002_v35 }
 0x4a7   : > { %3605 = vst.msk [vmem:[#allocation4 + $0xf0] sm:$0x3] %vm11375_vm4, %v3559_v41  ;;  %v3679_v46 = vpop.permute.xlu0 %3678  ;;  %v5613_v48 = vmax.f32 %v5611_v57, %v5612_v43  ;;  %4172 = vrot.lane.b32.xlu1 %v4115_v8, %s11066_s10  ;;  %5959 = vmatprep.subr.bf16.mxu1 %v7813_v2  ;;  %vm11381_vm4 = vcmask 730784   ;;  %v10228_v57 = vld [vmem:[#allocation3 + $0xc4] sm:$0xff]  ;;  %v10233_v8 = vshrl.u32 %v5432_v17, 7 }
 0x4a8   : > { %3726 = vst.msk [vmem:[#allocation4 + $0xe0] sm:$0xff] %vm11376_vm14, %v3679_v46  ;;  %vm11382_vm14 = vcmask 786128   ;;  %v5440_v46 = vunpack.c.0.s8 %v5439_v14  ;;  %v2653_v14 = vld [vmem:[#allocation3 + $0x9c] sm:$0x3] }
 0x4a9   : > { %4292 = vrot.lane.b32.xlu0 %v10029_v33, %s11069_s26  ;;  %v10179_v25 = vadd.f32 %v9762_v12, %v5613_v48  ;;  %v3681_v53 = vpop.permute.xlu1 %3680 }
 0x4aa   : > { %3727 = vst.msk [vmem:[#allocation4 + $0xf0] sm:$0x3] %vm11377_vm7, %v3681_v53  ;;  %5960 = vmatpush1.bf16.msra.mxu1 %v8675_v32  ;;  %vm11383_vm7 = vcmask 779984  }
 0x4ab   : > { %v3801_v10 = vpop.permute.xlu0 %3800  ;;  %v5616_v24 = vmin.f32 %v10179_v25, 20.0  ;;  %4294 = vrot.lane.b32.xlu1 %v4237_v36, %s11069_s26  ;;  %6072 = vmatprep.subr.bf16.mxu1 %v7813_v2  ;;  %v5113_v36 = vld [vmem:[#allocation3 + $0xcc] sm:$0x3] }
 0x4ac   : > { %3848 = vst.msk [vmem:[#allocation4 + $0xe0] sm:$0xff] %vm11378_vm2, %v3801_v10  ;;  %vm11384_vm2 = vcmask 835328  }
 0x4ad   : > { %4780 = vrot.lane.b32.xlu0 %v10186_v56, %s11058_s20  ;;  %v5617_v12 = vmul.f32 1.442695, %v5616_v24  ;;  %v3803_v7 = vpop.permute.xlu1 %3802 }
 0x4ae   : > { %3849 = vst.msk [vmem:[#allocation4 + $0xf0] sm:$0x3] %vm11379_vm10, %v3803_v7  ;;  %vm11385_vm10 = vcmask 829184   ;;  %v10241_v7 = vsub.s32 %v5440_v46, %v10233_v8  ;;  %v3018_v46 = vld [vmem:[#allocation3 + $0xa2] sm:$0xff] }
 0x4af   : > { %v3923_v27 = vpop.permute.xlu0 %3922  ;;  %7657 = vpow2.f32 %v5617_v12  ;;  %4782 = vrot.lane.b32.xlu1 %v4725_v3, %s11058_s20 }
 0x4b0   : > { %3970 = vst.msk [vmem:[#allocation4 + $0xe0] sm:$0xff] %vm11380_vm3, %v3923_v27  ;;  %vm11386_vm3 = vcmask 884528  }
 0x4b1   : > { %4414 = vrot.lane.b32.xlu0 %v10041_v54, %s11072_s21  ;;  %v3925_v4 = vpop.permute.xlu1 %3924 }
 0x4b2   : > { %3971 = vst.msk [vmem:[#allocation4 + $0xf0] sm:$0x3] %vm11381_vm4, %v3925_v4  ;;  %vm11387_vm4 = vcmask 878384  }
 0x4b3   : > { %v4045_v38 = vpop.permute.xlu0 %4044  ;;  %4416 = vrot.lane.b32.xlu1 %v4359_v42, %s11072_s21  ;;  %v2287_v42 = vld [vmem:[#allocation3 + $0x99] sm:$0x3] }
 0x4b4   : > { %4092 = vst.msk [vmem:[#allocation4 + $0xe0] sm:$0xff] %vm11382_vm14, %v4045_v38  ;;  %vm11388_vm14 = vcmask 31744  }
 0x4b5   : > { %4924 = vrot.lane.b32.xlu0 %v10199_v61, %s11063_s27  ;;  %v4047_v37 = vpop.permute.xlu1 %4046 }
 0x4b6   : > { %4093 = vst.msk [vmem:[#allocation4 + $0xf0] sm:$0x3] %vm11383_vm7, %v4047_v37  ;;  %vm11389_vm7 = vcmask 25600  }
 0x4b7   : > { %v4167_v40 = vpop.permute.xlu0 %4166  ;;  %4926 = vrot.lane.b32.xlu1 %v4869_v63, %s11063_s27  ;;  %v2409_v63 = vld [vmem:[#allocation3 + $0x9a] sm:$0x3] }
 0x4b8   : > { %4214 = vst.msk [vmem:[#allocation4 + $0xe0] sm:$0xff] %vm11384_vm2, %v4167_v40  ;;  %vm11390_vm2 = vcmask 933728  }
 0x4b9   : > { %v7658_v19 = vpop.eup %7657  ;;  %4536 = vrot.lane.b32.xlu0 %v10055_v22, %s11074_s18  ;;  %v4169_v47 = vpop.permute.xlu1 %4168 }
 0x4ba   : > { %v5619_v45 = vadd.f32 1.0, %v7658_v19  ;;  %4215 = vst.msk [vmem:[#allocation4 + $0xf0] sm:$0x3] %vm11385_vm10, %v4169_v47  ;;  %v5622_v31 = vmul.f32 -0.5, %v7658_v19  ;;  %v5625_v43 = vand.u32 2147483647, %v7658_v19 }
 0x4bb   : > { %v4289_v62 = vpop.permute.xlu0 %4288  ;;  %4538 = vrot.lane.b32.xlu1 %v4481_v29, %s11074_s18  ;;  %vm11391_vm10 = vcmask 927584  }
 0x4bc   : > { %4336 = vst.msk [vmem:[#allocation4 + $0xe0] sm:$0xff] %vm11386_vm3, %v4289_v62  ;;  %7659 = vlog2.f32 %v5619_v45  ;;  %v5623_v41 = vadd.f32 1.0, %v5622_v31  ;;  %vm11392_vm3 = vcmask 80928  }
 0x4bd   : > { %5046 = vrot.lane.b32.xlu0 %v10211_v44, %s11065_s1  ;;  %v4291_v39 = vpop.permute.xlu1 %4290 }
 0x4be   : > { %4337 = vst.msk [vmem:[#allocation4 + $0xf0] sm:$0x3] %vm11387_vm4, %v4291_v39  ;;  %v5624_v12 = vmul.f32 %v7658_v19, %v5623_v41  ;;  %vm5626_vm4 = vcmp.lt.f32.partialorder %v5625_v43, 0.0004427343  ;;  %v2531_v39 = vld [vmem:[#allocation3 + $0x9b] sm:$0x3] }
 0x4bf   : > { %v10216_v26 = vpop.permute.xlu0 %4776  ;;  %5048 = vrot.lane.b32.xlu1 %v4991_v0, %s11065_s1  ;;  %v2775_v41 = vld [vmem:[#allocation3 + $0xa8] sm:$0x3] }
 0x4c0   : > { %4841 = vst.msk [vmem:[#allocation4 + $0xe8] sm:$0xff] %vm11388_vm14, %v10216_v26  ;;  %vm5615_vm14 = vcmp.gt.f32.partialorder %v10179_v25, 20.0  ;;  %v2897_v43 = vld [vmem:[#allocation3 + $0xa9] sm:$0x3] }
 0x4c1   : > { %4658 = vrot.lane.b32.xlu0 %v10221_v11, %s11057_s23  ;;  %v4779_v60 = vpop.permute.xlu1 %4778 }
 0x4c2   : > { %4843 = vst.msk [vmem:[#allocation4 + $0xf8] sm:$0x3] %vm11389_vm7, %v4779_v60  ;;  %vm11393_vm7 = vcmask 74784  }
 0x4c3   : > { %v4411_v9 = vpop.permute.xlu0 %4410  ;;  %4660 = vrot.lane.b32.xlu1 %v4603_v20, %s11057_s23 }
 0x4c4   : > { %4458 = vst.msk [vmem:[#allocation4 + $0xe0] sm:$0xff] %vm11390_vm2, %v4411_v9  ;;  %vm11394_vm2 = vcmask 982928   ;;  %v2774_v9 = vld [vmem:[#allocation3 + $0xa0] sm:$0xff] }
 0x4c5   : > { %5168 = vrot.lane.b32.xlu0 %v10228_v57, %s11067_s11  ;;  %v4413_v53 = vpop.permute.xlu1 %4412 }
 0x4c6   : > { %v7660_v48 = vpop.eup %7659  ;;  %4459 = vst.msk [vmem:[#allocation4 + $0xf0] sm:$0x3] %vm11391_vm10, %v4413_v53  ;;  %vm11395_vm10 = vcmask 976784  }
 0x4c7   : > { %v4921_v10 = vpop.permute.xlu0 %4920  ;;  %v5621_v24 = vmul.f32 0.6931472, %v7660_v48  ;;  %5170 = vrot.lane.b32.xlu1 %v5113_v36, %s11067_s11 }
 0x4c8   : > { %4968 = vst.msk [vmem:[#allocation4 + $0xe8] sm:$0xff] %vm11392_vm3, %v4921_v10  ;;  %vm11396_vm3 = vcmask 123984  }
 0x4c9   : > { %2344 = vrot.lane.b32.xlu0 %v10088_v15, %s11048_s0  ;;  %v5627_v27 = vsel %vm5626_vm4, %v5624_v12, %v5621_v24  ;;  %v4923_v3 = vpop.permute.xlu1 %4922  ;;  %vm11397_vm4 = vcmask 1032128  }
 0x4ca   : > { %v10245_v4 = vsel %vm5615_vm14, %v10179_v25, %v5627_v27  ;;  %4969 = vst.msk [vmem:[#allocation4 + $0xf8] sm:$0x3] %vm11393_vm7, %v4923_v3  ;;  %vm11398_vm14 = vcmask 1048560   ;;  %vm11399_vm7 = vcmask 173184  }
 0x4cb   : > { %v4533_v38 = vpop.permute.xlu0 %4532  ;;  %v10250_v37 = vrot.slane %v10245_v4, %v10241_v7  ;;  %2346 = vrot.lane.b32.xlu1 %v2287_v42, %s11048_s0 }
 0x4cc   : > { %4580 = vst.msk [vmem:[#allocation4 + $0xe0] sm:$0xff] %vm11394_vm2, %v4533_v38  ;;  %vm11400_vm2 = vcmask 97328   ;;  %v3140_v38 = vld [vmem:[#allocation3 + $0xa3] sm:$0xff] }
 0x4cd   : > { %2466 = vrot.lane.b32.xlu0 %v10095_v51, %s11049_s19  ;;  %v5651_v15 = vcombine.high %v10250_v37, %v10250_v37  ;;  %v4535_v25 = vpop.permute.xlu1 %4534 }
 0x4ce   : > { %4581 = vst.msk [vmem:[#allocation4 + $0xf0] sm:$0x3] %vm11395_vm10, %v4535_v25  ;;  %vm11401_vm10 = vcmask 91184   ;;  %v3141_v25 = vld [vmem:[#allocation3 + $0xab] sm:$0x3] }
 0x4cf   : > { %v5043_v40 = vpop.permute.xlu0 %5042  ;;  %v10260_v19 = vrot.slane %v5651_v15, %v10241_v7  ;;  %2468 = vrot.lane.b32.xlu1 %v2409_v63, %s11049_s19 }
 0x4d0   : > { %5090 = vst.msk [vmem:[#allocation4 + $0xe8] sm:$0xff] %vm5074_vm8, %v5043_v40  ;;  %v3262_v40 = vld [vmem:[#allocation3 + $0xa4] sm:$0xff] }
 0x4d1   : > { %2588 = vrot.lane.b32.xlu0 %v10102_v50, %s11033_s13  ;;  %v5674_v51 = vcombine.high %v10260_v19, %v10260_v19  ;;  %v5045_v47 = vpop.permute.xlu1 %5044 }
 0x4d2   : > { %v10268_v45 = vpop.f32.mrb[16].mxu1  ;;  %5091 = vst.msk [vmem:[#allocation4 + $0xf8] sm:$0x3] %vm11396_vm3, %v5045_v47  ;;  %vm11402_vm3 = vcmask 146528   ;;  %v3263_v47 = vld [vmem:[#allocation3 + $0xac] sm:$0x3] }
 0x4d3   : > { %v5742_v62 = vpop.f32.mrb[17].mxu1  ;;  %v4655_v29 = vpop.permute.xlu0 %4654  ;;  %5676 = vst.msk [vmem:[#allocation7 + $0x1] sm:$0x1] %vm9882_vm12, %v5674_v51  ;;  %2590 = vrot.lane.b32.xlu1 %v2531_v39, %s11033_s13  ;;  %v3507_v39 = vld [vmem:[#allocation3 + $0xb9] sm:$0x3] }
 0x4d4   : > { %4702 = vst.msk [vmem:[#allocation4 + $0xe0] sm:$0xff] %vm11397_vm4, %v4655_v29  ;;  %v10275_v0 = vpop.f32.mrb[18].mxu1  ;;  %vm11403_vm4 = vcmask 140384   ;;  %v3385_v29 = vld [vmem:[#allocation3 + $0xb8] sm:$0x3] }
 0x4d5   : > { %4840 = vst.msk [vmem:[#allocation4 + $0xe0] sm:$0xff] %vm11398_vm14, %v10216_v26  ;;  %v5745_v50 = vpop.f32.mrb[19].mxu1  ;;  %2710 = vrot.lane.b32.xlu0 %v10111_v23, %s11034_s15  ;;  %v4657_v31 = vpop.permute.xlu1 %4656  ;;  %vm11404_vm14 = vcmask 195728  }
 0x4d6   : > { %4703 = vst.msk [vmem:[#allocation4 + $0xf0] sm:$0x3] %vm4688_vm13, %v4657_v31  ;;  %v3629_v50 = vld [vmem:[#allocation3 + $0xba] sm:$0x3] }
 0x4d7   : > { %v5165_v5 = vpop.permute.xlu0 %5164  ;;  %4842 = vst.msk [vmem:[#allocation4 + $0xf0] sm:$0x3] %vm4812_vm5, %v4779_v60  ;;  %2712 = vrot.lane.b32.xlu1 %v2653_v14, %s11034_s15 }
 0x4d8   : > { %5212 = vst.msk [vmem:[#allocation4 + $0xe8] sm:$0xff] %vm5196_vm6, %v5165_v5 }
 0x4d9   : > { %2832 = vrot.lane.b32.xlu0 %v2774_v9, %s11055_s17  ;;  %v5167_v20 = vpop.permute.xlu1 %5166  ;;  %v3751_v9 = vld [vmem:[#allocation3 + $0xbb] sm:$0x3] }
 0x4da   : > { %5213 = vst.msk [vmem:[#allocation4 + $0xf8] sm:$0x3] %vm11399_vm7, %v5167_v20  ;;  %vm11405_vm7 = vcmask 179200  }
 0x4db   : > { %v2341_v26 = vpop.permute.xlu0 %2340  ;;  %2834 = vrot.lane.b32.xlu1 %v2775_v41, %s11055_s17  ;;  %v3995_v41 = vld [vmem:[#allocation3 + $0xc8] sm:$0x3]  ;;  %s11519_s17 = sld [smem:[#allocation27_spill]] }
 0x4dc   : > { %2386 = vst.msk [vmem:[#allocation4 + $0x100] sm:$0xff] %vm11400_vm2, %v2341_v26  ;;  %v5932_v27 = vld [vmem:[#allocation4 + $0xe0] sm:$0xff]  ;;  %vm11406_vm2 = vcmask 189584   ;;  %v3873_v26 = vld [vmem:[#allocation3 + $0xbc] sm:$0x3] }
 0x4dd   : > { %2954 = vrot.lane.b32.xlu0 %v10127_v18, %s11042_s25  ;;  %v2343_v23 = vpop.permute.xlu1 %2342  ;;  %v3019_v18 = vld [vmem:[#allocation3 + $0xaa] sm:$0x3] }
 0x4de   : > { %2387 = vst.msk [vmem:[#allocation4 + $0x110] sm:$0x3] %vm11401_vm10, %v2343_v23  ;;  %v5934_v48 = vld [vmem:[#allocation4 + $0xf0] sm:$0x3]  ;;  %vm11407_vm10 = vcmask 244928  }
 0x4df   : > { %v2463_v60 = vpop.permute.xlu0 %2462  ;;  %2956 = vrot.lane.b32.xlu1 %v2897_v43, %s11042_s25  ;;  %v5933_v10 = vld [vmem:[#allocation4 + $0xe8] sm:$0xff]  ;;  %v5936_v3 = vpack.c.bf16 %v5934_v48, %v5932_v27 }
 0x4e0   : > { %2508 = vst.msk [vmem:[#allocation4 + $0x100] sm:$0xff] %vm11402_vm3, %v2463_v60  ;;  %vm11408_vm3 = vcmask 238784   ;;  %v4117_v43 = vld [vmem:[#allocation3 + $0xc9] sm:$0x3] }
 0x4e1   : > { %3076 = vrot.lane.b32.xlu0 %v3018_v46, %s11043_s29  ;;  %v2465_v53 = vpop.permute.xlu1 %2464  ;;  %v5935_v36 = vld [vmem:[#allocation4 + $0xf8] sm:$0x3] }
 0x4e2   : > { %2509 = vst.msk [vmem:[#allocation4 + $0x110] sm:$0x3] %vm11403_vm4, %v2465_v53  ;;  %v5937_v12 = vpack.c.bf16 %v5935_v36, %v5933_v10  ;;  %vm11409_vm4 = vcmask 294128   ;;  %v4239_v53 = vld [vmem:[#allocation3 + $0xca] sm:$0x3] }
 0x4e3   : > { %v2585_v24 = vpop.permute.xlu0 %2584  ;;  %3078 = vrot.lane.b32.xlu1 %v3019_v18, %s11043_s29 }
 0x4e4   : > { %2630 = vst.msk [vmem:[#allocation4 + $0x100] sm:$0xff] %vm11404_vm14, %v2585_v24  ;;  %6983 = vmatprep.mubr.msk.bf16.mxu1 %vm11405_vm7, %v5937_v12  ;;  %vm11410_vm14 = vcmask 287984   ;;  %vm11411_vm7 = vcmask 343328   ;;  %v4727_v12 = vld [vmem:[#allocation3 + $0xd9] sm:$0x3] }
 0x4e5   : > { %3198 = vrot.lane.b32.xlu0 %v3140_v38, %s11044_s22  ;;  %5974 = vmatmul.mubr.bf16.vlgmr.msra.gmra.mrb[28].mxu1 %v5936_v3  ;;  %v2587_v42 = vpop.permute.xlu1 %2586  ;;  %v4361_v38 = vld [vmem:[#allocation3 + $0xcb] sm:$0x3] }
 0x4e6   : > { %2631 = vst.msk [vmem:[#allocation4 + $0x110] sm:$0x3] %vm11406_vm2, %v2587_v42  ;;  %6073 = vmatpush1.bf16.msra.mxu1 %v9911_v21  ;;  %vm11412_vm2 = vcmask 337184   ;;  %v4870_v42 = vld [vmem:[#allocation3 + $0xd2] sm:$0xff] }
 0x4e7   : > { %v2707_v15 = vpop.permute.xlu0 %2706  ;;  %3200 = vrot.lane.b32.xlu1 %v3141_v25, %s11044_s22  ;;  %6074 = vmatprep.subr.bf16.mxu1 %v7813_v2 }
 0x4e8   : > { %2752 = vst.msk [vmem:[#allocation4 + $0x100] sm:$0xff] %vm11407_vm10, %v2707_v15  ;;  %vm11413_vm10 = vcmask 392528  }
 0x4e9   : > { %3320 = vrot.lane.b32.xlu0 %v3262_v40, %s11045_s30  ;;  %v2709_v63 = vpop.permute.xlu1 %2708  ;;  %v4871_v40 = vld [vmem:[#allocation3 + $0xda] sm:$0x3] }
 0x4ea   : > { %2753 = vst.msk [vmem:[#allocation4 + $0x110] sm:$0x3] %vm11408_vm3, %v2709_v63  ;;  %6075 = vmatpush1.bf16.msra.mxu1 %v9923_v59  ;;  %vm11414_vm3 = vcmask 386384  }
 0x4eb   : > { %v2829_v51 = vpop.permute.xlu0 %2828  ;;  %3322 = vrot.lane.b32.xlu1 %v3263_v47, %s11045_s30  ;;  %6076 = vmatprep.subr.bf16.mxu1 %v7813_v2  ;;  %s11514_s30 = sld [smem:[#allocation24_spill]] }
 0x4ec   : > { %2874 = vst.msk [vmem:[#allocation4 + $0x100] sm:$0xff] %vm11409_vm4, %v2829_v51  ;;  %vm11415_vm4 = vcmask 441728  }
 0x4ed   : > { %3442 = vrot.lane.b32.xlu0 %v10048_v52, %s11035_s24  ;;  %v2831_v21 = vpop.permute.xlu1 %2830 }
 0x4ee   : > { %2875 = vst.msk [vmem:[#allocation4 + $0x110] sm:$0x3] %vm11410_vm14, %v2831_v21  ;;  %6077 = vmatpush1.bf16.msra.mxu1 %v9934_v16  ;;  %vm11416_vm14 = vcmask 123904   ;;  %v4483_v21 = vld [vmem:[#allocation3 + $0xcc] sm:$0x3] }
 0x4ef   : > { %v2951_v62 = vpop.permute.xlu0 %2950  ;;  %3444 = vrot.lane.b32.xlu1 %v3385_v29, %s11035_s24  ;;  %6078 = vmatprep.subr.bf16.mxu1 %v7813_v2 }
 0x4f0   : > { %2996 = vst.msk [vmem:[#allocation4 + $0x100] sm:$0xff] %vm11411_vm7, %v2951_v62  ;;  %vm11417_vm7 = vcmask 540128   ;;  %v4992_v62 = vld [vmem:[#allocation3 + $0xd3] sm:$0xff] }
 0x4f1   : > { %3564 = vrot.lane.b32.xlu0 %v10011_v28, %s11040_s12  ;;  %v2953_v59 = vpop.permute.xlu1 %2952 }
 0x4f2   : > { %2997 = vst.msk [vmem:[#allocation4 + $0x110] sm:$0x3] %vm11412_vm2, %v2953_v59  ;;  %6079 = vmatpush1.bf16.msra.mxu1 %v9945_v6  ;;  %vm11418_vm2 = vcmask 533984  }
 0x4f3   : > { %v3073_v52 = vpop.permute.xlu0 %3072  ;;  %3566 = vrot.lane.b32.xlu1 %v3507_v39, %s11040_s12  ;;  %6080 = vmatprep.subr.bf16.mxu1 %v7813_v2  ;;  %v4604_v39 = vld [vmem:[#allocation3 + $0xd0] sm:$0xff]  ;;  %s11515_s12 = sld [smem:[#allocation12_spill]] }
 0x4f4   : > { %3118 = vst.msk [vmem:[#allocation4 + $0x100] sm:$0xff] %vm11413_vm10, %v3073_v52  ;;  %vm11419_vm10 = vcmask 589328   ;;  %v5444_v52 = vrot.slane %v9889_v30, %v10241_v7 }
 0x4f5   : > { %3686 = vrot.lane.b32.xlu0 %v10029_v33, %s11041_s16  ;;  %v3075_v16 = vpop.permute.xlu1 %3074 }
 0x4f6   : > { %3119 = vst.msk [vmem:[#allocation4 + $0x110] sm:$0x3] %vm11414_vm3, %v3075_v16  ;;  %6081 = vmatpush1.bf16.msra.mxu1 %v9956_v55  ;;  %vm11420_vm3 = vcmask 583184  }
 0x4f7   : > { %v3195_v28 = vpop.permute.xlu0 %3194  ;;  %3688 = vrot.lane.b32.xlu1 %v3629_v50, %s11041_s16  ;;  %6082 = vmatprep.subr.bf16.mxu1 %v7813_v2  ;;  %s11516_s16 = sld [smem:[#allocation15_spill]] }
 0x4f8   : > { %3240 = vst.msk [vmem:[#allocation4 + $0x100] sm:$0xff] %vm11415_vm4, %v3195_v28  ;;  %vm11421_vm4 = vcmask 638528   ;;  %v5677_v28 = vcombine.high %v10245_v4, %v10245_v4 }
 0x4f9   : > { %3808 = vrot.lane.b32.xlu0 %v10041_v54, %s11082_s8  ;;  %v3197_v31 = vpop.permute.xlu1 %3196  ;;  %s377_s13 = sand.u32 1, %s11515_s12  }
 0x4fa   : > { %v5791_v6 = vpop.f32.mrb[20].mxu1  ;;  %3241 = vst.msk [vmem:[#allocation4 + $0x110] sm:$0x3] %vm3224_vm9, %v3197_v31  ;;  %6083 = vmatpush1.bf16.msra.mxu1 %v9967_v58  ;;  %v4605_v31 = vld [vmem:[#allocation3 + $0xd8] sm:$0x3]  ;;  %s378_s6 = scalar_lea.vmem [#allocation8], %s377_s13 }
 0x4fb   : > { %v5798_v33 = vmax.f32 %v10268_v45, %v5791_v6  ;;  %v5793_v5 = vpop.f32.mrb[21].mxu1  ;;  %v3317_v14 = vpop.permute.xlu0 %3316  ;;  %3810 = vrot.lane.b32.xlu1 %v3751_v9, %s11082_s8  ;;  %6084 = vmatprep.subr.bf16.mxu1 %v7813_v2 }
 0x4fc   : > { %v5794_v55 = vpop.f32.mrb[22].mxu1  ;;  %3362 = vst.msk [vmem:[#allocation4 + $0x100] sm:$0xff] %vm3344_vm0, %v3317_v14  ;;  %v5114_v5 = vld [vmem:[#allocation3 + $0xd4] sm:$0xff] }
 0x4fd   : > { %5800 = vst.msk [vmem:[#allocation6] sm:$0xff] %vm11011_vm11, %v5798_v33  ;;  %v5799_v54 = vmax.f32 %v10275_v0, %v5794_v55  ;;  %v5796_v20 = vpop.f32.mrb[23].mxu1  ;;  %3930 = vrot.lane.b32.xlu0 %v10055_v22, %s11083_s9  ;;  %v3319_v45 = vpop.permute.xlu1 %3318  ;;  %v5445_v33 = vcombine.high %v5444_v52, %v5444_v52  ;;  %v5684_v55 = vrot.slane %v5677_v28, %v10241_v7  ;;  %vm5671_vm11 = vcmp.lt.s32.totalorder %v5432_v17, 128  ;;  %s7028_s14 = sshll.u32 %s11516_s16, 4 }
 0x4fe   : > { %3363 = vst.msk [vmem:[#allocation4 + $0x110] sm:$0x3] %vm3346_vm1, %v3319_v45  ;;  %6085 = vmatpush1.bf16.msra.mxu1 %v9978_v34  ;;  %v5115_v20 = vld [vmem:[#allocation3 + $0xdc] sm:$0x3] }
 0x4ff   : > { %5801 = vst.msk [vmem:[#allocation6 + $0x8] sm:$0x3] %vm11416_vm14, %v5799_v54  ;;  %v3439_v58 = vpop.permute.xlu0 %3438  ;;  %3932 = vrot.lane.b32.xlu1 %v3873_v26, %s11083_s9  ;;  %6086 = vmatprep.subr.bf16.mxu1 %v7813_v2  ;;  %vm11422_vm14 = vcmask 632384   ;;  %v5459_v45 = vrot.slane %v5445_v33, %v10241_v7  ;;  %s11513_s9 = sld [smem:[#allocation25_spill]] }
 0x500   : > { %3484 = vst.msk [vmem:[#allocation4 + $0x100] sm:$0xff] %vm11417_vm7, %v3439_v58  ;;  %vm11423_vm7 = vcmask 687728  }
 0x501   : > { %4052 = vrot.lane.b32.xlu0 %v10221_v11, %s11050_s28  ;;  %v3441_v0 = vpop.permute.xlu1 %3440 }
 0x502   : > { %3485 = vst.msk [vmem:[#allocation4 + $0x110] sm:$0x3] %vm11418_vm2, %v3441_v0  ;;  %6087 = vmatpush1.bf16.msra.mxu1 %v9990_v13  ;;  %v10369_v13 = vld [vmem:[%s10891_s4] ss:$0 sm:$0xff]  ;;  %vm11424_vm2 = vcmask 681584  }
 0x503   : > { %v3561_v22 = vpop.permute.xlu0 %3560  ;;  %4054 = vrot.lane.b32.xlu1 %v3995_v41, %s11050_s28  ;;  %6088 = vmatprep.subr.bf16.mxu1 %v7813_v2  ;;  %v5452_v41 = vrot.slane %v5444_v52, %v10241_v7  ;;  %s7823_s28 = smov 112  }
 0x504   : > { %3606 = vst.msk [vmem:[#allocation4 + $0x100] sm:$0xff] %vm11419_vm10, %v3561_v22  ;;  %vm11425_vm10 = vcmask 736928   ;;  %v5691_v22 = vrot.slane %v5684_v55, %v10241_v7 }
 0x505   : > { %4174 = vrot.lane.b32.xlu0 %v10186_v56, %s11066_s10  ;;  %v3563_v34 = vpop.permute.xlu1 %3562 }
 0x506   : > { %v5802_v23 = vld [vmem:[#allocation6] ss:$2 sm:$0x1f]  ;;  %v5803_v60 = vld [vmem:[#allocation6 + $0x1] ss:$2 sm:$0x1f]  ;;  %6089 = vmatpush1.bf16.msra.mxu1 %v10002_v35 }
 0x507   : > { %3607 = vst.msk [vmem:[#allocation4 + $0x110] sm:$0x3] %vm11420_vm3, %v3563_v34  ;;  %v3683_v11 = vpop.permute.xlu0 %3682  ;;  %v5804_v46 = vmax.f32 %v5802_v23, %v5803_v60  ;;  %4176 = vrot.lane.b32.xlu1 %v4117_v43, %s11066_s10  ;;  %6090 = vmatprep.subr.bf16.mxu1 %v7813_v2  ;;  %vm11426_vm3 = vcmask 730784   ;;  %v5483_v34 = vcombine.high %v9889_v30, %v9889_v30  ;;  %v7502_v30 = vld [vmem:[%s10892_s5 + $0x40] sm:$0xff]  }
 0x508   : > { %3728 = vst.msk [vmem:[#allocation4 + $0x100] sm:$0xff] %vm11421_vm4, %v3683_v11  ;;  %vm11427_vm4 = vcmask 786128   ;;  %v5475_v11 = vcombine.high %v5459_v45, %v5459_v45  ;;  %7085 = vmatprep.subr.bf16.mxu0 %v7502_v30 }
 0x509   : > { %4296 = vrot.lane.b32.xlu0 %v10199_v61, %s11069_s26  ;;  %v10372_v56 = vadd.f32 %v10369_v13, %v5804_v46  ;;  %v3685_v48 = vpop.permute.xlu1 %3684  ;;  %v4726_v61 = vld [vmem:[#allocation3 + $0xd1] sm:$0xff] }
 0x50a   : > { %3729 = vst.msk [vmem:[#allocation4 + $0x110] sm:$0x3] %vm11422_vm14, %v3685_v48  ;;  %6091 = vmatpush1.bf16.msra.mxu1 %v8675_v32  ;;  %vm11428_vm14 = vcmask 779984   ;;  %v7503_v48 = vld [vmem:[%s10892_s5] sm:$0xff]  }
 0x50b   : > { %v3805_v35 = vpop.permute.xlu0 %3804  ;;  %v5807_v10 = vmin.f32 %v10372_v56, 20.0  ;;  %4298 = vrot.lane.b32.xlu1 %v4239_v53, %s11069_s26  ;;  %6123 = vmatprep.subr.bf16.mxu1 %v7813_v2  ;;  %v5467_v53 = vcombine.high %v5452_v41, %v5452_v41 }
 0x50c   : > { %3850 = vst.msk [vmem:[#allocation4 + $0x100] sm:$0xff] %vm11423_vm7, %v3805_v35  ;;  %vm11429_vm7 = vcmask 835328   ;;  %7086 = vmatpush3.bf16.msra.mxu0 %v7503_v48  ;;  %v7723_v48 = vld [vmem:[%s10890_s3 + $0x28] sm:$0xff]  }
 0x50d   : > { %4784 = vrot.lane.b32.xlu0 %v4726_v61, %s11058_s20  ;;  %v5808_v36 = vmul.f32 1.442695, %v5807_v10  ;;  %v3807_v24 = vpop.permute.xlu1 %3806  ;;  %v5490_v10 = vrot.slane %v5483_v34, %v10241_v7 }
 0x50e   : > { %3851 = vst.msk [vmem:[#allocation4 + $0x110] sm:$0x3] %vm11424_vm2, %v3807_v24  ;;  %vm11430_vm2 = vcmask 829184  }
 0x50f   : > { %v3927_v18 = vpop.permute.xlu0 %3926  ;;  %7661 = vpow2.f32 %v5808_v36  ;;  %4786 = vrot.lane.b32.xlu1 %v4727_v12, %s11058_s20  ;;  %v5643_v36 = vrot.slane %v10250_v37, %v10241_v7  ;;  %s7820_s20 = smov 32   ;;  %v5497_v12 = vrot.slane %v5490_v10, %v10241_v7 }
 0x510   : > { %3972 = vst.msk [vmem:[#allocation4 + $0x100] sm:$0xff] %vm11425_vm10, %v3927_v18  ;;  %vm11431_vm10 = vcmask 884528  }
 0x511   : > { %4418 = vrot.lane.b32.xlu0 %v10211_v44, %s11072_s21  ;;  %v3929_v27 = vpop.permute.xlu1 %3928  ;;  %v5666_v37 = vcombine.high %v5643_v36, %v5643_v36 }
 0x512   : > { %3973 = vst.msk [vmem:[#allocation4 + $0x110] sm:$0x3] %vm11426_vm3, %v3929_v27  ;;  %vm11432_vm3 = vcmask 878384  }
 0x513   : > { %v4049_v3 = vpop.permute.xlu0 %4048  ;;  %4420 = vrot.lane.b32.xlu1 %v4361_v38, %s11072_s21  ;;  %s7821_s21 = smov 80  }
 0x514   : > { %4094 = vst.msk [vmem:[#allocation4 + $0x100] sm:$0xff] %vm11427_vm4, %v4049_v3  ;;  %vm11433_vm4 = vcmask 31744  }
 0x515   : > { %4928 = vrot.lane.b32.xlu0 %v4870_v42, %s11063_s27  ;;  %v4051_v15 = vpop.permute.xlu1 %4050 }
 0x516   : > { %4095 = vst.msk [vmem:[#allocation4 + $0x110] sm:$0x3] %vm11428_vm14, %v4051_v15  ;;  %vm11434_vm14 = vcmask 25600  }
 0x517   : > { %v4171_v25 = vpop.permute.xlu0 %4170  ;;  %4930 = vrot.lane.b32.xlu1 %v4871_v40, %s11063_s27  ;;  %s7822_s27 = smov 64  }
 0x518   : > { %4216 = vst.msk [vmem:[#allocation4 + $0x100] sm:$0xff] %vm11429_vm7, %v4171_v25  ;;  %vm11435_vm7 = vcmask 933728  }
 0x519   : > { %v7662_v44 = vpop.eup %7661  ;;  %4540 = vrot.lane.b32.xlu0 %v10228_v57, %s11074_s18  ;;  %v4173_v63 = vpop.permute.xlu1 %4172  ;;  %v4993_v57 = vld [vmem:[#allocation3 + $0xdb] sm:$0x3] }
 0x51a   : > { %v5810_v51 = vadd.f32 1.0, %v7662_v44  ;;  %4217 = vst.msk [vmem:[#allocation4 + $0x110] sm:$0x3] %vm11430_vm2, %v4173_v63  ;;  %v5813_v50 = vmul.f32 -0.5, %v7662_v44  ;;  %vm11436_vm2 = vcmask 927584  }
 0x51b   : > { %v4293_v47 = vpop.permute.xlu0 %4292  ;;  %4542 = vrot.lane.b32.xlu1 %v4483_v21, %s11074_s18  ;;  %v5816_v58 = vand.u32 2147483647, %v7662_v44  ;;  %s6789_s18 = scalar_lea.sflag [#allocation9], %s377_s13 }
 0x51c   : > { %4338 = vst.msk [vmem:[#allocation4 + $0x100] sm:$0xff] %vm11431_vm10, %v4293_v47  ;;  %7663 = vlog2.f32 %v5810_v51  ;;  %v5814_v54 = vadd.f32 1.0, %v5813_v50  ;;  %vm11437_vm10 = vcmask 80928  }
 0x51d   : > { %5050 = vrot.lane.b32.xlu0 %v4992_v62, %s11065_s1  ;;  %v4295_v29 = vpop.permute.xlu1 %4294 }
 0x51e   : > { %4339 = vst.msk [vmem:[#allocation4 + $0x110] sm:$0x3] %vm11432_vm3, %v4295_v29  ;;  %v5815_v23 = vmul.f32 %v7662_v44, %v5814_v54  ;;  %vm11438_vm3 = vcmask 74784   ;;  %v7505_v29 = vld [vmem:[%s10892_s5 + $0x8] sm:$0xff]  }
 0x51f   : > { %v10400_v59 = vpop.permute.xlu0 %4780  ;;  %5052 = vrot.lane.b32.xlu1 %v4993_v57, %s11065_s1  ;;  %s11517_s1 = sld [smem:[#allocation26_spill]] }
 0x520   : > { %4845 = vst.msk [vmem:[#allocation4 + $0x108] sm:$0xff] %vm11433_vm4, %v10400_v59  ;;  %vm10428_vm4 = vcmp.lt.f32.partialorder %v5816_v58, 0.0004427343  ;;  %v7720_v58 = vld [vmem:[%s10890_s3 + $0x10] sm:$0xff]  }
 0x521   : > { %4662 = vrot.lane.b32.xlu0 %v4604_v39, %s11057_s23  ;;  %v10408_v16 = vpop.permute.xlu1 %4782 }
 0x522   : > { %4847 = vst.msk [vmem:[#allocation4 + $0x118] sm:$0x3] %vm11434_vm14, %v10408_v16  ;;  %vm11441_vm14 = vcmask 982928  }
 0x523   : > { %v4415_v6 = vpop.permute.xlu0 %4414  ;;  %4664 = vrot.lane.b32.xlu1 %v4605_v31, %s11057_s23 }
 0x524   : > { %4460 = vst.msk [vmem:[#allocation4 + $0x100] sm:$0xff] %vm11435_vm7, %v4415_v6  ;;  %vm5806_vm7 = vcmp.gt.f32.partialorder %v10372_v56, 20.0 }
 0x525   : > { %5172 = vrot.lane.b32.xlu0 %v5114_v5, %s11067_s11  ;;  %v4417_v9 = vpop.permute.xlu1 %4416 }
 0x526   : > { %v7664_v14 = vpop.eup %7663  ;;  %4461 = vst.msk [vmem:[#allocation4 + $0x110] sm:$0x3] %vm11436_vm2, %v4417_v9  ;;  %vm11442_vm2 = vcmask 976784   ;;  %v7718_v9 = vld [vmem:[%s10890_s3] sm:$0xff]  }
 0x527   : > { %v4925_v4 = vpop.permute.xlu0 %4924  ;;  %5174 = vrot.lane.b32.xlu1 %v5115_v20, %s11067_s11  ;;  %v5812_v26 = vmul.f32 0.6931472, %v7664_v14 }
 0x528   : > { %4970 = vst.msk [vmem:[#allocation4 + $0x108] sm:$0xff] %vm11437_vm10, %v4925_v4  ;;  %vm11443_vm10 = vcmask 123984   ;;  %v7719_v4 = vld [vmem:[%s10890_s3 + $0x8] sm:$0xff]  }
 0x529   : > { %5460 = vrot.lane.b32.xlu0 %v5459_v45, %s11067_s11  ;;  %v4927_v0 = vpop.permute.xlu1 %4926  ;;  %v5818_v46 = vsel %vm10428_vm4, %v5815_v23, %v5812_v26  ;;  %vm11445_vm4 = vcmask 1048560   ;;  %v7722_v23 = vld [vmem:[%s10890_s3 + $0x20] sm:$0xff]  }
 0x52a   : > { %4971 = vst.msk [vmem:[#allocation4 + $0x118] sm:$0x3] %vm11438_vm3, %v4927_v0  ;;  %v5819_v24 = vsel %vm5806_vm7, %v10372_v56, %v5818_v46  ;;  %vm11444_vm3 = vcmask 1032128   ;;  %vm11447_vm7 = vcmask 97328  }
 0x52b   : > { %v4537_v60 = vpop.permute.xlu0 %4536  ;;  %5692 = vrot.lane.b32.xlu1 %v5691_v22, %s11067_s11  ;;  %v5827_v27 = vrot.slane %v5819_v24, %v10241_v7  ;;  %v5861_v25 = vcombine.high %v5819_v24, %v5819_v24  ;;  %v7721_v22 = vld [vmem:[%s10890_s3 + $0x18] sm:$0xff]  }
 0x52c   : > { %4582 = vst.msk [vmem:[#allocation4 + $0x100] sm:$0xff] %vm11441_vm14, %v4537_v60  ;;  %vm11446_vm14 = vcmask 173184  }
 0x52d   : > { %5476 = vrot.lane.b32.xlu0 %v5475_v11, %s11044_s22  ;;  %v4539_v35 = vpop.permute.xlu1 %4538  ;;  %v5839_v38 = vcombine.high %v5827_v27, %v5827_v27  ;;  %v5834_v15 = vrot.slane %v5827_v27, %v10241_v7  ;;  %v5868_v47 = vrot.slane %v5861_v25, %v10241_v7 }
 0x52e   : > { %4583 = vst.msk [vmem:[#allocation4 + $0x110] sm:$0x3] %vm11442_vm2, %v4539_v35  ;;  %vm11448_vm2 = vcmask 91184  }
 0x52f   : > { %v5047_v61 = vpop.permute.xlu0 %5046  ;;  %5468 = vrot.lane.b32.xlu1 %v5467_v53, %s7820_s20  ;;  %v5846_v44 = vrot.slane %v5839_v38, %v10241_v7  ;;  %v5851_v51 = vcombine.high %v5834_v15, %v5834_v15  ;;  %v5875_v57 = vrot.slane %v5868_v47, %v10241_v7 }
 0x530   : > { %5092 = vst.msk [vmem:[#allocation4 + $0x108] sm:$0xff] %vm5074_vm8, %v5047_v61  ;;  %v7724_v61 = vld [vmem:[%s10890_s3 + $0x30] sm:$0xff]  }
 0x531   : > { %5644 = vrot.lane.b32.xlu0 %v5643_v36, %s7821_s21  ;;  %v5049_v18 = vpop.permute.xlu1 %5048  ;;  %v5856_v62 = vcombine.high %v5846_v44, %v5846_v44 }
 0x532   : > { %5093 = vst.msk [vmem:[#allocation4 + $0x118] sm:$0x3] %vm11443_vm10, %v5049_v18  ;;  %vm11449_vm10 = vcmask 146528   ;;  %v7725_v18 = vld [vmem:[%s10890_s3 + $0x38] sm:$0xff]  }
 0x533   : > { %v4659_v3 = vpop.permute.xlu0 %4658  ;;  %5498 = vrot.lane.b32.xlu1 %v5497_v12, %s7822_s27 }
 0x534   : > { %4704 = vst.msk [vmem:[#allocation4 + $0x100] sm:$0xff] %vm11444_vm3, %v4659_v3  ;;  %vm11450_vm3 = vcmask 140384   ;;  %v7726_v3 = vld [vmem:[%s10890_s3 + $0x40] sm:$0xff]  }
 0x535   : > { %4844 = vst.msk [vmem:[#allocation4 + $0x100] sm:$0xff] %vm11445_vm4, %v10400_v59  ;;  %5667 = vrot.lane.b32.xlu0 %v5666_v37, %s7823_s28  ;;  %v4661_v56 = vpop.permute.xlu1 %4660  ;;  %vm11451_vm4 = vcmask 195728  }
 0x536   : > { %4705 = vst.msk [vmem:[#allocation4 + $0x110] sm:$0x3] %vm4688_vm13, %v4661_v56 }
 0x537   : > { %v5169_v42 = vpop.permute.xlu0 %5168  ;;  %4846 = vst.msk [vmem:[#allocation4 + $0x110] sm:$0x3] %vm4812_vm5, %v10408_v16  ;;  %5659 = vrot.lane.b32.xlu1 %v10260_v19, %s11066_s10  ;;  %v7504_v19 = vld [vmem:[%s10892_s5 + $0x48] sm:$0xff]  }
 0x538   : > { %5214 = vst.msk [vmem:[#allocation4 + $0x108] sm:$0xff] %vm5196_vm6, %v5169_v42  ;;  %7087 = vmatprep.subr.bf16.mxu0 %v7504_v19 }
 0x539   : > { %5835 = vrot.lane.b32.xlu0 %v5834_v15, %s7820_s20  ;;  %v5171_v40 = vpop.permute.xlu1 %5170  ;;  %7088 = vmatpush3.bf16.msra.mxu0 %v7505_v29 }
 0x53a   : > { %5215 = vst.msk [vmem:[#allocation4 + $0x118] sm:$0x3] %vm11446_vm14, %v5171_v40  ;;  %vm11452_vm14 = vcmask 179200   ;;  %v7507_v40 = vld [vmem:[%s10892_s5 + $0x10] sm:$0xff]  }
 0x53b   : > { %v2345_v63 = vpop.permute.xlu0 %2344  ;;  %5847 = vrot.lane.b32.xlu1 %v5846_v44, %s11044_s22 }
 0x53c   : > { %2388 = vst.msk [vmem:[#allocation4 + $0x120] sm:$0xff] %vm11447_vm7, %v2345_v63  ;;  %v6063_v31 = vld [vmem:[#allocation4 + $0x100] sm:$0xff]  ;;  %vm11453_vm7 = vcmask 189584  }
 0x53d   : > { %5852 = vrot.lane.b32.xlu0 %v5851_v51, %s7822_s27  ;;  %v2347_v21 = vpop.permute.xlu1 %2346 }
 0x53e   : > { %2389 = vst.msk [vmem:[#allocation4 + $0x130] sm:$0x3] %vm11448_vm2, %v2347_v21  ;;  %v6065_v52 = vld [vmem:[#allocation4 + $0x110] sm:$0x3]  ;;  %vm11454_vm2 = vcmask 244928  }
 0x53f   : > { %v2467_v59 = vpop.permute.xlu0 %2466  ;;  %5857 = vrot.lane.b32.xlu1 %v5856_v62, %s7821_s21  ;;  %v6064_v16 = vld [vmem:[#allocation4 + $0x108] sm:$0xff]  ;;  %v6067_v33 = vpack.c.bf16 %v6065_v52, %v6063_v31 }
 0x540   : > { %2510 = vst.msk [vmem:[#allocation4 + $0x120] sm:$0xff] %vm11449_vm10, %v2467_v59  ;;  %vm11455_vm10 = vcmask 238784  }
 0x541   : > { %5876 = vrot.lane.b32.xlu0 %v5875_v57, %s11066_s10  ;;  %v2469_v39 = vpop.permute.xlu1 %2468  ;;  %v6066_v28 = vld [vmem:[#allocation4 + $0x118] sm:$0x3] }
 0x542   : > { %2511 = vst.msk [vmem:[#allocation4 + $0x130] sm:$0x3] %vm11450_vm3, %v2469_v39  ;;  %v6068_v6 = vpack.c.bf16 %v6066_v28, %v6064_v16  ;;  %vm11456_vm3 = vcmask 294128  }
 0x543   : > { %v2589_v50 = vpop.permute.xlu0 %2588 }
 0x544   : > { %2632 = vst.msk [vmem:[#allocation4 + $0x120] sm:$0xff] %vm11451_vm4, %v2589_v50  ;;  %6984 = vmatprep.mubr.msk.bf16.mxu1 %vm11452_vm14, %v6068_v6  ;;  %vm11457_vm4 = vcmask 287984   ;;  %vm11458_vm14 = vcmask 343328  }
 0x545   : > { %6105 = vmatmul.mubr.bf16.vlgmr.msra.gmra.mrb[32].mxu1 %v6067_v33  ;;  %v2591_v5 = vpop.permute.xlu1 %2590 }
 0x546   : > { %2633 = vst.msk [vmem:[#allocation4 + $0x130] sm:$0x3] %vm11453_vm7, %v2591_v5  ;;  %6124 = vmatpush1.bf16.msra.mxu1 %v7718_v9  ;;  %vm11459_vm7 = vcmask 337184  }
 0x547   : > { %v2711_v14 = vpop.permute.xlu0 %2710  ;;  %6125 = vmatprep.subr.bf16.mxu1 %v7813_v2 }
 0x548   : > { %2754 = vst.msk [vmem:[#allocation4 + $0x120] sm:$0xff] %vm11454_vm2, %v2711_v14  ;;  %vm11460_vm2 = vcmask 392528  }
 0x549   : > { %v2713_v55 = vpop.permute.xlu1 %2712 }
 0x54a   : > { %2755 = vst.msk [vmem:[#allocation4 + $0x130] sm:$0x3] %vm11455_vm10, %v2713_v55  ;;  %6126 = vmatpush1.bf16.msra.mxu1 %v7719_v4  ;;  %vm11461_vm10 = vcmask 386384   ;;  %v7508_v55 = vld [vmem:[%s10892_s5 + $0x58] sm:$0xff]  }
 0x54b   : > { %v2833_v54 = vpop.permute.xlu0 %2832  ;;  %6127 = vmatprep.subr.bf16.mxu1 %v7813_v2 }
 0x54c   : > { %2876 = vst.msk [vmem:[#allocation4 + $0x120] sm:$0xff] %vm11456_vm3, %v2833_v54  ;;  %vm11462_vm3 = vcmask 441728   ;;  %v7509_v54 = vld [vmem:[%s10892_s5 + $0x18] sm:$0xff]  }
 0x54d   : > { %v2835_v20 = vpop.permute.xlu1 %2834 }
 0x54e   : > { %2877 = vst.msk [vmem:[#allocation4 + $0x130] sm:$0x3] %vm11457_vm4, %v2835_v20  ;;  %6128 = vmatpush1.bf16.msra.mxu1 %v7720_v58  ;;  %vm11464_vm4 = vcmask 533984  }
 0x54f   : > { %v2955_v45 = vpop.permute.xlu0 %2954  ;;  %6129 = vmatprep.subr.bf16.mxu1 %v7813_v2 }
 0x550   : > { %2998 = vst.msk [vmem:[#allocation4 + $0x120] sm:$0xff] %vm11458_vm14, %v2955_v45  ;;  %vm11467_vm14 = vcmask 638528  }
 0x551   : > { %v2957_v26 = vpop.permute.xlu1 %2956 }
 0x552   : > { %2999 = vst.msk [vmem:[#allocation4 + $0x130] sm:$0x3] %vm11459_vm7, %v2957_v26  ;;  %6130 = vmatpush1.bf16.msra.mxu1 %v7721_v22  ;;  %vm11468_vm7 = vcmask 632384  }
 0x553   : > { %v3077_v0 = vpop.permute.xlu0 %3076  ;;  %6131 = vmatprep.subr.bf16.mxu1 %v7813_v2 }
 0x554   : > { %3120 = vst.msk [vmem:[#allocation4 + $0x120] sm:$0xff] %vm11460_vm2, %v3077_v0  ;;  %vm11469_vm2 = vcmask 687728  }
 0x555   : > { %v3079_v41 = vpop.permute.xlu1 %3078 }
 0x556   : > { %3121 = vst.msk [vmem:[#allocation4 + $0x130] sm:$0x3] %vm11461_vm10, %v3079_v41  ;;  %6132 = vmatpush1.bf16.msra.mxu1 %v7722_v23  ;;  %vm11470_vm10 = vcmask 681584  }
 0x557   : > { %v3199_v34 = vpop.permute.xlu0 %3198  ;;  %6133 = vmatprep.subr.bf16.mxu1 %v7813_v2 }
 0x558   : > { %3242 = vst.msk [vmem:[#allocation4 + $0x120] sm:$0xff] %vm11462_vm3, %v3199_v34  ;;  %v10518_v60 = vpop.f32.mrb[24].mxu1  ;;  %vm11471_vm3 = vcmask 736928  }
 0x559   : > { %v5926_v11 = vpop.f32.mrb[25].mxu1  ;;  %v3201_v43 = vpop.permute.xlu1 %3200 }
 0x55a   : > { %3243 = vst.msk [vmem:[#allocation4 + $0x130] sm:$0x3] %vm3224_vm9, %v3201_v43  ;;  %v10521_v46 = vpop.f32.mrb[26].mxu1  ;;  %6134 = vmatpush1.bf16.msra.mxu1 %v7723_v48  ;;  %vm11463_vm9 = vcmask 540128   ;;  %v6256_v48 = vsub.s32 2, %v10233_v8 }
 0x55b   : > { %v3321_v30 = vpop.permute.xlu0 %3320  ;;  %v5929_v35 = vpop.f32.mrb[27].mxu1  ;;  %6135 = vmatprep.subr.bf16.mxu1 %v7813_v2 }
 0x55c   : > { %3364 = vst.msk [vmem:[#allocation4 + $0x120] sm:$0xff] %vm3344_vm0, %v3321_v30  ;;  %vm11466_vm0 = vcmask 583184   ;;  %v6260_v30 = vsub.s32 3, %v10233_v8 }
 0x55d   : > { %v3323_v53 = vpop.permute.xlu1 %3322 }
 0x55e   : > { %3365 = vst.msk [vmem:[#allocation4 + $0x130] sm:$0x3] %vm3346_vm1, %v3323_v53  ;;  %6136 = vmatpush1.bf16.msra.mxu1 %v7724_v61  ;;  %vm11465_vm1 = vcmask 589328  }
 0x55f   : > { %v3443_v10 = vpop.permute.xlu0 %3442  ;;  %6137 = vmatprep.subr.bf16.mxu1 %v7813_v2 }
 0x560   : > { %3486 = vst.msk [vmem:[#allocation4 + $0x120] sm:$0xff] %vm11463_vm9, %v3443_v10  ;;  %vm11472_vm9 = vcmask 730784  }
 0x561   : > { %v3445_v36 = vpop.permute.xlu1 %3444 }
 0x562   : > { %3487 = vst.msk [vmem:[#allocation4 + $0x130] sm:$0x3] %vm11464_vm4, %v3445_v36  ;;  %6138 = vmatpush1.bf16.msra.mxu1 %v7725_v18  ;;  %vm11473_vm4 = vcmask 786128  }
 0x563   : > { %v3565_v24 = vpop.permute.xlu0 %3564  ;;  %6139 = vmatprep.subr.bf16.mxu1 %v7813_v2 }
 0x564   : > { %3608 = vst.msk [vmem:[#allocation4 + $0x120] sm:$0xff] %vm11465_vm1, %v3565_v24  ;;  %vm11474_vm1 = vcmask 779984  }
 0x565   : > { %v3567_v12 = vpop.permute.xlu1 %3566 }
 0x566   : > { %3609 = vst.msk [vmem:[#allocation4 + $0x130] sm:$0x3] %vm11466_vm0, %v3567_v12  ;;  %6140 = vmatpush1.bf16.msra.mxu1 %v7726_v3  ;;  %vm11475_vm0 = vcmask 835328  }
 0x567   : > { %v3687_v27 = vpop.permute.xlu0 %3686  ;;  %6141 = vmatprep.subr.bf16.mxu1 %v7813_v2 }
 0x568   : > { %3730 = vst.msk [vmem:[#allocation4 + $0x120] sm:$0xff] %vm11467_vm14, %v3687_v27  ;;  %vm11476_vm14 = vcmask 829184  }
 0x569   : > { %v3689_v37 = vpop.permute.xlu1 %3688 }
 0x56a   : > { %3731 = vst.msk [vmem:[#allocation4 + $0x130] sm:$0x3] %vm11468_vm7, %v3689_v37  ;;  %6142 = vmatpush1.bf16.msra.mxu1 %v8675_v32  ;;  %v7506_v32 = vld [vmem:[%s10892_s5 + $0x50] sm:$0xff]   ;;  %vm11477_vm7 = vcmask 884528  }
 0x56b   : > { %v3809_v56 = vpop.permute.xlu0 %3808  ;;  %6514 = vmatprep.subr.bf16.mxu1 %v7813_v2  ;;  %7089 = vmatprep.subr.bf16.mxu0 %v7506_v32 }
 0x56c   : > { %3852 = vst.msk [vmem:[#allocation4 + $0x120] sm:$0xff] %vm11469_vm2, %v3809_v56  ;;  %7090 = vmatpush3.bf16.msra.mxu0 %v7507_v40  ;;  %vm11478_vm2 = vcmask 878384  }
 0x56d   : > { %v3811_v38 = vpop.permute.xlu1 %3810  ;;  %7091 = vmatprep.subr.bf16.mxu0 %v7508_v55 }
 0x56e   : > { %3853 = vst.msk [vmem:[#allocation4 + $0x130] sm:$0x3] %vm11470_vm10, %v3811_v38  ;;  %vm11479_vm10 = vcmask 31744  }
 0x56f   : > { %v3931_v42 = vpop.permute.xlu0 %3930 }
 0x570   : > { %3974 = vst.msk [vmem:[#allocation4 + $0x120] sm:$0xff] %vm11471_vm3, %v3931_v42  ;;  %vm11480_vm3 = vcmask 25600   ;;  %7092 = vmatpush3.bf16.msra.mxu0 %v7509_v54 }
 0x571   : > { %v3933_v15 = vpop.permute.xlu1 %3932 }
 0x572   : > { %3975 = vst.msk [vmem:[#allocation4 + $0x130] sm:$0x3] %vm11472_vm9, %v3933_v15  ;;  %vm11481_vm9 = vcmask 933728  }
 0x573   : > { %v4053_v25 = vpop.permute.xlu0 %4052 }
 0x574   : > { %4096 = vst.msk [vmem:[#allocation4 + $0x120] sm:$0xff] %vm11473_vm4, %v4053_v25  ;;  %vm11482_vm4 = vcmask 927584  }
 0x575   : > { %v4055_v44 = vpop.permute.xlu1 %4054 }
 0x576   : > { %4097 = vst.msk [vmem:[#allocation4 + $0x130] sm:$0x3] %vm11474_vm1, %v4055_v44  ;;  %vm11483_vm1 = vcmask 80928  }
 0x577   : > { %v4175_v63 = vpop.permute.xlu0 %4174 }
 0x578   : > { %4218 = vst.msk [vmem:[#allocation4 + $0x120] sm:$0xff] %vm11475_vm0, %v4175_v63  ;;  %vm11484_vm0 = vcmask 74784  }
 0x579   : > { %v4177_v51 = vpop.permute.xlu1 %4176 }
 0x57a   : > { %4219 = vst.msk [vmem:[#allocation4 + $0x130] sm:$0x3] %vm11476_vm14, %v4177_v51  ;;  %vm11485_vm14 = vcmask 982928  }
 0x57b   : > { %v4297_v47 = vpop.permute.xlu0 %4296 }
 0x57c   : > { %4340 = vst.msk [vmem:[#allocation4 + $0x120] sm:$0xff] %vm11477_vm7, %v4297_v47  ;;  %vm11486_vm7 = vcmask 976784  }
 0x57d   : > { %v4299_v21 = vpop.permute.xlu1 %4298 }
 0x57e   : > { %4341 = vst.msk [vmem:[#allocation4 + $0x130] sm:$0x3] %vm11478_vm2, %v4299_v21  ;;  %vm11487_vm2 = vcmask 123984  }
 0x57f   : > { %v4785_v62 = vpop.permute.xlu0 %4784 }
 0x580   : > { %4849 = vst.msk [vmem:[#allocation4 + $0x128] sm:$0xff] %vm11479_vm10, %v4785_v62  ;;  %vm11488_vm10 = vcmask 1032128  }
 0x581   : > { %v4787_v19 = vpop.permute.xlu1 %4786 }
 0x582   : > { %4851 = vst.msk [vmem:[#allocation4 + $0x138] sm:$0x3] %vm11480_vm3, %v4787_v19  ;;  %vm11489_vm3 = vcmask 1048560  }
 0x583   : > { %v4419_v29 = vpop.permute.xlu0 %4418 }
 0x584   : > { %4462 = vst.msk [vmem:[#allocation4 + $0x120] sm:$0xff] %vm11481_vm9, %v4419_v29  ;;  %vm5463_vm9 = vcmp.ge.s32.totalorder %v5432_v17, 16 }
 0x585   : > { %v4421_v59 = vpop.permute.xlu1 %4420 }
 0x586   : > { %4463 = vst.msk [vmem:[#allocation4 + $0x130] sm:$0x3] %vm11482_vm4, %v4421_v59  ;;  %vm5464_vm4 = vcmp.lt.s32.totalorder %v5432_v17, 32 }
 0x587   : > { %v4929_v57 = vpop.permute.xlu0 %4928 }
 0x588   : > { %4972 = vst.msk [vmem:[#allocation4 + $0x128] sm:$0xff] %vm11483_vm1, %v4929_v57  ;;  %vm11492_vm1 = vcmask 173184   ;;  %v7510_v57 = vld [vmem:[%s10892_s5 + $0x60] sm:$0xff]  }
 0x589   : > { %v4931_v52 = vpop.permute.xlu1 %4930  ;;  %7093 = vmatprep.subr.bf16.mxu0 %v7510_v57 }
 0x58a   : > { %4973 = vst.msk [vmem:[#allocation4 + $0x138] sm:$0x3] %vm11484_vm0, %v4931_v52  ;;  %vm5480_vm0 = vcmp.lt.s32.totalorder %v5432_v17, 64  ;;  %v7511_v52 = vld [vmem:[%s10892_s5 + $0x20] sm:$0xff]  }
 0x58b   : > { %v4541_v39 = vpop.permute.xlu0 %4540  ;;  %7094 = vmatpush3.bf16.msra.mxu0 %v7511_v52 }
 0x58c   : > { %4584 = vst.msk [vmem:[#allocation4 + $0x120] sm:$0xff] %vm11485_vm14, %v4541_v39 }
 0x58d   : > { %v4543_v16 = vpop.permute.xlu1 %4542 }
 0x58e   : > { %4585 = vst.msk [vmem:[#allocation4 + $0x130] sm:$0x3] %vm11486_vm7, %v4543_v16 }
 0x58f   : > { %v5051_v28 = vpop.permute.xlu0 %5050 }
 0x590   : > { %5094 = vst.msk [vmem:[#allocation4 + $0x128] sm:$0xff] %vm5074_vm8, %v5051_v28  ;;  %vm10582_vm8 = vmand %vm5463_vm9, %vm5464_vm4  ;;  %vm5648_vm9 = vcmp.lt.s32.totalorder %v5432_v17, 96 }
 0x591   : > { %v5053_v50 = vpop.permute.xlu1 %5052 }
 0x592   : > { %5095 = vst.msk [vmem:[#allocation4 + $0x138] sm:$0x3] %vm11487_vm2, %v5053_v50  ;;  %vm5501_vm2 = vcmp.ge.s32.totalorder %v5432_v17, 64 }
 0x593   : > { %v4663_v6 = vpop.permute.xlu0 %4662 }
 0x594   : > { %4706 = vst.msk [vmem:[#allocation4 + $0x120] sm:$0xff] %vm11488_vm10, %v4663_v6  ;;  %vm5502_vm10 = vcmp.lt.s32.totalorder %v5432_v17, 80 }
 0x595   : > { %4848 = vst.msk [vmem:[#allocation4 + $0x120] sm:$0xff] %vm11489_vm3, %v4785_v62  ;;  %v4665_v31 = vpop.permute.xlu1 %4664  ;;  %vm5647_vm3 = vcmp.ge.s32.totalorder %v5432_v17, 80  ;;  %vm10617_vm4 = vmand %vm5501_vm2, %vm5502_vm10 }
 0x596   : > { %4707 = vst.msk [vmem:[#allocation4 + $0x130] sm:$0x3] %vm4688_vm13, %v4665_v31  ;;  %vm5479_vm13 = vcmp.ge.s32.totalorder %v5432_v17, 48 }
 0x597   : > { %v5173_v33 = vpop.permute.xlu0 %5172  ;;  %4850 = vst.msk [vmem:[#allocation4 + $0x130] sm:$0x3] %vm4812_vm5, %v4787_v19  ;;  %vm5472_vm5 = vcmp.lt.s32.totalorder %v5432_v17, 48  ;;  %vm10605_vm7 = vmand %vm5479_vm13, %vm5480_vm0  ;;  %vm5663_vm13 = vcmp.lt.s32.totalorder %v5432_v17, 112  ;;  %vm5670_vm0 = vcmp.ge.s32.totalorder %v5432_v17, 112 }
 0x598   : > { %5216 = vst.msk [vmem:[#allocation4 + $0x128] sm:$0xff] %vm5196_vm6, %v5173_v33  ;;  %vm5471_vm6 = vcmp.ge.s32.totalorder %v5432_v17, 32  ;;  %vm10638_vm10 = vmand %vm5670_vm0, %vm5671_vm11  ;;  %vm11506_vm11 = vcmask 130048   ;;  %vm6742_vm0 = vcmask 1041408  }
 0x599   : > { %v5175_v14 = vpop.permute.xlu1 %5174  ;;  %vm10601_vm14 = vmand %vm5471_vm6, %vm5472_vm5  ;;  %vm5662_vm5 = vcmp.ge.s32.totalorder %v5432_v17, 96 }
 0x59a   : > { %5217 = vst.msk [vmem:[#allocation4 + $0x138] sm:$0x3] %vm11492_vm1, %v5175_v14  ;;  %vm11499_vm1 = vcmask 179200   ;;  %vm10622_vm6 = vmand %vm5647_vm3, %vm5648_vm9  ;;  %vm11507_vm3 = vcmask 123904  }
 0x59b   : > { %v5461_v9 = vpop.permute.xlu0 %5460  ;;  %vm10634_vm2 = vmand %vm5662_vm5, %vm5663_vm13 }
 0x59c   : > { %5466 = vst.msk [vmem:[#allocation7] sm:$0x1] %vm10582_vm8, %v5461_v9  ;;  %v6114_v11 = vld [vmem:[#allocation4 + $0x120] sm:$0xff]  ;;  %vm11508_vm5 = vmmov %vm11506_vm11 }
 0x59d   : > { %v5693_v4 = vpop.permute.xlu1 %5692  ;;  %vm11509_vm13 = vmmov %vm11507_vm3 }
 0x59e   : > { %5695 = vst.msk [vmem:[#allocation7 + $0x1] sm:$0x1] %vm10582_vm8, %v5693_v4  ;;  %v6116_v58 = vld [vmem:[#allocation4 + $0x130] sm:$0x3]  ;;  %v7512_v4 = vld [vmem:[%s10892_s5 + $0x68] sm:$0xff]  }
 0x59f   : > { %v5477_v20 = vpop.permute.xlu0 %5476  ;;  %v6115_v22 = vld [vmem:[#allocation4 + $0x128] sm:$0xff]  ;;  %v6118_v43 = vpack.c.bf16 %v6116_v58, %v6114_v11  ;;  %7095 = vmatprep.subr.bf16.mxu0 %v7512_v4 }
 0x5a0   : > { %v7516_v11 = vld [vmem:[%s10892_s5 + $0x78] sm:$0xff]  }
 0x5a1   : > { %v5469_v0 = vpop.permute.xlu1 %5468  ;;  %v6117_v41 = vld [vmem:[#allocation4 + $0x138] sm:$0x3] }
 0x5a2   : > { %5474 = vst.msk [vmem:[#allocation7] sm:$0x1] %vm10601_vm14, %v5469_v0  ;;  %v6119_v23 = vpack.c.bf16 %v6117_v41, %v6115_v22 }
 0x5a3   : > { %v5645_v34 = vpop.permute.xlu0 %5644  ;;  %5482 = vst.msk [vmem:[#allocation7] sm:$0x1] %vm10605_vm7, %v5477_v20  ;;  %v7513_v20 = vld [vmem:[%s10892_s5 + $0x28] sm:$0xff]  }
 0x5a4   : > { %6985 = vmatprep.mubr.msk.bf16.mxu1 %vm11499_vm1, %v6119_v23  ;;  %7096 = vmatpush3.bf16.msra.mxu0 %v7513_v20  ;;  %v7515_v23 = vld [vmem:[%s10892_s5 + $0x30] sm:$0xff]   ;;  %v6248_v20 = vsub.s32 0, %v10233_v8 }
 0x5a5   : > { %6156 = vmatmul.mubr.bf16.vlgmr.msra.gmra.mrb[36].mxu1 %v6118_v43  ;;  %v5499_v35 = vpop.permute.xlu1 %5498  ;;  %v7518_v43 = vld [vmem:[%s10892_s5 + $0x80] sm:$0xff]  }
 0x5a6   : > { %5504 = vst.msk [vmem:[#allocation7] sm:$0x1] %vm10617_vm4, %v5499_v35  ;;  %v7517_v35 = vld [vmem:[%s10892_s5 + $0x38] sm:$0xff]   ;;  %6515 = vmatpush1.bf16.msra.mxu1 %v7518_v43 }
 0x5a7   : > { %v5668_v53 = vpop.permute.xlu0 %5667  ;;  %5650 = vst.msk [vmem:[#allocation7] sm:$0x1] %vm10622_vm6, %v5645_v34  ;;  %v7514_v34 = vld [vmem:[%s10892_s5 + $0x70] sm:$0xff]   ;;  %6516 = vmatprep.subr.bf16.mxu1 %v7813_v2 }
 0x5a8   : > { %7097 = vmatprep.subr.bf16.mxu0 %v7514_v34 }
 0x5a9   : > { %v5660_v36 = vpop.permute.xlu1 %5659  ;;  %7098 = vmatpush3.bf16.msra.mxu0 %v7515_v23 }
 0x5aa   : > { %5665 = vst.msk [vmem:[#allocation7] sm:$0x1] %vm10634_vm2, %v5660_v36  ;;  %7099 = vmatprep.subr.bf16.mxu0 %v7516_v11  ;;  %v7520_v36 = vld [vmem:[%s10892_s5 + $0x90] sm:$0xff]  }
 0x5ab   : > { %v5836_v17 = vpop.permute.xlu0 %5835  ;;  %5673 = vst.msk [vmem:[#allocation7] sm:$0x1] %vm10638_vm10, %v5668_v53  ;;  %v7519_v53 = vld [vmem:[%s10892_s5 + $0x88] sm:$0xff]  }
 0x5ac   : > { %5838 = vst.msk [vmem:[#allocation7 + $0x1] sm:$0x1] %vm10601_vm14, %v5836_v17  ;;  %6517 = vmatpush1.bf16.msra.mxu1 %v7519_v53  ;;  %v7521_v17 = vld [vmem:[%s10892_s5 + $0x98] sm:$0xff]  }
 0x5ad   : > { %v5848_v24 = vpop.permute.xlu1 %5847  ;;  %7100 = vmatpush3.bf16.msra.mxu0 %v7517_v35  ;;  %6518 = vmatprep.subr.bf16.mxu1 %v7813_v2 }
 0x5ae   : > { %5850 = vst.msk [vmem:[#allocation7 + $0x1] sm:$0x1] %vm10605_vm7, %v5848_v24  ;;  %7329 = vmatprep.subr.bf16.mxu0 %v7791_v1 }
 0x5af   : > { %v5853_v18 = vpop.permute.xlu0 %5852 }
 0x5b0   : > { %5855 = vst.msk [vmem:[#allocation7 + $0x1] sm:$0x1] %vm10617_vm4, %v5853_v18  ;;  %6519 = vmatpush1.bf16.msra.mxu1 %v7520_v36 }
 0x5b1   : > { %v5858_v12 = vpop.permute.xlu1 %5857  ;;  %6520 = vmatprep.subr.bf16.mxu1 %v7813_v2 }
 0x5b2   : > { %5860 = vst.msk [vmem:[#allocation7 + $0x1] sm:$0x1] %vm10622_vm6, %v5858_v12 }
 0x5b3   : > { %v5877_v27 = vpop.permute.xlu0 %5876 }
 0x5b4   : > { %5879 = vst.msk [vmem:[#allocation7 + $0x1] sm:$0x1] %vm10634_vm2, %v5877_v27  ;;  %6521 = vmatpush1.bf16.msra.mxu1 %v7521_v17 }
 0x5b5   : > { %6522 = vmatprep.subr.bf16.mxu1 %v7813_v2 }
 0x5b8   : > { %v5975_v3 = vpop.f32.mrb[28].mxu1 }
 0x5b9   : > { %v5982_v37 = vmax.f32 %v10518_v60, %v5975_v3  ;;  %v5977_v56 = vpop.f32.mrb[29].mxu1 }
 0x5ba   : > { %v5978_v38 = vpop.f32.mrb[30].mxu1 }
 0x5bb   : > { %5984 = vst.msk [vmem:[#allocation6] sm:$0xff] %vm11506_vm11, %v5982_v37  ;;  %v5983_v42 = vmax.f32 %v10521_v46, %v5978_v38  ;;  %v5980_v15 = vpop.f32.mrb[31].mxu1  ;;  %vm6738_vm11 = vcmask 687104  }
 0x5bd   : > { %5985 = vst.msk [vmem:[#allocation6 + $0x8] sm:$0x3] %vm11507_vm3, %v5983_v42  ;;  %vm6786_vm3 = vcmask 73728  }
 0x5c4   : > { %v5986_v25 = vld [vmem:[#allocation6] ss:$2 sm:$0x1f]  ;;  %v5987_v32 = vld [vmem:[#allocation6 + $0x1] ss:$2 sm:$0x1f] }
 0x5c5   : > { %v5988_v40 = vmax.f32 %v5986_v25, %v5987_v32 }
 0x5c7   : > { %v5989_v44 = vadd.f32 %v10369_v13, %v5988_v40 }
 0x5c9   : > { %v5991_v63 = vmin.f32 %v5989_v44, 20.0  ;;  %vm5990_vm1 = vcmp.gt.f32.partialorder %v5989_v44, 20.0 }
 0x5cb   : > { %v5992_v51 = vmul.f32 1.442695, %v5991_v63 }
 0x5cd   : > { %7665 = vpow2.f32 %v5992_v51 }
 0x5d7   : > { %v7666_v47 = vpop.eup %7665 }
 0x5d8   : > { %v5994_v21 = vadd.f32 1.0, %v7666_v47  ;;  %v5997_v60 = vmul.f32 -0.5, %v7666_v47  ;;  %v6000_v19 = vand.u32 2147483647, %v7666_v47 }
 0x5da   : > { %7667 = vlog2.f32 %v5994_v21  ;;  %v5998_v62 = vadd.f32 1.0, %v5997_v60  ;;  %vm6001_vm9 = vcmp.lt.f32.partialorder %v6000_v19, 0.0004427343  ;;  %v7522_v21 = vld [vmem:[%s10892_s5 + $0xa0] sm:$0xff]  }
 0x5db   : > { %6523 = vmatpush1.bf16.msra.mxu1 %v7522_v21 }
 0x5dc   : > { %v5999_v46 = vmul.f32 %v7666_v47, %v5998_v62  ;;  %6524 = vmatprep.subr.bf16.mxu1 %v7813_v2 }
 0x5e4   : > { %v7668_v29 = vpop.eup %7667 }
 0x5e5   : > { %v5996_v59 = vmul.f32 0.6931472, %v7668_v29 }
 0x5e7   : > { %v6002_v39 = vsel %vm6001_vm9, %v5999_v46, %v5996_v59  ;;  %v7524_v46 = vld [vmem:[%s10892_s5 + $0xb0] sm:$0xff]  }
 0x5e8   : > { %v6003_v16 = vsel %vm5990_vm1, %v5989_v44, %v6002_v39 }
 0x5e9   : > { %v6011_v28 = vrot.slane %v6003_v16, %v10241_v7  ;;  %v6043_v50 = vcombine.high %v6003_v16, %v6003_v16 }
 0x5eb   : > { %v10669_v6 = vrot.slane %v6011_v28, %v10241_v7  ;;  %v6023_v31 = vcombine.high %v6011_v28, %v6011_v28  ;;  %v6050_v9 = vrot.slane %v6043_v50, %v10241_v7  ;;  %v7525_v50 = vld [vmem:[%s10892_s5 + $0xb8] sm:$0xff]  }
 0x5ed   : > { %v6033_v33 = vcombine.high %v10669_v6, %v10669_v6  ;;  %v6030_v14 = vrot.slane %v6023_v31, %v10241_v7  ;;  %v6057_v54 = vrot.slane %v6050_v9, %v10241_v7  ;;  %v7526_v9 = vld [vmem:[%s10892_s5 + $0xc0] sm:$0xff]  }
 0x5ef   : > { %6034 = vrot.lane.b32.xlu0 %v6033_v33, %s11067_s11  ;;  %v6038_v55 = vcombine.high %v6030_v14, %v6030_v14  ;;  %6032 = vst.msk [vmem:[#allocation7 + $0x2] sm:$0x1] %vm9882_vm12, %v6030_v14  ;;  %s11520_s11 = smov %s11519_s17 }
 0x5f1   : > { %6039 = vrot.lane.b32.xlu1 %v6038_v55, %s7820_s20  ;;  %s10845_s20 = scalar_lea.hbm %s11519_s17, %s7028_s14 }
 0x5f3   : > { %6058 = vrot.lane.b32.xlu0 %v6057_v54, %s11044_s22 }
 0x618   : > { %v6106_v58 = vpop.f32.mrb[32].mxu1 }
 0x619   : > { %v6108_v0 = vpop.f32.mrb[33].mxu1 }
 0x61a   : > { %v6109_v22 = vpop.f32.mrb[34].mxu1 }
 0x61b   : > { %v6111_v41 = vpop.f32.mrb[35].mxu1 }
 0x661   : > { %v6035_v24 = vpop.permute.xlu0 %6034 }
 0x662   : > { %6037 = vst.msk [vmem:[#allocation7 + $0x2] sm:$0x1] %vm10582_vm8, %v6035_v24 }
 0x663   : > { %v6040_v18 = vpop.permute.xlu1 %6039 }
 0x664   : > { %6042 = vst.msk [vmem:[#allocation7 + $0x2] sm:$0x1] %vm10601_vm14, %v6040_v18 }
 0x665   : > { %v6059_v12 = vpop.permute.xlu0 %6058 }
 0x666   : > { %6061 = vst.msk [vmem:[#allocation7 + $0x2] sm:$0x1] %vm10605_vm7, %v6059_v12 }
 0x678   : > { %v6157_v27 = vpop.f32.mrb[36].mxu1 }
 0x679   : > { %v6164_v3 = vmax.f32 %v6106_v58, %v6157_v27  ;;  %v6159_v37 = vpop.f32.mrb[37].mxu1 }
 0x67a   : > { %v6160_v56 = vpop.f32.mrb[38].mxu1  ;;  %v6320_v37 = vld [vmem:[%s11512_s7] sm:$0x1]  ;;  %s6801_s7 = sshll.u32 %s378_s6, 4  ;;  %s10847_s7 = int_to_ptr.vmem [resolvable:$true] %s6801_s7 }
 0x67b   : > { %6166 = vst.msk [vmem:[#allocation6] sm:$0xff] %vm11508_vm5, %v6164_v3  ;;  %v6165_v38 = vmax.f32 %v6109_v22, %v6160_v56  ;;  %v6162_v42 = vpop.f32.mrb[39].mxu1 }
 0x67d   : > { %6167 = vst.msk [vmem:[#allocation6 + $0x8] sm:$0x3] %vm11509_vm13, %v6165_v38 }
 0x684   : > { %v6168_v5 = vld [vmem:[#allocation6] ss:$2 sm:$0x1f]  ;;  %v6169_v15 = vld [vmem:[#allocation6 + $0x1] ss:$2 sm:$0x1f] }
 0x685   : > { %v6170_v25 = vmax.f32 %v6168_v5, %v6169_v15 }
 0x687   : > { %v6171_v45 = vadd.f32 %v10369_v13, %v6170_v25  ;;  %v7523_v13 = vld [vmem:[%s10892_s5 + $0xa8] sm:$0xff]  }
 0x688   : > { %6525 = vmatpush1.bf16.msra.mxu1 %v7523_v13 }
 0x689   : > { %v6173_v32 = vmin.f32 %v6171_v45, 20.0  ;;  %vm6172_vm14 = vcmp.gt.f32.partialorder %v6171_v45, 20.0  ;;  %6526 = vmatprep.subr.bf16.mxu1 %v7813_v2 }
 0x68b   : > { %v6174_v40 = vmul.f32 1.442695, %v6173_v32 }
 0x68c   : > { %6527 = vmatpush1.bf16.msra.mxu1 %v7524_v46 }
 0x68d   : > { %7669 = vpow2.f32 %v6174_v40  ;;  %6528 = vmatprep.subr.bf16.mxu1 %v7813_v2 }
 0x690   : > { %6529 = vmatpush1.bf16.msra.mxu1 %v7525_v50  ;;  %v7540_v50 = vld [vmem:[%s11513_s9 + $0x28] ss:$0 sps:$4 sm:$0x33]  }
 0x691   : > { %6530 = vmatprep.subr.bf16.mxu1 %v7813_v2 }
 0x694   : > { %6531 = vmatpush1.bf16.msra.mxu1 %v7526_v9 }
 0x695   : > { %7349 = vmatprep.subr.bf16.mxu1 %v7791_v1 }
 0x697   : > { %v7670_v26 = vpop.eup %7669 }
 0x698   : > { %v6176_v44 = vadd.f32 1.0, %v7670_v26  ;;  %v6179_v63 = vmul.f32 -0.5, %v7670_v26  ;;  %v6182_v47 = vand.u32 2147483647, %v7670_v26 }
 0x69a   : > { %7671 = vlog2.f32 %v6176_v44  ;;  %v6180_v51 = vadd.f32 1.0, %v6179_v63  ;;  %vm6183_vm8 = vcmp.lt.f32.partialorder %v6182_v47, 0.0004427343 }
 0x69c   : > { %v6181_v19 = vmul.f32 %v7670_v26, %v6180_v51 }
 0x6a4   : > { %v7672_v60 = vpop.eup %7671 }
 0x6a5   : > { %v6178_v62 = vmul.f32 0.6931472, %v7672_v60 }
 0x6a7   : > { %v6184_v29 = vsel %vm6183_vm8, %v6181_v19, %v6178_v62 }
 0x6a8   : > { %v6185_v59 = vsel %vm6172_vm14, %v6171_v45, %v6184_v29 }
 0x6a9   : > { %v6193_v57 = vrot.slane %v6185_v59, %v10241_v7  ;;  %v6227_v52 = vcombine.high %v6185_v59, %v6185_v59 }
 0x6ab   : > { %v6200_v39 = vrot.slane %v6193_v57, %v10241_v7  ;;  %v6234_v16 = vrot.slane %v6227_v52, %v10241_v7  ;;  %v6205_v28 = vcombine.high %v6193_v57, %v6193_v57  ;;  %v7535_v57 = vld [vmem:[%s11513_s9] sm:$0xff]   ;;  %v7536_v52 = vld [vmem:[%s11513_s9 + $0x8] sm:$0xff]  }
 0x6ad   : > { %v6241_v31 = vrot.slane %v6234_v16, %v10241_v7  ;;  %6201 = vrot.lane.b32.xlu1 %v6200_v39, %s7822_s27  ;;  %v6212_v33 = vrot.slane %v6205_v28, %v10241_v7  ;;  %v6217_v14 = vcombine.high %v6200_v39, %v6200_v39  ;;  %s11511_s27 = sld [smem:[#allocation23_spill]]  ;;  %v7537_v39 = vld [vmem:[%s11513_s9 + $0x10] sm:$0xff]   ;;  %v7538_v16 = vld [vmem:[%s11513_s9 + $0x18] sm:$0xff]   ;;  %v7539_v28 = vld [vmem:[%s11513_s9 + $0x20] sm:$0xff]  }
 0x6af   : > { %6243 = vst.msk [vmem:[#allocation7 + $0x3] sm:$0x1] %vm9882_vm12, %v6241_v31  ;;  %6213 = vrot.lane.b32.xlu0 %v6212_v33, %s7821_s21  ;;  %v6222_v55 = vcombine.high %v6212_v33, %v6212_v33  ;;  %vm11510_vm12 = vmmov %vm11508_vm5  ;;  %v6744_v31 = vsel %vm6742_vm0, %v7540_v50, 0  ;;  %v6584_v33 = vld [vmem:[%s11514_s30] sm:$0x1]  ;;  %s7824_s21 = smov [#allocation8]  }
 0x6b1   : > { %6218 = vrot.lane.b32.xlu1 %v6217_v14, %s11066_s10  ;;  %s7727_s10 = scalar_lea.vmem %s10847_s7, 16 }
 0x6b2   : > { %p7728_p11 = scmp.ne.s32.totalorder %s10847_s7, %s7727_s10 }
 0x6b3   : > { %6223 = vrot.lane.b32.xlu0 %v6222_v55, %s7823_s28  ;;  %v7528_v61 = vld [vmem:[%s11511_s27 + $0x8] sm:$0xff]   ;;  %v7529_v35 = vld [vmem:[%s11511_s27 + $0x10] sm:$0xff]   ;;  %v7530_v53 = vld [vmem:[%s11511_s27 + $0x18] sm:$0xff]  }
 0x6b4   : > { %v7531_v36 = vld [vmem:[%s11511_s27 + $0x20] sm:$0xff]   ;;  %v7532_v17 = vld [vmem:[%s11511_s27 + $0x28] sm:$0xff]   ;;  %v7533_v24 = vld [vmem:[%s11511_s27 + $0x30] sm:$0xff]   ;;  %p7729_p12 = pnand %p7728_p11, %p7923_p5 }
 0x6b5   : > { %6019 = vrot.lane.b32.xlu1 %v10669_v6, %s7823_s28  ;;  %v6252_v6 = vsub.s32 1, %v10233_v8  ;;  %v7527_v8 = vld [vmem:[%s11511_s27] sm:$0xff]   ;;  %v7534_v18 = vld [vmem:[%s11511_s27 + $0x38] ss:$0 sps:$4 sm:$0xff]   ;;  %s7731_s28 = sshll.u32 %s7824_s21, 4  ;;  %s7732_s28 = int_to_ptr.vmem [resolvable:$false] %s7731_s28 }
 0x6b6   : > { %p7730_p13 = pneg %p7729_p12  ;;  %s7733_s22 = scalar_lea.vmem %s7732_s28, 32 }
 0x6b7   : > { %p7734_p0 = scmp.lt.s32.totalorder %s10847_s7, %s7732_s28  ;;  %p7735_p1 = scmp.lt.s32.totalorder %s7733_s22, %s7727_s10 }
 0x6b9   : > { %p7736_p2 = por %p7735_p1, %p7734_p0 }
 0x6bb   : > { %p7737_p3 = pnand %p7736_p2, %p7730_p13 }
 0x71f   : > { %v6202_v49 = vpop.permute.xlu1 %6201 }
 0x720   : > { %6204 = vst.msk [vmem:[#allocation7 + $0x2] sm:$0x1] %vm10617_vm4, %v6202_v49 }
 0x721   : > { %v6214_v7 = vpop.permute.xlu0 %6213 }
 0x722   : > { %6216 = vst.msk [vmem:[#allocation7 + $0x2] sm:$0x1] %vm10622_vm6, %v6214_v7  ;;  %vm6630_vm6 = vcmask 982016  }
 0x723   : > { %v6219_v54 = vpop.permute.xlu1 %6218 }
 0x724   : > { %6221 = vst.msk [vmem:[#allocation7 + $0x2] sm:$0x1] %vm10634_vm2, %v6219_v54 }
 0x725   : > { %v6224_v2 = vpop.permute.xlu0 %6223 }
 0x726   : > { %6226 = vst.msk [vmem:[#allocation7 + $0x2] sm:$0x1] %vm10638_vm10, %v6224_v2 }
 0x727   : > { %v6020_v4 = vpop.permute.xlu1 %6019 }
 0x728   : > { %6022 = vst.msk [vmem:[#allocation7 + $0x1] sm:$0x1] %vm10638_vm10, %v6020_v4 }
 0x72f   : > { %v6244_v58 = vld [vmem:[#allocation7] sm:$0xf] }
 0x730   : > { %v6253_v0 = vrot.slane %v6244_v58, %v6252_v6  ;;  %v6261_v10 = vrot.slane %v6244_v58, %v6260_v30  ;;  %v6249_v22 = vrot.slane %v6244_v58, %v6248_v20  ;;  %v6257_v41 = vrot.slane %v6244_v58, %v6256_v48 }
 0x732   : > { %v6267_v34 = vpack.c.bf16 %v6253_v0, %v6253_v0  ;;  %v6269_v23 = vpack.c.bf16 %v6261_v10, %v6261_v10  ;;  %v6266_v11 = vpack.c.bf16 %v6249_v22, %v6249_v22  ;;  %v6268_v43 = vpack.c.bf16 %v6257_v41, %v6257_v41 }
 0x734   : > { %6506 = vmatprep.mubr.bf16.mxu0 %v6267_v34  ;;  %7011 = vmatprep.mubr.msk.bf16.mxu1 %vm11510_vm12, %v6269_v23  ;;  %v6704_v34 = vld [vmem:[%s11517_s1] sm:$0x1] }
 0x735   : > { %6507 = vmatmul.mubr.bf16.vlgmr.msra.gmra.mrb[196].mxu0 %v6266_v11  ;;  %6547 = vmatmul.mubr.bf16.vlgmr.msra.gmra.mrb[40].mxu1 %v6268_v43 }
 0x736   : > { %7345 = vmatprep.mubr.msk.bf16.mxu0 %vm11047_vm15, %v7791_v1  ;;  %7361 = vmatprep.mubr.msk.bf16.mxu1 %vm11047_vm15, %v7791_v1  ;;  %vm6634_vm15 = vcmask 1043456  }
 0x737   : > { %7330 = vmatpush3.bf16.msra.mxu0 %v7527_v8  ;;  %v6636_v12 = vsel %vm6634_vm15, %v7534_v18, 0  ;;  %7350 = vmatpush3.bf16.msra.mxu1 %v7535_v57 }
 0x738   : > { %7331 = vmatprep.subr.bf16.mxu0 %v7791_v1  ;;  %7351 = vmatprep.subr.bf16.mxu1 %v7791_v1 }
 0x73b   : > { %7332 = vmatpush3.bf16.msra.mxu0 %v7528_v61  ;;  %7352 = vmatpush3.bf16.msra.mxu1 %v7536_v52 }
 0x73c   : > { %7333 = vmatprep.subr.bf16.mxu0 %v7791_v1  ;;  %7353 = vmatprep.subr.bf16.mxu1 %v7791_v1 }
 0x73f   : > { %7334 = vmatpush3.bf16.msra.mxu0 %v7529_v35  ;;  %7354 = vmatpush3.bf16.msra.mxu1 %v7537_v39 }
 0x740   : > { %7335 = vmatprep.subr.bf16.mxu0 %v7791_v1  ;;  %7355 = vmatprep.subr.bf16.mxu1 %v7791_v1 }
 0x743   : > { %7336 = vmatpush3.bf16.msra.mxu0 %v7530_v53  ;;  %7356 = vmatpush3.bf16.msra.mxu1 %v7538_v16 }
 0x744   : > { %7337 = vmatprep.subr.bf16.mxu0 %v7791_v1  ;;  %7357 = vmatprep.subr.bf16.mxu1 %v7791_v1 }
 0x747   : > { %7338 = vmatpush3.bf16.msra.mxu0 %v7531_v36  ;;  %7358 = vmatpush3.bf16.msra.mxu1 %v7539_v28 }
 0x748   : > { %7339 = vmatprep.subr.bf16.mxu0 %v7791_v1  ;;  %7359 = vmatprep.subr.bf16.mxu1 %v7791_v1 }
 0x74b   : > { %7340 = vmatpush3.bf16.msra.mxu0 %v7532_v17  ;;  %7360 = vmatpush3.bf16.msra.mxu1 %v6744_v31 }
 0x74c   : > { %7341 = vmatprep.subr.bf16.mxu0 %v7791_v1 }
 0x74f   : > { %7342 = vmatpush3.bf16.msra.mxu0 %v7533_v24 }
 0x750   : > { %7343 = vmatprep.subr.bf16.mxu0 %v7791_v1 }
 0x753   : > { %7344 = vmatpush3.bf16.msra.mxu0 %v6636_v12 }
 0x808   : > { %v7101_v27 = vpop.f32.mrb[196].mxu0  ;;  %v6548_v3 = vpop.f32.mrb[40].mxu1 }
 0x809   : > { %v7102_v56 = vpop.f32.mrb[197].mxu0  ;;  %v6550_v38 = vpop.f32.mrb[41].mxu1 }
 0x80a   : > { %v7103_v42 = vadd.f32 %v7102_v56, %v7101_v27  ;;  %v7104_v5 = vpop.f32.mrb[198].mxu0  ;;  %v6551_v15 = vpop.f32.mrb[42].mxu1 }
 0x80b   : > { %v7105_v25 = vpop.f32.mrb[199].mxu0  ;;  %v6552_v45 = vpop.f32.mrb[43].mxu1 }
 0x80c   : > { %v6509_v32 = vadd.f32 %v7103_v42, %v6320_v37 }
 0x80e   : > { %v6549_v40 = vadd.f32 %v6548_v3, %v6509_v32 }
 0x810   : > { %v6555_v26 = vmin.f32 %v6549_v40, 20.0  ;;  %vm6554_vm4 = vcmp.gt.f32.partialorder %v6549_v40, 20.0 }
 0x812   : > { %v6556_v44 = vmul.f32 1.442695, %v6555_v26 }
 0x814   : > { %7673 = vpow2.f32 %v6556_v44 }
 0x81e   : > { %v7674_v63 = vpop.eup %7673 }
 0x81f   : > { %v6558_v51 = vadd.f32 1.0, %v7674_v63  ;;  %v6561_v47 = vmul.f32 -0.5, %v7674_v63  ;;  %v6564_v60 = vand.u32 2147483647, %v7674_v63 }
 0x821   : > { %7675 = vlog2.f32 %v6558_v51  ;;  %v6562_v21 = vadd.f32 1.0, %v6561_v47  ;;  %vm6565_vm7 = vcmp.lt.f32.partialorder %v6564_v60, 0.0004427343 }
 0x823   : > { %v6563_v13 = vmul.f32 %v7674_v63, %v6562_v21 }
 0x82b   : > { %v7676_v62 = vpop.eup %7675 }
 0x82c   : > { %v6560_v19 = vmul.f32 0.6931472, %v7676_v62 }
 0x82e   : > { %v6566_v29 = vsel %vm6565_vm7, %v6563_v13, %v6560_v19 }
 0x82f   : > { %v6567_v59 = vsel %vm6554_vm4, %v6549_v40, %v6566_v29 }
 0x830   : > { %v6568_v46 = vpack.c.bf16 %v6567_v59, %v6567_v59 }
 0x832   : > { %7346 = vmatmul.mubr.msk.bf16.vlgmr.msra.gmra.mrb[200].mxu0 %vm6630_vm6, %v6568_v46 }
 0x905   : > { %v6672_v14 = vpop.f32.mrb[200].mxu0 }
 0x906   : > { %v6673_v9 = vadd.f32 %v6672_v14, %v6584_v33  ;;  %v7347_v55 = vpop.f32.mrb[201].mxu0 }
 0x907   : > { %v6675_v49 = vpop.f32.mrb[202].mxu0 }
 0x908   : > { %v6679_v7 = vmin.f32 %v6673_v9, 20.0  ;;  %v7348_v54 = vpop.f32.mrb[203].mxu0  ;;  %vm6678_vm10 = vcmp.gt.f32.partialorder %v6673_v9, 20.0 }
 0x90a   : > { %v6680_v2 = vmul.f32 1.442695, %v6679_v7 }
 0x90c   : > { %7677 = vpow2.f32 %v6680_v2 }
 0x916   : > { %v7678_v4 = vpop.eup %7677 }
 0x917   : > { %v6682_v6 = vadd.f32 1.0, %v7678_v4  ;;  %v6685_v1 = vmul.f32 -0.5, %v7678_v4  ;;  %v6688_v20 = vand.u32 2147483647, %v7678_v4 }
 0x919   : > { %7679 = vlog2.f32 %v6682_v6  ;;  %v6686_v30 = vadd.f32 1.0, %v6685_v1  ;;  %vm6689_vm2 = vcmp.lt.f32.partialorder %v6688_v20, 0.0004427343 }
 0x91b   : > { %v6687_v0 = vmul.f32 %v7678_v4, %v6686_v30 }
 0x923   : > { %v7680_v48 = vpop.eup %7679 }
 0x924   : > { %v6684_v58 = vmul.f32 0.6931472, %v7680_v48 }
 0x926   : > { %v6690_v10 = vsel %vm6689_vm2, %v6687_v0, %v6684_v58 }
 0x927   : > { %v6691_v22 = vsel %vm6678_vm10, %v6673_v9, %v6690_v10 }
 0x928   : > { %v6692_v41 = vpack.c.bf16 %v6691_v22, %v6691_v22 }
 0x92a   : > { %7362 = vmatmul.mubr.msk.bf16.vlgmr.msra.gmra.mrb[44].mxu1 %vm6738_vm11, %v6692_v41 }
 0x9fd   : > { %v6780_v23 = vpop.f32.mrb[44].mxu1 }
 0x9fe   : > { %v6781_v11 = vadd.f32 %v6780_v23, %v6704_v34  ;;  %v7363_v43 = vpop.f32.mrb[45].mxu1 }
 0x9ff   : > { %v6783_v8 = vpop.f32.mrb[46].mxu1 }
 0xa00   : > { %v7364_v61 = vpop.f32.mrb[47].mxu1  ;;  %6787 = vst.msk [vmem:[%s378_s6] sm:$0x1] %vm6786_vm3, %v6781_v11 }
 0xa01   : > { %7740 = shalt.err (!%p7737_p3)
}
 0xa02   : > { %s7741_s19 = scalar_lea.hbm %s10845_s20, 16  ;;  %s7745_s29 = scalar_lea.hbm %s11520_s11, 32 }
 0xa03   : > { %p7742_p4 = scmp.ne.s32.totalorder %s10845_s20, %s7741_s19  ;;  %p7746_p9 = scmp.lt.u32.totalorder %s10845_s20, %s11520_s11 }
 0xa04   : > { %p7747_p10 = scmp.lt.u32.totalorder %s7745_s29, %s7741_s19  ;;  %p7749_p12 = scmp.lt.u32.totalorder %s7741_s19, %s10845_s20 }
 0xa05   : > { %p7743_p7 = pnand %p7742_p4, %p7923_p5 }
 0xa06   : > { %p7748_p11 = por %p7747_p10, %p7746_p9 }
 0xa07   : > { %p7744_p8 = pneg %p7743_p7 }
 0xa08   : > { %p7750_p13 = por %p7749_p12, %p7748_p11 }
 0xa0a   : > { %p7751_p0 = pnand %p7750_p13, %p7744_p8 }
 0xa0c   : > { %7754 = shalt.err (!%p7751_p0)
}
 0xa0d   : > { %7366 = dma.vmem_to_hbm [thread:$0]  (%p7923_p5), %s10847_s7, 16, %s10845_s20, %s6789_s18  }
 0xa0e PF: > { %s11521_s16 = sld [smem:[#allocation14_spill]]  ;;  %s11522_s13 = sld [smem:[#allocation11_spill]] }
 0xa14   : > { %p7372_p1 = scmp.ge.s32.totalorder %s11521_s16, 2  ;;  %s6813_s23 = sand.u32 1, %s11522_s13  }
 0xa15   : > { %s6814_s1 = scalar_lea.sflag [#allocation9], %s6813_s23 }
 0xa16   : > { %p7369_p2 = pnand %p7372_p1, %p7927_p6 }
 0xa18   : > { %7772 = dma.done.wait (!%p7369_p2), %s6814_s1, 16  }
 0xa19   : > { %7774 = vsyncadd (!%p7369_p2), %s6814_s1, 4294967280  ;;  %s11524_s20 = sld [smem:[#allocation16_spill]]  ;;  %s11525_s17 = sld [smem:[#allocation12_spill]] }
 0xa1a   : > { %s11526_s18 = sld [smem:[#allocation13_spill]]  ;;  %s11527_s19 = sld [smem:[#allocation17_spill]] }
 0xa1f   : > { %p21_p3 = scmp.ge.s32.totalorder %s11524_s20, 4  }
 0xa21   :  { %23 = sbr.rel (!%p21_p3) target bundleno = 12 (0xc), region = 125 }
 0xa28   :  { %6818 = vsyncpa [#allocation9], 1 }
 0xa29   :  { %6820 = vsyncpa [#allocation9 + $0x1], 1 }

</bundles_post_ra>
